<compile_context>
chip_gen: v7x
topology: tpu7x:2x2x1
jax: 0.10.0
libtpu: 0.0.40
codegen_flags: <defaults>
</compile_context>

<pallas_src>
import jax
import jax.numpy as jnp
from jax import lax
from jax.experimental import pallas as pl
from jax.experimental.pallas import tpu as pltpu

BN_EPS = 1e-5

# (cin, cout, ksize, stride, pad, has_bn) -- mirrors the nn.Sequential
LAYERS = [
    (3,    64,  4, 2, 1, False),
    (64,   128, 4, 2, 1, True),
    (128,  256, 4, 2, 1, True),
    (256,  512, 4, 2, 1, True),
    (512, 1024, 4, 1, 0, True),
]


def _round_up(x, m):
    return (x + m - 1) // m * m


def _pick_tile(total, cap, unit):
    """Largest multiple of `unit` that divides `total` and is <= cap."""
    t = min(cap, total)
    t = (t // unit) * unit
    while t > unit and total % t:
        t -= unit
    return t


def _maybe_pad2d(x, rows, cols):
    r, c = x.shape
    if r == rows and c == cols:
        return x                          # no copy when already aligned
    return jnp.pad(x, ((0, rows - r), (0, cols - c)))


# ---------------------------------------------------------------------------
# Pallas kernel: (M,N,K)-tiled matmul, bf16 operands, f32 accumulation,
# fused per-output-channel bias + ReLU epilogue.
# ---------------------------------------------------------------------------
def _matmul_bias_relu_kernel(a_ref, b_ref, bias_ref, o_ref, acc_ref):
    k = pl.program_id(2)

    @pl.when(k == 0)
    def _():
        acc_ref[...] = jnp.zeros_like(acc_ref)

    acc_ref[...] += jnp.dot(a_ref[...], b_ref[...],
                            preferred_element_type=jnp.float32)

    @pl.when(k == pl.num_programs(2) - 1)
    def _():
        y = acc_ref[...] + bias_ref[...]
        o_ref[...] = jnp.maximum(y, 0.0).astype(o_ref.dtype)


def matmul_bias_relu(patches, w_mat, bias, *, out_dtype):
    """ReLU(patches @ w_mat + bias).

    patches: (M, K) bf16; w_mat: (K, N) bf16 (BN scale pre-folded);
    bias: (N,) f32.  Returns (M, N) in out_dtype.
    """
    M, K = patches.shape
    Kw, N = w_mat.shape
    assert K == Kw

    Mp = _round_up(max(M, 16), 16)        # bf16-friendly sublane rows
    Kp = _round_up(K, 128)                # lane-aligned reduction dim
    Np = _round_up(N, 128)                # lane-dense output columns

    tm = _pick_tile(Mp, 512, 16)
    tn = _pick_tile(Np, 256, 128)         # matches 256-wide MXU on v6e/v7x
    tk = _pick_tile(Kp, 2048, 128)        # few grid steps even at K=8192

    a = _maybe_pad2d(patches, Mp, Kp)
    b = _maybe_pad2d(w_mat, Kp, Np)
    if Np != N:
        bias_p = jnp.zeros((1, Np), jnp.float32).at[0, :N].set(
            bias.astype(jnp.float32))
    else:
        bias_p = bias.reshape(1, N).astype(jnp.float32)

    out = pl.pallas_call(
        _matmul_bias_relu_kernel,
        out_shape=jax.ShapeDtypeStruct((Mp, Np), out_dtype),
        grid_spec=pltpu.PrefetchScalarGridSpec(
            num_scalar_prefetch=0,
            grid=(Mp // tm, Np // tn, Kp // tk),
            in_specs=[
                pl.BlockSpec((tm, tk), lambda i, j, k: (i, k)),
                pl.BlockSpec((tk, tn), lambda i, j, k: (k, j)),
                pl.BlockSpec((1, tn), lambda i, j, k: (0, j)),
            ],
            out_specs=pl.BlockSpec((tm, tn), lambda i, j, k: (i, j)),
            scratch_shapes=[pltpu.VMEM((tm, tn), jnp.float32)],
        ),
        compiler_params=pltpu.CompilerParams(
            dimension_semantics=("parallel", "parallel", "arbitrary")),
    )(a, b, bias_p)

    if Mp != M or Np != N:
        out = out[:M, :N]
    return out


# ---------------------------------------------------------------------------
# Glue: im2col (NHWC, bf16, tap-major/channel-minor), per-layer driver,
# parameter init / prep, reference.
# ---------------------------------------------------------------------------
def im2col_nhwc(x, ksize, stride, pad):
    """Patches with column index k = (kh*kW + kw)*C + c (no M x K transpose)."""
    N, H, W, C = x.shape
    if pad:
        x = jnp.pad(x, ((0, 0), (pad, pad), (pad, pad), (0, 0)))
    Ho = (H + 2 * pad - ksize) // stride + 1
    Wo = (W + 2 * pad - ksize) // stride + 1
    cols = []
    for kh in range(ksize):
        for kw in range(ksize):
            cols.append(x[:, kh:kh + stride * Ho:stride,
                          kw:kw + stride * Wo:stride, :])
    p = jnp.concatenate(cols, axis=-1)          # (N, Ho, Wo, kH*kW*C)
    return p.reshape(N * Ho * Wo, ksize * ksize * C), (N, Ho, Wo)


def prepare_params(params):
    """Fold BN scale into bf16 weight matrices (tap-major/channel-minor rows).

    Done once per parameter set; removes fold/transpose work from the forward.
    """
    folded = []
    for (w, scale, bias), (cin, cout, k, _s, _p, _bn) in zip(params, LAYERS):
        # OIHW -> (kH, kW, I, O) -> (kH*kW*Cin, Cout), matching im2col columns.
        w_mat = jnp.transpose(w, (2, 3, 1, 0)).reshape(k * k * cin, cout)
        w_mat = (w_mat * scale[None, :]).astype(jnp.bfloat16)
        folded.append((w_mat, bias.astype(jnp.float32)))
    return folded


def conv_bn_relu_layer(x_nhwc, w_mat, bias, ksize, stride, pad, cout,
                       out_dtype):
    patches, (N, Ho, Wo) = im2col_nhwc(x_nhwc, ksize, stride, pad)
    y = matmul_bias_relu(patches, w_mat, bias, out_dtype=out_dtype)
    return y.reshape(N, Ho, Wo, cout)


def init_params(key):
    params = []
    for (cin, cout, k, _s, _p, has_bn) in LAYERS:
        key, kw_, kg, kb = jax.random.split(key, 4)
        fan_in = cin * k * k
        w = (jax.random.normal(kw_, (cout, cin, k, k), jnp.float32)
             / jnp.sqrt(float(fan_in)))
        if has_bn:
            gamma = 1.0 + 0.1 * jax.random.normal(kg, (cout,), jnp.float32)
            beta = 0.1 * jax.random.normal(kb, (cout,), jnp.float32)
            # eval-mode BN (running_mean=0, running_var=1) folded to affine
            scale = gamma / jnp.sqrt(1.0 + BN_EPS)
            bias = beta
        else:
            scale = jnp.ones((cout,), jnp.float32)
            bias = jnp.zeros((cout,), jnp.float32)
        params.append((w, scale, bias))
    return params


def encoder_pallas(x_nchw, folded_params):
    x = jnp.transpose(x_nchw, (0, 2, 3, 1)).astype(jnp.bfloat16)   # -> NHWC
    n_layers = len(folded_params)
    for li, ((w_mat, bias), (_ci, cout, k, s, p, _bn)) in enumerate(
            zip(folded_params, LAYERS)):
        out_dtype = jnp.float32 if li == n_layers - 1 else jnp.bfloat16
        x = conv_bn_relu_layer(x, w_mat, bias, k, s, p, cout, out_dtype)
    return jnp.transpose(x, (0, 3, 1, 2)).astype(jnp.float32)      # -> NCHW


def encoder_reference(x_nchw, params):
    y = x_nchw.astype(jnp.float32)
    for (w, scale, bias), (_ci, _co, _k, s, p, _bn) in zip(params, LAYERS):
        y = lax.conv_general_dilated(
            y, w, window_strides=(s, s), padding=[(p, p), (p, p)],
            dimension_numbers=("NCHW", "OIHW", "NCHW"),
            precision=lax.Precision.HIGHEST)
        y = y * scale[None, :, None, None] + bias[None, :, None, None]
        y = jnp.maximum(y, 0.0)
    return y


if __name__ == "__main__":
    key = jax.random.PRNGKey(0)
    key, kx = jax.random.split(key)
    # Smallest spatial size that survives the five 4x4 convs: 64x64 -> 1x1.
    x = jax.random.normal(kx, (2, 3, 64, 64), jnp.float32)
    params = init_params(key)
    folded = prepare_params(params)

    encoder_fn = jax.jit(encoder_pallas)
    out = jax.block_until_ready(encoder_fn(x, folded))
    assert out.shape == (2, 1024, 1, 1), out.shape

    ref = jax.block_until_ready(encoder_reference(x, params))
    err = float(jnp.max(jnp.abs(out - ref)))
    denom = float(jnp.max(jnp.abs(ref))) + 1e-6
    # bf16 operands / activations with f32 accumulation: allow bf16-level error
    assert err / denom < 5e-2, f"mismatch: rel err {err / denom}"

    print("KERNEL_OK")
</pallas_src>

<mosaic_0001>
module attributes {stable_mosaic.version = 11 : i64} {
  func.func @_matmul_bias_relu_kernel(%arg0: i32, %arg1: i32, %arg2: i32, %arg3: memref<512x128xbf16, #tpu.memory_space<vmem>>, %arg4: memref<128x128xbf16, #tpu.memory_space<vmem>>, %arg5: memref<1x128xf32, #tpu.memory_space<vmem>>, %arg6: memref<512x128xbf16, #tpu.memory_space<vmem>>, %arg7: memref<512x128xf32, #tpu.memory_space<vmem>>) attributes {dimension_semantics = [#tpu.dimension_semantics<parallel>, #tpu.dimension_semantics<parallel>, #tpu.dimension_semantics<arbitrary>], iteration_bounds = array<i64: 4, 1, 1>, scalar_prefetch = 0 : i64, scratch_operands = 1 : i64, tpu.core_type = #tpu.core_type<tc>, window_params = [{transform_indices = @transform_0, window_bounds = array<i64: 512, 128>}, {transform_indices = @transform_1, window_bounds = array<i64: 128, 128>}, {transform_indices = @transform_2, window_bounds = array<i64: 1, 128>}, {transform_indices = @transform_3, window_bounds = array<i64: 512, 128>}]} {
    %c0_i32 = arith.constant 0 : i32
    %0 = arith.cmpi eq, %arg2, %c0_i32 : i32
    %1 = arith.extui %0 : i1 to i32
    %c0_i32_0 = arith.constant 0 : i32
    %2 = arith.cmpi ne, %1, %c0_i32_0 : i32
    scf.if %2 {
      %cst_10 = arith.constant 0.000000e+00 : f32
      %12 = vector.broadcast %cst_10 : f32 to vector<512x128xf32>
      %c0_11 = arith.constant 0 : index
      %c0_12 = arith.constant 0 : index
      %13 = vector.load %arg7[%c0_11, %c0_12] : memref<512x128xf32, #tpu.memory_space<vmem>>, vector<512x128xf32>
      tpu.vector_store %arg7[%c0_11, %c0_12], %12 {strides = array<i32>} : memref<512x128xf32, #tpu.memory_space<vmem>>, vector<512x128xf32>,
    } else {
    }
    %c0 = arith.constant 0 : index
    %c0_1 = arith.constant 0 : index
    %3 = vector.load %arg7[%c0, %c0_1] : memref<512x128xf32, #tpu.memory_space<vmem>>, vector<512x128xf32>
    %c0_2 = arith.constant 0 : index
    %c0_3 = arith.constant 0 : index
    %4 = vector.load %arg3[%c0_2, %c0_3] : memref<512x128xbf16, #tpu.memory_space<vmem>>, vector<512x128xbf16>
    %c0_4 = arith.constant 0 : index
    %c0_5 = arith.constant 0 : index
    %5 = vector.load %arg4[%c0_4, %c0_5] : memref<128x128xbf16, #tpu.memory_space<vmem>>, vector<128x128xbf16>
    %cst = arith.constant dense<0.000000e+00> : vector<512x128xf32>
    %6 = tpu.matmul %4, %5, %cst {dimension_numbers = #tpu.dot_dimension_numbers<[1], [0], [0], [1], [0, 0, 1, 1], [], []>} : vector<512x128xbf16>, vector<128x128xbf16>, vector<512x128xf32> -> vector<512x128xf32>
    %7 = arith.addf %3, %6 : vector<512x128xf32>
    %c0_6 = arith.constant 0 : index
    %c0_7 = arith.constant 0 : index
    %8 = vector.load %arg7[%c0_6, %c0_7] : memref<512x128xf32, #tpu.memory_space<vmem>>, vector<512x128xf32>
    tpu.vector_store %arg7[%c0_6, %c0_7], %7 {strides = array<i32>} : memref<512x128xf32, #tpu.memory_space<vmem>>, vector<512x128xf32>,
    %c0_i32_8 = arith.constant 0 : i32
    %9 = arith.cmpi eq, %arg2, %c0_i32_8 : i32
    %10 = arith.extui %9 : i1 to i32
    %c0_i32_9 = arith.constant 0 : i32
    %11 = arith.cmpi ne, %10, %c0_i32_9 : i32
    scf.if %11 {
      %c0_10 = arith.constant 0 : index
      %c0_11 = arith.constant 0 : index
      %12 = vector.load %arg7[%c0_10, %c0_11] : memref<512x128xf32, #tpu.memory_space<vmem>>, vector<512x128xf32>
      %c0_12 = arith.constant 0 : index
      %c0_13 = arith.constant 0 : index
      %13 = vector.load %arg5[%c0_12, %c0_13] : memref<1x128xf32, #tpu.memory_space<vmem>>, vector<1x128xf32>
      %14 = vector.broadcast %13 : vector<1x128xf32> to vector<512x128xf32>
      %15 = arith.addf %12, %14 : vector<512x128xf32>
      %cst_14 = arith.constant 0.000000e+00 : f32
      %16 = vector.broadcast %cst_14 : f32 to vector<512x128xf32>
      %17 = arith.maximumf %15, %16 : vector<512x128xf32>
      %18 = arith.truncf %17 : vector<512x128xf32> to vector<512x128xbf16>
      %c0_15 = arith.constant 0 : index
      %c0_16 = arith.constant 0 : index
      %19 = vector.load %arg6[%c0_15, %c0_16] : memref<512x128xbf16, #tpu.memory_space<vmem>>, vector<512x128xbf16>
      tpu.vector_store %arg6[%c0_15, %c0_16], %18 {strides = array<i32>} : memref<512x128xbf16, #tpu.memory_space<vmem>>, vector<512x128xbf16>,
    } else {
    }
    return
  }
  func.func @transform_0(%arg0: i32, %arg1: i32, %arg2: i32) -> (i32, i32) {
    %c0_i32 = arith.constant 0 : i32
    return %arg0, %arg2 : i32, i32
  }
  func.func @transform_1(%arg0: i32, %arg1: i32, %arg2: i32) -> (i32, i32) {
    %c0_i32 = arith.constant 0 : i32
    return %arg2, %arg1 : i32, i32
  }
  func.func @transform_2(%arg0: i32, %arg1: i32, %arg2: i32) -> (i32, i32) {
    %c0_i32 = arith.constant 0 : i32
    %c0_i32_0 = arith.constant 0 : i32
    return %c0_i32, %arg1 : i32, i32
  }
  func.func @transform_3(%arg0: i32, %arg1: i32, %arg2: i32) -> (i32, i32) {
    %c0_i32 = arith.constant 0 : i32
    return %arg0, %arg1 : i32, i32
  }
}

module attributes {stable_mosaic.version = 11 : i64} {
  func.func @_matmul_bias_relu_kernel(%arg0: i32, %arg1: i32, %arg2: i32, %arg3: memref<512x1024xbf16, #tpu.memory_space<vmem>>, %arg4: memref<1024x128xbf16, #tpu.memory_space<vmem>>, %arg5: memref<1x128xf32, #tpu.memory_space<vmem>>, %arg6: memref<512x128xbf16, #tpu.memory_space<vmem>>, %arg7: memref<512x128xf32, #tpu.memory_space<vmem>>) attributes {dimension_semantics = [#tpu.dimension_semantics<parallel>, #tpu.dimension_semantics<parallel>, #tpu.dimension_semantics<arbitrary>], iteration_bounds = array<i64: 1, 1, 1>, scalar_prefetch = 0 : i64, scratch_operands = 1 : i64, tpu.core_type = #tpu.core_type<tc>, window_params = [{transform_indices = @transform_0, window_bounds = array<i64: 512, 1024>}, {transform_indices = @transform_1, window_bounds = array<i64: 1024, 128>}, {transform_indices = @transform_2, window_bounds = array<i64: 1, 128>}, {transform_indices = @transform_3, window_bounds = array<i64: 512, 128>}]} {
    %c0_i32 = arith.constant 0 : i32
    %0 = arith.cmpi eq, %arg2, %c0_i32 : i32
    %1 = arith.extui %0 : i1 to i32
    %c0_i32_0 = arith.constant 0 : i32
    %2 = arith.cmpi ne, %1, %c0_i32_0 : i32
    scf.if %2 {
      %cst_10 = arith.constant 0.000000e+00 : f32
      %12 = vector.broadcast %cst_10 : f32 to vector<512x128xf32>
      %c0_11 = arith.constant 0 : index
      %c0_12 = arith.constant 0 : index
      %13 = vector.load %arg7[%c0_11, %c0_12] : memref<512x128xf32, #tpu.memory_space<vmem>>, vector<512x128xf32>
      tpu.vector_store %arg7[%c0_11, %c0_12], %12 {strides = array<i32>} : memref<512x128xf32, #tpu.memory_space<vmem>>, vector<512x128xf32>,
    } else {
    }
    %c0 = arith.constant 0 : index
    %c0_1 = arith.constant 0 : index
    %3 = vector.load %arg7[%c0, %c0_1] : memref<512x128xf32, #tpu.memory_space<vmem>>, vector<512x128xf32>
    %c0_2 = arith.constant 0 : index
    %c0_3 = arith.constant 0 : index
    %4 = vector.load %arg3[%c0_2, %c0_3] : memref<512x1024xbf16, #tpu.memory_space<vmem>>, vector<512x1024xbf16>
    %c0_4 = arith.constant 0 : index
    %c0_5 = arith.constant 0 : index
    %5 = vector.load %arg4[%c0_4, %c0_5] : memref<1024x128xbf16, #tpu.memory_space<vmem>>, vector<1024x128xbf16>
    %cst = arith.constant dense<0.000000e+00> : vector<512x128xf32>
    %6 = tpu.matmul %4, %5, %cst {dimension_numbers = #tpu.dot_dimension_numbers<[1], [0], [0], [1], [0, 0, 1, 1], [], []>} : vector<512x1024xbf16>, vector<1024x128xbf16>, vector<512x128xf32> -> vector<512x128xf32>
    %7 = arith.addf %3, %6 : vector<512x128xf32>
    %c0_6 = arith.constant 0 : index
    %c0_7 = arith.constant 0 : index
    %8 = vector.load %arg7[%c0_6, %c0_7] : memref<512x128xf32, #tpu.memory_space<vmem>>, vector<512x128xf32>
    tpu.vector_store %arg7[%c0_6, %c0_7], %7 {strides = array<i32>} : memref<512x128xf32, #tpu.memory_space<vmem>>, vector<512x128xf32>,
    %c0_i32_8 = arith.constant 0 : i32
    %9 = arith.cmpi eq, %arg2, %c0_i32_8 : i32
    %10 = arith.extui %9 : i1 to i32
    %c0_i32_9 = arith.constant 0 : i32
    %11 = arith.cmpi ne, %10, %c0_i32_9 : i32
    scf.if %11 {
      %c0_10 = arith.constant 0 : index
      %c0_11 = arith.constant 0 : index
      %12 = vector.load %arg7[%c0_10, %c0_11] : memref<512x128xf32, #tpu.memory_space<vmem>>, vector<512x128xf32>
      %c0_12 = arith.constant 0 : index
      %c0_13 = arith.constant 0 : index
      %13 = vector.load %arg5[%c0_12, %c0_13] : memref<1x128xf32, #tpu.memory_space<vmem>>, vector<1x128xf32>
      %14 = vector.broadcast %13 : vector<1x128xf32> to vector<512x128xf32>
      %15 = arith.addf %12, %14 : vector<512x128xf32>
      %cst_14 = arith.constant 0.000000e+00 : f32
      %16 = vector.broadcast %cst_14 : f32 to vector<512x128xf32>
      %17 = arith.maximumf %15, %16 : vector<512x128xf32>
      %18 = arith.truncf %17 : vector<512x128xf32> to vector<512x128xbf16>
      %c0_15 = arith.constant 0 : index
      %c0_16 = arith.constant 0 : index
      %19 = vector.load %arg6[%c0_15, %c0_16] : memref<512x128xbf16, #tpu.memory_space<vmem>>, vector<512x128xbf16>
      tpu.vector_store %arg6[%c0_15, %c0_16], %18 {strides = array<i32>} : memref<512x128xbf16, #tpu.memory_space<vmem>>, vector<512x128xbf16>,
    } else {
    }
    return
  }
  func.func @transform_0(%arg0: i32, %arg1: i32, %arg2: i32) -> (i32, i32) {
    %c0_i32 = arith.constant 0 : i32
    return %arg0, %arg2 : i32, i32
  }
  func.func @transform_1(%arg0: i32, %arg1: i32, %arg2: i32) -> (i32, i32) {
    %c0_i32 = arith.constant 0 : i32
    return %arg2, %arg1 : i32, i32
  }
  func.func @transform_2(%arg0: i32, %arg1: i32, %arg2: i32) -> (i32, i32) {
    %c0_i32 = arith.constant 0 : i32
    %c0_i32_0 = arith.constant 0 : i32
    return %c0_i32, %arg1 : i32, i32
  }
  func.func @transform_3(%arg0: i32, %arg1: i32, %arg2: i32) -> (i32, i32) {
    %c0_i32 = arith.constant 0 : i32
    return %arg0, %arg1 : i32, i32
  }
}

module attributes {stable_mosaic.version = 11 : i64} {
  func.func @_matmul_bias_relu_kernel(%arg0: i32, %arg1: i32, %arg2: i32, %arg3: memref<128x2048xbf16, #tpu.memory_space<vmem>>, %arg4: memref<2048x256xbf16, #tpu.memory_space<vmem>>, %arg5: memref<1x256xf32, #tpu.memory_space<vmem>>, %arg6: memref<128x256xbf16, #tpu.memory_space<vmem>>, %arg7: memref<128x256xf32, #tpu.memory_space<vmem>>) attributes {dimension_semantics = [#tpu.dimension_semantics<parallel>, #tpu.dimension_semantics<parallel>, #tpu.dimension_semantics<arbitrary>], iteration_bounds = array<i64: 1, 1, 1>, scalar_prefetch = 0 : i64, scratch_operands = 1 : i64, tpu.core_type = #tpu.core_type<tc>, window_params = [{transform_indices = @transform_0, window_bounds = array<i64: 128, 2048>}, {transform_indices = @transform_1, window_bounds = array<i64: 2048, 256>}, {transform_indices = @transform_2, window_bounds = array<i64: 1, 256>}, {transform_indices = @transform_3, window_bounds = array<i64: 128, 256>}]} {
    %c0_i32 = arith.constant 0 : i32
    %0 = arith.cmpi eq, %arg2, %c0_i32 : i32
    %1 = arith.extui %0 : i1 to i32
    %c0_i32_0 = arith.constant 0 : i32
    %2 = arith.cmpi ne, %1, %c0_i32_0 : i32
    scf.if %2 {
      %cst_10 = arith.constant 0.000000e+00 : f32
      %12 = vector.broadcast %cst_10 : f32 to vector<128x256xf32>
      %c0_11 = arith.constant 0 : index
      %c0_12 = arith.constant 0 : index
      %13 = vector.load %arg7[%c0_11, %c0_12] : memref<128x256xf32, #tpu.memory_space<vmem>>, vector<128x256xf32>
      tpu.vector_store %arg7[%c0_11, %c0_12], %12 {strides = array<i32>} : memref<128x256xf32, #tpu.memory_space<vmem>>, vector<128x256xf32>,
    } else {
    }
    %c0 = arith.constant 0 : index
    %c0_1 = arith.constant 0 : index
    %3 = vector.load %arg7[%c0, %c0_1] : memref<128x256xf32, #tpu.memory_space<vmem>>, vector<128x256xf32>
    %c0_2 = arith.constant 0 : index
    %c0_3 = arith.constant 0 : index
    %4 = vector.load %arg3[%c0_2, %c0_3] : memref<128x2048xbf16, #tpu.memory_space<vmem>>, vector<128x2048xbf16>
    %c0_4 = arith.constant 0 : index
    %c0_5 = arith.constant 0 : index
    %5 = vector.load %arg4[%c0_4, %c0_5] : memref<2048x256xbf16, #tpu.memory_space<vmem>>, vector<2048x256xbf16>
    %cst = arith.constant dense<0.000000e+00> : vector<128x256xf32>
    %6 = tpu.matmul %4, %5, %cst {dimension_numbers = #tpu.dot_dimension_numbers<[1], [0], [0], [1], [0, 0, 1, 1], [], []>} : vector<128x2048xbf16>, vector<2048x256xbf16>, vector<128x256xf32> -> vector<128x256xf32>
    %7 = arith.addf %3, %6 : vector<128x256xf32>
    %c0_6 = arith.constant 0 : index
    %c0_7 = arith.constant 0 : index
    %8 = vector.load %arg7[%c0_6, %c0_7] : memref<128x256xf32, #tpu.memory_space<vmem>>, vector<128x256xf32>
    tpu.vector_store %arg7[%c0_6, %c0_7], %7 {strides = array<i32>} : memref<128x256xf32, #tpu.memory_space<vmem>>, vector<128x256xf32>,
    %c0_i32_8 = arith.constant 0 : i32
    %9 = arith.cmpi eq, %arg2, %c0_i32_8 : i32
    %10 = arith.extui %9 : i1 to i32
    %c0_i32_9 = arith.constant 0 : i32
    %11 = arith.cmpi ne, %10, %c0_i32_9 : i32
    scf.if %11 {
      %c0_10 = arith.constant 0 : index
      %c0_11 = arith.constant 0 : index
      %12 = vector.load %arg7[%c0_10, %c0_11] : memref<128x256xf32, #tpu.memory_space<vmem>>, vector<128x256xf32>
      %c0_12 = arith.constant 0 : index
      %c0_13 = arith.constant 0 : index
      %13 = vector.load %arg5[%c0_12, %c0_13] : memref<1x256xf32, #tpu.memory_space<vmem>>, vector<1x256xf32>
      %14 = vector.broadcast %13 : vector<1x256xf32> to vector<128x256xf32>
      %15 = arith.addf %12, %14 : vector<128x256xf32>
      %cst_14 = arith.constant 0.000000e+00 : f32
      %16 = vector.broadcast %cst_14 : f32 to vector<128x256xf32>
      %17 = arith.maximumf %15, %16 : vector<128x256xf32>
      %18 = arith.truncf %17 : vector<128x256xf32> to vector<128x256xbf16>
      %c0_15 = arith.constant 0 : index
      %c0_16 = arith.constant 0 : index
      %19 = vector.load %arg6[%c0_15, %c0_16] : memref<128x256xbf16, #tpu.memory_space<vmem>>, vector<128x256xbf16>
      tpu.vector_store %arg6[%c0_15, %c0_16], %18 {strides = array<i32>} : memref<128x256xbf16, #tpu.memory_space<vmem>>, vector<128x256xbf16>,
    } else {
    }
    return
  }
  func.func @transform_0(%arg0: i32, %arg1: i32, %arg2: i32) -> (i32, i32) {
    %c0_i32 = arith.constant 0 : i32
    return %arg0, %arg2 : i32, i32
  }
  func.func @transform_1(%arg0: i32, %arg1: i32, %arg2: i32) -> (i32, i32) {
    %c0_i32 = arith.constant 0 : i32
    return %arg2, %arg1 : i32, i32
  }
  func.func @transform_2(%arg0: i32, %arg1: i32, %arg2: i32) -> (i32, i32) {
    %c0_i32 = arith.constant 0 : i32
    %c0_i32_0 = arith.constant 0 : i32
    return %c0_i32, %arg1 : i32, i32
  }
  func.func @transform_3(%arg0: i32, %arg1: i32, %arg2: i32) -> (i32, i32) {
    %c0_i32 = arith.constant 0 : i32
    return %arg0, %arg1 : i32, i32
  }
}

module attributes {stable_mosaic.version = 11 : i64} {
  func.func @_matmul_bias_relu_kernel(%arg0: i32, %arg1: i32, %arg2: i32, %arg3: memref<32x2048xbf16, #tpu.memory_space<vmem>>, %arg4: memref<2048x256xbf16, #tpu.memory_space<vmem>>, %arg5: memref<1x256xf32, #tpu.memory_space<vmem>>, %arg6: memref<32x256xbf16, #tpu.memory_space<vmem>>, %arg7: memref<32x256xf32, #tpu.memory_space<vmem>>) attributes {dimension_semantics = [#tpu.dimension_semantics<parallel>, #tpu.dimension_semantics<parallel>, #tpu.dimension_semantics<arbitrary>], iteration_bounds = array<i64: 1, 2, 2>, scalar_prefetch = 0 : i64, scratch_operands = 1 : i64, tpu.core_type = #tpu.core_type<tc>, window_params = [{transform_indices = @transform_0, window_bounds = array<i64: 32, 2048>}, {transform_indices = @transform_1, window_bounds = array<i64: 2048, 256>}, {transform_indices = @transform_2, window_bounds = array<i64: 1, 256>}, {transform_indices = @transform_3, window_bounds = array<i64: 32, 256>}]} {
    %c0_i32 = arith.constant 0 : i32
    %0 = arith.cmpi eq, %arg2, %c0_i32 : i32
    %1 = arith.extui %0 : i1 to i32
    %c0_i32_0 = arith.constant 0 : i32
    %2 = arith.cmpi ne, %1, %c0_i32_0 : i32
    scf.if %2 {
      %cst_9 = arith.constant 0.000000e+00 : f32
      %12 = vector.broadcast %cst_9 : f32 to vector<32x256xf32>
      %c0_10 = arith.constant 0 : index
      %c0_11 = arith.constant 0 : index
      %13 = vector.load %arg7[%c0_10, %c0_11] : memref<32x256xf32, #tpu.memory_space<vmem>>, vector<32x256xf32>
      tpu.vector_store %arg7[%c0_10, %c0_11], %12 {strides = array<i32>} : memref<32x256xf32, #tpu.memory_space<vmem>>, vector<32x256xf32>,
    } else {
    }
    %c0 = arith.constant 0 : index
    %c0_1 = arith.constant 0 : index
    %3 = vector.load %arg7[%c0, %c0_1] : memref<32x256xf32, #tpu.memory_space<vmem>>, vector<32x256xf32>
    %c0_2 = arith.constant 0 : index
    %c0_3 = arith.constant 0 : index
    %4 = vector.load %arg3[%c0_2, %c0_3] : memref<32x2048xbf16, #tpu.memory_space<vmem>>, vector<32x2048xbf16>
    %c0_4 = arith.constant 0 : index
    %c0_5 = arith.constant 0 : index
    %5 = vector.load %arg4[%c0_4, %c0_5] : memref<2048x256xbf16, #tpu.memory_space<vmem>>, vector<2048x256xbf16>
    %cst = arith.constant dense<0.000000e+00> : vector<32x256xf32>
    %6 = tpu.matmul %4, %5, %cst {dimension_numbers = #tpu.dot_dimension_numbers<[1], [0], [0], [1], [0, 0, 1, 1], [], []>} : vector<32x2048xbf16>, vector<2048x256xbf16>, vector<32x256xf32> -> vector<32x256xf32>
    %7 = arith.addf %3, %6 : vector<32x256xf32>
    %c0_6 = arith.constant 0 : index
    %c0_7 = arith.constant 0 : index
    %8 = vector.load %arg7[%c0_6, %c0_7] : memref<32x256xf32, #tpu.memory_space<vmem>>, vector<32x256xf32>
    tpu.vector_store %arg7[%c0_6, %c0_7], %7 {strides = array<i32>} : memref<32x256xf32, #tpu.memory_space<vmem>>, vector<32x256xf32>,
    %c1_i32 = arith.constant 1 : i32
    %9 = arith.cmpi eq, %arg2, %c1_i32 : i32
    %10 = arith.extui %9 : i1 to i32
    %c0_i32_8 = arith.constant 0 : i32
    %11 = arith.cmpi ne, %10, %c0_i32_8 : i32
    scf.if %11 {
      %c0_9 = arith.constant 0 : index
      %c0_10 = arith.constant 0 : index
      %12 = vector.load %arg7[%c0_9, %c0_10] : memref<32x256xf32, #tpu.memory_space<vmem>>, vector<32x256xf32>
      %c0_11 = arith.constant 0 : index
      %c0_12 = arith.constant 0 : index
      %13 = vector.load %arg5[%c0_11, %c0_12] : memref<1x256xf32, #tpu.memory_space<vmem>>, vector<1x256xf32>
      %14 = vector.broadcast %13 : vector<1x256xf32> to vector<32x256xf32>
      %15 = arith.addf %12, %14 : vector<32x256xf32>
      %cst_13 = arith.constant 0.000000e+00 : f32
      %16 = vector.broadcast %cst_13 : f32 to vector<32x256xf32>
      %17 = arith.maximumf %15, %16 : vector<32x256xf32>
      %18 = arith.truncf %17 : vector<32x256xf32> to vector<32x256xbf16>
      %c0_14 = arith.constant 0 : index
      %c0_15 = arith.constant 0 : index
      %19 = vector.load %arg6[%c0_14, %c0_15] : memref<32x256xbf16, #tpu.memory_space<vmem>>, vector<32x256xbf16>
      tpu.vector_store %arg6[%c0_14, %c0_15], %18 {strides = array<i32>} : memref<32x256xbf16, #tpu.memory_space<vmem>>, vector<32x256xbf16>,
    } else {
    }
    return
  }
  func.func @transform_0(%arg0: i32, %arg1: i32, %arg2: i32) -> (i32, i32) {
    %c0_i32 = arith.constant 0 : i32
    return %arg0, %arg2 : i32, i32
  }
  func.func @transform_1(%arg0: i32, %arg1: i32, %arg2: i32) -> (i32, i32) {
    %c0_i32 = arith.constant 0 : i32
    return %arg2, %arg1 : i32, i32
  }
  func.func @transform_2(%arg0: i32, %arg1: i32, %arg2: i32) -> (i32, i32) {
    %c0_i32 = arith.constant 0 : i32
    %c0_i32_0 = arith.constant 0 : i32
    return %c0_i32, %arg1 : i32, i32
  }
  func.func @transform_3(%arg0: i32, %arg1: i32, %arg2: i32) -> (i32, i32) {
    %c0_i32 = arith.constant 0 : i32
    return %arg0, %arg1 : i32, i32
  }
}

module attributes {stable_mosaic.version = 11 : i64} {
  func.func @_matmul_bias_relu_kernel(%arg0: i32, %arg1: i32, %arg2: i32, %arg3: memref<16x2048xbf16, #tpu.memory_space<vmem>>, %arg4: memref<2048x256xbf16, #tpu.memory_space<vmem>>, %arg5: memref<1x256xf32, #tpu.memory_space<vmem>>, %arg6: memref<16x256xf32, #tpu.memory_space<vmem>>, %arg7: memref<16x256xf32, #tpu.memory_space<vmem>>) attributes {dimension_semantics = [#tpu.dimension_semantics<parallel>, #tpu.dimension_semantics<parallel>, #tpu.dimension_semantics<arbitrary>], iteration_bounds = array<i64: 1, 4, 4>, scalar_prefetch = 0 : i64, scratch_operands = 1 : i64, tpu.core_type = #tpu.core_type<tc>, window_params = [{transform_indices = @transform_0, window_bounds = array<i64: 16, 2048>}, {transform_indices = @transform_1, window_bounds = array<i64: 2048, 256>}, {transform_indices = @transform_2, window_bounds = array<i64: 1, 256>}, {transform_indices = @transform_3, window_bounds = array<i64: 16, 256>}]} {
    %c0_i32 = arith.constant 0 : i32
    %0 = arith.cmpi eq, %arg2, %c0_i32 : i32
    %1 = arith.extui %0 : i1 to i32
    %c0_i32_0 = arith.constant 0 : i32
    %2 = arith.cmpi ne, %1, %c0_i32_0 : i32
    scf.if %2 {
      %cst_9 = arith.constant 0.000000e+00 : f32
      %12 = vector.broadcast %cst_9 : f32 to vector<16x256xf32>
      %c0_10 = arith.constant 0 : index
      %c0_11 = arith.constant 0 : index
      %13 = vector.load %arg7[%c0_10, %c0_11] : memref<16x256xf32, #tpu.memory_space<vmem>>, vector<16x256xf32>
      tpu.vector_store %arg7[%c0_10, %c0_11], %12 {strides = array<i32>} : memref<16x256xf32, #tpu.memory_space<vmem>>, vector<16x256xf32>,
    } else {
    }
    %c0 = arith.constant 0 : index
    %c0_1 = arith.constant 0 : index
    %3 = vector.load %arg7[%c0, %c0_1] : memref<16x256xf32, #tpu.memory_space<vmem>>, vector<16x256xf32>
    %c0_2 = arith.constant 0 : index
    %c0_3 = arith.constant 0 : index
    %4 = vector.load %arg3[%c0_2, %c0_3] : memref<16x2048xbf16, #tpu.memory_space<vmem>>, vector<16x2048xbf16>
    %c0_4 = arith.constant 0 : index
    %c0_5 = arith.constant 0 : index
    %5 = vector.load %arg4[%c0_4, %c0_5] : memref<2048x256xbf16, #tpu.memory_space<vmem>>, vector<2048x256xbf16>
    %cst = arith.constant dense<0.000000e+00> : vector<16x256xf32>
    %6 = tpu.matmul %4, %5, %cst {dimension_numbers = #tpu.dot_dimension_numbers<[1], [0], [0], [1], [0, 0, 1, 1], [], []>} : vector<16x2048xbf16>, vector<2048x256xbf16>, vector<16x256xf32> -> vector<16x256xf32>
    %7 = arith.addf %3, %6 : vector<16x256xf32>
    %c0_6 = arith.constant 0 : index
    %c0_7 = arith.constant 0 : index
    %8 = vector.load %arg7[%c0_6, %c0_7] : memref<16x256xf32, #tpu.memory_space<vmem>>, vector<16x256xf32>
    tpu.vector_store %arg7[%c0_6, %c0_7], %7 {strides = array<i32>} : memref<16x256xf32, #tpu.memory_space<vmem>>, vector<16x256xf32>,
    %c3_i32 = arith.constant 3 : i32
    %9 = arith.cmpi eq, %arg2, %c3_i32 : i32
    %10 = arith.extui %9 : i1 to i32
    %c0_i32_8 = arith.constant 0 : i32
    %11 = arith.cmpi ne, %10, %c0_i32_8 : i32
    scf.if %11 {
      %c0_9 = arith.constant 0 : index
      %c0_10 = arith.constant 0 : index
      %12 = vector.load %arg7[%c0_9, %c0_10] : memref<16x256xf32, #tpu.memory_space<vmem>>, vector<16x256xf32>
      %c0_11 = arith.constant 0 : index
      %c0_12 = arith.constant 0 : index
      %13 = vector.load %arg5[%c0_11, %c0_12] : memref<1x256xf32, #tpu.memory_space<vmem>>, vector<1x256xf32>
      %14 = vector.broadcast %13 : vector<1x256xf32> to vector<16x256xf32>
      %15 = arith.addf %12, %14 : vector<16x256xf32>
      %cst_13 = arith.constant 0.000000e+00 : f32
      %16 = vector.broadcast %cst_13 : f32 to vector<16x256xf32>
      %17 = arith.maximumf %15, %16 : vector<16x256xf32>
      %c0_14 = arith.constant 0 : index
      %c0_15 = arith.constant 0 : index
      %18 = vector.load %arg6[%c0_14, %c0_15] : memref<16x256xf32, #tpu.memory_space<vmem>>, vector<16x256xf32>
      tpu.vector_store %arg6[%c0_14, %c0_15], %17 {strides = array<i32>} : memref<16x256xf32, #tpu.memory_space<vmem>>, vector<16x256xf32>,
    } else {
    }
    return
  }
  func.func @transform_0(%arg0: i32, %arg1: i32, %arg2: i32) -> (i32, i32) {
    %c0_i32 = arith.constant 0 : i32
    return %arg0, %arg2 : i32, i32
  }
  func.func @transform_1(%arg0: i32, %arg1: i32, %arg2: i32) -> (i32, i32) {
    %c0_i32 = arith.constant 0 : i32
    return %arg2, %arg1 : i32, i32
  }
  func.func @transform_2(%arg0: i32, %arg1: i32, %arg2: i32) -> (i32, i32) {
    %c0_i32 = arith.constant 0 : i32
    %c0_i32_0 = arith.constant 0 : i32
    return %c0_i32, %arg1 : i32, i32
  }
  func.func @transform_3(%arg0: i32, %arg1: i32, %arg2: i32) -> (i32, i32) {
    %c0_i32 = arith.constant 0 : i32
    return %arg0, %arg1 : i32, i32
  }
}

</mosaic_0001>

<bundles_post_ra>
// kernel: encoder_pallas.5
= control target key start
LH: loop header
LB: loop body
LE: loop exit
PB: predicated region body
PF: predicated region fallthrough
CT: control target
= control target key end

     0   :  { %s2379_s12 = smov 0   ;;  %s2381_s13 = smov 0   ;;  %s2580_s0 = inlined_call_operand.vmem [shape: bf16[2048,128], index: 0, kind: input, shape index: {}]   ;;  %s2581_s1 = inlined_call_operand.vmem [shape: bf16[128,128], index: 1, kind: input, shape index: {}]   ;;  %s2582_s2 = inlined_call_operand.vmem [shape: f32[1,128], index: 2, kind: input, shape index: {}]   ;;  %s2583_s3 = inlined_call_operand.vmem [shape: bf16[2048,128], index: 3, kind: output, shape index: {}]  }
   0x1   :  { %s2383_s14 = smov 0  }
   0x2 LB: > { %s32_s15 = sadd.s32 1, %s2353_s13  ;;  %p1768_p0 = scmp.ge.s32.totalorder %s2357_s14, 1  ;;  %s2357_s14 = sphi %s2383_s14, %s13_s14   ;;  %s2353_s13 = sphi %s2381_s13, %s2585_s13   ;;  %s2349_s12 = sphi %s2379_s12, %s2584_s12  }
   0x3   : > { %p34_p1 = scmp.ge.s32.totalorder %s32_s15, 4  ;;  %p188_p2 = scmp.lt.s32.totalorder %s2357_s14, 5 }
   0x5   : > { %s2587_s15 = smov (%p34_p1, %s32_s15), 0  ;;  %p189_p3 = pnand %p1768_p0, %p188_p2 }
   0x6   : > { %v2295_v0 = vld [vmem:[%s2581_s1] sm:$0xff] (!%p189_p3)   ;;  %s1769_s18 = sshll.u32 (!%p189_p3), %s2349_s12, 6  ;;  %v2296_v1 = vld [vmem:[%s2581_s1 + $0x8] sm:$0xff] (!%p189_p3)   ;;  %v2297_v2 = vld [vmem:[%s2581_s1 + $0x10] sm:$0xff] (!%p189_p3)  }
   0x7   : > { %192 = sbr.rel (%p189_p3) target bundleno = 317 (0x13d), region = 32  ;;  %p230_p4 = scmp.lt.s32.totalorder (!%p189_p3), %s1769_s18, 255  ;;  %2175 = vmatprep.subr.bf16.mxu0 (!%p189_p3), %v2295_v0  ;;  %2255 = vmatprep.subr.bf16.mxu1 (!%p189_p3), %v2295_v0  ;;  %v2298_v3 = vld [vmem:[%s2581_s1 + $0x18] sm:$0xff] (!%p189_p3)   ;;  %v2299_v6 = vld [vmem:[%s2581_s1 + $0x20] sm:$0xff] (!%p189_p3)   ;;  %v2300_v7 = vld [vmem:[%s2581_s1 + $0x28] sm:$0xff] (!%p189_p3)  }
   0x8   : > { %2176 = vmatpush3.bf16.msra.mxu0 (!%p189_p3), %v2295_v0  ;;  %2263 = vmatpush3.bf16.msra.mxu1 (!%p189_p3), %v2295_v0  ;;  %v2301_v8 = vld [vmem:[%s2581_s1 + $0x30] sm:$0xff] (!%p189_p3)   ;;  %v2302_v9 = vld [vmem:[%s2581_s1 + $0x38] sm:$0xff] (!%p189_p3)   ;;  %v2466_v40 = vld [vmem:[%s2582_s2] ss:$0 sm:$0xff] (!%p189_p3) }
   0x9   : > { %2177 = vmatprep.subr.bf16.mxu0 (!%p189_p3), %v2296_v1  ;;  %2256 = vmatprep.subr.bf16.mxu1 (!%p189_p3), %v2296_v1 }
   0xc   : > { %2178 = vmatpush3.bf16.msra.mxu0 (!%p189_p3), %v2296_v1  ;;  %2264 = vmatpush3.bf16.msra.mxu1 (!%p189_p3), %v2296_v1 }
   0xd   : > { %2179 = vmatprep.subr.bf16.mxu0 (!%p189_p3), %v2297_v2  ;;  %2257 = vmatprep.subr.bf16.mxu1 (!%p189_p3), %v2297_v2 }
   0xe   : > { %s2589_s18 = smov (!%p230_p4, %s1769_s18), 255 }
   0xf   : > { %s1770_s23 = sshll.u32 %s2589_s18, 2 }
  0x10   : > { %s2414_s26 = scalar_lea.vmem %s2580_s0, %s1770_s23  ;;  %2180 = vmatpush3.bf16.msra.mxu0 %v2297_v2  ;;  %2265 = vmatpush3.bf16.msra.mxu1 %v2297_v2  ;;  %s2481_s17 = scalar_lea.vmem %s2583_s3, %s1770_s23 }
  0x11   : > { %v2303_v4 = vld [vmem:[%s2414_s26] sm:$0xff]   ;;  %2181 = vmatprep.subr.bf16.mxu0 %v2298_v3  ;;  %2258 = vmatprep.subr.bf16.mxu1 %v2298_v3  ;;  %v2305_v10 = vld [vmem:[%s2414_s26 + $0x8] sm:$0xff]   ;;  %v2307_v12 = vld [vmem:[%s2414_s26 + $0x10] sm:$0xff]  }
  0x12   : > { %v2304_v5 = vld [vmem:[%s2414_s26 + $0x80] sm:$0xff]   ;;  %2191 = vmatprep.mubr.bf16.mxu0 %v2303_v4  ;;  %v2306_v11 = vld [vmem:[%s2414_s26 + $0x88] sm:$0xff]   ;;  %v2308_v13 = vld [vmem:[%s2414_s26 + $0x90] sm:$0xff]  }
  0x13   : > { %2223 = vmatprep.mubr.bf16.mxu1 %v2304_v5  ;;  %v2309_v14 = vld [vmem:[%s2414_s26 + $0x18] sm:$0xff]   ;;  %v2311_v16 = vld [vmem:[%s2414_s26 + $0x20] sm:$0xff]   ;;  %v2313_v18 = vld [vmem:[%s2414_s26 + $0x28] sm:$0xff]  }
  0x14   : > { %2182 = vmatpush3.bf16.msra.mxu0 %v2298_v3  ;;  %2266 = vmatpush3.bf16.msra.mxu1 %v2298_v3  ;;  %v2310_v15 = vld [vmem:[%s2414_s26 + $0x98] sm:$0xff]   ;;  %v2312_v17 = vld [vmem:[%s2414_s26 + $0xa0] sm:$0xff]   ;;  %v2314_v19 = vld [vmem:[%s2414_s26 + $0xa8] sm:$0xff]  }
  0x15   : > { %2183 = vmatprep.subr.bf16.mxu0 %v2299_v6  ;;  %2259 = vmatprep.subr.bf16.mxu1 %v2299_v6  ;;  %v2315_v20 = vld [vmem:[%s2414_s26 + $0x30] sm:$0xff]   ;;  %v2317_v22 = vld [vmem:[%s2414_s26 + $0x38] sm:$0xff]   ;;  %v2319_v24 = vld [vmem:[%s2414_s26 + $0x40] sm:$0xff]  }
  0x16   : > { %v2316_v21 = vld [vmem:[%s2414_s26 + $0xb0] sm:$0xff]   ;;  %v2318_v23 = vld [vmem:[%s2414_s26 + $0xb8] sm:$0xff]   ;;  %v2320_v25 = vld [vmem:[%s2414_s26 + $0xc0] sm:$0xff]  }
  0x17   : > { %v2321_v26 = vld [vmem:[%s2414_s26 + $0x48] sm:$0xff]   ;;  %v2323_v28 = vld [vmem:[%s2414_s26 + $0x50] sm:$0xff]   ;;  %v2325_v30 = vld [vmem:[%s2414_s26 + $0x58] sm:$0xff]  }
  0x18   : > { %2184 = vmatpush3.bf16.msra.mxu0 %v2299_v6  ;;  %2267 = vmatpush3.bf16.msra.mxu1 %v2299_v6  ;;  %v2322_v27 = vld [vmem:[%s2414_s26 + $0xc8] sm:$0xff]   ;;  %v2324_v29 = vld [vmem:[%s2414_s26 + $0xd0] sm:$0xff]   ;;  %v2326_v31 = vld [vmem:[%s2414_s26 + $0xd8] sm:$0xff]  }
  0x19   : > { %2185 = vmatprep.subr.bf16.mxu0 %v2300_v7  ;;  %2260 = vmatprep.subr.bf16.mxu1 %v2300_v7  ;;  %v2327_v32 = vld [vmem:[%s2414_s26 + $0x60] sm:$0xff]   ;;  %v2329_v34 = vld [vmem:[%s2414_s26 + $0x68] sm:$0xff]   ;;  %v2331_v36 = vld [vmem:[%s2414_s26 + $0x70] sm:$0xff]  }
  0x1a   : > { %v2328_v33 = vld [vmem:[%s2414_s26 + $0xe0] sm:$0xff]   ;;  %v2330_v35 = vld [vmem:[%s2414_s26 + $0xe8] sm:$0xff]   ;;  %v2332_v37 = vld [vmem:[%s2414_s26 + $0xf0] sm:$0xff]  }
  0x1b   : > { %v2333_v38 = vld [vmem:[%s2414_s26 + $0x78] sm:$0xff]  }
  0x1c   : > { %2186 = vmatpush3.bf16.msra.mxu0 %v2300_v7  ;;  %2268 = vmatpush3.bf16.msra.mxu1 %v2300_v7  ;;  %v2334_v39 = vld [vmem:[%s2414_s26 + $0xf8] sm:$0xff]  }
  0x1d   : > { %2187 = vmatprep.subr.bf16.mxu0 %v2301_v8  ;;  %2261 = vmatprep.subr.bf16.mxu1 %v2301_v8 }
  0x20   : > { %2188 = vmatpush3.bf16.msra.mxu0 %v2301_v8  ;;  %2269 = vmatpush3.bf16.msra.mxu1 %v2301_v8 }
  0x21   : > { %2189 = vmatprep.subr.bf16.mxu0 %v2302_v9  ;;  %2262 = vmatprep.subr.bf16.mxu1 %v2302_v9 }
  0x24   : > { %2190 = vmatpush3.bf16.msra.mxu0 %v2302_v9  ;;  %2270 = vmatpush3.bf16.msra.mxu1 %v2302_v9 }
  0x27   : > { %2192 = vmatmul.mubr.bf16.vlgmr.msra.gmra.mrb[0].mxu0 %v2305_v10  ;;  %2224 = vmatmul.mubr.bf16.vlgmr.msra.gmra.mrb[0].mxu1 %v2306_v11 }
  0x28   : > { %2195 = vmatprep.mubr.bf16.mxu0 %v2307_v12  ;;  %2227 = vmatprep.mubr.bf16.mxu1 %v2308_v13 }
  0x2f   : > { %2196 = vmatmul.mubr.bf16.gmra.mrb[4].mxu0 %v2309_v14  ;;  %2228 = vmatmul.mubr.bf16.gmra.mrb[4].mxu1 %v2310_v15 }
  0x30   : > { %2199 = vmatprep.mubr.bf16.mxu0 %v2311_v16  ;;  %2231 = vmatprep.mubr.bf16.mxu1 %v2312_v17 }
  0x37   : > { %2200 = vmatmul.mubr.bf16.gmra.mrb[8].mxu0 %v2313_v18  ;;  %2232 = vmatmul.mubr.bf16.gmra.mrb[8].mxu1 %v2314_v19 }
  0x38   : > { %2203 = vmatprep.mubr.bf16.mxu0 %v2315_v20  ;;  %2235 = vmatprep.mubr.bf16.mxu1 %v2316_v21 }
  0x3f   : > { %2204 = vmatmul.mubr.bf16.gmra.mrb[12].mxu0 %v2317_v22  ;;  %2236 = vmatmul.mubr.bf16.gmra.mrb[12].mxu1 %v2318_v23 }
  0x40   : > { %2207 = vmatprep.mubr.bf16.mxu0 %v2319_v24  ;;  %2239 = vmatprep.mubr.bf16.mxu1 %v2320_v25 }
  0x47   : > { %2208 = vmatmul.mubr.bf16.gmra.mrb[16].mxu0 %v2321_v26  ;;  %2240 = vmatmul.mubr.bf16.gmra.mrb[16].mxu1 %v2322_v27 }
  0x48   : > { %2211 = vmatprep.mubr.bf16.mxu0 %v2323_v28  ;;  %2243 = vmatprep.mubr.bf16.mxu1 %v2324_v29 }
  0x4f   : > { %2212 = vmatmul.mubr.bf16.gmra.mrb[20].mxu0 %v2325_v30  ;;  %2244 = vmatmul.mubr.bf16.gmra.mrb[20].mxu1 %v2326_v31 }
  0x50   : > { %2215 = vmatprep.mubr.bf16.mxu0 %v2327_v32  ;;  %2247 = vmatprep.mubr.bf16.mxu1 %v2328_v33 }
  0x57   : > { %2216 = vmatmul.mubr.bf16.gmra.mrb[24].mxu0 %v2329_v34  ;;  %2248 = vmatmul.mubr.bf16.gmra.mrb[24].mxu1 %v2330_v35 }
  0x58   : > { %2219 = vmatprep.mubr.bf16.mxu0 %v2331_v36  ;;  %2251 = vmatprep.mubr.bf16.mxu1 %v2332_v37 }
  0x5f   : > { %2220 = vmatmul.mubr.bf16.gmra.mrb[28].mxu0 %v2333_v38  ;;  %2252 = vmatmul.mubr.bf16.gmra.mrb[28].mxu1 %v2334_v39 }
  0xfa   : > { %v2193_v41 = vpop.f32.mrb[0].mxu0  ;;  %v2225_v42 = vpop.f32.mrb[0].mxu1 }
  0xfb   : > { %v1205_v43 = vadd.f32 %v2193_v41, %v2466_v40  ;;  %v1237_v44 = vadd.f32 %v2225_v42, %v2466_v40  ;;  %v746_v45 = vpop.f32.mrb[1].mxu0  ;;  %v874_v46 = vpop.f32.mrb[1].mxu1 }
  0xfc   : > { %v1203_v47 = vadd.f32 %v2466_v40, %v746_v45  ;;  %v1235_v48 = vadd.f32 %v2466_v40, %v874_v46  ;;  %v2194_v49 = vpop.f32.mrb[2].mxu0  ;;  %v2226_v50 = vpop.f32.mrb[2].mxu1 }
  0xfd   : > { %v1206_v51 = vadd.f32 %v2194_v49, %v2466_v40  ;;  %v1238_v52 = vadd.f32 %v2226_v50, %v2466_v40  ;;  %v749_v53 = vpop.f32.mrb[3].mxu0  ;;  %v877_v54 = vpop.f32.mrb[3].mxu1  ;;  %v1269_v57 = vmax.f32 %v1205_v43, 0.0  ;;  %v1301_v58 = vmax.f32 %v1237_v44, 0.0 }
  0xfe   : > { %v1204_v55 = vadd.f32 %v2466_v40, %v749_v53  ;;  %v1236_v56 = vadd.f32 %v2466_v40, %v877_v54  ;;  %v1267_v61 = vmax.f32 %v1203_v47, 0.0  ;;  %v1299_v62 = vmax.f32 %v1235_v48, 0.0 }
  0xff   : > { %v1270_v59 = vmax.f32 %v1206_v51, 0.0  ;;  %v1302_v60 = vmax.f32 %v1238_v52, 0.0 }
 0x100   : > { %v1268_v63 = vmax.f32 %v1204_v55, 0.0  ;;  %v1300_v0 = vmax.f32 %v1236_v56, 0.0 }
 0x101   : > { %v1952_v1 = vpack.c.bf16 %v1270_v59, %v1269_v57  ;;  %v2032_v2 = vpack.c.bf16 %v1302_v60, %v1301_v58 }
 0x102   : > { %v1947_v3 = vpack.c.bf16 %v1268_v63, %v1267_v61  ;;  %v2027_v4 = vpack.c.bf16 %v1300_v0, %v1299_v62  ;;  %v2197_v5 = vpop.f32.mrb[4].mxu0  ;;  %v2229_v6 = vpop.f32.mrb[4].mxu1 }
 0x103   : > { %2104 = vst [vmem:[%s2481_s17 + $0x8] sm:$0xff] %v1952_v1   ;;  %2120 = vst [vmem:[%s2481_s17 + $0x88] sm:$0xff] %v2032_v2   ;;  %v1209_v7 = vadd.f32 %v2197_v5, %v2466_v40  ;;  %v1241_v8 = vadd.f32 %v2229_v6, %v2466_v40  ;;  %v762_v9 = vpop.f32.mrb[5].mxu0  ;;  %v890_v10 = vpop.f32.mrb[5].mxu1 }
 0x104   : > { %1948 = vst [vmem:[%s2481_s17] sm:$0xff] %v1947_v3   ;;  %2119 = vst [vmem:[%s2481_s17 + $0x80] sm:$0xff] %v2027_v4   ;;  %v1207_v11 = vadd.f32 %v2466_v40, %v762_v9  ;;  %v1239_v12 = vadd.f32 %v2466_v40, %v890_v10  ;;  %v2198_v13 = vpop.f32.mrb[6].mxu0  ;;  %v2230_v14 = vpop.f32.mrb[6].mxu1 }
 0x105   : > { %v1210_v15 = vadd.f32 %v2198_v13, %v2466_v40  ;;  %v1242_v16 = vadd.f32 %v2230_v14, %v2466_v40  ;;  %v765_v17 = vpop.f32.mrb[7].mxu0  ;;  %v893_v18 = vpop.f32.mrb[7].mxu1  ;;  %v1273_v21 = vmax.f32 %v1209_v7, 0.0  ;;  %v1305_v22 = vmax.f32 %v1241_v8, 0.0 }
 0x106   : > { %v1208_v19 = vadd.f32 %v2466_v40, %v765_v17  ;;  %v1240_v20 = vadd.f32 %v2466_v40, %v893_v18  ;;  %v1271_v25 = vmax.f32 %v1207_v11, 0.0  ;;  %v1303_v26 = vmax.f32 %v1239_v12, 0.0 }
 0x107   : > { %v1274_v23 = vmax.f32 %v1210_v15, 0.0  ;;  %v1306_v24 = vmax.f32 %v1242_v16, 0.0 }
 0x108   : > { %v1272_v27 = vmax.f32 %v1208_v19, 0.0  ;;  %v1304_v28 = vmax.f32 %v1240_v20, 0.0 }
 0x109   : > { %v1962_v29 = vpack.c.bf16 %v1274_v23, %v1273_v21  ;;  %v2042_v30 = vpack.c.bf16 %v1306_v24, %v1305_v22 }
 0x10a   : > { %v1957_v31 = vpack.c.bf16 %v1272_v27, %v1271_v25  ;;  %v2037_v32 = vpack.c.bf16 %v1304_v28, %v1303_v26  ;;  %v2201_v33 = vpop.f32.mrb[8].mxu0  ;;  %v2233_v34 = vpop.f32.mrb[8].mxu1 }
 0x10b   : > { %2106 = vst [vmem:[%s2481_s17 + $0x18] sm:$0xff] %v1962_v29   ;;  %2122 = vst [vmem:[%s2481_s17 + $0x98] sm:$0xff] %v2042_v30   ;;  %v1213_v35 = vadd.f32 %v2201_v33, %v2466_v40  ;;  %v1245_v36 = vadd.f32 %v2233_v34, %v2466_v40  ;;  %v778_v37 = vpop.f32.mrb[9].mxu0  ;;  %v906_v38 = vpop.f32.mrb[9].mxu1 }
 0x10c   : > { %2105 = vst [vmem:[%s2481_s17 + $0x10] sm:$0xff] %v1957_v31   ;;  %2121 = vst [vmem:[%s2481_s17 + $0x90] sm:$0xff] %v2037_v32   ;;  %v1211_v39 = vadd.f32 %v2466_v40, %v778_v37  ;;  %v1243_v41 = vadd.f32 %v2466_v40, %v906_v38  ;;  %v2202_v42 = vpop.f32.mrb[10].mxu0  ;;  %v2234_v43 = vpop.f32.mrb[10].mxu1 }
 0x10d   : > { %v1214_v44 = vadd.f32 %v2202_v42, %v2466_v40  ;;  %v1246_v45 = vadd.f32 %v2234_v43, %v2466_v40  ;;  %v781_v46 = vpop.f32.mrb[11].mxu0  ;;  %v909_v47 = vpop.f32.mrb[11].mxu1  ;;  %v1277_v50 = vmax.f32 %v1213_v35, 0.0  ;;  %v1309_v51 = vmax.f32 %v1245_v36, 0.0 }
 0x10e   : > { %v1212_v48 = vadd.f32 %v2466_v40, %v781_v46  ;;  %v1244_v49 = vadd.f32 %v2466_v40, %v909_v47  ;;  %v1275_v54 = vmax.f32 %v1211_v39, 0.0  ;;  %v1307_v55 = vmax.f32 %v1243_v41, 0.0 }
 0x10f   : > { %v1278_v52 = vmax.f32 %v1214_v44, 0.0  ;;  %v1310_v53 = vmax.f32 %v1246_v45, 0.0 }
 0x110   : > { %v1276_v56 = vmax.f32 %v1212_v48, 0.0  ;;  %v1308_v57 = vmax.f32 %v1244_v49, 0.0 }
 0x111   : > { %v1972_v58 = vpack.c.bf16 %v1278_v52, %v1277_v50  ;;  %v2052_v59 = vpack.c.bf16 %v1310_v53, %v1309_v51 }
 0x112   : > { %v1967_v60 = vpack.c.bf16 %v1276_v56, %v1275_v54  ;;  %v2047_v61 = vpack.c.bf16 %v1308_v57, %v1307_v55  ;;  %v2205_v62 = vpop.f32.mrb[12].mxu0  ;;  %v2237_v63 = vpop.f32.mrb[12].mxu1 }
 0x113   : > { %2108 = vst [vmem:[%s2481_s17 + $0x28] sm:$0xff] %v1972_v58   ;;  %2124 = vst [vmem:[%s2481_s17 + $0xa8] sm:$0xff] %v2052_v59   ;;  %v1217_v0 = vadd.f32 %v2205_v62, %v2466_v40  ;;  %v1249_v1 = vadd.f32 %v2237_v63, %v2466_v40  ;;  %v794_v2 = vpop.f32.mrb[13].mxu0  ;;  %v922_v3 = vpop.f32.mrb[13].mxu1 }
 0x114   : > { %2107 = vst [vmem:[%s2481_s17 + $0x20] sm:$0xff] %v1967_v60   ;;  %2123 = vst [vmem:[%s2481_s17 + $0xa0] sm:$0xff] %v2047_v61   ;;  %v1215_v4 = vadd.f32 %v2466_v40, %v794_v2  ;;  %v1247_v5 = vadd.f32 %v2466_v40, %v922_v3  ;;  %v2206_v6 = vpop.f32.mrb[14].mxu0  ;;  %v2238_v7 = vpop.f32.mrb[14].mxu1 }
 0x115   : > { %v1218_v8 = vadd.f32 %v2206_v6, %v2466_v40  ;;  %v1250_v9 = vadd.f32 %v2238_v7, %v2466_v40  ;;  %v797_v10 = vpop.f32.mrb[15].mxu0  ;;  %v925_v11 = vpop.f32.mrb[15].mxu1  ;;  %v1281_v14 = vmax.f32 %v1217_v0, 0.0  ;;  %v1313_v15 = vmax.f32 %v1249_v1, 0.0 }
 0x116   : > { %v1216_v12 = vadd.f32 %v2466_v40, %v797_v10  ;;  %v1248_v13 = vadd.f32 %v2466_v40, %v925_v11  ;;  %v1279_v18 = vmax.f32 %v1215_v4, 0.0  ;;  %v1311_v19 = vmax.f32 %v1247_v5, 0.0 }
 0x117   : > { %v1282_v16 = vmax.f32 %v1218_v8, 0.0  ;;  %v1314_v17 = vmax.f32 %v1250_v9, 0.0 }
 0x118   : > { %v1280_v20 = vmax.f32 %v1216_v12, 0.0  ;;  %v1312_v21 = vmax.f32 %v1248_v13, 0.0 }
 0x119   : > { %v1982_v22 = vpack.c.bf16 %v1282_v16, %v1281_v14  ;;  %v2062_v23 = vpack.c.bf16 %v1314_v17, %v1313_v15 }
 0x11a   : > { %v1977_v24 = vpack.c.bf16 %v1280_v20, %v1279_v18  ;;  %v2057_v25 = vpack.c.bf16 %v1312_v21, %v1311_v19  ;;  %v2209_v26 = vpop.f32.mrb[16].mxu0  ;;  %v2241_v27 = vpop.f32.mrb[16].mxu1 }
 0x11b   : > { %2110 = vst [vmem:[%s2481_s17 + $0x38] sm:$0xff] %v1982_v22   ;;  %2126 = vst [vmem:[%s2481_s17 + $0xb8] sm:$0xff] %v2062_v23   ;;  %v1221_v28 = vadd.f32 %v2209_v26, %v2466_v40  ;;  %v1253_v29 = vadd.f32 %v2241_v27, %v2466_v40  ;;  %v810_v30 = vpop.f32.mrb[17].mxu0  ;;  %v938_v31 = vpop.f32.mrb[17].mxu1 }
 0x11c   : > { %2109 = vst [vmem:[%s2481_s17 + $0x30] sm:$0xff] %v1977_v24   ;;  %2125 = vst [vmem:[%s2481_s17 + $0xb0] sm:$0xff] %v2057_v25   ;;  %v1219_v32 = vadd.f32 %v2466_v40, %v810_v30  ;;  %v1251_v33 = vadd.f32 %v2466_v40, %v938_v31  ;;  %v2210_v34 = vpop.f32.mrb[18].mxu0  ;;  %v2242_v35 = vpop.f32.mrb[18].mxu1 }
 0x11d   : > { %v1222_v36 = vadd.f32 %v2210_v34, %v2466_v40  ;;  %v1254_v37 = vadd.f32 %v2242_v35, %v2466_v40  ;;  %v813_v38 = vpop.f32.mrb[19].mxu0  ;;  %v941_v39 = vpop.f32.mrb[19].mxu1  ;;  %v1285_v43 = vmax.f32 %v1221_v28, 0.0  ;;  %v1317_v44 = vmax.f32 %v1253_v29, 0.0 }
 0x11e   : > { %v1220_v41 = vadd.f32 %v2466_v40, %v813_v38  ;;  %v1252_v42 = vadd.f32 %v2466_v40, %v941_v39  ;;  %v1283_v47 = vmax.f32 %v1219_v32, 0.0  ;;  %v1315_v48 = vmax.f32 %v1251_v33, 0.0 }
 0x11f   : > { %v1286_v45 = vmax.f32 %v1222_v36, 0.0  ;;  %v1318_v46 = vmax.f32 %v1254_v37, 0.0 }
 0x120   : > { %v1284_v49 = vmax.f32 %v1220_v41, 0.0  ;;  %v1316_v50 = vmax.f32 %v1252_v42, 0.0 }
 0x121   : > { %v1992_v51 = vpack.c.bf16 %v1286_v45, %v1285_v43  ;;  %v2072_v52 = vpack.c.bf16 %v1318_v46, %v1317_v44 }
 0x122   : > { %v1987_v53 = vpack.c.bf16 %v1284_v49, %v1283_v47  ;;  %v2067_v54 = vpack.c.bf16 %v1316_v50, %v1315_v48  ;;  %v2213_v55 = vpop.f32.mrb[20].mxu0  ;;  %v2245_v56 = vpop.f32.mrb[20].mxu1 }
 0x123   : > { %2112 = vst [vmem:[%s2481_s17 + $0x48] sm:$0xff] %v1992_v51   ;;  %2128 = vst [vmem:[%s2481_s17 + $0xc8] sm:$0xff] %v2072_v52   ;;  %v1225_v57 = vadd.f32 %v2213_v55, %v2466_v40  ;;  %v1257_v58 = vadd.f32 %v2245_v56, %v2466_v40  ;;  %v826_v59 = vpop.f32.mrb[21].mxu0  ;;  %v954_v60 = vpop.f32.mrb[21].mxu1 }
 0x124   : > { %2111 = vst [vmem:[%s2481_s17 + $0x40] sm:$0xff] %v1987_v53   ;;  %2127 = vst [vmem:[%s2481_s17 + $0xc0] sm:$0xff] %v2067_v54   ;;  %v1223_v61 = vadd.f32 %v2466_v40, %v826_v59  ;;  %v1255_v62 = vadd.f32 %v2466_v40, %v954_v60  ;;  %v2214_v63 = vpop.f32.mrb[22].mxu0  ;;  %v2246_v0 = vpop.f32.mrb[22].mxu1 }
 0x125   : > { %v1226_v1 = vadd.f32 %v2214_v63, %v2466_v40  ;;  %v1258_v2 = vadd.f32 %v2246_v0, %v2466_v40  ;;  %v829_v3 = vpop.f32.mrb[23].mxu0  ;;  %v957_v4 = vpop.f32.mrb[23].mxu1  ;;  %v1289_v7 = vmax.f32 %v1225_v57, 0.0  ;;  %v1321_v8 = vmax.f32 %v1257_v58, 0.0 }
 0x126   : > { %v1224_v5 = vadd.f32 %v2466_v40, %v829_v3  ;;  %v1256_v6 = vadd.f32 %v2466_v40, %v957_v4  ;;  %v1287_v11 = vmax.f32 %v1223_v61, 0.0  ;;  %v1319_v12 = vmax.f32 %v1255_v62, 0.0 }
 0x127   : > { %v1290_v9 = vmax.f32 %v1226_v1, 0.0  ;;  %v1322_v10 = vmax.f32 %v1258_v2, 0.0 }
 0x128   : > { %v1288_v13 = vmax.f32 %v1224_v5, 0.0  ;;  %v1320_v14 = vmax.f32 %v1256_v6, 0.0 }
 0x129   : > { %v2002_v15 = vpack.c.bf16 %v1290_v9, %v1289_v7  ;;  %v2082_v16 = vpack.c.bf16 %v1322_v10, %v1321_v8 }
 0x12a   : > { %v1997_v17 = vpack.c.bf16 %v1288_v13, %v1287_v11  ;;  %v2077_v18 = vpack.c.bf16 %v1320_v14, %v1319_v12  ;;  %v2217_v19 = vpop.f32.mrb[24].mxu0  ;;  %v2249_v20 = vpop.f32.mrb[24].mxu1 }
 0x12b   : > { %2114 = vst [vmem:[%s2481_s17 + $0x58] sm:$0xff] %v2002_v15   ;;  %2130 = vst [vmem:[%s2481_s17 + $0xd8] sm:$0xff] %v2082_v16   ;;  %v1229_v21 = vadd.f32 %v2217_v19, %v2466_v40  ;;  %v1261_v22 = vadd.f32 %v2249_v20, %v2466_v40  ;;  %v842_v23 = vpop.f32.mrb[25].mxu0  ;;  %v970_v24 = vpop.f32.mrb[25].mxu1 }
 0x12c   : > { %2113 = vst [vmem:[%s2481_s17 + $0x50] sm:$0xff] %v1997_v17   ;;  %2129 = vst [vmem:[%s2481_s17 + $0xd0] sm:$0xff] %v2077_v18   ;;  %v1227_v25 = vadd.f32 %v2466_v40, %v842_v23  ;;  %v1259_v26 = vadd.f32 %v2466_v40, %v970_v24  ;;  %v2218_v27 = vpop.f32.mrb[26].mxu0  ;;  %v2250_v28 = vpop.f32.mrb[26].mxu1 }
 0x12d   : > { %v1230_v29 = vadd.f32 %v2218_v27, %v2466_v40  ;;  %v1262_v30 = vadd.f32 %v2250_v28, %v2466_v40  ;;  %v845_v31 = vpop.f32.mrb[27].mxu0  ;;  %v973_v32 = vpop.f32.mrb[27].mxu1  ;;  %v1293_v35 = vmax.f32 %v1229_v21, 0.0  ;;  %v1325_v36 = vmax.f32 %v1261_v22, 0.0 }
 0x12e   : > { %v1228_v33 = vadd.f32 %v2466_v40, %v845_v31  ;;  %v1260_v34 = vadd.f32 %v2466_v40, %v973_v32  ;;  %v1291_v39 = vmax.f32 %v1227_v25, 0.0  ;;  %v1323_v41 = vmax.f32 %v1259_v26, 0.0 }
 0x12f   : > { %v1294_v37 = vmax.f32 %v1230_v29, 0.0  ;;  %v1326_v38 = vmax.f32 %v1262_v30, 0.0 }
 0x130   : > { %v1292_v42 = vmax.f32 %v1228_v33, 0.0  ;;  %v1324_v43 = vmax.f32 %v1260_v34, 0.0 }
 0x131   : > { %v2012_v44 = vpack.c.bf16 %v1294_v37, %v1293_v35  ;;  %v2092_v45 = vpack.c.bf16 %v1326_v38, %v1325_v36 }
 0x132   : > { %v2007_v46 = vpack.c.bf16 %v1292_v42, %v1291_v39  ;;  %v2087_v47 = vpack.c.bf16 %v1324_v43, %v1323_v41  ;;  %v2221_v48 = vpop.f32.mrb[28].mxu0  ;;  %v2253_v49 = vpop.f32.mrb[28].mxu1 }
 0x133   : > { %2116 = vst [vmem:[%s2481_s17 + $0x68] sm:$0xff] %v2012_v44   ;;  %2132 = vst [vmem:[%s2481_s17 + $0xe8] sm:$0xff] %v2092_v45   ;;  %v1233_v50 = vadd.f32 %v2221_v48, %v2466_v40  ;;  %v1265_v51 = vadd.f32 %v2253_v49, %v2466_v40  ;;  %v858_v52 = vpop.f32.mrb[29].mxu0  ;;  %v986_v53 = vpop.f32.mrb[29].mxu1 }
 0x134   : > { %2115 = vst [vmem:[%s2481_s17 + $0x60] sm:$0xff] %v2007_v46   ;;  %2131 = vst [vmem:[%s2481_s17 + $0xe0] sm:$0xff] %v2087_v47   ;;  %v1231_v54 = vadd.f32 %v2466_v40, %v858_v52  ;;  %v1263_v55 = vadd.f32 %v2466_v40, %v986_v53  ;;  %v2222_v56 = vpop.f32.mrb[30].mxu0  ;;  %v2254_v57 = vpop.f32.mrb[30].mxu1 }
 0x135   : > { %v1234_v58 = vadd.f32 %v2222_v56, %v2466_v40  ;;  %v1266_v59 = vadd.f32 %v2254_v57, %v2466_v40  ;;  %v861_v60 = vpop.f32.mrb[31].mxu0  ;;  %v989_v61 = vpop.f32.mrb[31].mxu1  ;;  %v1297_v0 = vmax.f32 %v1233_v50, 0.0  ;;  %v1329_v1 = vmax.f32 %v1265_v51, 0.0 }
 0x136   : > { %v1232_v62 = vadd.f32 %v2466_v40, %v861_v60  ;;  %v1264_v63 = vadd.f32 %v2466_v40, %v989_v61  ;;  %v1295_v4 = vmax.f32 %v1231_v54, 0.0  ;;  %v1327_v5 = vmax.f32 %v1263_v55, 0.0 }
 0x137   : > { %v1298_v2 = vmax.f32 %v1234_v58, 0.0  ;;  %v1330_v3 = vmax.f32 %v1266_v59, 0.0 }
 0x138   : > { %v1296_v6 = vmax.f32 %v1232_v62, 0.0  ;;  %v1328_v7 = vmax.f32 %v1264_v63, 0.0 }
 0x139   : > { %v2022_v8 = vpack.c.bf16 %v1298_v2, %v1297_v0  ;;  %v2102_v9 = vpack.c.bf16 %v1330_v3, %v1329_v1 }
 0x13a   : > { %v2017_v10 = vpack.c.bf16 %v1296_v6, %v1295_v4  ;;  %v2097_v11 = vpack.c.bf16 %v1328_v7, %v1327_v5 }
 0x13b   : > { %2118 = vst [vmem:[%s2481_s17 + $0x78] sm:$0xff] %v2022_v8   ;;  %2134 = vst [vmem:[%s2481_s17 + $0xf8] sm:$0xff] %v2102_v9  }
 0x13c   : > { %2117 = vst [vmem:[%s2481_s17 + $0x70] sm:$0xff] %v2017_v10   ;;  %2133 = vst [vmem:[%s2481_s17 + $0xf0] sm:$0xff] %v2097_v11  }
 0x13d PF: > { %s13_s14 = sadd.s32 1, %s2357_s14   ;;  %s2584_s12 = smov %s2353_s13 }
 0x13e   : > { %p10_p5 = scmp.ge.s32.totalorder %s13_s14, 6   ;;  %s2585_s13 = smov %s2587_s15 }
 0x140   :  { %12 = sbr.rel (!%p10_p5) target bundleno = 2 (0x2), region = 76 }

// kernel: encoder_pallas.6
= control target key start
LH: loop header
LB: loop body
LE: loop exit
PB: predicated region body
PF: predicated region fallthrough
CT: control target
= control target key end

     0   :  { %8 = vsyncpa [#allocation4], 0  ;;  %s6044_s0 = inlined_call_operand.vmem [shape: bf16[512,1024], index: 0, kind: input, shape index: {}]   ;;  %s6045_s1 = inlined_call_operand.hbm [shape: bf16[1024,128], index: 1, kind: input, shape index: {}]   ;;  %s6046_s2 = inlined_call_operand.hbm [shape: f32[1,128], index: 2, kind: input, shape index: {}]   ;;  %s6047_s3 = inlined_call_operand.vmem [shape: bf16[512,128], index: 3, kind: output, shape index: {}]  }
   0x1   :  { %9 = vsyncpa [#allocation6], 0  ;;  %s4791_s12 = smov [#allocation3]   ;;  %s4743_s16 = scalar_lea.hbm %s6045_s1, 8192 }
   0x2   :  { %s17_s13 = sshll.u32 %s4791_s12, 4  ;;  %p4744_p0 = scmp.ne.s32.totalorder %s6045_s1, %s4743_s16  ;;  %s18_s13 = int_to_ptr.vmem [resolvable:$true] %s17_s13 }
   0x3   :  { %p4747_p1 = scmp.lt.u32.totalorder %s4743_s16, %s6045_s1 }
   0x5   :  { %p4749_p2 = pnand %p4747_p1, %p4744_p0 }
   0x7   :  { %4752 = shalt.err (!%p4749_p2)
}
   0x8   :  { %s4753_s21 = scalar_lea.vmem %s18_s13, 8192  ;;  %p4758_p4 = scmp.lt.s32.totalorder %s18_s13, %s18_s13 }
   0x9   :  { %p4754_p3 = scmp.ne.s32.totalorder %s18_s13, %s4753_s21  ;;  %p4759_p5 = scmp.lt.s32.totalorder %s4753_s21, %s4753_s21 }
   0xb   :  { %p4760_p6 = por %p4759_p5, %p4758_p4 }
   0xd   :  { %p4761_p7 = pnand %p4760_p6, %p4754_p3 }
   0xf   :  { %4764 = shalt.err (!%p4761_p7)
}
  0x10   :  { %s4792_s22 = smov 64   ;;  %s4793_s23 = smov 4  }
  0x11   :  { %23 = dma.hbm_to_vmem [thread:$0]  %s6045_s1, 8192, %s18_s13, [#allocation4], %s4792_s22, %s4792_s22, %s4793_s23  }
  0x12   :  { %s4794_s26 = smov [#allocation5]   ;;  %s4765_s30 = scalar_lea.hbm %s6046_s2, 16 }
  0x13   :  { %s30_s27 = sshll.u32 %s4794_s26, 4  ;;  %p4766_p8 = scmp.ne.s32.totalorder %s6046_s2, %s4765_s30  ;;  %s31_s27 = int_to_ptr.vmem [resolvable:$true] %s30_s27 }
  0x14   :  { %p4769_p9 = scmp.lt.u32.totalorder %s4765_s30, %s6046_s2 }
  0x16   :  { %p4771_p10 = pnand %p4769_p9, %p4766_p8 }
  0x18   :  { %4774 = shalt.err (!%p4771_p10)
}
  0x19   :  { %s4775_s8 = scalar_lea.vmem %s31_s27, 16  ;;  %s4779_s1 = scalar_lea.vmem %s31_s27, 32 }
  0x1a   :  { %p4776_p11 = scmp.ne.s32.totalorder %s31_s27, %s4775_s8  ;;  %p4780_p12 = scmp.lt.s32.totalorder %s31_s27, %s31_s27 }
  0x1b   :  { %p4781_p13 = scmp.lt.s32.totalorder %s4779_s1, %s4775_s8 }
  0x1d   :  { %p4782_p0 = por %p4781_p13, %p4780_p12 }
  0x1f   :  { %p4783_p1 = pnand %p4782_p0, %p4776_p11 }
  0x21   :  { %4786 = shalt.err (!%p4783_p1)
}
  0x22   :  { %33 = dma.hbm_to_vmem [thread:$0]  %s6046_s2, 16, %s31_s27, [#allocation6]  }
  0x23   :  { %4787 = dma.done.wait [#allocation4], 8192  }
  0x24   :  { %4788 = vsyncadd [#allocation4], 4294959104 }
  0x25   :  { %4789 = dma.done.wait [#allocation6], 16  }
  0x26   :  { %4790 = vsyncadd [#allocation6], 4294967280  ;;  %v4795_v0 = vmov 0   ;;  %v4678_v1 = vld [vmem:[#allocation3] sm:$0xff]   ;;  %v4680_v3 = vld [vmem:[#allocation3 + $0x8] sm:$0xff]  }
  0x27   :  { %2221 = vmatprep.subr.bf16.mxu0 %v4795_v0  ;;  %2510 = vmatprep.subr.bf16.mxu1 %v4795_v0  ;;  %v4679_v2 = vld [vmem:[#allocation3 + $0x80] sm:$0xff]   ;;  %v4681_v4 = vld [vmem:[#allocation3 + $0x88] sm:$0xff]   ;;  %v4682_v5 = vld [vmem:[#allocation3 + $0x10] sm:$0xff]  }
  0x28   :  { %2222 = vmatpush1.bf16.msra.mxu0 %v4678_v1  ;;  %2511 = vmatpush1.bf16.msra.mxu1 %v4679_v2  ;;  %v4683_v6 = vld [vmem:[#allocation3 + $0x90] sm:$0xff]   ;;  %v4684_v7 = vld [vmem:[#allocation3 + $0x18] sm:$0xff]   ;;  %v4686_v9 = vld [vmem:[#allocation3 + $0x20] sm:$0xff]  }
  0x29   :  { %2223 = vmatprep.subr.bf16.mxu0 %v4795_v0  ;;  %2512 = vmatprep.subr.bf16.mxu1 %v4795_v0  ;;  %v4685_v8 = vld [vmem:[#allocation3 + $0x98] sm:$0xff]   ;;  %v4687_v10 = vld [vmem:[#allocation3 + $0xa0] sm:$0xff]   ;;  %v4688_v11 = vld [vmem:[#allocation3 + $0x28] sm:$0xff]  }
  0x2a   :  { %v4689_v12 = vld [vmem:[#allocation3 + $0xa8] sm:$0xff]   ;;  %v4690_v13 = vld [vmem:[#allocation3 + $0x30] sm:$0xff]   ;;  %v4692_v15 = vld [vmem:[#allocation3 + $0x38] sm:$0xff]  }
  0x2b   :  { %v4691_v14 = vld [vmem:[#allocation3 + $0xb0] sm:$0xff]   ;;  %v4693_v16 = vld [vmem:[#allocation3 + $0xb8] sm:$0xff]   ;;  %v4694_v17 = vld [vmem:[#allocation3 + $0x40] sm:$0xff]  }
  0x2c   :  { %2224 = vmatpush1.bf16.msra.mxu0 %v4680_v3  ;;  %2513 = vmatpush1.bf16.msra.mxu1 %v4681_v4  ;;  %v4695_v18 = vld [vmem:[#allocation3 + $0xc0] sm:$0xff]   ;;  %v4871_v21 = vld [vmem:[%s6044_s0 + $0x8] sm:$0xff]  ;;  %v4698_v27 = vld [vmem:[#allocation3 + $0x50] sm:$0xff]  }
  0x2d   :  { %2225 = vmatprep.subr.bf16.mxu0 %v4795_v0  ;;  %2514 = vmatprep.subr.bf16.mxu1 %v4795_v0  ;;  %v4861_v19 = vld [vmem:[%s6044_s0] sm:$0xff]  ;;  %v4878_v23 = vld [vmem:[%s6044_s0 + $0x28] sm:$0xff]  ;;  %v4699_v28 = vld [vmem:[#allocation3 + $0xd0] sm:$0xff]  }
  0x2e   :  { %v4866_v20 = vld [vmem:[%s6044_s0 + $0x20] sm:$0xff]  ;;  %v4696_v24 = vld [vmem:[#allocation3 + $0x48] sm:$0xff]   ;;  %v4036_v25 = vcombine.high %v4871_v21, %v4878_v23  ;;  %v4700_v29 = vld [vmem:[#allocation3 + $0x58] sm:$0xff]   ;;  %v4035_v44 = vcombine.low %v4871_v21, %v4878_v23 }
  0x2f   :  { %v4034_v22 = vcombine.high %v4861_v19, %v4866_v20  ;;  %v4697_v26 = vld [vmem:[#allocation3 + $0xc8] sm:$0xff]   ;;  %v4701_v30 = vld [vmem:[#allocation3 + $0xd8] sm:$0xff]   ;;  %v4702_v31 = vld [vmem:[#allocation3 + $0x60] sm:$0xff]   ;;  %v4033_v42 = vcombine.low %v4861_v19, %v4866_v20 }
  0x30   :  { %2226 = vmatpush1.bf16.msra.mxu0 %v4682_v5  ;;  %2515 = vmatpush1.bf16.msra.mxu1 %v4683_v6  ;;  %v4703_v32 = vld [vmem:[#allocation3 + $0xe0] sm:$0xff]   ;;  %v4704_v33 = vld [vmem:[#allocation3 + $0x68] sm:$0xff]   ;;  %v4706_v35 = vld [vmem:[#allocation3 + $0x70] sm:$0xff]  }
  0x31   :  { %2227 = vmatprep.subr.bf16.mxu0 %v4795_v0  ;;  %2516 = vmatprep.subr.bf16.mxu1 %v4795_v0  ;;  %v4705_v34 = vld [vmem:[#allocation3 + $0xe8] sm:$0xff]   ;;  %v4707_v36 = vld [vmem:[#allocation3 + $0xf0] sm:$0xff]   ;;  %v4708_v37 = vld [vmem:[#allocation3 + $0x78] sm:$0xff]  }
  0x32   :  { %2253 = vmatprep.mubr.bf16.mxu0 %v4034_v22  ;;  %2542 = vmatprep.mubr.bf16.mxu1 %v4036_v25  ;;  %v4709_v38 = vld [vmem:[#allocation3 + $0xf8] sm:$0xff]   ;;  %v181_v39 = vld [vmem:[%s6044_s0 + $0x40] sm:$0xff]  ;;  %v182_v41 = vld [vmem:[%s6044_s0 + $0x48] sm:$0xff] }
  0x33   :  { %v185_v40 = vld [vmem:[%s6044_s0 + $0x60] sm:$0xff]  ;;  %v186_v43 = vld [vmem:[%s6044_s0 + $0x68] sm:$0xff]  ;;  %v4714_v59 = vld [vmem:[#allocation3 + $0x110] sm:$0xff]  }
  0x34   :  { %2228 = vmatpush1.bf16.msra.mxu0 %v4684_v7  ;;  %2517 = vmatpush1.bf16.msra.mxu1 %v4685_v8  ;;  %v4710_v45 = vld [vmem:[#allocation3 + $0x100] sm:$0xff]   ;;  %v4042_v47 = vcombine.high %v181_v39, %v185_v40  ;;  %v4044_v48 = vcombine.high %v182_v41, %v186_v43  ;;  %v4712_v51 = vld [vmem:[#allocation3 + $0x108] sm:$0xff]   ;;  %v4041_v55 = vcombine.low %v181_v39, %v185_v40  ;;  %v4715_v60 = vld [vmem:[#allocation3 + $0x190] sm:$0xff]  }
  0x35   :  { %2229 = vmatprep.subr.bf16.mxu0 %v4795_v0  ;;  %2518 = vmatprep.subr.bf16.mxu1 %v4795_v0  ;;  %v4711_v46 = vld [vmem:[#allocation3 + $0x180] sm:$0xff]   ;;  %v4713_v52 = vld [vmem:[#allocation3 + $0x188] sm:$0xff]   ;;  %v4043_v56 = vcombine.low %v182_v41, %v186_v43  ;;  %v4716_v2 = vld [vmem:[#allocation3 + $0x118] sm:$0xff]  }
  0x36   :  { %v189_v49 = vld [vmem:[%s6044_s0 + $0x80] sm:$0xff]  ;;  %v190_v53 = vld [vmem:[%s6044_s0 + $0x88] sm:$0xff]  ;;  %v4717_v3 = vld [vmem:[#allocation3 + $0x198] sm:$0xff]  }
  0x37   :  { %v193_v50 = vld [vmem:[%s6044_s0 + $0xa0] sm:$0xff]  ;;  %v194_v54 = vld [vmem:[%s6044_s0 + $0xa8] sm:$0xff]  ;;  %v4722_v20 = vld [vmem:[#allocation3 + $0x130] sm:$0xff]  }
  0x38   :  { %2230 = vmatpush1.bf16.msra.mxu0 %v4686_v9  ;;  %2519 = vmatpush1.bf16.msra.mxu1 %v4687_v10  ;;  %v4050_v57 = vcombine.high %v189_v49, %v193_v50  ;;  %v4052_v58 = vcombine.high %v190_v53, %v194_v54  ;;  %v197_v61 = vld [vmem:[%s6044_s0 + $0xc0] sm:$0xff]  ;;  %v198_v63 = vld [vmem:[%s6044_s0 + $0xc8] sm:$0xff]  ;;  %v4049_v4 = vcombine.low %v189_v49, %v193_v50  ;;  %v4723_v21 = vld [vmem:[#allocation3 + $0x1b0] sm:$0xff]  }
  0x39   :  { %2231 = vmatprep.subr.bf16.mxu0 %v4795_v0  ;;  %2520 = vmatprep.subr.bf16.mxu1 %v4795_v0  ;;  %v201_v62 = vld [vmem:[%s6044_s0 + $0xe0] sm:$0xff]  ;;  %v202_v1 = vld [vmem:[%s6044_s0 + $0xe8] sm:$0xff]  ;;  %v4051_v6 = vcombine.low %v190_v53, %v194_v54  ;;  %v4732_v54 = vld [vmem:[#allocation3 + $0x158] sm:$0xff]  }
  0x3a   :  { %v4718_v5 = vld [vmem:[#allocation3 + $0x120] sm:$0xff]   ;;  %v4058_v7 = vcombine.high %v197_v61, %v201_v62  ;;  %v4060_v9 = vcombine.high %v198_v63, %v202_v1  ;;  %v214_v25 = vld [vmem:[%s6044_s0 + $0x148] sm:$0xff] }
  0x3b   :  { %v4719_v8 = vld [vmem:[#allocation3 + $0x1a0] sm:$0xff]   ;;  %v4729_v39 = vld [vmem:[#allocation3 + $0x1c8] sm:$0xff]  }
  0x3c   :  { %2232 = vmatpush1.bf16.msra.mxu0 %v4688_v11  ;;  %2521 = vmatpush1.bf16.msra.mxu1 %v4689_v12  ;;  %v205_v10 = vld [vmem:[%s6044_s0 + $0x100] sm:$0xff]  ;;  %v206_v12 = vld [vmem:[%s6044_s0 + $0x108] sm:$0xff] }
  0x3d   :  { %2233 = vmatprep.subr.bf16.mxu0 %v4795_v0  ;;  %2522 = vmatprep.subr.bf16.mxu1 %v4795_v0  ;;  %v209_v11 = vld [vmem:[%s6044_s0 + $0x120] sm:$0xff]  ;;  %v234_v49 = vld [vmem:[%s6044_s0 + $0x1e8] sm:$0xff] }
  0x3e   :  { %v213_v22 = vld [vmem:[%s6044_s0 + $0x140] sm:$0xff] }
  0x3f   :  { %v217_v23 = vld [vmem:[%s6044_s0 + $0x160] sm:$0xff] }
  0x40   :  { %2234 = vmatpush1.bf16.msra.mxu0 %v4690_v13  ;;  %2523 = vmatpush1.bf16.msra.mxu1 %v4691_v14  ;;  %v210_v13 = vld [vmem:[%s6044_s0 + $0x128] sm:$0xff]  ;;  %v4073_v40 = vcombine.low %v213_v22, %v217_v23 }
  0x41   :  { %2235 = vmatprep.subr.bf16.mxu0 %v4795_v0  ;;  %2524 = vmatprep.subr.bf16.mxu1 %v4795_v0  ;;  %v4720_v14 = vld [vmem:[#allocation3 + $0x128] sm:$0xff]   ;;  %v4068_v19 = vcombine.high %v206_v12, %v210_v13 }
  0x44   :  { %2236 = vmatpush1.bf16.msra.mxu0 %v4692_v15  ;;  %2525 = vmatpush1.bf16.msra.mxu1 %v4693_v16  ;;  %v4721_v15 = vld [vmem:[#allocation3 + $0x1a8] sm:$0xff]   ;;  %v4057_v16 = vcombine.low %v197_v61, %v201_v62 }
  0x45   :  { %2237 = vmatprep.subr.bf16.mxu0 %v4795_v0  ;;  %2526 = vmatprep.subr.bf16.mxu1 %v4795_v0 }
  0x48   :  { %2238 = vmatpush1.bf16.msra.mxu0 %v4694_v17  ;;  %2527 = vmatpush1.bf16.msra.mxu1 %v4695_v18  ;;  %v4059_v17 = vcombine.low %v198_v63, %v202_v1  ;;  %v4066_v18 = vcombine.high %v205_v10, %v209_v11  ;;  %v245_v1 = vld [vmem:[%s6044_s0 + $0x240] sm:$0xff] }
  0x49   :  { %2239 = vmatprep.subr.bf16.mxu0 %v4795_v0  ;;  %2528 = vmatprep.subr.bf16.mxu1 %v4795_v0 }
  0x4c   :  { %2240 = vmatpush1.bf16.msra.mxu0 %v4696_v24  ;;  %2529 = vmatpush1.bf16.msra.mxu1 %v4697_v26  ;;  %v4724_v24 = vld [vmem:[#allocation3 + $0x138] sm:$0xff]   ;;  %v218_v26 = vld [vmem:[%s6044_s0 + $0x168] sm:$0xff] }
  0x4d   :  { %2241 = vmatprep.subr.bf16.mxu0 %v4795_v0  ;;  %2530 = vmatprep.subr.bf16.mxu1 %v4795_v0  ;;  %v4075_v41 = vcombine.low %v214_v25, %v218_v26 }
  0x50   :  { %2242 = vmatpush1.bf16.msra.mxu0 %v4698_v27  ;;  %2531 = vmatpush1.bf16.msra.mxu1 %v4699_v28  ;;  %v4725_v27 = vld [vmem:[#allocation3 + $0x1b8] sm:$0xff]   ;;  %v4065_v28 = vcombine.low %v205_v10, %v209_v11  ;;  %v4735_v10 = vld [vmem:[#allocation3 + $0x1e0] sm:$0xff]  }
  0x51   :  { %2243 = vmatprep.subr.bf16.mxu0 %v4795_v0  ;;  %2532 = vmatprep.subr.bf16.mxu1 %v4795_v0  ;;  %v253_v11 = vld [vmem:[%s6044_s0 + $0x280] sm:$0xff] }
  0x54   :  { %2244 = vmatpush1.bf16.msra.mxu0 %v4700_v29  ;;  %2533 = vmatpush1.bf16.msra.mxu1 %v4701_v30  ;;  %v4067_v29 = vcombine.low %v206_v12, %v210_v13  ;;  %v4074_v30 = vcombine.high %v213_v22, %v217_v23  ;;  %v257_v12 = vld [vmem:[%s6044_s0 + $0x2a0] sm:$0xff]  ;;  %v254_v13 = vld [vmem:[%s6044_s0 + $0x288] sm:$0xff] }
  0x55   :  { %2245 = vmatprep.subr.bf16.mxu0 %v4795_v0  ;;  %2534 = vmatprep.subr.bf16.mxu1 %v4795_v0  ;;  %v266_v22 = vld [vmem:[%s6044_s0 + $0x2e8] sm:$0xff]  ;;  %v4113_v23 = vcombine.low %v253_v11, %v257_v12 }
  0x58   :  { %2246 = vmatpush1.bf16.msra.mxu0 %v4702_v31  ;;  %2535 = vmatpush1.bf16.msra.mxu1 %v4703_v32  ;;  %v4076_v31 = vcombine.high %v214_v25, %v218_v26  ;;  %v4726_v32 = vld [vmem:[#allocation3 + $0x140] sm:$0xff]  }
  0x59   :  { %2247 = vmatprep.subr.bf16.mxu0 %v4795_v0  ;;  %2536 = vmatprep.subr.bf16.mxu1 %v4795_v0 }
  0x5c   :  { %2248 = vmatpush1.bf16.msra.mxu0 %v4704_v33  ;;  %2537 = vmatpush1.bf16.msra.mxu1 %v4705_v34  ;;  %v4727_v33 = vld [vmem:[#allocation3 + $0x1c0] sm:$0xff]  }
  0x5d   :  { %2249 = vmatprep.subr.bf16.mxu0 %v4795_v0  ;;  %2538 = vmatprep.subr.bf16.mxu1 %v4795_v0  ;;  %v221_v34 = vld [vmem:[%s6044_s0 + $0x180] sm:$0xff] }
  0x60   :  { %2250 = vmatpush1.bf16.msra.mxu0 %v4706_v35  ;;  %2539 = vmatpush1.bf16.msra.mxu1 %v4707_v36  ;;  %v225_v35 = vld [vmem:[%s6044_s0 + $0x1a0] sm:$0xff]  ;;  %v4728_v36 = vld [vmem:[#allocation3 + $0x148] sm:$0xff]  }
  0x61   :  { %2251 = vmatprep.subr.bf16.mxu0 %v4795_v0  ;;  %2540 = vmatprep.subr.bf16.mxu1 %v4795_v0  ;;  %v4081_v50 = vcombine.low %v221_v34, %v225_v35 }
  0x64   :  { %2252 = vmatpush1.bf16.msra.mxu0 %v4708_v37  ;;  %2541 = vmatpush1.bf16.msra.mxu1 %v4709_v38  ;;  %v222_v37 = vld [vmem:[%s6044_s0 + $0x188] sm:$0xff] }
  0x65   :  { %2799 = vmatprep.subr.bf16.mxu0 %v4795_v0  ;;  %3088 = vmatprep.subr.bf16.mxu1 %v4795_v0  ;;  %v226_v38 = vld [vmem:[%s6044_s0 + $0x1a8] sm:$0xff] }
  0x66   :  { %v4084_v43 = vcombine.high %v222_v37, %v226_v38 }
  0x67   :  { %2254 = vmatmul.mubr.bf16.vlgmr.msra.gmra.mrb[0].mxu0 %v4033_v42  ;;  %2543 = vmatmul.mubr.bf16.vlgmr.msra.gmra.mrb[0].mxu1 %v4035_v44  ;;  %v4082_v42 = vcombine.high %v221_v34, %v225_v35  ;;  %v4730_v44 = vld [vmem:[#allocation3 + $0x150] sm:$0xff]   ;;  %v4737_v35 = vld [vmem:[#allocation3 + $0x1e8] sm:$0xff]  }
  0x68   :  { %2800 = vmatpush1.bf16.msra.mxu0 %v4710_v45  ;;  %3089 = vmatpush1.bf16.msra.mxu1 %v4711_v46  ;;  %v4731_v45 = vld [vmem:[#allocation3 + $0x1d0] sm:$0xff]   ;;  %v229_v46 = vld [vmem:[%s6044_s0 + $0x1c0] sm:$0xff] }
  0x69   :  { %2261 = vmatprep.mubr.bf16.mxu0 %v4042_v47  ;;  %2550 = vmatprep.mubr.bf16.mxu1 %v4044_v48  ;;  %v233_v47 = vld [vmem:[%s6044_s0 + $0x1e0] sm:$0xff]  ;;  %v230_v48 = vld [vmem:[%s6044_s0 + $0x1c8] sm:$0xff] }
  0x6a   :  { %2801 = vmatprep.subr.bf16.mxu0 %v4795_v0  ;;  %3090 = vmatprep.subr.bf16.mxu1 %v4795_v0  ;;  %v4092_v53 = vcombine.high %v230_v48, %v234_v49  ;;  %v4091_v61 = vcombine.low %v230_v48, %v234_v49  ;;  %v286_v48 = vld [vmem:[%s6044_s0 + $0x388] sm:$0xff] }
  0x6b   :  { %v290_v49 = vld [vmem:[%s6044_s0 + $0x3a8] sm:$0xff] }
  0x6c   :  { %2802 = vmatpush1.bf16.msra.mxu0 %v4712_v51  ;;  %3091 = vmatpush1.bf16.msra.mxu1 %v4713_v52  ;;  %v4083_v51 = vcombine.low %v222_v37, %v226_v38  ;;  %v4090_v52 = vcombine.high %v229_v46, %v233_v47  ;;  %v277_v37 = vld [vmem:[%s6044_s0 + $0x340] sm:$0xff] }
  0x6d   :  { %2803 = vmatprep.subr.bf16.mxu0 %v4795_v0  ;;  %3092 = vmatprep.subr.bf16.mxu1 %v4795_v0  ;;  %v281_v38 = vld [vmem:[%s6044_s0 + $0x360] sm:$0xff] }
  0x6f   :  { %2262 = vmatmul.mubr.bf16.gmra.mrb[4].mxu0 %v4041_v55  ;;  %2551 = vmatmul.mubr.bf16.gmra.mrb[4].mxu1 %v4043_v56  ;;  %v4733_v55 = vld [vmem:[#allocation3 + $0x1d8] sm:$0xff]   ;;  %v237_v56 = vld [vmem:[%s6044_s0 + $0x200] sm:$0xff] }
  0x70   :  { %2269 = vmatprep.mubr.bf16.mxu0 %v4050_v57  ;;  %2558 = vmatprep.mubr.bf16.mxu1 %v4052_v58  ;;  %v241_v57 = vld [vmem:[%s6044_s0 + $0x220] sm:$0xff]  ;;  %v238_v58 = vld [vmem:[%s6044_s0 + $0x208] sm:$0xff] }
  0x71   :  { %2804 = vmatpush1.bf16.msra.mxu0 %v4714_v59  ;;  %3093 = vmatpush1.bf16.msra.mxu1 %v4715_v60  ;;  %v242_v59 = vld [vmem:[%s6044_s0 + $0x228] sm:$0xff]  ;;  %v4089_v60 = vcombine.low %v229_v46, %v233_v47  ;;  %v4098_v62 = vcombine.high %v237_v56, %v241_v57  ;;  %v285_v46 = vld [vmem:[%s6044_s0 + $0x380] sm:$0xff] }
  0x72   :  { %2805 = vmatprep.subr.bf16.mxu0 %v4795_v0  ;;  %3094 = vmatprep.subr.bf16.mxu1 %v4795_v0  ;;  %v4100_v63 = vcombine.high %v238_v58, %v242_v59  ;;  %v289_v47 = vld [vmem:[%s6044_s0 + $0x3a0] sm:$0xff] }
  0x75   :  { %2806 = vmatpush1.bf16.msra.mxu0 %v4716_v2  ;;  %3095 = vmatpush1.bf16.msra.mxu1 %v4717_v3  ;;  %v249_v2 = vld [vmem:[%s6044_s0 + $0x260] sm:$0xff]  ;;  %v246_v3 = vld [vmem:[%s6044_s0 + $0x248] sm:$0xff] }
  0x76   :  { %2807 = vmatprep.subr.bf16.mxu0 %v4795_v0  ;;  %3096 = vmatprep.subr.bf16.mxu1 %v4795_v0 }
  0x77   :  { %2270 = vmatmul.mubr.bf16.gmra.mrb[8].mxu0 %v4049_v4  ;;  %2559 = vmatmul.mubr.bf16.gmra.mrb[8].mxu1 %v4051_v6  ;;  %v250_v4 = vld [vmem:[%s6044_s0 + $0x268] sm:$0xff]  ;;  %v4099_v6 = vcombine.low %v238_v58, %v242_v59  ;;  %v4147_v59 = vcombine.low %v286_v48, %v290_v49 }
  0x78   :  { %2277 = vmatprep.mubr.bf16.mxu0 %v4058_v7  ;;  %2566 = vmatprep.mubr.bf16.mxu1 %v4060_v9  ;;  %v4106_v7 = vcombine.high %v245_v1, %v249_v2  ;;  %v4734_v9 = vld [vmem:[#allocation3 + $0x160] sm:$0xff]   ;;  %v298_v58 = vld [vmem:[%s6044_s0 + $0x3e8] sm:$0xff] }
  0x79   :  { %2808 = vmatpush1.bf16.msra.mxu0 %v4718_v5  ;;  %3097 = vmatpush1.bf16.msra.mxu1 %v4719_v8  ;;  %v4097_v5 = vcombine.low %v237_v56, %v241_v57  ;;  %v4108_v8 = vcombine.high %v246_v3, %v250_v4  ;;  %v297_v56 = vld [vmem:[%s6044_s0 + $0x3e0] sm:$0xff]  ;;  %v294_v57 = vld [vmem:[%s6044_s0 + $0x3c8] sm:$0xff] }
  0x7a   :  { %2809 = vmatprep.subr.bf16.mxu0 %v4795_v0  ;;  %3098 = vmatprep.subr.bf16.mxu1 %v4795_v0 }
  0x7d   :  { %2810 = vmatpush1.bf16.msra.mxu0 %v4720_v14  ;;  %3099 = vmatpush1.bf16.msra.mxu1 %v4721_v15  ;;  %v258_v14 = vld [vmem:[%s6044_s0 + $0x2a8] sm:$0xff]  ;;  %v4105_v15 = vcombine.low %v245_v1, %v249_v2  ;;  %v305_v1 = vld [vmem:[%s6044_s0 + $0x420] sm:$0xff] }
  0x7e   :  { %2811 = vmatprep.subr.bf16.mxu0 %v4795_v0  ;;  %3100 = vmatprep.subr.bf16.mxu1 %v4795_v0  ;;  %v302_v2 = vld [vmem:[%s6044_s0 + $0x408] sm:$0xff] }
  0x7f   :  { %2278 = vmatmul.mubr.bf16.gmra.mrb[12].mxu0 %v4057_v16  ;;  %2567 = vmatmul.mubr.bf16.gmra.mrb[12].mxu1 %v4059_v17  ;;  %v4107_v16 = vcombine.low %v246_v3, %v250_v4  ;;  %v4114_v17 = vcombine.high %v253_v11, %v257_v12  ;;  %v306_v3 = vld [vmem:[%s6044_s0 + $0x428] sm:$0xff] }
  0x80   :  { %2285 = vmatprep.mubr.bf16.mxu0 %v4066_v18  ;;  %2574 = vmatprep.mubr.bf16.mxu1 %v4068_v19  ;;  %v4116_v18 = vcombine.high %v254_v13, %v258_v14  ;;  %v261_v19 = vld [vmem:[%s6044_s0 + $0x2c0] sm:$0xff]  ;;  %v310_v11 = vld [vmem:[%s6044_s0 + $0x448] sm:$0xff] }
  0x81   :  { %2812 = vmatpush1.bf16.msra.mxu0 %v4722_v20  ;;  %3101 = vmatpush1.bf16.msra.mxu1 %v4723_v21  ;;  %v265_v20 = vld [vmem:[%s6044_s0 + $0x2e0] sm:$0xff]  ;;  %v262_v21 = vld [vmem:[%s6044_s0 + $0x2c8] sm:$0xff] }
  0x82   :  { %2813 = vmatprep.subr.bf16.mxu0 %v4795_v0  ;;  %3102 = vmatprep.subr.bf16.mxu1 %v4795_v0  ;;  %v4122_v25 = vcombine.high %v261_v19, %v265_v20  ;;  %v4124_v26 = vcombine.high %v262_v21, %v266_v22  ;;  %v314_v12 = vld [vmem:[%s6044_s0 + $0x468] sm:$0xff] }
  0x85   :  { %2814 = vmatpush1.bf16.msra.mxu0 %v4724_v24  ;;  %3103 = vmatpush1.bf16.msra.mxu1 %v4725_v27  ;;  %v4115_v24 = vcombine.low %v254_v13, %v258_v14  ;;  %v4736_v27 = vld [vmem:[#allocation3 + $0x168] sm:$0xff]   ;;  %v4163_v14 = vcombine.low %v302_v2, %v306_v3 }
  0x86   :  { %2815 = vmatprep.subr.bf16.mxu0 %v4795_v0  ;;  %3104 = vmatprep.subr.bf16.mxu1 %v4795_v0 }
  0x87   :  { %2286 = vmatmul.mubr.bf16.gmra.mrb[16].mxu0 %v4065_v28  ;;  %2575 = vmatmul.mubr.bf16.gmra.mrb[16].mxu1 %v4067_v29  ;;  %v269_v28 = vld [vmem:[%s6044_s0 + $0x300] sm:$0xff] }
  0x88   :  { %2293 = vmatprep.mubr.bf16.mxu0 %v4074_v30  ;;  %2582 = vmatprep.mubr.bf16.mxu1 %v4076_v31  ;;  %v273_v29 = vld [vmem:[%s6044_s0 + $0x320] sm:$0xff]  ;;  %v270_v30 = vld [vmem:[%s6044_s0 + $0x308] sm:$0xff] }
  0x89   :  { %2816 = vmatpush1.bf16.msra.mxu0 %v4726_v32  ;;  %3105 = vmatpush1.bf16.msra.mxu1 %v4727_v33  ;;  %v274_v31 = vld [vmem:[%s6044_s0 + $0x328] sm:$0xff]  ;;  %v4121_v32 = vcombine.low %v261_v19, %v265_v20  ;;  %v4123_v33 = vcombine.low %v262_v21, %v266_v22  ;;  %v4130_v34 = vcombine.high %v269_v28, %v273_v29 }
  0x8a   :  { %2817 = vmatprep.subr.bf16.mxu0 %v4795_v0  ;;  %3106 = vmatprep.subr.bf16.mxu1 %v4795_v0  ;;  %v318_v19 = vld [vmem:[%s6044_s0 + $0x488] sm:$0xff]  ;;  %v4171_v22 = vcombine.low %v310_v11, %v314_v12 }
  0x8b   :  { %v322_v20 = vld [vmem:[%s6044_s0 + $0x4a8] sm:$0xff] }
  0x8d   :  { %2818 = vmatpush1.bf16.msra.mxu0 %v4728_v36  ;;  %3107 = vmatpush1.bf16.msra.mxu1 %v4729_v39  ;;  %v4132_v36 = vcombine.high %v270_v30, %v274_v31  ;;  %v278_v39 = vld [vmem:[%s6044_s0 + $0x348] sm:$0xff] }
  0x8e   :  { %2819 = vmatprep.subr.bf16.mxu0 %v4795_v0  ;;  %3108 = vmatprep.subr.bf16.mxu1 %v4795_v0 }
  0x8f   :  { %2294 = vmatmul.mubr.bf16.gmra.mrb[20].mxu0 %v4073_v40  ;;  %2583 = vmatmul.mubr.bf16.gmra.mrb[20].mxu1 %v4075_v41  ;;  %v282_v40 = vld [vmem:[%s6044_s0 + $0x368] sm:$0xff]  ;;  %v4129_v41 = vcombine.low %v269_v28, %v273_v29 }
  0x90   :  { %2301 = vmatprep.mubr.bf16.mxu0 %v4082_v42  ;;  %2590 = vmatprep.mubr.bf16.mxu1 %v4084_v43  ;;  %v4131_v42 = vcombine.low %v270_v30, %v274_v31  ;;  %v4138_v43 = vcombine.high %v277_v37, %v281_v38  ;;  %v330_v28 = vld [vmem:[%s6044_s0 + $0x4e8] sm:$0xff]  ;;  %v4179_v30 = vcombine.low %v318_v19, %v322_v20 }
  0x91   :  { %2820 = vmatpush1.bf16.msra.mxu0 %v4730_v44  ;;  %3109 = vmatpush1.bf16.msra.mxu1 %v4731_v45  ;;  %v4140_v44 = vcombine.high %v278_v39, %v282_v40  ;;  %v4738_v45 = vld [vmem:[#allocation3 + $0x170] sm:$0xff]  }
  0x92   :  { %2821 = vmatprep.subr.bf16.mxu0 %v4795_v0  ;;  %3110 = vmatprep.subr.bf16.mxu1 %v4795_v0 }
  0x95   :  { %2822 = vmatpush1.bf16.msra.mxu0 %v4732_v54  ;;  %3111 = vmatpush1.bf16.msra.mxu1 %v4733_v55  ;;  %v4148_v54 = vcombine.high %v286_v48, %v290_v49  ;;  %v293_v55 = vld [vmem:[%s6044_s0 + $0x3c0] sm:$0xff] }
  0x96   :  { %2823 = vmatprep.subr.bf16.mxu0 %v4795_v0  ;;  %3112 = vmatprep.subr.bf16.mxu1 %v4795_v0  ;;  %v4153_v4 = vcombine.low %v293_v55, %v297_v56  ;;  %v349_v49 = vld [vmem:[%s6044_s0 + $0x580] sm:$0xff] }
  0x97   :  { %2302 = vmatmul.mubr.bf16.gmra.mrb[24].mxu0 %v4081_v50  ;;  %2591 = vmatmul.mubr.bf16.gmra.mrb[24].mxu1 %v4083_v51  ;;  %v4137_v50 = vcombine.low %v277_v37, %v281_v38  ;;  %v4139_v51 = vcombine.low %v278_v39, %v282_v40 }
  0x98   :  { %2309 = vmatprep.mubr.bf16.mxu0 %v4090_v52  ;;  %2598 = vmatprep.mubr.bf16.mxu1 %v4092_v53  ;;  %v4146_v52 = vcombine.high %v285_v46, %v289_v47  ;;  %v4739_v53 = vld [vmem:[#allocation3 + $0x1f0] sm:$0xff]  }
  0x99   :  { %2824 = vmatpush1.bf16.msra.mxu0 %v4734_v9  ;;  %3113 = vmatpush1.bf16.msra.mxu1 %v4735_v10  ;;  %v309_v9 = vld [vmem:[%s6044_s0 + $0x440] sm:$0xff] }
  0x9a   :  { %2825 = vmatprep.subr.bf16.mxu0 %v4795_v0  ;;  %3114 = vmatprep.subr.bf16.mxu1 %v4795_v0  ;;  %v313_v10 = vld [vmem:[%s6044_s0 + $0x460] sm:$0xff] }
  0x9b   :  { %v4169_v21 = vcombine.low %v309_v9, %v313_v10 }
  0x9d   :  { %2826 = vmatpush1.bf16.msra.mxu0 %v4736_v27  ;;  %3115 = vmatpush1.bf16.msra.mxu1 %v4737_v35  ;;  %v326_v27 = vld [vmem:[%s6044_s0 + $0x4c8] sm:$0xff] }
  0x9e   :  { %2827 = vmatprep.subr.bf16.mxu0 %v4795_v0  ;;  %3116 = vmatprep.subr.bf16.mxu1 %v4795_v0  ;;  %v334_v35 = vld [vmem:[%s6044_s0 + $0x508] sm:$0xff]  ;;  %v4187_v38 = vcombine.low %v326_v27, %v330_v28 }
  0x9f   :  { %2310 = vmatmul.mubr.bf16.gmra.mrb[28].mxu0 %v4089_v60  ;;  %2599 = vmatmul.mubr.bf16.gmra.mrb[28].mxu1 %v4091_v61  ;;  %v4154_v60 = vcombine.high %v293_v55, %v297_v56  ;;  %v4156_v61 = vcombine.high %v294_v57, %v298_v58 }
  0xa0   :  { %2317 = vmatprep.mubr.bf16.mxu0 %v4098_v62  ;;  %2606 = vmatprep.mubr.bf16.mxu1 %v4100_v63  ;;  %v4740_v62 = vld [vmem:[#allocation3 + $0x178] sm:$0xff]   ;;  %v301_v63 = vld [vmem:[%s6044_s0 + $0x400] sm:$0xff] }
  0xa1   :  { %2828 = vmatpush1.bf16.msra.mxu0 %v4738_v45  ;;  %3117 = vmatpush1.bf16.msra.mxu1 %v4739_v53  ;;  %v4161_v13 = vcombine.low %v301_v63, %v305_v1 }
  0xa2   :  { %2829 = vmatprep.subr.bf16.mxu0 %v4795_v0  ;;  %3118 = vmatprep.subr.bf16.mxu1 %v4795_v0  ;;  %v4145_v0 = vcombine.low %v285_v46, %v289_v47 }
  0xa5   :  { %2830 = vmatpush1.bf16.msra.mxu0 %v4740_v62 }
  0xa7   :  { %2318 = vmatmul.mubr.bf16.gmra.mrb[32].mxu0 %v4097_v5  ;;  %2607 = vmatmul.mubr.bf16.gmra.mrb[32].mxu1 %v4099_v6  ;;  %v4155_v5 = vcombine.low %v294_v57, %v298_v58  ;;  %v4162_v6 = vcombine.high %v301_v63, %v305_v1  ;;  %v357_v57 = vld [vmem:[%s6044_s0 + $0x5c0] sm:$0xff] }
  0xa8   :  { %2325 = vmatprep.mubr.bf16.mxu0 %v4106_v7  ;;  %2614 = vmatprep.mubr.bf16.mxu1 %v4108_v8  ;;  %v4741_v7 = vld [vmem:[#allocation3 + $0x1f8] sm:$0xff]   ;;  %v4164_v8 = vcombine.high %v302_v2, %v306_v3  ;;  %v361_v58 = vld [vmem:[%s6044_s0 + $0x5e0] sm:$0xff]  ;;  %v366_v3 = vld [vmem:[%s6044_s0 + $0x608] sm:$0xff] }
  0xa9   :  { %3119 = vmatpush1.bf16.msra.mxu1 %v4741_v7  ;;  %v4218_v62 = vcombine.high %v357_v57, %v361_v58  ;;  %v365_v1 = vld [vmem:[%s6044_s0 + $0x600] sm:$0xff] }
  0xaa   :  { %v369_v2 = vld [vmem:[%s6044_s0 + $0x620] sm:$0xff] }
  0xab   :  { %v4226_v7 = vcombine.high %v365_v1, %v369_v2 }
  0xaf   :  { %2326 = vmatmul.mubr.bf16.gmra.mrb[36].mxu0 %v4105_v15  ;;  %2615 = vmatmul.mubr.bf16.gmra.mrb[36].mxu1 %v4107_v16  ;;  %v4170_v15 = vcombine.high %v309_v9, %v313_v10  ;;  %v4172_v16 = vcombine.high %v310_v11, %v314_v12  ;;  %v373_v9 = vld [vmem:[%s6044_s0 + $0x640] sm:$0xff]  ;;  %v374_v11 = vld [vmem:[%s6044_s0 + $0x648] sm:$0xff] }
  0xb0   :  { %2333 = vmatprep.mubr.bf16.mxu0 %v4114_v17  ;;  %2622 = vmatprep.mubr.bf16.mxu1 %v4116_v18  ;;  %v317_v17 = vld [vmem:[%s6044_s0 + $0x480] sm:$0xff]  ;;  %v378_v12 = vld [vmem:[%s6044_s0 + $0x668] sm:$0xff] }
  0xb1   :  { %v321_v18 = vld [vmem:[%s6044_s0 + $0x4a0] sm:$0xff] }
  0xb2   :  { %v4177_v29 = vcombine.low %v317_v17, %v321_v18  ;;  %v377_v10 = vld [vmem:[%s6044_s0 + $0x660] sm:$0xff] }
  0xb7   :  { %2334 = vmatmul.mubr.bf16.gmra.mrb[40].mxu0 %v4113_v23  ;;  %2623 = vmatmul.mubr.bf16.gmra.mrb[40].mxu1 %v4115_v24  ;;  %v4178_v23 = vcombine.high %v317_v17, %v321_v18  ;;  %v4180_v24 = vcombine.high %v318_v19, %v322_v20  ;;  %v381_v17 = vld [vmem:[%s6044_s0 + $0x680] sm:$0xff]  ;;  %v382_v19 = vld [vmem:[%s6044_s0 + $0x688] sm:$0xff] }
  0xb8   :  { %2341 = vmatprep.mubr.bf16.mxu0 %v4122_v25  ;;  %2630 = vmatprep.mubr.bf16.mxu1 %v4124_v26  ;;  %v325_v25 = vld [vmem:[%s6044_s0 + $0x4c0] sm:$0xff]  ;;  %v386_v20 = vld [vmem:[%s6044_s0 + $0x6a8] sm:$0xff] }
  0xb9   :  { %v329_v26 = vld [vmem:[%s6044_s0 + $0x4e0] sm:$0xff] }
  0xba   :  { %v4186_v31 = vcombine.high %v325_v25, %v329_v26  ;;  %v4185_v37 = vcombine.low %v325_v25, %v329_v26  ;;  %v385_v18 = vld [vmem:[%s6044_s0 + $0x6a0] sm:$0xff] }
  0xbb   :  { %v389_v25 = vld [vmem:[%s6044_s0 + $0x6c0] sm:$0xff] }
  0xbc   :  { %v393_v26 = vld [vmem:[%s6044_s0 + $0x6e0] sm:$0xff] }
  0xbf   :  { %2342 = vmatmul.mubr.bf16.gmra.mrb[44].mxu0 %v4121_v32  ;;  %2631 = vmatmul.mubr.bf16.gmra.mrb[44].mxu1 %v4123_v33  ;;  %v4188_v32 = vcombine.high %v326_v27, %v330_v28  ;;  %v333_v33 = vld [vmem:[%s6044_s0 + $0x500] sm:$0xff]  ;;  %v390_v27 = vld [vmem:[%s6044_s0 + $0x6c8] sm:$0xff] }
  0xc0   :  { %2349 = vmatprep.mubr.bf16.mxu0 %v4130_v34  ;;  %2638 = vmatprep.mubr.bf16.mxu1 %v4132_v36  ;;  %v337_v34 = vld [vmem:[%s6044_s0 + $0x520] sm:$0xff]  ;;  %v338_v36 = vld [vmem:[%s6044_s0 + $0x528] sm:$0xff] }
  0xc1   :  { %v4194_v39 = vcombine.high %v333_v33, %v337_v34  ;;  %v4196_v40 = vcombine.high %v334_v35, %v338_v36  ;;  %v4193_v45 = vcombine.low %v333_v33, %v337_v34  ;;  %v4195_v46 = vcombine.low %v334_v35, %v338_v36  ;;  %v394_v28 = vld [vmem:[%s6044_s0 + $0x6e8] sm:$0xff]  ;;  %v397_v33 = vld [vmem:[%s6044_s0 + $0x700] sm:$0xff] }
  0xc2   :  { %v401_v34 = vld [vmem:[%s6044_s0 + $0x720] sm:$0xff]  ;;  %v398_v36 = vld [vmem:[%s6044_s0 + $0x708] sm:$0xff] }
  0xc7   :  { %2350 = vmatmul.mubr.bf16.gmra.mrb[48].mxu0 %v4129_v41  ;;  %2639 = vmatmul.mubr.bf16.gmra.mrb[48].mxu1 %v4131_v42  ;;  %v341_v41 = vld [vmem:[%s6044_s0 + $0x540] sm:$0xff] }
  0xc8   :  { %2357 = vmatprep.mubr.bf16.mxu0 %v4138_v43  ;;  %2646 = vmatprep.mubr.bf16.mxu1 %v4140_v44  ;;  %v345_v42 = vld [vmem:[%s6044_s0 + $0x560] sm:$0xff]  ;;  %v342_v43 = vld [vmem:[%s6044_s0 + $0x548] sm:$0xff] }
  0xc9   :  { %v346_v44 = vld [vmem:[%s6044_s0 + $0x568] sm:$0xff]  ;;  %v4202_v47 = vcombine.high %v341_v41, %v345_v42  ;;  %v4201_v53 = vcombine.low %v341_v41, %v345_v42 }
  0xca   :  { %v4204_v48 = vcombine.high %v342_v43, %v346_v44 }
  0xcf   :  { %2358 = vmatmul.mubr.bf16.gmra.mrb[52].mxu0 %v4137_v50  ;;  %2647 = vmatmul.mubr.bf16.gmra.mrb[52].mxu1 %v4139_v51  ;;  %v353_v50 = vld [vmem:[%s6044_s0 + $0x5a0] sm:$0xff]  ;;  %v350_v51 = vld [vmem:[%s6044_s0 + $0x588] sm:$0xff] }
  0xd0   :  { %2365 = vmatprep.mubr.bf16.mxu0 %v4146_v52  ;;  %2654 = vmatprep.mubr.bf16.mxu1 %v4148_v54  ;;  %v354_v52 = vld [vmem:[%s6044_s0 + $0x5a8] sm:$0xff]  ;;  %v4203_v54 = vcombine.low %v342_v43, %v346_v44  ;;  %v4210_v55 = vcombine.high %v349_v49, %v353_v50  ;;  %v4251_v44 = vcombine.low %v390_v27, %v394_v28 }
  0xd1   :  { %v4212_v56 = vcombine.high %v350_v51, %v354_v52 }
  0xd7   :  { %2366 = vmatmul.mubr.bf16.gmra.mrb[56].mxu0 %v4145_v0  ;;  %2655 = vmatmul.mubr.bf16.gmra.mrb[56].mxu1 %v4147_v59  ;;  %v358_v0 = vld [vmem:[%s6044_s0 + $0x5c8] sm:$0xff] }
  0xd8   :  { %2373 = vmatprep.mubr.bf16.mxu0 %v4154_v60  ;;  %2662 = vmatprep.mubr.bf16.mxu1 %v4156_v61  ;;  %v362_v59 = vld [vmem:[%s6044_s0 + $0x5e8] sm:$0xff]  ;;  %v4209_v60 = vcombine.low %v349_v49, %v353_v50  ;;  %v4211_v61 = vcombine.low %v350_v51, %v354_v52  ;;  %v405_v51 = vld [vmem:[%s6044_s0 + $0x740] sm:$0xff] }
  0xd9   :  { %v4220_v63 = vcombine.high %v358_v0, %v362_v59  ;;  %v409_v52 = vld [vmem:[%s6044_s0 + $0x760] sm:$0xff] }
  0xdf   :  { %2374 = vmatmul.mubr.bf16.gmra.mrb[60].mxu0 %v4153_v4  ;;  %2663 = vmatmul.mubr.bf16.gmra.mrb[60].mxu1 %v4155_v5  ;;  %v370_v4 = vld [vmem:[%s6044_s0 + $0x628] sm:$0xff]  ;;  %v4217_v5 = vcombine.low %v357_v57, %v361_v58  ;;  %v4257_v58 = vcombine.low %v397_v33, %v401_v34 }
  0xe0   :  { %2381 = vmatprep.mubr.bf16.mxu0 %v4162_v6  ;;  %2670 = vmatprep.mubr.bf16.mxu1 %v4164_v8  ;;  %v4219_v6 = vcombine.low %v358_v0, %v362_v59  ;;  %v4228_v8 = vcombine.high %v366_v3, %v370_v4 }
  0xe7   :  { %2382 = vmatmul.mubr.bf16.gmra.mrb[64].mxu0 %v4161_v13  ;;  %2671 = vmatmul.mubr.bf16.gmra.mrb[64].mxu1 %v4163_v14  ;;  %v4225_v13 = vcombine.low %v365_v1, %v369_v2  ;;  %v4227_v14 = vcombine.low %v366_v3, %v370_v4 }
  0xe8   :  { %2389 = vmatprep.mubr.bf16.mxu0 %v4170_v15  ;;  %2678 = vmatprep.mubr.bf16.mxu1 %v4172_v16  ;;  %v4234_v15 = vcombine.high %v373_v9, %v377_v10  ;;  %v4236_v16 = vcombine.high %v374_v11, %v378_v12 }
  0xef   :  { %2390 = vmatmul.mubr.bf16.gmra.mrb[68].mxu0 %v4169_v21  ;;  %2679 = vmatmul.mubr.bf16.gmra.mrb[68].mxu1 %v4171_v22  ;;  %v4233_v21 = vcombine.low %v373_v9, %v377_v10  ;;  %v4235_v22 = vcombine.low %v374_v11, %v378_v12  ;;  %v418_v9 = vld [vmem:[%s6044_s0 + $0x7a8] sm:$0xff]  ;;  %v4265_v12 = vcombine.low %v405_v51, %v409_v52 }
  0xf0   :  { %2397 = vmatprep.mubr.bf16.mxu0 %v4178_v23  ;;  %2686 = vmatprep.mubr.bf16.mxu1 %v4180_v24  ;;  %v4242_v23 = vcombine.high %v381_v17, %v385_v18  ;;  %v4244_v24 = vcombine.high %v382_v19, %v386_v20 }
  0xf7   :  { %2398 = vmatmul.mubr.bf16.gmra.mrb[72].mxu0 %v4177_v29  ;;  %2687 = vmatmul.mubr.bf16.gmra.mrb[72].mxu1 %v4179_v30  ;;  %v4241_v29 = vcombine.low %v381_v17, %v385_v18  ;;  %v4243_v30 = vcombine.low %v382_v19, %v386_v20 }
  0xf8   :  { %2405 = vmatprep.mubr.bf16.mxu0 %v4186_v31  ;;  %2694 = vmatprep.mubr.bf16.mxu1 %v4188_v32  ;;  %v4250_v31 = vcombine.high %v389_v25, %v393_v26  ;;  %v4252_v32 = vcombine.high %v390_v27, %v394_v28  ;;  %v426_v27 = vld [vmem:[%s6044_s0 + $0x7e8] sm:$0xff] }
  0xff   :  { %2406 = vmatmul.mubr.bf16.gmra.mrb[76].mxu0 %v4185_v37  ;;  %2695 = vmatmul.mubr.bf16.gmra.mrb[76].mxu1 %v4187_v38  ;;  %v402_v37 = vld [vmem:[%s6044_s0 + $0x728] sm:$0xff] }
 0x100   :  { %2413 = vmatprep.mubr.bf16.mxu0 %v4194_v39  ;;  %2702 = vmatprep.mubr.bf16.mxu1 %v4196_v40  ;;  %v4249_v40 = vcombine.low %v389_v25, %v393_v26  ;;  %v422_v26 = vld [vmem:[%s6044_s0 + $0x7c8] sm:$0xff] }
 0x107   :  { %2414 = vmatmul.mubr.bf16.gmra.mrb[80].mxu0 %v4193_v45  ;;  %2703 = vmatmul.mubr.bf16.gmra.mrb[80].mxu1 %v4195_v46  ;;  %v4258_v45 = vcombine.high %v397_v33, %v401_v34 }
 0x108   :  { %2421 = vmatprep.mubr.bf16.mxu0 %v4202_v47  ;;  %2710 = vmatprep.mubr.bf16.mxu1 %v4204_v48  ;;  %v4260_v48 = vcombine.high %v398_v36, %v402_v37 }
 0x10f   :  { %2422 = vmatmul.mubr.bf16.gmra.mrb[84].mxu0 %v4201_v53  ;;  %2711 = vmatmul.mubr.bf16.gmra.mrb[84].mxu1 %v4203_v54  ;;  %v406_v54 = vld [vmem:[%s6044_s0 + $0x748] sm:$0xff] }
 0x110   :  { %2429 = vmatprep.mubr.bf16.mxu0 %v4210_v55  ;;  %2718 = vmatprep.mubr.bf16.mxu1 %v4212_v56  ;;  %v410_v55 = vld [vmem:[%s6044_s0 + $0x768] sm:$0xff] }
 0x111   :  { %v4268_v2 = vcombine.high %v406_v54, %v410_v55 }
 0x117   :  { %2430 = vmatmul.mubr.bf16.gmra.mrb[88].mxu0 %v4209_v60  ;;  %2719 = vmatmul.mubr.bf16.gmra.mrb[88].mxu1 %v4211_v61  ;;  %v4259_v61 = vcombine.low %v398_v36, %v402_v37 }
 0x118   :  { %2437 = vmatprep.mubr.bf16.mxu0 %v4218_v62  ;;  %2726 = vmatprep.mubr.bf16.mxu1 %v4220_v63  ;;  %v4266_v62 = vcombine.high %v405_v51, %v409_v52 }
 0x11f   :  { %2438 = vmatmul.mubr.bf16.gmra.mrb[92].mxu0 %v4217_v5  ;;  %2727 = vmatmul.mubr.bf16.gmra.mrb[92].mxu1 %v4219_v6  ;;  %v413_v5 = vld [vmem:[%s6044_s0 + $0x780] sm:$0xff] }
 0x120   :  { %2445 = vmatprep.mubr.bf16.mxu0 %v4226_v7  ;;  %2734 = vmatprep.mubr.bf16.mxu1 %v4228_v8  ;;  %v417_v6 = vld [vmem:[%s6044_s0 + $0x7a0] sm:$0xff]  ;;  %v414_v8 = vld [vmem:[%s6044_s0 + $0x788] sm:$0xff] }
 0x121   :  { %v4274_v17 = vcombine.high %v413_v5, %v417_v6  ;;  %v4276_v20 = vcombine.high %v414_v8, %v418_v9  ;;  %v4275_v34 = vcombine.low %v414_v8, %v418_v9 }
 0x127   :  { %2446 = vmatmul.mubr.bf16.gmra.mrb[96].mxu0 %v4225_v13  ;;  %2735 = vmatmul.mubr.bf16.gmra.mrb[96].mxu1 %v4227_v14 }
 0x128   :  { %2453 = vmatprep.mubr.bf16.mxu0 %v4234_v15  ;;  %2742 = vmatprep.mubr.bf16.mxu1 %v4236_v16  ;;  %v4267_v16 = vcombine.low %v406_v54, %v410_v55  ;;  %v4283_v54 = vcombine.low %v422_v26, %v426_v27 }
 0x12f   :  { %2454 = vmatmul.mubr.bf16.gmra.mrb[100].mxu0 %v4233_v21  ;;  %2743 = vmatmul.mubr.bf16.gmra.mrb[100].mxu1 %v4235_v22 }
 0x130   :  { %2461 = vmatprep.mubr.bf16.mxu0 %v4242_v23  ;;  %2750 = vmatprep.mubr.bf16.mxu1 %v4244_v24  ;;  %v421_v23 = vld [vmem:[%s6044_s0 + $0x7c0] sm:$0xff] }
 0x131   :  { %v425_v24 = vld [vmem:[%s6044_s0 + $0x7e0] sm:$0xff] }
 0x137   :  { %2462 = vmatmul.mubr.bf16.gmra.mrb[104].mxu0 %v4241_v29  ;;  %2751 = vmatmul.mubr.bf16.gmra.mrb[104].mxu1 %v4243_v30  ;;  %v4273_v30 = vcombine.low %v413_v5, %v417_v6 }
 0x138   :  { %2469 = vmatprep.mubr.bf16.mxu0 %v4250_v31  ;;  %2758 = vmatprep.mubr.bf16.mxu1 %v4252_v32 }
 0x13a   :  { %v2255_v35 = vpop.f32.mrb[0].mxu0  ;;  %v2544_v38 = vpop.f32.mrb[0].mxu1 }
 0x13b   :  { %v2257_v39 = vpop.f32.mrb[1].mxu0  ;;  %v5268_v41 = vadd.f32 %v2544_v38, %v2255_v35  ;;  %v2546_v42 = vpop.f32.mrb[1].mxu1  ;;  %v4282_v35 = vcombine.high %v421_v23, %v425_v24  ;;  %v4284_v38 = vcombine.high %v422_v26, %v426_v27 }
 0x13c   :  { %v2258_v43 = vpop.f32.mrb[2].mxu0  ;;  %v2547_v46 = vpop.f32.mrb[2].mxu1  ;;  %v175_v42 = vld [vmem:[%s6044_s0 + $0x10] sm:$0xff] }
 0x13d   :  { %v2260_v47 = vpop.f32.mrb[3].mxu0  ;;  %v5270_v49 = vadd.f32 %v2547_v46, %v2258_v43  ;;  %v2549_v50 = vpop.f32.mrb[3].mxu1  ;;  %v179_v43 = vld [vmem:[%s6044_s0 + $0x30] sm:$0xff]  ;;  %v180_v46 = vld [vmem:[%s6044_s0 + $0x38] sm:$0xff] }
 0x13e   :  { %v4281_v50 = vcombine.low %v421_v23, %v425_v24  ;;  %v4038_v55 = vcombine.high %v175_v42, %v179_v43  ;;  %v4037_v6 = vcombine.low %v175_v42, %v179_v43  ;;  %v196_v23 = vld [vmem:[%s6044_s0 + $0xb8] sm:$0xff] }
 0x13f   :  { %2470 = vmatmul.mubr.bf16.gmra.mrb[108].mxu0 %v4249_v40  ;;  %2759 = vmatmul.mubr.bf16.gmra.mrb[108].mxu1 %v4251_v44  ;;  %v200_v43 = vld [vmem:[%s6044_s0 + $0xd8] sm:$0xff] }
 0x140   :  { %2477 = vmatprep.mubr.bf16.mxu0 %v4258_v45  ;;  %2766 = vmatprep.mubr.bf16.mxu1 %v4260_v48  ;;  %v176_v45 = vld [vmem:[%s6044_s0 + $0x18] sm:$0xff] }
 0x142   :  { %v2263_v53 = vpop.f32.mrb[4].mxu0  ;;  %v2552_v56 = vpop.f32.mrb[4].mxu1 }
 0x143   :  { %v2265_v57 = vpop.f32.mrb[5].mxu0  ;;  %v5284_v0 = vadd.f32 %v2552_v56, %v2263_v53  ;;  %v2554_v59 = vpop.f32.mrb[5].mxu1 }
 0x144   :  { %v2266_v60 = vpop.f32.mrb[6].mxu0  ;;  %v2555_v63 = vpop.f32.mrb[6].mxu1 }
 0x145   :  { %v2268_v1 = vpop.f32.mrb[7].mxu0  ;;  %v5286_v3 = vadd.f32 %v2555_v63, %v2266_v60  ;;  %v2557_v4 = vpop.f32.mrb[7].mxu1 }
 0x146   :  { %v184_v1 = vld [vmem:[%s6044_s0 + $0x58] sm:$0xff] }
 0x147   :  { %2478 = vmatmul.mubr.bf16.gmra.mrb[112].mxu0 %v4257_v58  ;;  %2767 = vmatmul.mubr.bf16.gmra.mrb[112].mxu1 %v4259_v61  ;;  %v4040_v58 = vcombine.high %v176_v45, %v180_v46  ;;  %v183_v61 = vld [vmem:[%s6044_s0 + $0x50] sm:$0xff] }
 0x148   :  { %2485 = vmatprep.mubr.bf16.mxu0 %v4266_v62  ;;  %2774 = vmatprep.mubr.bf16.mxu1 %v4268_v2  ;;  %v187_v62 = vld [vmem:[%s6044_s0 + $0x70] sm:$0xff]  ;;  %v188_v2 = vld [vmem:[%s6044_s0 + $0x78] sm:$0xff] }
 0x149   :  { %v4045_v26 = vcombine.low %v183_v61, %v187_v62 }
 0x14a   :  { %v2271_v7 = vpop.f32.mrb[8].mxu0  ;;  %v2560_v10 = vpop.f32.mrb[8].mxu1 }
 0x14b   :  { %v2273_v11 = vpop.f32.mrb[9].mxu0  ;;  %v5300_v13 = vadd.f32 %v2560_v10, %v2271_v7  ;;  %v2562_v14 = vpop.f32.mrb[9].mxu1  ;;  %v4039_v10 = vcombine.low %v176_v45, %v180_v46 }
 0x14c   :  { %v2274_v15 = vpop.f32.mrb[10].mxu0  ;;  %v2563_v18 = vpop.f32.mrb[10].mxu1  ;;  %v4046_v11 = vcombine.high %v183_v61, %v187_v62  ;;  %v207_v61 = vld [vmem:[%s6044_s0 + $0x110] sm:$0xff] }
 0x14d   :  { %v2276_v19 = vpop.f32.mrb[11].mxu0  ;;  %v5302_v21 = vadd.f32 %v2563_v18, %v2274_v15  ;;  %v2565_v22 = vpop.f32.mrb[11].mxu1  ;;  %v4048_v15 = vcombine.high %v184_v1, %v188_v2  ;;  %v191_v18 = vld [vmem:[%s6044_s0 + $0x90] sm:$0xff] }
 0x14e   :  { %v195_v19 = vld [vmem:[%s6044_s0 + $0xb0] sm:$0xff]  ;;  %v192_v22 = vld [vmem:[%s6044_s0 + $0x98] sm:$0xff] }
 0x14f   :  { %2486 = vmatmul.mubr.bf16.gmra.mrb[116].mxu0 %v4265_v12  ;;  %2775 = vmatmul.mubr.bf16.gmra.mrb[116].mxu1 %v4267_v16  ;;  %v211_v62 = vld [vmem:[%s6044_s0 + $0x130] sm:$0xff] }
 0x150   :  { %2493 = vmatprep.mubr.bf16.mxu0 %v4274_v17  ;;  %2782 = vmatprep.mubr.bf16.mxu1 %v4276_v20 }
 0x152   :  { %v2279_v25 = vpop.f32.mrb[12].mxu0  ;;  %v2568_v28 = vpop.f32.mrb[12].mxu1 }
 0x153   :  { %v2281_v29 = vpop.f32.mrb[13].mxu0  ;;  %v5316_v31 = vadd.f32 %v2568_v28, %v2279_v25  ;;  %v2570_v32 = vpop.f32.mrb[13].mxu1 }
 0x154   :  { %v2282_v33 = vpop.f32.mrb[14].mxu0  ;;  %v2571_v36 = vpop.f32.mrb[14].mxu1  ;;  %v4054_v32 = vcombine.high %v191_v18, %v195_v19 }
 0x155   :  { %v2284_v37 = vpop.f32.mrb[15].mxu0  ;;  %v5318_v39 = vadd.f32 %v2571_v36, %v2282_v33  ;;  %v2573_v40 = vpop.f32.mrb[15].mxu1 }
 0x156   :  { %v203_v40 = vld [vmem:[%s6044_s0 + $0xf0] sm:$0xff] }
 0x157   :  { %2494 = vmatmul.mubr.bf16.gmra.mrb[120].mxu0 %v4273_v30  ;;  %2783 = vmatmul.mubr.bf16.gmra.mrb[120].mxu1 %v4275_v34  ;;  %v4047_v30 = vcombine.low %v184_v1, %v188_v2  ;;  %v208_v1 = vld [vmem:[%s6044_s0 + $0x118] sm:$0xff] }
 0x158   :  { %2501 = vmatprep.mubr.bf16.mxu0 %v4282_v35  ;;  %2790 = vmatprep.mubr.bf16.mxu1 %v4284_v38  ;;  %v4056_v35 = vcombine.high %v192_v22, %v196_v23  ;;  %v199_v38 = vld [vmem:[%s6044_s0 + $0xd0] sm:$0xff]  ;;  %v212_v2 = vld [vmem:[%s6044_s0 + $0x138] sm:$0xff] }
 0x15a   :  { %v2287_v44 = vpop.f32.mrb[16].mxu0  ;;  %v2576_v47 = vpop.f32.mrb[16].mxu1 }
 0x15b   :  { %v2289_v48 = vpop.f32.mrb[17].mxu0  ;;  %v5332_v51 = vadd.f32 %v2576_v47, %v2287_v44  ;;  %v2578_v52 = vpop.f32.mrb[17].mxu1  ;;  %v204_v44 = vld [vmem:[%s6044_s0 + $0xf8] sm:$0xff]  ;;  %v4053_v47 = vcombine.low %v191_v18, %v195_v19 }
 0x15c   :  { %v2290_v53 = vpop.f32.mrb[18].mxu0  ;;  %v2579_v56 = vpop.f32.mrb[18].mxu1 }
 0x15d   :  { %v2292_v57 = vpop.f32.mrb[19].mxu0  ;;  %v5334_v59 = vadd.f32 %v2579_v56, %v2290_v53  ;;  %v2581_v60 = vpop.f32.mrb[19].mxu1  ;;  %v4055_v53 = vcombine.low %v192_v22, %v196_v23  ;;  %v219_v22 = vld [vmem:[%s6044_s0 + $0x170] sm:$0xff] }
 0x15e   :  { %v4064_v57 = vcombine.high %v200_v43, %v204_v44 }
 0x15f   :  { %2502 = vmatmul.mubr.bf16.gmra.mrb[124].mxu0 %v4281_v50  ;;  %2791 = vmatmul.mubr.bf16.gmra.mrb[124].mxu1 %v4283_v54  ;;  %v4062_v54 = vcombine.high %v199_v38, %v203_v40 }
 0x160   :  { %2831 = vmatprep.mubr.bf16.mxu0 %v4038_v55  ;;  %3120 = vmatprep.mubr.bf16.mxu1 %v4040_v58 }
 0x162   :  { %v2295_v63 = vpop.f32.mrb[20].mxu0  ;;  %v2584_v4 = vpop.f32.mrb[20].mxu1 }
 0x163   :  { %v2297_v5 = vpop.f32.mrb[21].mxu0  ;;  %v5348_v7 = vadd.f32 %v2584_v4, %v2295_v63  ;;  %v2586_v8 = vpop.f32.mrb[21].mxu1 }
 0x164   :  { %v2298_v9 = vpop.f32.mrb[22].mxu0  ;;  %v2587_v12 = vpop.f32.mrb[22].mxu1 }
 0x165   :  { %v2300_v14 = vpop.f32.mrb[23].mxu0  ;;  %v5350_v16 = vadd.f32 %v2587_v12, %v2298_v9  ;;  %v2589_v17 = vpop.f32.mrb[23].mxu1  ;;  %v4070_v12 = vcombine.high %v207_v61, %v211_v62 }
 0x166   :  { %v4072_v17 = vcombine.high %v208_v1, %v212_v2 }
 0x167   :  { %2832 = vmatmul.mubr.bf16.vlgmr.msra.gmra.mrb[128].mxu0 %v4037_v6  ;;  %3121 = vmatmul.mubr.bf16.vlgmr.msra.gmra.mrb[128].mxu1 %v4039_v10  ;;  %v4061_v6 = vcombine.low %v199_v38, %v203_v40 }
 0x168   :  { %2839 = vmatprep.mubr.bf16.mxu0 %v4046_v11  ;;  %3128 = vmatprep.mubr.bf16.mxu1 %v4048_v15  ;;  %v4063_v11 = vcombine.low %v200_v43, %v204_v44  ;;  %v223_v44 = vld [vmem:[%s6044_s0 + $0x190] sm:$0xff] }
 0x16a   :  { %v2303_v20 = vpop.f32.mrb[24].mxu0  ;;  %v2592_v24 = vpop.f32.mrb[24].mxu1 }
 0x16b   :  { %v2305_v25 = vpop.f32.mrb[25].mxu0  ;;  %v5364_v27 = vadd.f32 %v2592_v24, %v2303_v20  ;;  %v2594_v28 = vpop.f32.mrb[25].mxu1  ;;  %v215_v20 = vld [vmem:[%s6044_s0 + $0x150] sm:$0xff]  ;;  %v216_v24 = vld [vmem:[%s6044_s0 + $0x158] sm:$0xff] }
 0x16c   :  { %v2306_v29 = vpop.f32.mrb[26].mxu0  ;;  %v2595_v33 = vpop.f32.mrb[26].mxu1  ;;  %v220_v25 = vld [vmem:[%s6044_s0 + $0x178] sm:$0xff] }
 0x16d   :  { %v2308_v34 = vpop.f32.mrb[27].mxu0  ;;  %v5366_v36 = vadd.f32 %v2595_v33, %v2306_v29  ;;  %v2597_v37 = vpop.f32.mrb[27].mxu1  ;;  %v4069_v29 = vcombine.low %v207_v61, %v211_v62  ;;  %v4080_v40 = vcombine.high %v216_v24, %v220_v25 }
 0x16e   :  { %v4071_v34 = vcombine.low %v208_v1, %v212_v2 }
 0x16f   :  { %2840 = vmatmul.mubr.bf16.gmra.mrb[132].mxu0 %v4045_v26  ;;  %3129 = vmatmul.mubr.bf16.gmra.mrb[132].mxu1 %v4047_v30 }
 0x170   :  { %2847 = vmatprep.mubr.bf16.mxu0 %v4054_v32  ;;  %3136 = vmatprep.mubr.bf16.mxu1 %v4056_v35  ;;  %v4078_v35 = vcombine.high %v215_v20, %v219_v22 }
 0x172   :  { %v2311_v42 = vpop.f32.mrb[28].mxu0  ;;  %v2600_v45 = vpop.f32.mrb[28].mxu1 }
 0x173   :  { %v2313_v46 = vpop.f32.mrb[29].mxu0  ;;  %v5380_v48 = vadd.f32 %v2600_v45, %v2311_v42  ;;  %v2602_v50 = vpop.f32.mrb[29].mxu1  ;;  %v227_v45 = vld [vmem:[%s6044_s0 + $0x1b0] sm:$0xff] }
 0x174   :  { %v2314_v52 = vpop.f32.mrb[30].mxu0  ;;  %v2603_v55 = vpop.f32.mrb[30].mxu1  ;;  %v228_v50 = vld [vmem:[%s6044_s0 + $0x1b8] sm:$0xff]  ;;  %v4086_v61 = vcombine.high %v223_v44, %v227_v45 }
 0x175   :  { %v2316_v56 = vpop.f32.mrb[31].mxu0  ;;  %v5382_v58 = vadd.f32 %v2603_v55, %v2314_v52  ;;  %v2605_v60 = vpop.f32.mrb[31].mxu1 }
 0x176   :  { %v4079_v60 = vcombine.low %v216_v24, %v220_v25 }
 0x177   :  { %2848 = vmatmul.mubr.bf16.gmra.mrb[136].mxu0 %v4053_v47  ;;  %3137 = vmatmul.mubr.bf16.gmra.mrb[136].mxu1 %v4055_v53  ;;  %v224_v47 = vld [vmem:[%s6044_s0 + $0x198] sm:$0xff] }
 0x178   :  { %2855 = vmatprep.mubr.bf16.mxu0 %v4062_v54  ;;  %3144 = vmatprep.mubr.bf16.mxu1 %v4064_v57  ;;  %v4077_v54 = vcombine.low %v215_v20, %v219_v22  ;;  %v4088_v1 = vcombine.high %v224_v47, %v228_v50  ;;  %v4087_v22 = vcombine.low %v224_v47, %v228_v50 }
 0x17a   :  { %v2319_v63 = vpop.f32.mrb[32].mxu0  ;;  %v2608_v4 = vpop.f32.mrb[32].mxu1 }
 0x17b   :  { %v2321_v5 = vpop.f32.mrb[33].mxu0  ;;  %v5396_v8 = vadd.f32 %v2608_v4, %v2319_v63  ;;  %v2610_v9 = vpop.f32.mrb[33].mxu1 }
 0x17c   :  { %v2322_v10 = vpop.f32.mrb[34].mxu0  ;;  %v2611_v14 = vpop.f32.mrb[34].mxu1  ;;  %v231_v5 = vld [vmem:[%s6044_s0 + $0x1d0] sm:$0xff] }
 0x17d   :  { %v2324_v15 = vpop.f32.mrb[35].mxu0  ;;  %v5398_v18 = vadd.f32 %v2611_v14, %v2322_v10  ;;  %v2613_v19 = vpop.f32.mrb[35].mxu1  ;;  %v232_v10 = vld [vmem:[%s6044_s0 + $0x1d8] sm:$0xff] }
 0x17e   :  { %v4085_v15 = vcombine.low %v223_v44, %v227_v45 }
 0x17f   :  { %2856 = vmatmul.mubr.bf16.gmra.mrb[140].mxu0 %v4061_v6  ;;  %3145 = vmatmul.mubr.bf16.gmra.mrb[140].mxu1 %v4063_v11  ;;  %v235_v6 = vld [vmem:[%s6044_s0 + $0x1f0] sm:$0xff]  ;;  %v236_v11 = vld [vmem:[%s6044_s0 + $0x1f8] sm:$0xff] }
 0x180   :  { %2863 = vmatprep.mubr.bf16.mxu0 %v4070_v12  ;;  %3152 = vmatprep.mubr.bf16.mxu1 %v4072_v17  ;;  %v4095_v47 = vcombine.low %v232_v10, %v236_v11 }
 0x182   :  { %v2327_v23 = vpop.f32.mrb[36].mxu0  ;;  %v2616_v26 = vpop.f32.mrb[36].mxu1 }
 0x183   :  { %v2329_v28 = vpop.f32.mrb[37].mxu0  ;;  %v5412_v30 = vadd.f32 %v2616_v26, %v2327_v23  ;;  %v2618_v32 = vpop.f32.mrb[37].mxu1  ;;  %v4094_v23 = vcombine.high %v231_v5, %v235_v6  ;;  %v4096_v26 = vcombine.high %v232_v10, %v236_v11 }
 0x184   :  { %v2330_v33 = vpop.f32.mrb[38].mxu0  ;;  %v2619_v37 = vpop.f32.mrb[38].mxu1  ;;  %v239_v32 = vld [vmem:[%s6044_s0 + $0x210] sm:$0xff] }
 0x185   :  { %v2332_v38 = vpop.f32.mrb[39].mxu0  ;;  %v5414_v42 = vadd.f32 %v2619_v37, %v2330_v33  ;;  %v2621_v43 = vpop.f32.mrb[39].mxu1  ;;  %v243_v33 = vld [vmem:[%s6044_s0 + $0x230] sm:$0xff]  ;;  %v244_v37 = vld [vmem:[%s6044_s0 + $0x238] sm:$0xff] }
 0x186   :  { %v4093_v43 = vcombine.low %v231_v5, %v235_v6  ;;  %v4102_v50 = vcombine.high %v239_v32, %v243_v33  ;;  %v4101_v6 = vcombine.low %v239_v32, %v243_v33  ;;  %v260_v32 = vld [vmem:[%s6044_s0 + $0x2b8] sm:$0xff] }
 0x187   :  { %2864 = vmatmul.mubr.bf16.gmra.mrb[144].mxu0 %v4069_v29  ;;  %3153 = vmatmul.mubr.bf16.gmra.mrb[144].mxu1 %v4071_v34 }
 0x188   :  { %2871 = vmatprep.mubr.bf16.mxu0 %v4078_v35  ;;  %3160 = vmatprep.mubr.bf16.mxu1 %v4080_v40  ;;  %v240_v35 = vld [vmem:[%s6044_s0 + $0x218] sm:$0xff] }
 0x18a   :  { %v2335_v46 = vpop.f32.mrb[40].mxu0  ;;  %v2624_v52 = vpop.f32.mrb[40].mxu1 }
 0x18b   :  { %v2337_v53 = vpop.f32.mrb[41].mxu0  ;;  %v5428_v55 = vadd.f32 %v2624_v52, %v2335_v46  ;;  %v2626_v56 = vpop.f32.mrb[41].mxu1 }
 0x18c   :  { %v2338_v57 = vpop.f32.mrb[42].mxu0  ;;  %v2627_v62 = vpop.f32.mrb[42].mxu1 }
 0x18d   :  { %v2340_v63 = vpop.f32.mrb[43].mxu0  ;;  %v5430_v2 = vadd.f32 %v2627_v62, %v2338_v57  ;;  %v2629_v4 = vpop.f32.mrb[43].mxu1 }
 0x18e   :  { %v248_v63 = vld [vmem:[%s6044_s0 + $0x258] sm:$0xff] }
 0x18f   :  { %2872 = vmatmul.mubr.bf16.gmra.mrb[148].mxu0 %v4077_v54  ;;  %3161 = vmatmul.mubr.bf16.gmra.mrb[148].mxu1 %v4079_v60  ;;  %v4104_v54 = vcombine.high %v240_v35, %v244_v37  ;;  %v247_v60 = vld [vmem:[%s6044_s0 + $0x250] sm:$0xff] }
 0x190   :  { %2879 = vmatprep.mubr.bf16.mxu0 %v4086_v61  ;;  %3168 = vmatprep.mubr.bf16.mxu1 %v4088_v1  ;;  %v251_v61 = vld [vmem:[%s6044_s0 + $0x270] sm:$0xff]  ;;  %v252_v1 = vld [vmem:[%s6044_s0 + $0x278] sm:$0xff] }
 0x192   :  { %v2343_v9 = vpop.f32.mrb[44].mxu0  ;;  %v2632_v12 = vpop.f32.mrb[44].mxu1 }
 0x193   :  { %v2345_v14 = vpop.f32.mrb[45].mxu0  ;;  %v5444_v17 = vadd.f32 %v2632_v12, %v2343_v9  ;;  %v2634_v19 = vpop.f32.mrb[45].mxu1  ;;  %v4103_v12 = vcombine.low %v240_v35, %v244_v37  ;;  %v4109_v35 = vcombine.low %v247_v60, %v251_v61 }
 0x194   :  { %v2346_v20 = vpop.f32.mrb[46].mxu0  ;;  %v2635_v24 = vpop.f32.mrb[46].mxu1  ;;  %v4110_v14 = vcombine.high %v247_v60, %v251_v61  ;;  %v264_v61 = vld [vmem:[%s6044_s0 + $0x2d8] sm:$0xff] }
 0x195   :  { %v2348_v25 = vpop.f32.mrb[47].mxu0  ;;  %v5446_v28 = vadd.f32 %v2635_v24, %v2346_v20  ;;  %v2637_v29 = vpop.f32.mrb[47].mxu1  ;;  %v4112_v20 = vcombine.high %v248_v63, %v252_v1  ;;  %v255_v24 = vld [vmem:[%s6044_s0 + $0x290] sm:$0xff] }
 0x196   :  { %v259_v25 = vld [vmem:[%s6044_s0 + $0x2b0] sm:$0xff]  ;;  %v256_v29 = vld [vmem:[%s6044_s0 + $0x298] sm:$0xff] }
 0x197   :  { %2880 = vmatmul.mubr.bf16.gmra.mrb[152].mxu0 %v4085_v15  ;;  %3169 = vmatmul.mubr.bf16.gmra.mrb[152].mxu1 %v4087_v22 }
 0x198   :  { %2887 = vmatprep.mubr.bf16.mxu0 %v4094_v23  ;;  %3176 = vmatprep.mubr.bf16.mxu1 %v4096_v26 }
 0x19a   :  { %v2351_v34 = vpop.f32.mrb[48].mxu0  ;;  %v2640_v38 = vpop.f32.mrb[48].mxu1 }
 0x19b   :  { %v2353_v40 = vpop.f32.mrb[49].mxu0  ;;  %v5460_v44 = vadd.f32 %v2640_v38, %v2351_v34  ;;  %v2642_v45 = vpop.f32.mrb[49].mxu1 }
 0x19c   :  { %v2354_v46 = vpop.f32.mrb[50].mxu0  ;;  %v2643_v52 = vpop.f32.mrb[50].mxu1  ;;  %v4118_v45 = vcombine.high %v255_v24, %v259_v25 }
 0x19d   :  { %v2356_v53 = vpop.f32.mrb[51].mxu0  ;;  %v5462_v56 = vadd.f32 %v2643_v52, %v2354_v46  ;;  %v2645_v57 = vpop.f32.mrb[51].mxu1 }
 0x19e   :  { %v267_v57 = vld [vmem:[%s6044_s0 + $0x2f0] sm:$0xff] }
 0x19f   :  { %2888 = vmatmul.mubr.bf16.gmra.mrb[156].mxu0 %v4093_v43  ;;  %3177 = vmatmul.mubr.bf16.gmra.mrb[156].mxu1 %v4095_v47  ;;  %v4111_v43 = vcombine.low %v248_v63, %v252_v1 }
 0x1a0   :  { %2895 = vmatprep.mubr.bf16.mxu0 %v4102_v50  ;;  %3184 = vmatprep.mubr.bf16.mxu1 %v4104_v54  ;;  %v4120_v50 = vcombine.high %v256_v29, %v260_v32  ;;  %v263_v54 = vld [vmem:[%s6044_s0 + $0x2d0] sm:$0xff] }
 0x1a2   :  { %v2359_v62 = vpop.f32.mrb[52].mxu0  ;;  %v2648_v4 = vpop.f32.mrb[52].mxu1 }
 0x1a3   :  { %v2361_v5 = vpop.f32.mrb[53].mxu0  ;;  %v5476_v9 = vadd.f32 %v2648_v4, %v2359_v62  ;;  %v2650_v10 = vpop.f32.mrb[53].mxu1  ;;  %v268_v62 = vld [vmem:[%s6044_s0 + $0x2f8] sm:$0xff]  ;;  %v4117_v4 = vcombine.low %v255_v24, %v259_v25  ;;  %v271_v24 = vld [vmem:[%s6044_s0 + $0x310] sm:$0xff] }
 0x1a4   :  { %v2362_v11 = vpop.f32.mrb[54].mxu0  ;;  %v2651_v15 = vpop.f32.mrb[54].mxu1  ;;  %v275_v25 = vld [vmem:[%s6044_s0 + $0x330] sm:$0xff] }
 0x1a5   :  { %v2364_v19 = vpop.f32.mrb[55].mxu0  ;;  %v5478_v22 = vadd.f32 %v2651_v15, %v2362_v11  ;;  %v2653_v23 = vpop.f32.mrb[55].mxu1  ;;  %v4119_v11 = vcombine.low %v256_v29, %v260_v32  ;;  %v272_v29 = vld [vmem:[%s6044_s0 + $0x318] sm:$0xff] }
 0x1a6   :  { %v4128_v19 = vcombine.high %v264_v61, %v268_v62  ;;  %v276_v32 = vld [vmem:[%s6044_s0 + $0x338] sm:$0xff] }
 0x1a7   :  { %2896 = vmatmul.mubr.bf16.gmra.mrb[160].mxu0 %v4101_v6  ;;  %3185 = vmatmul.mubr.bf16.gmra.mrb[160].mxu1 %v4103_v12  ;;  %v4126_v12 = vcombine.high %v263_v54, %v267_v57 }
 0x1a8   :  { %2903 = vmatprep.mubr.bf16.mxu0 %v4110_v14  ;;  %3192 = vmatprep.mubr.bf16.mxu1 %v4112_v20 }
 0x1aa   :  { %v2367_v26 = vpop.f32.mrb[56].mxu0  ;;  %v2656_v33 = vpop.f32.mrb[56].mxu1 }
 0x1ab   :  { %v2369_v34 = vpop.f32.mrb[57].mxu0  ;;  %v5492_v37 = vadd.f32 %v2656_v33, %v2367_v26  ;;  %v2658_v38 = vpop.f32.mrb[57].mxu1 }
 0x1ac   :  { %v2370_v40 = vpop.f32.mrb[58].mxu0  ;;  %v2659_v46 = vpop.f32.mrb[58].mxu1 }
 0x1ad   :  { %v2372_v47 = vpop.f32.mrb[59].mxu0  ;;  %v5494_v52 = vadd.f32 %v2659_v46, %v2370_v40  ;;  %v2661_v53 = vpop.f32.mrb[59].mxu1  ;;  %v4134_v46 = vcombine.high %v271_v24, %v275_v25 }
 0x1ae   :  { %v4136_v53 = vcombine.high %v272_v29, %v276_v32 }
 0x1af   :  { %2904 = vmatmul.mubr.bf16.gmra.mrb[164].mxu0 %v4109_v35  ;;  %3193 = vmatmul.mubr.bf16.gmra.mrb[164].mxu1 %v4111_v43  ;;  %v4125_v35 = vcombine.low %v263_v54, %v267_v57  ;;  %v279_v54 = vld [vmem:[%s6044_s0 + $0x350] sm:$0xff] }
 0x1b0   :  { %2911 = vmatprep.mubr.bf16.mxu0 %v4118_v45  ;;  %3200 = vmatprep.mubr.bf16.mxu1 %v4120_v50  ;;  %v4127_v45 = vcombine.low %v264_v61, %v268_v62  ;;  %v283_v57 = vld [vmem:[%s6044_s0 + $0x370] sm:$0xff]  ;;  %v280_v62 = vld [vmem:[%s6044_s0 + $0x358] sm:$0xff] }
 0x1b2   :  { %v2375_v60 = vpop.f32.mrb[60].mxu0  ;;  %v2664_v63 = vpop.f32.mrb[60].mxu1 }
 0x1b3   :  { %v2377_v1 = vpop.f32.mrb[61].mxu0  ;;  %v5508_v5 = vadd.f32 %v2664_v63, %v2375_v60  ;;  %v2666_v6 = vpop.f32.mrb[61].mxu1 }
 0x1b4   :  { %v2378_v10 = vpop.f32.mrb[62].mxu0  ;;  %v2667_v14 = vpop.f32.mrb[62].mxu1  ;;  %v284_v1 = vld [vmem:[%s6044_s0 + $0x378] sm:$0xff] }
 0x1b5   :  { %v2380_v15 = vpop.f32.mrb[63].mxu0  ;;  %v5510_v20 = vadd.f32 %v2667_v14, %v2378_v10  ;;  %v2669_v23 = vpop.f32.mrb[63].mxu1  ;;  %v4133_v10 = vcombine.low %v271_v24, %v275_v25  ;;  %v287_v24 = vld [vmem:[%s6044_s0 + $0x390] sm:$0xff] }
 0x1b6   :  { %v4135_v15 = vcombine.low %v272_v29, %v276_v32  ;;  %v291_v25 = vld [vmem:[%s6044_s0 + $0x3b0] sm:$0xff]  ;;  %v288_v32 = vld [vmem:[%s6044_s0 + $0x398] sm:$0xff] }
 0x1b7   :  { %2912 = vmatmul.mubr.bf16.gmra.mrb[168].mxu0 %v4117_v4  ;;  %3201 = vmatmul.mubr.bf16.gmra.mrb[168].mxu1 %v4119_v11 }
 0x1b8   :  { %2919 = vmatprep.mubr.bf16.mxu0 %v4126_v12  ;;  %3208 = vmatprep.mubr.bf16.mxu1 %v4128_v19  ;;  %v4142_v19 = vcombine.high %v279_v54, %v283_v57 }
 0x1ba   :  { %v2383_v26 = vpop.f32.mrb[64].mxu0  ;;  %v2672_v33 = vpop.f32.mrb[64].mxu1 }
 0x1bb   :  { %v2385_v34 = vpop.f32.mrb[65].mxu0  ;;  %v5524_v38 = vadd.f32 %v2672_v33, %v2383_v26  ;;  %v2674_v40 = vpop.f32.mrb[65].mxu1  ;;  %v4144_v33 = vcombine.high %v280_v62, %v284_v1 }
 0x1bc   :  { %v2386_v43 = vpop.f32.mrb[66].mxu0  ;;  %v2675_v47 = vpop.f32.mrb[66].mxu1  ;;  %v292_v40 = vld [vmem:[%s6044_s0 + $0x3b8] sm:$0xff] }
 0x1bd   :  { %v2388_v50 = vpop.f32.mrb[67].mxu0  ;;  %v5526_v60 = vadd.f32 %v2675_v47, %v2386_v43  ;;  %v2677_v63 = vpop.f32.mrb[67].mxu1 }
 0x1be   :  { %v4143_v63 = vcombine.low %v280_v62, %v284_v1  ;;  %v296_v1 = vld [vmem:[%s6044_s0 + $0x3d8] sm:$0xff] }
 0x1bf   :  { %2920 = vmatmul.mubr.bf16.gmra.mrb[172].mxu0 %v4125_v35  ;;  %3209 = vmatmul.mubr.bf16.gmra.mrb[172].mxu1 %v4127_v45 }
 0x1c0   :  { %2927 = vmatprep.mubr.bf16.mxu0 %v4134_v46  ;;  %3216 = vmatprep.mubr.bf16.mxu1 %v4136_v53  ;;  %v4141_v46 = vcombine.low %v279_v54, %v283_v57  ;;  %v295_v54 = vld [vmem:[%s6044_s0 + $0x3d0] sm:$0xff] }
 0x1c1   :  { %v299_v57 = vld [vmem:[%s6044_s0 + $0x3f0] sm:$0xff] }
 0x1c2   :  { %v2391_v61 = vpop.f32.mrb[68].mxu0  ;;  %v2680_v4 = vpop.f32.mrb[68].mxu1 }
 0x1c3   :  { %v2393_v6 = vpop.f32.mrb[69].mxu0  ;;  %v5540_v11 = vadd.f32 %v2680_v4, %v2391_v61  ;;  %v2682_v12 = vpop.f32.mrb[69].mxu1  ;;  %v4150_v61 = vcombine.high %v287_v24, %v291_v25 }
 0x1c4   :  { %v2394_v14 = vpop.f32.mrb[70].mxu0  ;;  %v2683_v23 = vpop.f32.mrb[70].mxu1 }
 0x1c5   :  { %v2396_v26 = vpop.f32.mrb[71].mxu0  ;;  %v5542_v34 = vadd.f32 %v2683_v23, %v2394_v14  ;;  %v2685_v35 = vpop.f32.mrb[71].mxu1 }
 0x1c6   :  { %v4149_v26 = vcombine.low %v287_v24, %v291_v25  ;;  %v303_v24 = vld [vmem:[%s6044_s0 + $0x410] sm:$0xff] }
 0x1c7   :  { %2928 = vmatmul.mubr.bf16.gmra.mrb[176].mxu0 %v4133_v10  ;;  %3217 = vmatmul.mubr.bf16.gmra.mrb[176].mxu1 %v4135_v15  ;;  %v4152_v10 = vcombine.high %v288_v32, %v292_v40  ;;  %v300_v15 = vld [vmem:[%s6044_s0 + $0x3f8] sm:$0xff]  ;;  %v307_v25 = vld [vmem:[%s6044_s0 + $0x430] sm:$0xff] }
 0x1c8   :  { %2935 = vmatprep.mubr.bf16.mxu0 %v4142_v19  ;;  %3224 = vmatprep.mubr.bf16.mxu1 %v4144_v33 }
 0x1ca   :  { %v2399_v29 = vpop.f32.mrb[72].mxu0  ;;  %v2688_v43 = vpop.f32.mrb[72].mxu1 }
 0x1cb   :  { %v2401_v45 = vpop.f32.mrb[73].mxu0  ;;  %v5556_v47 = vadd.f32 %v2688_v43, %v2399_v29  ;;  %v2690_v50 = vpop.f32.mrb[73].mxu1  ;;  %v4151_v43 = vcombine.low %v288_v32, %v292_v40  ;;  %v304_v40 = vld [vmem:[%s6044_s0 + $0x418] sm:$0xff] }
 0x1cc   :  { %v2402_v53 = vpop.f32.mrb[74].mxu0  ;;  %v2691_v4 = vpop.f32.mrb[74].mxu1  ;;  %v4158_v45 = vcombine.high %v295_v54, %v299_v57 }
 0x1cd   :  { %v2404_v6 = vpop.f32.mrb[75].mxu0  ;;  %v5558_v12 = vadd.f32 %v2691_v4, %v2402_v53  ;;  %v2693_v14 = vpop.f32.mrb[75].mxu1  ;;  %v4160_v53 = vcombine.high %v296_v1, %v300_v15  ;;  %v308_v4 = vld [vmem:[%s6044_s0 + $0x438] sm:$0xff] }
 0x1ce   :  { %v4157_v14 = vcombine.low %v295_v54, %v299_v57  ;;  %v311_v54 = vld [vmem:[%s6044_s0 + $0x450] sm:$0xff] }
 0x1cf   :  { %6048 = vst [vmem:[#allocation9_spill] sm:$0xff] %v5558_v12  ;;  %2936 = vmatmul.mubr.bf16.gmra.mrb[180].mxu0 %v4141_v46  ;;  %3225 = vmatmul.mubr.bf16.gmra.mrb[180].mxu1 %v4143_v63  ;;  %v315_v57 = vld [vmem:[%s6044_s0 + $0x470] sm:$0xff] }
 0x1d0   :  { %2943 = vmatprep.mubr.bf16.mxu0 %v4150_v61  ;;  %3232 = vmatprep.mubr.bf16.mxu1 %v4152_v10 }
 0x1d2   :  { %v2407_v62 = vpop.f32.mrb[76].mxu0  ;;  %v2696_v19 = vpop.f32.mrb[76].mxu1 }
 0x1d3   :  { %v2409_v23 = vpop.f32.mrb[77].mxu0  ;;  %v5572_v33 = vadd.f32 %v2696_v19, %v2407_v62  ;;  %v2698_v35 = vpop.f32.mrb[77].mxu1 }
 0x1d4   :  { %v2410_v29 = vpop.f32.mrb[78].mxu0  ;;  %v2699_v46 = vpop.f32.mrb[78].mxu1  ;;  %v4166_v35 = vcombine.high %v303_v24, %v307_v25 }
 0x1d5   :  { %6049 = vst [vmem:[#allocation10_spill] sm:$0xff] %v5572_v33  ;;  %v2412_v50 = vpop.f32.mrb[79].mxu0  ;;  %v5574_v63 = vadd.f32 %v2699_v46, %v2410_v29  ;;  %v2701_v61 = vpop.f32.mrb[79].mxu1 }
 0x1d7   :  { %6050 = vst [vmem:[#allocation11_spill] sm:$0xff] %v5574_v63  ;;  %2944 = vmatmul.mubr.bf16.gmra.mrb[184].mxu0 %v4149_v26  ;;  %3233 = vmatmul.mubr.bf16.gmra.mrb[184].mxu1 %v4151_v43  ;;  %v4159_v26 = vcombine.low %v296_v1, %v300_v15  ;;  %v312_v15 = vld [vmem:[%s6044_s0 + $0x458] sm:$0xff] }
 0x1d8   :  { %2951 = vmatprep.mubr.bf16.mxu0 %v4158_v45  ;;  %3240 = vmatprep.mubr.bf16.mxu1 %v4160_v53  ;;  %v4168_v45 = vcombine.high %v304_v40, %v308_v4  ;;  %v316_v53 = vld [vmem:[%s6044_s0 + $0x478] sm:$0xff] }
 0x1da   :  { %v2415_v32 = vpop.f32.mrb[80].mxu0  ;;  %v2704_v6 = vpop.f32.mrb[80].mxu1 }
 0x1db   :  { %v2417_v10 = vpop.f32.mrb[81].mxu0  ;;  %v5588_v62 = vadd.f32 %v2704_v6, %v2415_v32  ;;  %v2706_v19 = vpop.f32.mrb[81].mxu1  ;;  %v4165_v6 = vcombine.low %v303_v24, %v307_v25  ;;  %v319_v24 = vld [vmem:[%s6044_s0 + $0x490] sm:$0xff] }
 0x1dc   :  { %v2418_v23 = vpop.f32.mrb[82].mxu0  ;;  %v2707_v29 = vpop.f32.mrb[82].mxu1  ;;  %v323_v25 = vld [vmem:[%s6044_s0 + $0x4b0] sm:$0xff] }
 0x1dd   :  { %6051 = vst [vmem:[#allocation12_spill] sm:$0xff] %v5588_v62  ;;  %v2420_v43 = vpop.f32.mrb[83].mxu0  ;;  %v5590_v46 = vadd.f32 %v2707_v29, %v2418_v23  ;;  %v2709_v50 = vpop.f32.mrb[83].mxu1  ;;  %v4167_v23 = vcombine.low %v304_v40, %v308_v4  ;;  %v320_v4 = vld [vmem:[%s6044_s0 + $0x498] sm:$0xff] }
 0x1de   :  { %v4176_v43 = vcombine.high %v312_v15, %v316_v53 }
 0x1df   :  { %6052 = vst [vmem:[#allocation13_spill] sm:$0xff] %v5590_v46  ;;  %2952 = vmatmul.mubr.bf16.gmra.mrb[188].mxu0 %v4157_v14  ;;  %3241 = vmatmul.mubr.bf16.gmra.mrb[188].mxu1 %v4159_v26  ;;  %v4174_v26 = vcombine.high %v311_v54, %v315_v57 }
 0x1e0   :  { %2959 = vmatprep.mubr.bf16.mxu0 %v4166_v35  ;;  %3248 = vmatprep.mubr.bf16.mxu1 %v4168_v45 }
 0x1e2   :  { %v2423_v1 = vpop.f32.mrb[84].mxu0  ;;  %v2712_v61 = vpop.f32.mrb[84].mxu1 }
 0x1e3   :  { %v2425_v32 = vpop.f32.mrb[85].mxu0  ;;  %v5604_v10 = vadd.f32 %v2712_v61, %v2423_v1  ;;  %v2714_v14 = vpop.f32.mrb[85].mxu1  ;;  %v324_v1 = vld [vmem:[%s6044_s0 + $0x4b8] sm:$0xff] }
 0x1e4   :  { %v2426_v19 = vpop.f32.mrb[86].mxu0  ;;  %v2715_v35 = vpop.f32.mrb[86].mxu1 }
 0x1e5   :  { %6053 = vst [vmem:[#allocation14_spill] sm:$0xff] %v5604_v10  ;;  %v2428_v29 = vpop.f32.mrb[87].mxu0  ;;  %v5606_v45 = vadd.f32 %v2715_v35, %v2426_v19  ;;  %v2717_v50 = vpop.f32.mrb[87].mxu1  ;;  %v4182_v35 = vcombine.high %v319_v24, %v323_v25 }
 0x1e6   :  { %v4184_v50 = vcombine.high %v320_v4, %v324_v1 }
 0x1e7   :  { %6054 = vst [vmem:[#allocation15_spill] sm:$0xff] %v5606_v45  ;;  %2960 = vmatmul.mubr.bf16.gmra.mrb[192].mxu0 %v4165_v6  ;;  %3249 = vmatmul.mubr.bf16.gmra.mrb[192].mxu1 %v4167_v23  ;;  %v4173_v6 = vcombine.low %v311_v54, %v315_v57  ;;  %v327_v54 = vld [vmem:[%s6044_s0 + $0x4d0] sm:$0xff] }
 0x1e8   :  { %2967 = vmatprep.mubr.bf16.mxu0 %v4174_v26  ;;  %3256 = vmatprep.mubr.bf16.mxu1 %v4176_v43  ;;  %v4175_v26 = vcombine.low %v312_v15, %v316_v53  ;;  %v331_v57 = vld [vmem:[%s6044_s0 + $0x4f0] sm:$0xff]  ;;  %v328_v53 = vld [vmem:[%s6044_s0 + $0x4d8] sm:$0xff] }
 0x1ea   :  { %v2431_v40 = vpop.f32.mrb[88].mxu0  ;;  %v2720_v61 = vpop.f32.mrb[88].mxu1 }
 0x1eb   :  { %v2433_v32 = vpop.f32.mrb[89].mxu0  ;;  %v5620_v14 = vadd.f32 %v2720_v61, %v2431_v40  ;;  %v2722_v19 = vpop.f32.mrb[89].mxu1 }
 0x1ec   :  { %v2434_v23 = vpop.f32.mrb[90].mxu0  ;;  %v2723_v29 = vpop.f32.mrb[90].mxu1  ;;  %v4181_v32 = vcombine.low %v319_v24, %v323_v25  ;;  %v335_v24 = vld [vmem:[%s6044_s0 + $0x510] sm:$0xff] }
 0x1ed   :  { %6055 = vst [vmem:[#allocation16_spill] sm:$0xff] %v5620_v14  ;;  %v2436_v43 = vpop.f32.mrb[91].mxu0  ;;  %v5622_v45 = vadd.f32 %v2723_v29, %v2434_v23  ;;  %v2725_v10 = vpop.f32.mrb[91].mxu1  ;;  %v339_v25 = vld [vmem:[%s6044_s0 + $0x530] sm:$0xff] }
 0x1ee   :  { %v332_v10 = vld [vmem:[%s6044_s0 + $0x4f8] sm:$0xff] }
 0x1ef   :  { %6056 = vst [vmem:[#allocation17_spill] sm:$0xff] %v5622_v45  ;;  %2968 = vmatmul.mubr.bf16.gmra.mrb[196].mxu0 %v4173_v6  ;;  %3257 = vmatmul.mubr.bf16.gmra.mrb[196].mxu1 %v4175_v26  ;;  %v4183_v26 = vcombine.low %v320_v4, %v324_v1  ;;  %v336_v1 = vld [vmem:[%s6044_s0 + $0x518] sm:$0xff] }
 0x1f0   :  { %2975 = vmatprep.mubr.bf16.mxu0 %v4182_v35  ;;  %3264 = vmatprep.mubr.bf16.mxu1 %v4184_v50  ;;  %v4190_v35 = vcombine.high %v327_v54, %v331_v57  ;;  %v4192_v50 = vcombine.high %v328_v53, %v332_v10 }
 0x1f2   :  { %v2439_v15 = vpop.f32.mrb[92].mxu0  ;;  %v2728_v40 = vpop.f32.mrb[92].mxu1 }
 0x1f3   :  { %v2441_v61 = vpop.f32.mrb[93].mxu0  ;;  %v5636_v6 = vadd.f32 %v2728_v40, %v2439_v15  ;;  %v2730_v19 = vpop.f32.mrb[93].mxu1 }
 0x1f4   :  { %v2442_v23 = vpop.f32.mrb[94].mxu0  ;;  %v2731_v29 = vpop.f32.mrb[94].mxu1  ;;  %v4189_v61 = vcombine.low %v327_v54, %v331_v57  ;;  %v343_v54 = vld [vmem:[%s6044_s0 + $0x550] sm:$0xff] }
 0x1f5   :  { %6057 = vst [vmem:[#allocation18_spill] sm:$0xff] %v5636_v6  ;;  %v2444_v43 = vpop.f32.mrb[95].mxu0  ;;  %v5638_v45 = vadd.f32 %v2731_v29, %v2442_v23  ;;  %v2733_v14 = vpop.f32.mrb[95].mxu1  ;;  %v347_v57 = vld [vmem:[%s6044_s0 + $0x570] sm:$0xff] }
 0x1f6   :  { %v340_v14 = vld [vmem:[%s6044_s0 + $0x538] sm:$0xff] }
 0x1f7   :  { %6058 = vst [vmem:[#allocation19_spill] sm:$0xff] %v5638_v45  ;;  %2976 = vmatmul.mubr.bf16.gmra.mrb[200].mxu0 %v4181_v32  ;;  %3265 = vmatmul.mubr.bf16.gmra.mrb[200].mxu1 %v4183_v26  ;;  %v4191_v26 = vcombine.low %v328_v53, %v332_v10  ;;  %v344_v10 = vld [vmem:[%s6044_s0 + $0x558] sm:$0xff] }
 0x1f8   :  { %2983 = vmatprep.mubr.bf16.mxu0 %v4190_v35  ;;  %3272 = vmatprep.mubr.bf16.mxu1 %v4192_v50  ;;  %v4198_v35 = vcombine.high %v335_v24, %v339_v25  ;;  %v4200_v50 = vcombine.high %v336_v1, %v340_v14 }
 0x1fa   :  { %v2447_v4 = vpop.f32.mrb[96].mxu0  ;;  %v2736_v15 = vpop.f32.mrb[96].mxu1 }
 0x1fb   :  { %v2449_v40 = vpop.f32.mrb[97].mxu0  ;;  %v5652_v32 = vadd.f32 %v2736_v15, %v2447_v4  ;;  %v2738_v19 = vpop.f32.mrb[97].mxu1 }
 0x1fc   :  { %v2450_v23 = vpop.f32.mrb[98].mxu0  ;;  %v2739_v29 = vpop.f32.mrb[98].mxu1  ;;  %v4197_v40 = vcombine.low %v335_v24, %v339_v25  ;;  %v351_v24 = vld [vmem:[%s6044_s0 + $0x590] sm:$0xff] }
 0x1fd   :  { %6059 = vst [vmem:[#allocation20_spill] sm:$0xff] %v5652_v32  ;;  %v2452_v43 = vpop.f32.mrb[99].mxu0  ;;  %v5654_v45 = vadd.f32 %v2739_v29, %v2450_v23  ;;  %v2741_v6 = vpop.f32.mrb[99].mxu1  ;;  %v355_v25 = vld [vmem:[%s6044_s0 + $0x5b0] sm:$0xff] }
 0x1fe   :  { %v348_v6 = vld [vmem:[%s6044_s0 + $0x578] sm:$0xff] }
 0x1ff   :  { %6060 = vst [vmem:[#allocation21_spill] sm:$0xff] %v5654_v45  ;;  %2984 = vmatmul.mubr.bf16.gmra.mrb[204].mxu0 %v4189_v61  ;;  %3273 = vmatmul.mubr.bf16.gmra.mrb[204].mxu1 %v4191_v26  ;;  %v4199_v26 = vcombine.low %v336_v1, %v340_v14  ;;  %v352_v14 = vld [vmem:[%s6044_s0 + $0x598] sm:$0xff] }
 0x200   :  { %2991 = vmatprep.mubr.bf16.mxu0 %v4198_v35  ;;  %3280 = vmatprep.mubr.bf16.mxu1 %v4200_v50  ;;  %v4206_v35 = vcombine.high %v343_v54, %v347_v57  ;;  %v4208_v50 = vcombine.high %v344_v10, %v348_v6 }
 0x202   :  { %v2455_v53 = vpop.f32.mrb[100].mxu0  ;;  %v2744_v4 = vpop.f32.mrb[100].mxu1 }
 0x203   :  { %v2457_v15 = vpop.f32.mrb[101].mxu0  ;;  %v5668_v61 = vadd.f32 %v2744_v4, %v2455_v53  ;;  %v2746_v19 = vpop.f32.mrb[101].mxu1 }
 0x204   :  { %v2458_v23 = vpop.f32.mrb[102].mxu0  ;;  %v2747_v29 = vpop.f32.mrb[102].mxu1  ;;  %v4205_v15 = vcombine.low %v343_v54, %v347_v57  ;;  %v359_v54 = vld [vmem:[%s6044_s0 + $0x5d0] sm:$0xff] }
 0x205   :  { %6061 = vst [vmem:[#allocation22_spill] sm:$0xff] %v5668_v61  ;;  %v2460_v43 = vpop.f32.mrb[103].mxu0  ;;  %v5670_v45 = vadd.f32 %v2747_v29, %v2458_v23  ;;  %v2749_v32 = vpop.f32.mrb[103].mxu1  ;;  %v363_v57 = vld [vmem:[%s6044_s0 + $0x5f0] sm:$0xff] }
 0x206   :  { %v356_v32 = vld [vmem:[%s6044_s0 + $0x5b8] sm:$0xff] }
 0x207   :  { %6062 = vst [vmem:[#allocation23_spill] sm:$0xff] %v5670_v45  ;;  %2992 = vmatmul.mubr.bf16.gmra.mrb[208].mxu0 %v4197_v40  ;;  %3281 = vmatmul.mubr.bf16.gmra.mrb[208].mxu1 %v4199_v26  ;;  %v4207_v26 = vcombine.low %v344_v10, %v348_v6  ;;  %v360_v6 = vld [vmem:[%s6044_s0 + $0x5d8] sm:$0xff] }
 0x208   :  { %2999 = vmatprep.mubr.bf16.mxu0 %v4206_v35  ;;  %3288 = vmatprep.mubr.bf16.mxu1 %v4208_v50  ;;  %v4214_v35 = vcombine.high %v351_v24, %v355_v25  ;;  %v4216_v50 = vcombine.high %v352_v14, %v356_v32 }
 0x20a   :  { %v2463_v1 = vpop.f32.mrb[104].mxu0  ;;  %v2752_v53 = vpop.f32.mrb[104].mxu1 }
 0x20b   :  { %v2465_v4 = vpop.f32.mrb[105].mxu0  ;;  %v5684_v40 = vadd.f32 %v2752_v53, %v2463_v1  ;;  %v2754_v19 = vpop.f32.mrb[105].mxu1 }
 0x20c   :  { %v2466_v23 = vpop.f32.mrb[106].mxu0  ;;  %v2755_v29 = vpop.f32.mrb[106].mxu1  ;;  %v4213_v4 = vcombine.low %v351_v24, %v355_v25  ;;  %v367_v24 = vld [vmem:[%s6044_s0 + $0x610] sm:$0xff] }
 0x20d   :  { %6063 = vst [vmem:[#allocation24_spill] sm:$0xff] %v5684_v40  ;;  %v2468_v43 = vpop.f32.mrb[107].mxu0  ;;  %v5686_v45 = vadd.f32 %v2755_v29, %v2466_v23  ;;  %v2757_v61 = vpop.f32.mrb[107].mxu1  ;;  %v371_v25 = vld [vmem:[%s6044_s0 + $0x630] sm:$0xff] }
 0x20e   :  { %v364_v61 = vld [vmem:[%s6044_s0 + $0x5f8] sm:$0xff] }
 0x20f   :  { %6064 = vst [vmem:[#allocation25_spill] sm:$0xff] %v5686_v45  ;;  %3000 = vmatmul.mubr.bf16.gmra.mrb[212].mxu0 %v4205_v15  ;;  %3289 = vmatmul.mubr.bf16.gmra.mrb[212].mxu1 %v4207_v26  ;;  %v4215_v26 = vcombine.low %v352_v14, %v356_v32  ;;  %v368_v32 = vld [vmem:[%s6044_s0 + $0x618] sm:$0xff] }
 0x210   :  { %3007 = vmatprep.mubr.bf16.mxu0 %v4214_v35  ;;  %3296 = vmatprep.mubr.bf16.mxu1 %v4216_v50  ;;  %v4222_v35 = vcombine.high %v359_v54, %v363_v57  ;;  %v4224_v50 = vcombine.high %v360_v6, %v364_v61 }
 0x212   :  { %v2471_v10 = vpop.f32.mrb[108].mxu0  ;;  %v2760_v1 = vpop.f32.mrb[108].mxu1 }
 0x213   :  { %v2473_v53 = vpop.f32.mrb[109].mxu0  ;;  %v5700_v15 = vadd.f32 %v2760_v1, %v2471_v10  ;;  %v2762_v19 = vpop.f32.mrb[109].mxu1 }
 0x214   :  { %v2474_v23 = vpop.f32.mrb[110].mxu0  ;;  %v2763_v29 = vpop.f32.mrb[110].mxu1  ;;  %v4221_v53 = vcombine.low %v359_v54, %v363_v57  ;;  %v375_v54 = vld [vmem:[%s6044_s0 + $0x650] sm:$0xff] }
 0x215   :  { %6065 = vst [vmem:[#allocation26_spill] sm:$0xff] %v5700_v15  ;;  %v2476_v43 = vpop.f32.mrb[111].mxu0  ;;  %v5702_v45 = vadd.f32 %v2763_v29, %v2474_v23  ;;  %v2765_v40 = vpop.f32.mrb[111].mxu1  ;;  %v379_v57 = vld [vmem:[%s6044_s0 + $0x670] sm:$0xff] }
 0x216   :  { %v372_v40 = vld [vmem:[%s6044_s0 + $0x638] sm:$0xff] }
 0x217   :  { %6066 = vst [vmem:[#allocation27_spill] sm:$0xff] %v5702_v45  ;;  %3008 = vmatmul.mubr.bf16.gmra.mrb[216].mxu0 %v4213_v4  ;;  %3297 = vmatmul.mubr.bf16.gmra.mrb[216].mxu1 %v4215_v26  ;;  %v4223_v26 = vcombine.low %v360_v6, %v364_v61  ;;  %v376_v61 = vld [vmem:[%s6044_s0 + $0x658] sm:$0xff] }
 0x218   :  { %3015 = vmatprep.mubr.bf16.mxu0 %v4222_v35  ;;  %3304 = vmatprep.mubr.bf16.mxu1 %v4224_v50  ;;  %v4230_v35 = vcombine.high %v367_v24, %v371_v25  ;;  %v4232_v50 = vcombine.high %v368_v32, %v372_v40 }
 0x21a   :  { %v2479_v14 = vpop.f32.mrb[112].mxu0  ;;  %v2768_v10 = vpop.f32.mrb[112].mxu1 }
 0x21b   :  { %v2481_v1 = vpop.f32.mrb[113].mxu0  ;;  %v5716_v4 = vadd.f32 %v2768_v10, %v2479_v14  ;;  %v2770_v19 = vpop.f32.mrb[113].mxu1 }
 0x21c   :  { %v2482_v23 = vpop.f32.mrb[114].mxu0  ;;  %v2771_v29 = vpop.f32.mrb[114].mxu1  ;;  %v4229_v1 = vcombine.low %v367_v24, %v371_v25  ;;  %v383_v24 = vld [vmem:[%s6044_s0 + $0x690] sm:$0xff] }
 0x21d   :  { %6067 = vst [vmem:[#allocation28_spill] sm:$0xff] %v5716_v4  ;;  %v2484_v43 = vpop.f32.mrb[115].mxu0  ;;  %v5718_v45 = vadd.f32 %v2771_v29, %v2482_v23  ;;  %v2773_v15 = vpop.f32.mrb[115].mxu1  ;;  %v387_v25 = vld [vmem:[%s6044_s0 + $0x6b0] sm:$0xff] }
 0x21e   :  { %v380_v15 = vld [vmem:[%s6044_s0 + $0x678] sm:$0xff] }
 0x21f   :  { %6068 = vst [vmem:[#allocation29_spill] sm:$0xff] %v5718_v45  ;;  %3016 = vmatmul.mubr.bf16.gmra.mrb[220].mxu0 %v4221_v53  ;;  %3305 = vmatmul.mubr.bf16.gmra.mrb[220].mxu1 %v4223_v26  ;;  %v4231_v26 = vcombine.low %v368_v32, %v372_v40  ;;  %v384_v40 = vld [vmem:[%s6044_s0 + $0x698] sm:$0xff] }
 0x220   :  { %3023 = vmatprep.mubr.bf16.mxu0 %v4230_v35  ;;  %3312 = vmatprep.mubr.bf16.mxu1 %v4232_v50  ;;  %v4238_v35 = vcombine.high %v375_v54, %v379_v57  ;;  %v4240_v50 = vcombine.high %v376_v61, %v380_v15 }
 0x222   :  { %v2487_v6 = vpop.f32.mrb[116].mxu0  ;;  %v2776_v14 = vpop.f32.mrb[116].mxu1 }
 0x223   :  { %v2489_v10 = vpop.f32.mrb[117].mxu0  ;;  %v5732_v53 = vadd.f32 %v2776_v14, %v2487_v6  ;;  %v2778_v19 = vpop.f32.mrb[117].mxu1 }
 0x224   :  { %v2490_v23 = vpop.f32.mrb[118].mxu0  ;;  %v2779_v29 = vpop.f32.mrb[118].mxu1  ;;  %v4237_v10 = vcombine.low %v375_v54, %v379_v57  ;;  %v391_v54 = vld [vmem:[%s6044_s0 + $0x6d0] sm:$0xff] }
 0x225   :  { %6069 = vst [vmem:[#allocation30_spill] sm:$0xff] %v5732_v53  ;;  %v2492_v43 = vpop.f32.mrb[119].mxu0  ;;  %v5734_v45 = vadd.f32 %v2779_v29, %v2490_v23  ;;  %v2781_v4 = vpop.f32.mrb[119].mxu1  ;;  %v395_v57 = vld [vmem:[%s6044_s0 + $0x6f0] sm:$0xff] }
 0x226   :  { %v388_v4 = vld [vmem:[%s6044_s0 + $0x6b8] sm:$0xff] }
 0x227   :  { %6070 = vst [vmem:[#allocation31_spill] sm:$0xff] %v5734_v45  ;;  %3024 = vmatmul.mubr.bf16.gmra.mrb[224].mxu0 %v4229_v1  ;;  %3313 = vmatmul.mubr.bf16.gmra.mrb[224].mxu1 %v4231_v26  ;;  %v4239_v26 = vcombine.low %v376_v61, %v380_v15  ;;  %v392_v15 = vld [vmem:[%s6044_s0 + $0x6d8] sm:$0xff] }
 0x228   :  { %3031 = vmatprep.mubr.bf16.mxu0 %v4238_v35  ;;  %3320 = vmatprep.mubr.bf16.mxu1 %v4240_v50  ;;  %v4246_v35 = vcombine.high %v383_v24, %v387_v25  ;;  %v4248_v50 = vcombine.high %v384_v40, %v388_v4 }
 0x22a   :  { %v2495_v32 = vpop.f32.mrb[120].mxu0  ;;  %v2784_v6 = vpop.f32.mrb[120].mxu1 }
 0x22b   :  { %v2497_v14 = vpop.f32.mrb[121].mxu0  ;;  %v5748_v1 = vadd.f32 %v2784_v6, %v2495_v32  ;;  %v2786_v19 = vpop.f32.mrb[121].mxu1 }
 0x22c   :  { %v2498_v23 = vpop.f32.mrb[122].mxu0  ;;  %v2787_v29 = vpop.f32.mrb[122].mxu1  ;;  %v4245_v14 = vcombine.low %v383_v24, %v387_v25  ;;  %v399_v24 = vld [vmem:[%s6044_s0 + $0x710] sm:$0xff] }
 0x22d   :  { %6071 = vst [vmem:[#allocation32_spill] sm:$0xff] %v5748_v1  ;;  %v2500_v43 = vpop.f32.mrb[123].mxu0  ;;  %v5750_v45 = vadd.f32 %v2787_v29, %v2498_v23  ;;  %v2789_v53 = vpop.f32.mrb[123].mxu1  ;;  %v403_v25 = vld [vmem:[%s6044_s0 + $0x730] sm:$0xff] }
 0x22e   :  { %v396_v53 = vld [vmem:[%s6044_s0 + $0x6f8] sm:$0xff] }
 0x22f   :  { %6072 = vst [vmem:[#allocation33_spill] sm:$0xff] %v5750_v45  ;;  %3032 = vmatmul.mubr.bf16.gmra.mrb[228].mxu0 %v4237_v10  ;;  %3321 = vmatmul.mubr.bf16.gmra.mrb[228].mxu1 %v4239_v26  ;;  %v4247_v26 = vcombine.low %v384_v40, %v388_v4  ;;  %v400_v4 = vld [vmem:[%s6044_s0 + $0x718] sm:$0xff] }
 0x230   :  { %3039 = vmatprep.mubr.bf16.mxu0 %v4246_v35  ;;  %3328 = vmatprep.mubr.bf16.mxu1 %v4248_v50  ;;  %v4254_v35 = vcombine.high %v391_v54, %v395_v57  ;;  %v4256_v50 = vcombine.high %v392_v15, %v396_v53 }
 0x232   :  { %v2503_v61 = vpop.f32.mrb[124].mxu0  ;;  %v2792_v32 = vpop.f32.mrb[124].mxu1 }
 0x233   :  { %v2505_v6 = vpop.f32.mrb[125].mxu0  ;;  %v5764_v10 = vadd.f32 %v2792_v32, %v2503_v61  ;;  %v2794_v19 = vpop.f32.mrb[125].mxu1 }
 0x234   :  { %v2506_v23 = vpop.f32.mrb[126].mxu0  ;;  %v2795_v29 = vpop.f32.mrb[126].mxu1  ;;  %v5781_v19 = vld [vmem:[#allocation5] ss:$0 sm:$0xff] }
 0x235   :  { %6073 = vst [vmem:[#allocation34_spill] sm:$0xff] %v5764_v10  ;;  %v2508_v43 = vpop.f32.mrb[127].mxu0  ;;  %v5766_v45 = vadd.f32 %v2795_v29, %v2506_v23  ;;  %v2797_v1 = vpop.f32.mrb[127].mxu1  ;;  %v4262_v29 = vcombine.high %v399_v24, %v403_v25 }
 0x236   :  { %v404_v1 = vld [vmem:[%s6044_s0 + $0x738] sm:$0xff] }
 0x237   :  { %6074 = vst [vmem:[#allocation35_spill] sm:$0xff] %v5766_v45  ;;  %3040 = vmatmul.mubr.bf16.gmra.mrb[232].mxu0 %v4245_v14  ;;  %3329 = vmatmul.mubr.bf16.gmra.mrb[232].mxu1 %v4247_v26  ;;  %v4253_v14 = vcombine.low %v391_v54, %v395_v57  ;;  %v4264_v46 = vcombine.high %v400_v4, %v404_v1  ;;  %v407_v54 = vld [vmem:[%s6044_s0 + $0x750] sm:$0xff] }
 0x238   :  { %3047 = vmatprep.mubr.bf16.mxu0 %v4254_v35  ;;  %3336 = vmatprep.mubr.bf16.mxu1 %v4256_v50  ;;  %v4255_v35 = vcombine.low %v392_v15, %v396_v53 }
 0x23a   :  { %v2833_v40 = vpop.f32.mrb[128].mxu0  ;;  %v3122_v32 = vpop.f32.mrb[128].mxu1 }
 0x23b   :  { %v2834_v61 = vadd.f32 %v2833_v40, %v5268_v41  ;;  %v2835_v6 = vpop.f32.mrb[129].mxu0  ;;  %v3124_v23 = vpop.f32.mrb[129].mxu1  ;;  %v4261_v40 = vcombine.low %v399_v24, %v403_v25 }
 0x23c   :  { %v2836_v26 = vpop.f32.mrb[130].mxu0  ;;  %v3125_v45 = vpop.f32.mrb[130].mxu1  ;;  %v4263_v6 = vcombine.low %v400_v4, %v404_v1  ;;  %v416_v4 = vld [vmem:[%s6044_s0 + $0x798] sm:$0xff] }
 0x23d   :  { %v3123_v43 = vadd.f32 %v3122_v32, %v2834_v61  ;;  %v2837_v50 = vadd.f32 %v2836_v26, %v5270_v49  ;;  %v2838_v10 = vpop.f32.mrb[131].mxu0  ;;  %v3127_v62 = vpop.f32.mrb[131].mxu1  ;;  %v411_v49 = vld [vmem:[%s6044_s0 + $0x770] sm:$0xff]  ;;  %v420_v1 = vld [vmem:[%s6044_s0 + $0x7b8] sm:$0xff] }
 0x23e   :  { %v408_v62 = vld [vmem:[%s6044_s0 + $0x758] sm:$0xff] }
 0x23f   :  { %v3579_v63 = vadd.f32 %v5781_v19, %v3123_v43  ;;  %v3126_v33 = vadd.f32 %v3125_v45, %v2837_v50  ;;  %3048 = vmatmul.mubr.bf16.gmra.mrb[236].mxu0 %v4253_v14  ;;  %3337 = vmatmul.mubr.bf16.gmra.mrb[236].mxu1 %v4255_v35  ;;  %v412_v45 = vld [vmem:[%s6044_s0 + $0x778] sm:$0xff]  ;;  %v4270_v14 = vcombine.high %v407_v54, %v411_v49 }
 0x240   :  { %3055 = vmatprep.mubr.bf16.mxu0 %v4262_v29  ;;  %3344 = vmatprep.mubr.bf16.mxu1 %v4264_v46  ;;  %v4272_v50 = vcombine.high %v408_v62, %v412_v45 }
 0x241   :  { %v3580_v41 = vadd.f32 %v5781_v19, %v3126_v33  ;;  %v3643_v15 = vmax.f32 %v3579_v63, 0.0 }
 0x242   :  { %v2841_v57 = vpop.f32.mrb[132].mxu0  ;;  %v3130_v53 = vpop.f32.mrb[132].mxu1 }
 0x243   :  { %v3644_v33 = vmax.f32 %v3580_v41, 0.0  ;;  %v2842_v46 = vadd.f32 %v2841_v57, %v5284_v0  ;;  %v2843_v10 = vpop.f32.mrb[133].mxu0  ;;  %v3132_v61 = vpop.f32.mrb[133].mxu1 }
 0x244   :  { %v2844_v32 = vpop.f32.mrb[134].mxu0  ;;  %v3133_v29 = vpop.f32.mrb[134].mxu1  ;;  %v4271_v61 = vcombine.low %v408_v62, %v412_v45  ;;  %v424_v45 = vld [vmem:[%s6044_s0 + $0x7d8] sm:$0xff] }
 0x245   :  { %v4485_v23 = vpack.c.bf16 %v3644_v33, %v3643_v15  ;;  %v3131_v26 = vadd.f32 %v3130_v53, %v2842_v46  ;;  %v2845_v35 = vadd.f32 %v2844_v32, %v5286_v3  ;;  %v2846_v43 = vpop.f32.mrb[135].mxu0  ;;  %v3135_v12 = vpop.f32.mrb[135].mxu1  ;;  %v415_v3 = vld [vmem:[%s6044_s0 + $0x790] sm:$0xff]  ;;  %v4269_v53 = vcombine.low %v407_v54, %v411_v49 }
 0x246   :  { %v419_v12 = vld [vmem:[%s6044_s0 + $0x7b0] sm:$0xff] }
 0x247   :  { %4486 = vst [vmem:[%s6047_s3] sm:$0xff] %v4485_v23   ;;  %v3581_v0 = vadd.f32 %v5781_v19, %v3131_v26  ;;  %v3134_v63 = vadd.f32 %v3133_v29, %v2845_v35  ;;  %3056 = vmatmul.mubr.bf16.gmra.mrb[240].mxu0 %v4261_v40  ;;  %3345 = vmatmul.mubr.bf16.gmra.mrb[240].mxu1 %v4263_v6  ;;  %v427_v49 = vld [vmem:[%s6044_s0 + $0x7f0] sm:$0xff] }
 0x248   :  { %3063 = vmatprep.mubr.bf16.mxu0 %v4270_v14  ;;  %3352 = vmatprep.mubr.bf16.mxu1 %v4272_v50  ;;  %v4278_v32 = vcombine.high %v415_v3, %v419_v12  ;;  %v4280_v29 = vcombine.high %v416_v4, %v420_v1 }
 0x249   :  { %v3582_v24 = vadd.f32 %v5781_v19, %v3134_v63  ;;  %v3645_v41 = vmax.f32 %v3581_v0, 0.0  ;;  %v428_v0 = vld [vmem:[%s6044_s0 + $0x7f8] sm:$0xff] }
 0x24a   :  { %v2849_v25 = vpop.f32.mrb[136].mxu0  ;;  %v3138_v33 = vpop.f32.mrb[136].mxu1 }
 0x24b   :  { %v3646_v57 = vmax.f32 %v3582_v24, 0.0  ;;  %v2850_v15 = vadd.f32 %v2849_v25, %v5300_v13  ;;  %v2851_v46 = vpop.f32.mrb[137].mxu0  ;;  %v3140_v10 = vpop.f32.mrb[137].mxu1 }
 0x24c   :  { %v2852_v40 = vpop.f32.mrb[138].mxu0  ;;  %v3141_v26 = vpop.f32.mrb[138].mxu1 }
 0x24d   :  { %v4490_v6 = vpack.c.bf16 %v3646_v57, %v3645_v41  ;;  %v3139_v14 = vadd.f32 %v3138_v33, %v2850_v15  ;;  %v2853_v23 = vadd.f32 %v2852_v40, %v5302_v21  ;;  %v2854_v35 = vpop.f32.mrb[139].mxu0  ;;  %v3143_v43 = vpop.f32.mrb[139].mxu1  ;;  %v423_v21 = vld [vmem:[%s6044_s0 + $0x7d0] sm:$0xff]  ;;  %v4277_v15 = vcombine.low %v415_v3, %v419_v12 }
 0x24e   :  { %v4286_v10 = vcombine.high %v423_v21, %v427_v49 }
 0x24f   :  { %4642 = vst [vmem:[%s6047_s3 + $0x8] sm:$0xff] %v4490_v6   ;;  %v3583_v13 = vadd.f32 %v5781_v19, %v3139_v14  ;;  %v3142_v50 = vadd.f32 %v3141_v26, %v2853_v23  ;;  %3064 = vmatmul.mubr.bf16.gmra.mrb[244].mxu0 %v4269_v53  ;;  %3353 = vmatmul.mubr.bf16.gmra.mrb[244].mxu1 %v4271_v61 }
 0x250   :  { %3071 = vmatprep.mubr.bf16.mxu0 %v4278_v32  ;;  %3360 = vmatprep.mubr.bf16.mxu1 %v4280_v29  ;;  %v4279_v53 = vcombine.low %v416_v4, %v420_v1  ;;  %v4288_v23 = vcombine.high %v424_v45, %v428_v0 }
 0x251   :  { %v3584_v54 = vadd.f32 %v5781_v19, %v3142_v50  ;;  %v3647_v63 = vmax.f32 %v3583_v13, 0.0  ;;  %v4285_v13 = vcombine.low %v423_v21, %v427_v49 }
 0x252   :  { %v2857_v62 = vpop.f32.mrb[140].mxu0  ;;  %v3146_v41 = vpop.f32.mrb[140].mxu1 }
 0x253   :  { %v3648_v24 = vmax.f32 %v3584_v54, 0.0  ;;  %v2858_v25 = vadd.f32 %v2857_v62, %v5316_v31  ;;  %v2859_v57 = vpop.f32.mrb[141].mxu0  ;;  %v3148_v33 = vpop.f32.mrb[141].mxu1  ;;  %v4287_v62 = vcombine.low %v424_v45, %v428_v0 }
 0x254   :  { %v2860_v46 = vpop.f32.mrb[142].mxu0  ;;  %v3149_v6 = vpop.f32.mrb[142].mxu1 }
 0x255   :  { %v4495_v40 = vpack.c.bf16 %v3648_v24, %v3647_v63  ;;  %v3147_v61 = vadd.f32 %v3146_v41, %v2858_v25  ;;  %v2861_v32 = vadd.f32 %v2860_v46, %v5318_v39  ;;  %v2862_v14 = vpop.f32.mrb[143].mxu0  ;;  %v3151_v26 = vpop.f32.mrb[143].mxu1 }
 0x257   :  { %4643 = vst [vmem:[%s6047_s3 + $0x10] sm:$0xff] %v4495_v40   ;;  %v3585_v31 = vadd.f32 %v5781_v19, %v3147_v61  ;;  %v3150_v35 = vadd.f32 %v3149_v6, %v2861_v32  ;;  %3072 = vmatmul.mubr.bf16.gmra.mrb[248].mxu0 %v4277_v15  ;;  %3361 = vmatmul.mubr.bf16.gmra.mrb[248].mxu1 %v4279_v53 }
 0x258   :  { %3079 = vmatprep.mubr.bf16.mxu0 %v4286_v10  ;;  %3368 = vmatprep.mubr.bf16.mxu1 %v4288_v23 }
 0x259   :  { %v3586_v3 = vadd.f32 %v5781_v19, %v3150_v35  ;;  %v3649_v4 = vmax.f32 %v3585_v31, 0.0 }
 0x25a   :  { %v2865_v12 = vpop.f32.mrb[144].mxu0  ;;  %v3154_v29 = vpop.f32.mrb[144].mxu1 }
 0x25b   :  { %v3650_v39 = vmax.f32 %v3586_v3, 0.0  ;;  %v2866_v1 = vadd.f32 %v2865_v12, %v5332_v51  ;;  %v2867_v43 = vpop.f32.mrb[145].mxu0  ;;  %v3156_v50 = vpop.f32.mrb[145].mxu1 }
 0x25c   :  { %v2868_v54 = vpop.f32.mrb[146].mxu0  ;;  %v3157_v41 = vpop.f32.mrb[146].mxu1 }
 0x25d   :  { %v4500_v63 = vpack.c.bf16 %v3650_v39, %v3649_v4  ;;  %v3155_v24 = vadd.f32 %v3154_v29, %v2866_v1  ;;  %v2869_v25 = vadd.f32 %v2868_v54, %v5334_v59  ;;  %v2870_v57 = vpop.f32.mrb[147].mxu0  ;;  %v3159_v15 = vpop.f32.mrb[147].mxu1 }
 0x25f   :  { %4644 = vst [vmem:[%s6047_s3 + $0x18] sm:$0xff] %v4500_v63   ;;  %v3587_v33 = vadd.f32 %v5781_v19, %v3155_v24  ;;  %v3158_v51 = vadd.f32 %v3157_v41, %v2869_v25  ;;  %3080 = vmatmul.mubr.bf16.gmra.mrb[252].mxu0 %v4285_v13  ;;  %3369 = vmatmul.mubr.bf16.gmra.mrb[252].mxu1 %v4287_v62 }
 0x261   :  { %v3588_v21 = vadd.f32 %v5781_v19, %v3158_v51  ;;  %v3651_v45 = vmax.f32 %v3587_v33, 0.0 }
 0x262   :  { %v2873_v49 = vpop.f32.mrb[148].mxu0  ;;  %v3162_v59 = vpop.f32.mrb[148].mxu1 }
 0x263   :  { %v3652_v0 = vmax.f32 %v3588_v21, 0.0  ;;  %v2874_v46 = vadd.f32 %v2873_v49, %v5348_v7  ;;  %v2875_v53 = vpop.f32.mrb[149].mxu0  ;;  %v3164_v10 = vpop.f32.mrb[149].mxu1 }
 0x264   :  { %v2876_v40 = vpop.f32.mrb[150].mxu0  ;;  %v3165_v14 = vpop.f32.mrb[150].mxu1 }
 0x265   :  { %v4505_v61 = vpack.c.bf16 %v3652_v0, %v3651_v45  ;;  %v3163_v32 = vadd.f32 %v3162_v59, %v2874_v46  ;;  %v2877_v6 = vadd.f32 %v2876_v40, %v5350_v16  ;;  %v2878_v23 = vpop.f32.mrb[151].mxu0  ;;  %v3167_v26 = vpop.f32.mrb[151].mxu1 }
 0x267   :  { %4645 = vst [vmem:[%s6047_s3 + $0x20] sm:$0xff] %v4505_v61   ;;  %v3589_v31 = vadd.f32 %v5781_v19, %v3163_v32  ;;  %v3166_v35 = vadd.f32 %v3165_v14, %v2877_v6 }
 0x269   :  { %v3590_v7 = vadd.f32 %v5781_v19, %v3166_v35  ;;  %v3653_v12 = vmax.f32 %v3589_v31, 0.0 }
 0x26a   :  { %v2881_v3 = vpop.f32.mrb[152].mxu0  ;;  %v3170_v1 = vpop.f32.mrb[152].mxu1 }
 0x26b   :  { %v3654_v4 = vmax.f32 %v3590_v7, 0.0  ;;  %v2882_v39 = vadd.f32 %v2881_v3, %v5364_v27  ;;  %v2883_v29 = vpop.f32.mrb[153].mxu0  ;;  %v3172_v16 = vpop.f32.mrb[153].mxu1 }
 0x26c   :  { %v2884_v43 = vpop.f32.mrb[154].mxu0  ;;  %v3173_v62 = vpop.f32.mrb[154].mxu1 }
 0x26d   :  { %v4510_v13 = vpack.c.bf16 %v3654_v4, %v3653_v12  ;;  %v3171_v50 = vadd.f32 %v3170_v1, %v2882_v39  ;;  %v2885_v54 = vadd.f32 %v2884_v43, %v5366_v36  ;;  %v2886_v63 = vpop.f32.mrb[155].mxu0  ;;  %v3175_v24 = vpop.f32.mrb[155].mxu1 }
 0x26f   :  { %4646 = vst [vmem:[%s6047_s3 + $0x28] sm:$0xff] %v4510_v13   ;;  %v3591_v25 = vadd.f32 %v5781_v19, %v3171_v50  ;;  %v3174_v41 = vadd.f32 %v3173_v62, %v2885_v54 }
 0x271   :  { %v3592_v27 = vadd.f32 %v5781_v19, %v3174_v41  ;;  %v3655_v15 = vmax.f32 %v3591_v25, 0.0 }
 0x272   :  { %v2889_v57 = vpop.f32.mrb[156].mxu0  ;;  %v3178_v21 = vpop.f32.mrb[156].mxu1 }
 0x273   :  { %v3656_v33 = vmax.f32 %v3592_v27, 0.0  ;;  %v2890_v51 = vadd.f32 %v2889_v57, %v5380_v48  ;;  %v2891_v49 = vpop.f32.mrb[157].mxu0  ;;  %v3180_v36 = vpop.f32.mrb[157].mxu1 }
 0x274   :  { %v2892_v45 = vpop.f32.mrb[158].mxu0  ;;  %v3181_v53 = vpop.f32.mrb[158].mxu1 }
 0x275   :  { %v4515_v0 = vpack.c.bf16 %v3656_v33, %v3655_v15  ;;  %v3179_v46 = vadd.f32 %v3178_v21, %v2890_v51  ;;  %v2893_v59 = vadd.f32 %v2892_v45, %v5382_v58  ;;  %v2894_v10 = vpop.f32.mrb[159].mxu0  ;;  %v3183_v40 = vpop.f32.mrb[159].mxu1 }
 0x277   :  { %4647 = vst [vmem:[%s6047_s3 + $0x30] sm:$0xff] %v4515_v0   ;;  %v3593_v61 = vadd.f32 %v5781_v19, %v3179_v46  ;;  %v3182_v32 = vadd.f32 %v3181_v53, %v2893_v59 }
 0x279   :  { %v3594_v48 = vadd.f32 %v5781_v19, %v3182_v32  ;;  %v3657_v14 = vmax.f32 %v3593_v61, 0.0 }
 0x27a   :  { %v2897_v6 = vpop.f32.mrb[160].mxu0  ;;  %v3186_v31 = vpop.f32.mrb[160].mxu1 }
 0x27b   :  { %v3658_v23 = vmax.f32 %v3594_v48, 0.0  ;;  %v2898_v26 = vadd.f32 %v2897_v6, %v5396_v8  ;;  %v2899_v35 = vpop.f32.mrb[161].mxu0  ;;  %v3188_v58 = vpop.f32.mrb[161].mxu1 }
 0x27c   :  { %v2900_v7 = vpop.f32.mrb[162].mxu0  ;;  %v3189_v39 = vpop.f32.mrb[162].mxu1 }
 0x27d   :  { %v4520_v3 = vpack.c.bf16 %v3658_v23, %v3657_v14  ;;  %v3187_v12 = vadd.f32 %v3186_v31, %v2898_v26  ;;  %v2901_v4 = vadd.f32 %v2900_v7, %v5398_v18  ;;  %v2902_v1 = vpop.f32.mrb[163].mxu0  ;;  %v3191_v29 = vpop.f32.mrb[163].mxu1 }
 0x27f   :  { %4648 = vst [vmem:[%s6047_s3 + $0x38] sm:$0xff] %v4520_v3   ;;  %v3595_v16 = vadd.f32 %v5781_v19, %v3187_v12  ;;  %v3190_v43 = vadd.f32 %v3189_v39, %v2901_v4 }
 0x281   :  { %v3596_v8 = vadd.f32 %v5781_v19, %v3190_v43  ;;  %v3659_v50 = vmax.f32 %v3595_v16, 0.0 }
 0x282   :  { %v2905_v13 = vpop.f32.mrb[164].mxu0  ;;  %v3194_v63 = vpop.f32.mrb[164].mxu1 }
 0x283   :  { %v3660_v54 = vmax.f32 %v3596_v8, 0.0  ;;  %v2906_v62 = vadd.f32 %v2905_v13, %v5412_v30  ;;  %v2907_v24 = vpop.f32.mrb[165].mxu0  ;;  %v3196_v18 = vpop.f32.mrb[165].mxu1 }
 0x284   :  { %v2908_v25 = vpop.f32.mrb[166].mxu0  ;;  %v3197_v15 = vpop.f32.mrb[166].mxu1 }
 0x285   :  { %v4525_v41 = vpack.c.bf16 %v3660_v54, %v3659_v50  ;;  %v3195_v27 = vadd.f32 %v3194_v63, %v2906_v62  ;;  %v2909_v57 = vadd.f32 %v2908_v25, %v5414_v42  ;;  %v2910_v33 = vpop.f32.mrb[167].mxu0  ;;  %v3199_v51 = vpop.f32.mrb[167].mxu1 }
 0x287   :  { %4649 = vst [vmem:[%s6047_s3 + $0x40] sm:$0xff] %v4525_v41   ;;  %v3597_v21 = vadd.f32 %v5781_v19, %v3195_v27  ;;  %v3198_v49 = vadd.f32 %v3197_v15, %v2909_v57 }
 0x289   :  { %v3598_v30 = vadd.f32 %v5781_v19, %v3198_v49  ;;  %v3661_v45 = vmax.f32 %v3597_v21, 0.0 }
 0x28a   :  { %v2913_v36 = vpop.f32.mrb[168].mxu0  ;;  %v3202_v59 = vpop.f32.mrb[168].mxu1 }
 0x28b   :  { %v3662_v0 = vmax.f32 %v3598_v30, 0.0  ;;  %v2914_v46 = vadd.f32 %v2913_v36, %v5428_v55  ;;  %v2915_v53 = vpop.f32.mrb[169].mxu0  ;;  %v3204_v42 = vpop.f32.mrb[169].mxu1 }
 0x28c   :  { %v2916_v10 = vpop.f32.mrb[170].mxu0  ;;  %v3205_v48 = vpop.f32.mrb[170].mxu1 }
 0x28d   :  { %v4530_v40 = vpack.c.bf16 %v3662_v0, %v3661_v45  ;;  %v3203_v61 = vadd.f32 %v3202_v59, %v2914_v46  ;;  %v2917_v32 = vadd.f32 %v2916_v10, %v5430_v2  ;;  %v2918_v6 = vpop.f32.mrb[171].mxu0  ;;  %v3207_v14 = vpop.f32.mrb[171].mxu1 }
 0x28f   :  { %4650 = vst [vmem:[%s6047_s3 + $0x48] sm:$0xff] %v4530_v40   ;;  %v3599_v23 = vadd.f32 %v5781_v19, %v3203_v61  ;;  %v3206_v26 = vadd.f32 %v3205_v48, %v2917_v32 }
 0x291   :  { %v3600_v55 = vadd.f32 %v5781_v19, %v3206_v26  ;;  %v3663_v35 = vmax.f32 %v3599_v23, 0.0 }
 0x292   :  { %v2921_v31 = vpop.f32.mrb[172].mxu0  ;;  %v3210_v3 = vpop.f32.mrb[172].mxu1 }
 0x293   :  { %v3664_v58 = vmax.f32 %v3600_v55, 0.0  ;;  %v2922_v7 = vadd.f32 %v2921_v31, %v5444_v17  ;;  %v2923_v12 = vpop.f32.mrb[173].mxu0  ;;  %v3212_v2 = vpop.f32.mrb[173].mxu1 }
 0x294   :  { %v2924_v4 = vpop.f32.mrb[174].mxu0  ;;  %v3213_v16 = vpop.f32.mrb[174].mxu1 }
 0x295   :  { %v4535_v39 = vpack.c.bf16 %v3664_v58, %v3663_v35  ;;  %v3211_v1 = vadd.f32 %v3210_v3, %v2922_v7  ;;  %v2925_v29 = vadd.f32 %v2924_v4, %v5446_v28  ;;  %v2926_v43 = vpop.f32.mrb[175].mxu0  ;;  %v3215_v8 = vpop.f32.mrb[175].mxu1 }
 0x297   :  { %4651 = vst [vmem:[%s6047_s3 + $0x50] sm:$0xff] %v4535_v39   ;;  %v3601_v13 = vadd.f32 %v5781_v19, %v3211_v1  ;;  %v3214_v50 = vadd.f32 %v3213_v16, %v2925_v29 }
 0x299   :  { %v3602_v17 = vadd.f32 %v5781_v19, %v3214_v50  ;;  %v3665_v62 = vmax.f32 %v3601_v13, 0.0 }
 0x29a   :  { %v2929_v54 = vpop.f32.mrb[176].mxu0  ;;  %v3218_v18 = vpop.f32.mrb[176].mxu1 }
 0x29b   :  { %v3666_v63 = vmax.f32 %v3602_v17, 0.0  ;;  %v2930_v24 = vadd.f32 %v2929_v54, %v5460_v44  ;;  %v2931_v25 = vpop.f32.mrb[177].mxu0  ;;  %v3220_v28 = vpop.f32.mrb[177].mxu1 }
 0x29c   :  { %v2932_v41 = vpop.f32.mrb[178].mxu0  ;;  %v3221_v33 = vpop.f32.mrb[178].mxu1 }
 0x29d   :  { %v4540_v27 = vpack.c.bf16 %v3666_v63, %v3665_v62  ;;  %v3219_v57 = vadd.f32 %v3218_v18, %v2930_v24  ;;  %v2933_v15 = vadd.f32 %v2932_v41, %v5462_v56  ;;  %v2934_v51 = vpop.f32.mrb[179].mxu0  ;;  %v3223_v21 = vpop.f32.mrb[179].mxu1 }
 0x29f   :  { %4652 = vst [vmem:[%s6047_s3 + $0x58] sm:$0xff] %v4540_v27   ;;  %v3603_v49 = vadd.f32 %v5781_v19, %v3219_v57  ;;  %v3222_v30 = vadd.f32 %v3221_v33, %v2933_v15 }
 0x2a1   :  { %v3604_v44 = vadd.f32 %v5781_v19, %v3222_v30  ;;  %v3667_v45 = vmax.f32 %v3603_v49, 0.0 }
 0x2a2   :  { %v2937_v36 = vpop.f32.mrb[180].mxu0  ;;  %v3226_v59 = vpop.f32.mrb[180].mxu1 }
 0x2a3   :  { %v3668_v0 = vmax.f32 %v3604_v44, 0.0  ;;  %v2938_v46 = vadd.f32 %v2937_v36, %v5476_v9  ;;  %v2939_v53 = vpop.f32.mrb[181].mxu0  ;;  %v3228_v56 = vpop.f32.mrb[181].mxu1 }
 0x2a4   :  { %v2940_v42 = vpop.f32.mrb[182].mxu0  ;;  %v3229_v32 = vpop.f32.mrb[182].mxu1 }
 0x2a5   :  { %v4545_v10 = vpack.c.bf16 %v3668_v0, %v3667_v45  ;;  %v3227_v40 = vadd.f32 %v3226_v59, %v2938_v46  ;;  %v2941_v61 = vadd.f32 %v2940_v42, %v5478_v22  ;;  %v2942_v48 = vpop.f32.mrb[183].mxu0  ;;  %v3231_v6 = vpop.f32.mrb[183].mxu1 }
 0x2a7   :  { %4653 = vst [vmem:[%s6047_s3 + $0x60] sm:$0xff] %v4545_v10   ;;  %v3605_v14 = vadd.f32 %v5781_v19, %v3227_v40  ;;  %v3230_v23 = vadd.f32 %v3229_v32, %v2941_v61 }
 0x2a9   :  { %v3606_v9 = vadd.f32 %v5781_v19, %v3230_v23  ;;  %v3669_v55 = vmax.f32 %v3605_v14, 0.0 }
 0x2aa   :  { %v2945_v26 = vpop.f32.mrb[184].mxu0  ;;  %v3234_v58 = vpop.f32.mrb[184].mxu1 }
 0x2ab   :  { %v3670_v31 = vmax.f32 %v3606_v9, 0.0  ;;  %v2946_v35 = vadd.f32 %v2945_v26, %v5492_v37  ;;  %v2947_v7 = vpop.f32.mrb[185].mxu0  ;;  %v3236_v22 = vpop.f32.mrb[185].mxu1 }
 0x2ac   :  { %v2948_v3 = vpop.f32.mrb[186].mxu0  ;;  %v3237_v39 = vpop.f32.mrb[186].mxu1 }
 0x2ad   :  { %v4550_v12 = vpack.c.bf16 %v3670_v31, %v3669_v55  ;;  %v3235_v2 = vadd.f32 %v3234_v58, %v2946_v35  ;;  %v2949_v4 = vadd.f32 %v2948_v3, %v5494_v52  ;;  %v2950_v1 = vpop.f32.mrb[187].mxu0  ;;  %v3239_v29 = vpop.f32.mrb[187].mxu1 }
 0x2af   :  { %4654 = vst [vmem:[%s6047_s3 + $0x68] sm:$0xff] %v4550_v12   ;;  %v3607_v16 = vadd.f32 %v5781_v19, %v3235_v2  ;;  %v3238_v43 = vadd.f32 %v3237_v39, %v2949_v4 }
 0x2b1   :  { %v3608_v37 = vadd.f32 %v5781_v19, %v3238_v43  ;;  %v3671_v13 = vmax.f32 %v3607_v16, 0.0 }
 0x2b2   :  { %v2953_v8 = vpop.f32.mrb[188].mxu0  ;;  %v3242_v54 = vpop.f32.mrb[188].mxu1 }
 0x2b3   :  { %v3672_v50 = vmax.f32 %v3608_v37, 0.0  ;;  %v2954_v17 = vadd.f32 %v2953_v8, %v5508_v5  ;;  %v2955_v62 = vpop.f32.mrb[189].mxu0  ;;  %v3244_v52 = vpop.f32.mrb[189].mxu1  ;;  %v6075_v37 = vld [vmem:[#allocation9_spill] sm:$0xff] }
 0x2b4   :  { %v2956_v63 = vpop.f32.mrb[190].mxu0  ;;  %v3245_v28 = vpop.f32.mrb[190].mxu1 }
 0x2b5   :  { %v4555_v24 = vpack.c.bf16 %v3672_v50, %v3671_v13  ;;  %v3243_v18 = vadd.f32 %v3242_v54, %v2954_v17  ;;  %v2957_v25 = vadd.f32 %v2956_v63, %v5510_v20  ;;  %v2958_v41 = vpop.f32.mrb[191].mxu0  ;;  %v3247_v27 = vpop.f32.mrb[191].mxu1 }
 0x2b7   :  { %4655 = vst [vmem:[%s6047_s3 + $0x70] sm:$0xff] %v4555_v24   ;;  %v3609_v57 = vadd.f32 %v5781_v19, %v3243_v18  ;;  %v3246_v15 = vadd.f32 %v3245_v28, %v2957_v25  ;;  %v6076_v18 = vld [vmem:[#allocation10_spill] sm:$0xff] }
 0x2b9   :  { %v3610_v5 = vadd.f32 %v5781_v19, %v3246_v15  ;;  %v3673_v51 = vmax.f32 %v3609_v57, 0.0 }
 0x2ba   :  { %v2961_v33 = vpop.f32.mrb[192].mxu0  ;;  %v3250_v30 = vpop.f32.mrb[192].mxu1 }
 0x2bb   :  { %v3674_v21 = vmax.f32 %v3610_v5, 0.0  ;;  %v2962_v49 = vadd.f32 %v2961_v33, %v5524_v38  ;;  %v2963_v44 = vpop.f32.mrb[193].mxu0  ;;  %v3252_v20 = vpop.f32.mrb[193].mxu1  ;;  %v6077_v33 = vld [vmem:[#allocation11_spill] sm:$0xff] }
 0x2bc   :  { %v2964_v36 = vpop.f32.mrb[194].mxu0  ;;  %v3253_v59 = vpop.f32.mrb[194].mxu1 }
 0x2bd   :  { %v4560_v45 = vpack.c.bf16 %v3674_v21, %v3673_v51  ;;  %v3251_v0 = vadd.f32 %v3250_v30, %v2962_v49  ;;  %v2965_v46 = vadd.f32 %v2964_v36, %v5526_v60  ;;  %v2966_v53 = vpop.f32.mrb[195].mxu0  ;;  %v3255_v56 = vpop.f32.mrb[195].mxu1 }
 0x2bf   :  { %4656 = vst [vmem:[%s6047_s3 + $0x78] sm:$0xff] %v4560_v45   ;;  %v3611_v42 = vadd.f32 %v5781_v19, %v3251_v0  ;;  %v3254_v10 = vadd.f32 %v3253_v59, %v2965_v46  ;;  %v6078_v59 = vld [vmem:[#allocation12_spill] sm:$0xff] }
 0x2c1   :  { %v3612_v38 = vadd.f32 %v5781_v19, %v3254_v10  ;;  %v3675_v61 = vmax.f32 %v3611_v42, 0.0 }
 0x2c2   :  { %v2969_v40 = vpop.f32.mrb[196].mxu0  ;;  %v3258_v6 = vpop.f32.mrb[196].mxu1 }
 0x2c3   :  { %v3676_v32 = vmax.f32 %v3612_v38, 0.0  ;;  %v2970_v48 = vadd.f32 %v2969_v40, %v5540_v11  ;;  %v2971_v14 = vpop.f32.mrb[197].mxu0  ;;  %v3260_v60 = vpop.f32.mrb[197].mxu1 }
 0x2c4   :  { %v2972_v23 = vpop.f32.mrb[198].mxu0  ;;  %v3261_v31 = vpop.f32.mrb[198].mxu1 }
 0x2c5   :  { %v4565_v9 = vpack.c.bf16 %v3676_v32, %v3675_v61  ;;  %v3259_v26 = vadd.f32 %v3258_v6, %v2970_v48  ;;  %v2973_v55 = vadd.f32 %v2972_v23, %v5542_v34  ;;  %v2974_v35 = vpop.f32.mrb[199].mxu0  ;;  %v3263_v58 = vpop.f32.mrb[199].mxu1  ;;  %v6079_v32 = vld [vmem:[#allocation13_spill] sm:$0xff] }
 0x2c6   :  { %v6080_v58 = vld [vmem:[#allocation14_spill] sm:$0xff] }
 0x2c7   :  { %4657 = vst [vmem:[%s6047_s3 + $0x80] sm:$0xff] %v4565_v9   ;;  %v3613_v7 = vadd.f32 %v5781_v19, %v3259_v26  ;;  %v3262_v22 = vadd.f32 %v3261_v31, %v2973_v55 }
 0x2c9   :  { %v3614_v11 = vadd.f32 %v5781_v19, %v3262_v22  ;;  %v3677_v12 = vmax.f32 %v3613_v7, 0.0 }
 0x2ca   :  { %v2977_v3 = vpop.f32.mrb[200].mxu0  ;;  %v3266_v39 = vpop.f32.mrb[200].mxu1 }
 0x2cb   :  { %v3678_v2 = vmax.f32 %v3614_v11, 0.0  ;;  %v2978_v4 = vadd.f32 %v2977_v3, %v5556_v47  ;;  %v2979_v1 = vpop.f32.mrb[201].mxu0  ;;  %v3268_v34 = vpop.f32.mrb[201].mxu1 }
 0x2cc   :  { %v2980_v29 = vpop.f32.mrb[202].mxu0  ;;  %v3269_v13 = vpop.f32.mrb[202].mxu1 }
 0x2cd   :  { %v4570_v16 = vpack.c.bf16 %v3678_v2, %v3677_v12  ;;  %v3267_v43 = vadd.f32 %v3266_v39, %v2978_v4  ;;  %v2981_v8 = vadd.f32 %v2980_v29, %v6075_v37  ;;  %v2982_v50 = vpop.f32.mrb[203].mxu0  ;;  %v3271_v17 = vpop.f32.mrb[203].mxu1  ;;  %v6081_v39 = vld [vmem:[#allocation15_spill] sm:$0xff] }
 0x2cf   :  { %4658 = vst [vmem:[%s6047_s3 + $0x88] sm:$0xff] %v4570_v16   ;;  %v3615_v54 = vadd.f32 %v5781_v19, %v3267_v43  ;;  %v3270_v62 = vadd.f32 %v3269_v13, %v2981_v8 }
 0x2d1   :  { %v3616_v47 = vadd.f32 %v5781_v19, %v3270_v62  ;;  %v3679_v63 = vmax.f32 %v3615_v54, 0.0  ;;  %v6082_v54 = vld [vmem:[#allocation16_spill] sm:$0xff] }
 0x2d2   :  { %v2985_v52 = vpop.f32.mrb[204].mxu0  ;;  %v3274_v28 = vpop.f32.mrb[204].mxu1 }
 0x2d3   :  { %v3680_v24 = vmax.f32 %v3616_v47, 0.0  ;;  %v2986_v25 = vadd.f32 %v2985_v52, %v6076_v18  ;;  %v2987_v41 = vpop.f32.mrb[205].mxu0  ;;  %v3276_v27 = vpop.f32.mrb[205].mxu1 }
 0x2d4   :  { %v2988_v57 = vpop.f32.mrb[206].mxu0  ;;  %v3277_v21 = vpop.f32.mrb[206].mxu1 }
 0x2d5   :  { %v4575_v15 = vpack.c.bf16 %v3680_v24, %v3679_v63  ;;  %v3275_v5 = vadd.f32 %v3274_v28, %v2986_v25  ;;  %v2989_v51 = vadd.f32 %v2988_v57, %v6077_v33  ;;  %v2990_v49 = vpop.f32.mrb[207].mxu0  ;;  %v3279_v30 = vpop.f32.mrb[207].mxu1  ;;  %v6083_v28 = vld [vmem:[#allocation17_spill] sm:$0xff] }
 0x2d7   :  { %4659 = vst [vmem:[%s6047_s3 + $0x90] sm:$0xff] %v4575_v15   ;;  %v3617_v44 = vadd.f32 %v5781_v19, %v3275_v5  ;;  %v3278_v20 = vadd.f32 %v3277_v21, %v2989_v51 }
 0x2d9   :  { %v3618_v36 = vadd.f32 %v5781_v19, %v3278_v20  ;;  %v3681_v0 = vmax.f32 %v3617_v44, 0.0  ;;  %v6084_v44 = vld [vmem:[#allocation18_spill] sm:$0xff] }
 0x2da   :  { %v2993_v45 = vpop.f32.mrb[208].mxu0  ;;  %v3282_v56 = vpop.f32.mrb[208].mxu1 }
 0x2db   :  { %v3682_v46 = vmax.f32 %v3618_v36, 0.0  ;;  %v2994_v53 = vadd.f32 %v2993_v45, %v6078_v59  ;;  %v2995_v42 = vpop.f32.mrb[209].mxu0  ;;  %v3284_v10 = vpop.f32.mrb[209].mxu1 }
 0x2dc   :  { %v2996_v38 = vpop.f32.mrb[210].mxu0  ;;  %v3285_v6 = vpop.f32.mrb[210].mxu1 }
 0x2dd   :  { %v4580_v40 = vpack.c.bf16 %v3682_v46, %v3681_v0  ;;  %v3283_v61 = vadd.f32 %v3282_v56, %v2994_v53  ;;  %v2997_v48 = vadd.f32 %v2996_v38, %v6079_v32  ;;  %v2998_v14 = vpop.f32.mrb[211].mxu0  ;;  %v3287_v60 = vpop.f32.mrb[211].mxu1  ;;  %v6085_v56 = vld [vmem:[#allocation19_spill] sm:$0xff] }
 0x2df   :  { %4660 = vst [vmem:[%s6047_s3 + $0x98] sm:$0xff] %v4580_v40   ;;  %v3619_v23 = vadd.f32 %v5781_v19, %v3283_v61  ;;  %v3286_v9 = vadd.f32 %v3285_v6, %v2997_v48 }
 0x2e1   :  { %v3620_v26 = vadd.f32 %v5781_v19, %v3286_v9  ;;  %v3683_v31 = vmax.f32 %v3619_v23, 0.0  ;;  %v6086_v23 = vld [vmem:[#allocation20_spill] sm:$0xff] }
 0x2e2   :  { %v3001_v55 = vpop.f32.mrb[212].mxu0  ;;  %v3290_v22 = vpop.f32.mrb[212].mxu1 }
 0x2e3   :  { %v3684_v35 = vmax.f32 %v3620_v26, 0.0  ;;  %v3002_v7 = vadd.f32 %v3001_v55, %v6080_v58  ;;  %v3003_v11 = vpop.f32.mrb[213].mxu0  ;;  %v3292_v3 = vpop.f32.mrb[213].mxu1 }
 0x2e4   :  { %v3004_v12 = vpop.f32.mrb[214].mxu0  ;;  %v3293_v34 = vpop.f32.mrb[214].mxu1 }
 0x2e5   :  { %v4585_v2 = vpack.c.bf16 %v3684_v35, %v3683_v31  ;;  %v3291_v4 = vadd.f32 %v3290_v22, %v3002_v7  ;;  %v3005_v1 = vadd.f32 %v3004_v12, %v6081_v39  ;;  %v3006_v29 = vpop.f32.mrb[215].mxu0  ;;  %v3295_v16 = vpop.f32.mrb[215].mxu1  ;;  %v6087_v22 = vld [vmem:[#allocation21_spill] sm:$0xff] }
 0x2e7   :  { %4661 = vst [vmem:[%s6047_s3 + $0xa0] sm:$0xff] %v4585_v2   ;;  %v3621_v43 = vadd.f32 %v5781_v19, %v3291_v4  ;;  %v3294_v37 = vadd.f32 %v3293_v34, %v3005_v1 }
 0x2e9   :  { %v3622_v8 = vadd.f32 %v5781_v19, %v3294_v37  ;;  %v3685_v50 = vmax.f32 %v3621_v43, 0.0  ;;  %v6088_v43 = vld [vmem:[#allocation22_spill] sm:$0xff] }
 0x2ea   :  { %v3009_v13 = vpop.f32.mrb[216].mxu0  ;;  %v3298_v47 = vpop.f32.mrb[216].mxu1 }
 0x2eb   :  { %v3686_v17 = vmax.f32 %v3622_v8, 0.0  ;;  %v3010_v62 = vadd.f32 %v3009_v13, %v6082_v54  ;;  %v3011_v52 = vpop.f32.mrb[217].mxu0  ;;  %v3300_v63 = vpop.f32.mrb[217].mxu1 }
 0x2ec   :  { %v3012_v24 = vpop.f32.mrb[218].mxu0  ;;  %v3301_v27 = vpop.f32.mrb[218].mxu1 }
 0x2ed   :  { %v4590_v18 = vpack.c.bf16 %v3686_v17, %v3685_v50  ;;  %v3299_v25 = vadd.f32 %v3298_v47, %v3010_v62  ;;  %v3013_v41 = vadd.f32 %v3012_v24, %v6083_v28  ;;  %v3014_v57 = vpop.f32.mrb[219].mxu0  ;;  %v3303_v15 = vpop.f32.mrb[219].mxu1  ;;  %v6089_v47 = vld [vmem:[#allocation23_spill] sm:$0xff] }
 0x2ef   :  { %4662 = vst [vmem:[%s6047_s3 + $0xa8] sm:$0xff] %v4590_v18   ;;  %v3623_v5 = vadd.f32 %v5781_v19, %v3299_v25  ;;  %v3302_v33 = vadd.f32 %v3301_v27, %v3013_v41 }
 0x2f1   :  { %v3624_v51 = vadd.f32 %v5781_v19, %v3302_v33  ;;  %v3687_v49 = vmax.f32 %v3623_v5, 0.0  ;;  %v6090_v5 = vld [vmem:[#allocation24_spill] sm:$0xff] }
 0x2f2   :  { %v3017_v21 = vpop.f32.mrb[220].mxu0  ;;  %v3306_v36 = vpop.f32.mrb[220].mxu1 }
 0x2f3   :  { %v3688_v30 = vmax.f32 %v3624_v51, 0.0  ;;  %v3018_v20 = vadd.f32 %v3017_v21, %v6084_v44  ;;  %v3019_v45 = vpop.f32.mrb[221].mxu0  ;;  %v3308_v0 = vpop.f32.mrb[221].mxu1 }
 0x2f4   :  { %v3020_v46 = vpop.f32.mrb[222].mxu0  ;;  %v3309_v10 = vpop.f32.mrb[222].mxu1 }
 0x2f5   :  { %v4595_v59 = vpack.c.bf16 %v3688_v30, %v3687_v49  ;;  %v3307_v53 = vadd.f32 %v3306_v36, %v3018_v20  ;;  %v3021_v42 = vadd.f32 %v3020_v46, %v6085_v56  ;;  %v3022_v38 = vpop.f32.mrb[223].mxu0  ;;  %v3311_v40 = vpop.f32.mrb[223].mxu1  ;;  %v6091_v36 = vld [vmem:[#allocation25_spill] sm:$0xff] }
 0x2f7   :  { %4663 = vst [vmem:[%s6047_s3 + $0xb0] sm:$0xff] %v4595_v59   ;;  %v3625_v61 = vadd.f32 %v5781_v19, %v3307_v53  ;;  %v3310_v32 = vadd.f32 %v3309_v10, %v3021_v42 }
 0x2f9   :  { %v3626_v48 = vadd.f32 %v5781_v19, %v3310_v32  ;;  %v3689_v14 = vmax.f32 %v3625_v61, 0.0  ;;  %v6092_v61 = vld [vmem:[#allocation26_spill] sm:$0xff] }
 0x2fa   :  { %v3025_v6 = vpop.f32.mrb[224].mxu0  ;;  %v3314_v26 = vpop.f32.mrb[224].mxu1 }
 0x2fb   :  { %v3690_v60 = vmax.f32 %v3626_v48, 0.0  ;;  %v3026_v9 = vadd.f32 %v3025_v6, %v6086_v23  ;;  %v3027_v55 = vpop.f32.mrb[225].mxu0  ;;  %v3316_v31 = vpop.f32.mrb[225].mxu1 }
 0x2fc   :  { %v3028_v35 = vpop.f32.mrb[226].mxu0  ;;  %v3317_v3 = vpop.f32.mrb[226].mxu1 }
 0x2fd   :  { %v4600_v58 = vpack.c.bf16 %v3690_v60, %v3689_v14  ;;  %v3315_v7 = vadd.f32 %v3314_v26, %v3026_v9  ;;  %v3029_v11 = vadd.f32 %v3028_v35, %v6087_v22  ;;  %v3030_v12 = vpop.f32.mrb[227].mxu0  ;;  %v3319_v2 = vpop.f32.mrb[227].mxu1  ;;  %v6093_v26 = vld [vmem:[#allocation27_spill] sm:$0xff] }
 0x2ff   :  { %4664 = vst [vmem:[%s6047_s3 + $0xb8] sm:$0xff] %v4600_v58   ;;  %v3627_v4 = vadd.f32 %v5781_v19, %v3315_v7  ;;  %v3318_v39 = vadd.f32 %v3317_v3, %v3029_v11 }
 0x301   :  { %v3628_v1 = vadd.f32 %v5781_v19, %v3318_v39  ;;  %v3691_v29 = vmax.f32 %v3627_v4, 0.0  ;;  %v6094_v4 = vld [vmem:[#allocation28_spill] sm:$0xff] }
 0x302   :  { %v3033_v34 = vpop.f32.mrb[228].mxu0  ;;  %v3322_v8 = vpop.f32.mrb[228].mxu1 }
 0x303   :  { %v3692_v16 = vmax.f32 %v3628_v1, 0.0  ;;  %v3034_v37 = vadd.f32 %v3033_v34, %v6088_v43  ;;  %v3035_v13 = vpop.f32.mrb[229].mxu0  ;;  %v3324_v50 = vpop.f32.mrb[229].mxu1 }
 0x304   :  { %v3036_v17 = vpop.f32.mrb[230].mxu0  ;;  %v3325_v63 = vpop.f32.mrb[230].mxu1 }
 0x305   :  { %v4605_v54 = vpack.c.bf16 %v3692_v16, %v3691_v29  ;;  %v3323_v62 = vadd.f32 %v3322_v8, %v3034_v37  ;;  %v3037_v52 = vadd.f32 %v3036_v17, %v6089_v47  ;;  %v3038_v24 = vpop.f32.mrb[231].mxu0  ;;  %v3327_v18 = vpop.f32.mrb[231].mxu1  ;;  %v6095_v8 = vld [vmem:[#allocation29_spill] sm:$0xff] }
 0x307   :  { %4665 = vst [vmem:[%s6047_s3 + $0xc0] sm:$0xff] %v4605_v54   ;;  %v3629_v25 = vadd.f32 %v5781_v19, %v3323_v62  ;;  %v3326_v28 = vadd.f32 %v3325_v63, %v3037_v52 }
 0x309   :  { %v3630_v41 = vadd.f32 %v5781_v19, %v3326_v28  ;;  %v3693_v57 = vmax.f32 %v3629_v25, 0.0  ;;  %v6002_v19 = vld [vmem:[#allocation5] ss:$0 sm:$0xff]  ;;  %v6096_v25 = vld [vmem:[#allocation30_spill] sm:$0xff] }
 0x30a   :  { %v3041_v27 = vpop.f32.mrb[232].mxu0  ;;  %v3330_v51 = vpop.f32.mrb[232].mxu1 }
 0x30b   :  { %v3694_v15 = vmax.f32 %v3630_v41, 0.0  ;;  %v3042_v33 = vadd.f32 %v3041_v27, %v6090_v5  ;;  %v3043_v21 = vpop.f32.mrb[233].mxu0  ;;  %v3332_v49 = vpop.f32.mrb[233].mxu1 }
 0x30c   :  { %v3044_v30 = vpop.f32.mrb[234].mxu0  ;;  %v3333_v0 = vpop.f32.mrb[234].mxu1 }
 0x30d   :  { %v4610_v44 = vpack.c.bf16 %v3694_v15, %v3693_v57  ;;  %v3331_v20 = vadd.f32 %v3330_v51, %v3042_v33  ;;  %v3045_v45 = vadd.f32 %v3044_v30, %v6091_v36  ;;  %v3046_v46 = vpop.f32.mrb[235].mxu0  ;;  %v3335_v59 = vpop.f32.mrb[235].mxu1  ;;  %v6097_v51 = vld [vmem:[#allocation31_spill] sm:$0xff] }
 0x30f   :  { %4666 = vst [vmem:[%s6047_s3 + $0xc8] sm:$0xff] %v4610_v44   ;;  %v3631_v53 = vadd.f32 %v6002_v19, %v3331_v20  ;;  %v3334_v56 = vadd.f32 %v3333_v0, %v3045_v45 }
 0x311   :  { %v3632_v42 = vadd.f32 %v6002_v19, %v3334_v56  ;;  %v3695_v38 = vmax.f32 %v3631_v53, 0.0  ;;  %v6098_v53 = vld [vmem:[#allocation32_spill] sm:$0xff] }
 0x312   :  { %v3049_v10 = vpop.f32.mrb[236].mxu0  ;;  %v3338_v48 = vpop.f32.mrb[236].mxu1 }
 0x313   :  { %v3696_v40 = vmax.f32 %v3632_v42, 0.0  ;;  %v3050_v32 = vadd.f32 %v3049_v10, %v6092_v61  ;;  %v3051_v6 = vpop.f32.mrb[237].mxu0  ;;  %v3340_v14 = vpop.f32.mrb[237].mxu1 }
 0x314   :  { %v3052_v60 = vpop.f32.mrb[238].mxu0  ;;  %v3341_v31 = vpop.f32.mrb[238].mxu1 }
 0x315   :  { %v4615_v23 = vpack.c.bf16 %v3696_v40, %v3695_v38  ;;  %v3339_v9 = vadd.f32 %v3338_v48, %v3050_v32  ;;  %v3053_v55 = vadd.f32 %v3052_v60, %v6093_v26  ;;  %v3054_v35 = vpop.f32.mrb[239].mxu0  ;;  %v3343_v58 = vpop.f32.mrb[239].mxu1  ;;  %v6099_v48 = vld [vmem:[#allocation33_spill] sm:$0xff] }
 0x317   :  { %4667 = vst [vmem:[%s6047_s3 + $0xd0] sm:$0xff] %v4615_v23   ;;  %v3633_v7 = vadd.f32 %v6002_v19, %v3339_v9  ;;  %v3342_v22 = vadd.f32 %v3341_v31, %v3053_v55 }
 0x319   :  { %v3634_v11 = vadd.f32 %v6002_v19, %v3342_v22  ;;  %v3697_v12 = vmax.f32 %v3633_v7, 0.0  ;;  %v6100_v7 = vld [vmem:[#allocation34_spill] sm:$0xff] }
 0x31a   :  { %v3057_v3 = vpop.f32.mrb[240].mxu0  ;;  %v3346_v1 = vpop.f32.mrb[240].mxu1 }
 0x31b   :  { %v3698_v2 = vmax.f32 %v3634_v11, 0.0  ;;  %v3058_v39 = vadd.f32 %v3057_v3, %v6094_v4  ;;  %v3059_v34 = vpop.f32.mrb[241].mxu0  ;;  %v3348_v29 = vpop.f32.mrb[241].mxu1 }
 0x31c   :  { %v3060_v16 = vpop.f32.mrb[242].mxu0  ;;  %v3349_v50 = vpop.f32.mrb[242].mxu1 }
 0x31d   :  { %v4620_v43 = vpack.c.bf16 %v3698_v2, %v3697_v12  ;;  %v3347_v37 = vadd.f32 %v3346_v1, %v3058_v39  ;;  %v3061_v13 = vadd.f32 %v3060_v16, %v6095_v8  ;;  %v3062_v17 = vpop.f32.mrb[243].mxu0  ;;  %v3351_v54 = vpop.f32.mrb[243].mxu1  ;;  %v6101_v1 = vld [vmem:[#allocation35_spill] sm:$0xff] }
 0x31f   :  { %4668 = vst [vmem:[%s6047_s3 + $0xd8] sm:$0xff] %v4620_v43   ;;  %v3635_v62 = vadd.f32 %v6002_v19, %v3347_v37  ;;  %v3350_v47 = vadd.f32 %v3349_v50, %v3061_v13 }
 0x321   :  { %v3636_v52 = vadd.f32 %v6002_v19, %v3350_v47  ;;  %v3699_v24 = vmax.f32 %v3635_v62, 0.0 }
 0x322   :  { %v3065_v63 = vpop.f32.mrb[244].mxu0  ;;  %v3354_v41 = vpop.f32.mrb[244].mxu1 }
 0x323   :  { %v3700_v18 = vmax.f32 %v3636_v52, 0.0  ;;  %v3066_v28 = vadd.f32 %v3065_v63, %v6096_v25  ;;  %v3067_v27 = vpop.f32.mrb[245].mxu0  ;;  %v3356_v57 = vpop.f32.mrb[245].mxu1 }
 0x324   :  { %v3068_v15 = vpop.f32.mrb[246].mxu0  ;;  %v3357_v49 = vpop.f32.mrb[246].mxu1 }
 0x325   :  { %v4625_v5 = vpack.c.bf16 %v3700_v18, %v3699_v24  ;;  %v3355_v33 = vadd.f32 %v3354_v41, %v3066_v28  ;;  %v3069_v21 = vadd.f32 %v3068_v15, %v6097_v51  ;;  %v3070_v30 = vpop.f32.mrb[247].mxu0  ;;  %v3359_v44 = vpop.f32.mrb[247].mxu1 }
 0x327   :  { %4669 = vst [vmem:[%s6047_s3 + $0xe0] sm:$0xff] %v4625_v5   ;;  %v3637_v20 = vadd.f32 %v6002_v19, %v3355_v33  ;;  %v3358_v36 = vadd.f32 %v3357_v49, %v3069_v21 }
 0x329   :  { %v3638_v45 = vadd.f32 %v6002_v19, %v3358_v36  ;;  %v3701_v46 = vmax.f32 %v3637_v20, 0.0 }
 0x32a   :  { %v3073_v0 = vpop.f32.mrb[248].mxu0  ;;  %v3362_v42 = vpop.f32.mrb[248].mxu1 }
 0x32b   :  { %v3702_v59 = vmax.f32 %v3638_v45, 0.0  ;;  %v3074_v56 = vadd.f32 %v3073_v0, %v6098_v53  ;;  %v3075_v10 = vpop.f32.mrb[249].mxu0  ;;  %v3364_v38 = vpop.f32.mrb[249].mxu1 }
 0x32c   :  { %v3076_v40 = vpop.f32.mrb[250].mxu0  ;;  %v3365_v14 = vpop.f32.mrb[250].mxu1 }
 0x32d   :  { %v4630_v61 = vpack.c.bf16 %v3702_v59, %v3701_v46  ;;  %v3363_v32 = vadd.f32 %v3362_v42, %v3074_v56  ;;  %v3077_v6 = vadd.f32 %v3076_v40, %v6099_v48  ;;  %v3078_v60 = vpop.f32.mrb[251].mxu0  ;;  %v3367_v23 = vpop.f32.mrb[251].mxu1 }
 0x32f   :  { %4670 = vst [vmem:[%s6047_s3 + $0xe8] sm:$0xff] %v4630_v61   ;;  %v3639_v9 = vadd.f32 %v6002_v19, %v3363_v32  ;;  %v3366_v26 = vadd.f32 %v3365_v14, %v3077_v6 }
 0x331   :  { %v3640_v55 = vadd.f32 %v6002_v19, %v3366_v26  ;;  %v3703_v35 = vmax.f32 %v3639_v9, 0.0 }
 0x332   :  { %v3081_v31 = vpop.f32.mrb[252].mxu0  ;;  %v3370_v11 = vpop.f32.mrb[252].mxu1 }
 0x333   :  { %v3704_v58 = vmax.f32 %v3640_v55, 0.0  ;;  %v3082_v22 = vadd.f32 %v3081_v31, %v6100_v7  ;;  %v3083_v3 = vpop.f32.mrb[253].mxu0  ;;  %v3372_v12 = vpop.f32.mrb[253].mxu1 }
 0x334   :  { %v3084_v2 = vpop.f32.mrb[254].mxu0  ;;  %v3373_v29 = vpop.f32.mrb[254].mxu1 }
 0x335   :  { %v4635_v4 = vpack.c.bf16 %v3704_v58, %v3703_v35  ;;  %v3371_v39 = vadd.f32 %v3370_v11, %v3082_v22  ;;  %v3085_v34 = vadd.f32 %v3084_v2, %v6101_v1  ;;  %v3086_v16 = vpop.f32.mrb[255].mxu0  ;;  %v3375_v43 = vpop.f32.mrb[255].mxu1 }
 0x337   :  { %4671 = vst [vmem:[%s6047_s3 + $0xf0] sm:$0xff] %v4635_v4   ;;  %v3641_v37 = vadd.f32 %v6002_v19, %v3371_v39  ;;  %v3374_v8 = vadd.f32 %v3373_v29, %v3085_v34 }
 0x339   :  { %v3642_v13 = vadd.f32 %v6002_v19, %v3374_v8  ;;  %v3705_v50 = vmax.f32 %v3641_v37, 0.0 }
 0x33b   :  { %v3706_v17 = vmax.f32 %v3642_v13, 0.0 }
 0x33d   :  { %v4640_v54 = vpack.c.bf16 %v3706_v17, %v3705_v50 }
 0x33f   :  { %4672 = vst [vmem:[%s6047_s3 + $0xf8] sm:$0xff] %v4640_v54  }
 0x340   :  { %4031 = vsyncpa [#allocation4], 1 }
 0x341   :  { %4032 = vsyncpa [#allocation6], 1 }

// kernel: encoder_pallas.7
= control target key start
LH: loop header
LB: loop body
LE: loop exit
PB: predicated region body
PF: predicated region fallthrough
CT: control target
= control target key end

     0   :  { %8 = vsyncpa [#allocation4], 0  ;;  %s5201_s0 = inlined_call_operand.vmem [shape: bf16[128,2048], index: 0, kind: input, shape index: {}]   ;;  %s5202_s1 = inlined_call_operand.hbm [shape: bf16[2048,256], index: 1, kind: input, shape index: {}]   ;;  %s5203_s2 = inlined_call_operand.hbm [shape: f32[1,256], index: 2, kind: input, shape index: {}]   ;;  %s5204_s3 = inlined_call_operand.vmem [shape: bf16[128,256], index: 3, kind: output, shape index: {}]  }
   0x1   :  { %9 = vsyncpa [#allocation6], 0  ;;  %s4685_s12 = smov [#allocation3]   ;;  %s4637_s16 = scalar_lea.hbm %s5202_s1, 32768 }
   0x2   :  { %s17_s13 = sshll.u32 %s4685_s12, 4  ;;  %p4638_p0 = scmp.ne.s32.totalorder %s5202_s1, %s4637_s16  ;;  %s18_s13 = int_to_ptr.vmem [resolvable:$true] %s17_s13 }
   0x3   :  { %p4641_p1 = scmp.lt.u32.totalorder %s4637_s16, %s5202_s1 }
   0x5   :  { %p4643_p2 = pnand %p4641_p1, %p4638_p0 }
   0x7   :  { %4646 = shalt.err (!%p4643_p2)
}
   0x8   :  { %s4647_s21 = scalar_lea.vmem %s18_s13, 32768  ;;  %p4652_p4 = scmp.lt.s32.totalorder %s18_s13, %s18_s13 }
   0x9   :  { %p4648_p3 = scmp.ne.s32.totalorder %s18_s13, %s4647_s21  ;;  %p4653_p5 = scmp.lt.s32.totalorder %s4647_s21, %s4647_s21 }
   0xb   :  { %p4654_p6 = por %p4653_p5, %p4652_p4 }
   0xd   :  { %p4655_p7 = pnand %p4654_p6, %p4648_p3 }
   0xf   :  { %4658 = shalt.err (!%p4655_p7)
}
  0x10   :  { %s4686_s22 = smov 128   ;;  %s4687_s23 = smov 8  }
  0x11   :  { %23 = dma.hbm_to_vmem [thread:$0]  %s5202_s1, 32768, %s18_s13, [#allocation4], %s4686_s22, %s4686_s22, %s4687_s23  }
  0x12   :  { %s4688_s26 = smov [#allocation5]   ;;  %s4659_s30 = scalar_lea.hbm %s5203_s2, 32 }
  0x13   :  { %s30_s27 = sshll.u32 %s4688_s26, 4  ;;  %p4660_p8 = scmp.ne.s32.totalorder %s5203_s2, %s4659_s30  ;;  %s31_s27 = int_to_ptr.vmem [resolvable:$true] %s30_s27 }
  0x14   :  { %p4663_p9 = scmp.lt.u32.totalorder %s4659_s30, %s5203_s2 }
  0x16   :  { %p4665_p10 = pnand %p4663_p9, %p4660_p8 }
  0x18   :  { %4668 = shalt.err (!%p4665_p10)
}
  0x19   :  { %s4669_s8 = scalar_lea.vmem %s31_s27, 32  ;;  %p4674_p12 = scmp.lt.s32.totalorder %s31_s27, %s31_s27 }
  0x1a   :  { %p4670_p11 = scmp.ne.s32.totalorder %s31_s27, %s4669_s8  ;;  %p4675_p13 = scmp.lt.s32.totalorder %s4669_s8, %s4669_s8 }
  0x1c   :  { %p4676_p0 = por %p4675_p13, %p4674_p12 }
  0x1e   :  { %p4677_p1 = pnand %p4676_p0, %p4670_p11 }
  0x20   :  { %4680 = shalt.err (!%p4677_p1)
}
  0x21   :  { %33 = dma.hbm_to_vmem [thread:$0]  %s5203_s2, 32, %s31_s27, [#allocation6]  }
  0x22   :  { %4681 = dma.done.wait [#allocation4], 32768  }
  0x23   :  { %4682 = vsyncadd [#allocation4], 4294934528 }
  0x24   :  { %4683 = dma.done.wait [#allocation6], 32  }
  0x25   :  { %4684 = vsyncadd [#allocation6], 4294967264  ;;  %v4253_v0 = vld [vmem:[#allocation3 + $0x4] ss:$8 sps:$4 sm:$0xff]   ;;  %v4257_v2 = vld [vmem:[#allocation3] ss:$8 sps:$4 sm:$0xff]  }
  0x26   :  { %v4255_v1 = vld [vmem:[#allocation3 + $0x404] ss:$8 sps:$4 sm:$0xff]   ;;  %2412 = vmatprep.subr.bf16.mxu1 %v4253_v0  ;;  %v4258_v3 = vld [vmem:[#allocation3 + $0x400] ss:$8 sps:$4 sm:$0xff]   ;;  %v4259_v4 = vld [vmem:[#allocation3 + $0x14] ss:$8 sps:$4 sm:$0xff]  }
  0x27   :  { %2864 = vmatprep.subr.bf16.mxu0 %v4255_v1  ;;  %2413 = vmatpush1.bf16.msra.mxu1 %v4257_v2  ;;  %v4261_v5 = vld [vmem:[#allocation3 + $0x414] ss:$8 sps:$4 sm:$0xff]   ;;  %v4263_v6 = vld [vmem:[#allocation3 + $0x10] ss:$8 sps:$4 sm:$0xff]   ;;  %v4265_v8 = vld [vmem:[#allocation3 + $0x24] ss:$8 sps:$4 sm:$0xff]  }
  0x28   :  { %2865 = vmatpush1.bf16.msra.mxu0 %v4258_v3  ;;  %2414 = vmatprep.subr.bf16.mxu1 %v4259_v4  ;;  %v4264_v7 = vld [vmem:[#allocation3 + $0x410] ss:$8 sps:$4 sm:$0xff]   ;;  %v4267_v9 = vld [vmem:[#allocation3 + $0x424] ss:$8 sps:$4 sm:$0xff]   ;;  %v4269_v10 = vld [vmem:[#allocation3 + $0x20] ss:$8 sps:$4 sm:$0xff]  }
  0x29   :  { %2866 = vmatprep.subr.bf16.mxu0 %v4261_v5  ;;  %v4270_v11 = vld [vmem:[#allocation3 + $0x420] ss:$8 sps:$4 sm:$0xff]   ;;  %v4271_v12 = vld [vmem:[#allocation3 + $0x34] ss:$8 sps:$4 sm:$0xff]   ;;  %v4275_v14 = vld [vmem:[#allocation3 + $0x30] ss:$8 sps:$4 sm:$0xff]  }
  0x2a   :  { %v4273_v13 = vld [vmem:[#allocation3 + $0x434] ss:$8 sps:$4 sm:$0xff]   ;;  %v4276_v15 = vld [vmem:[#allocation3 + $0x430] ss:$8 sps:$4 sm:$0xff]   ;;  %v4277_v16 = vld [vmem:[#allocation3 + $0x44] ss:$8 sps:$4 sm:$0xff]  }
  0x2b   :  { %2415 = vmatpush1.bf16.msra.mxu1 %v4263_v6  ;;  %v4279_v17 = vld [vmem:[#allocation3 + $0x444] ss:$8 sps:$4 sm:$0xff]   ;;  %v4281_v18 = vld [vmem:[#allocation3 + $0x40] ss:$8 sps:$4 sm:$0xff]   ;;  %v4283_v20 = vld [vmem:[#allocation3 + $0x54] ss:$8 sps:$4 sm:$0xff]  }
  0x2c   :  { %2867 = vmatpush1.bf16.msra.mxu0 %v4264_v7  ;;  %2416 = vmatprep.subr.bf16.mxu1 %v4265_v8  ;;  %v4282_v19 = vld [vmem:[#allocation3 + $0x440] ss:$8 sps:$4 sm:$0xff]   ;;  %v4285_v21 = vld [vmem:[#allocation3 + $0x454] ss:$8 sps:$4 sm:$0xff]   ;;  %v4287_v22 = vld [vmem:[#allocation3 + $0x50] ss:$8 sps:$4 sm:$0xff]  }
  0x2d   :  { %2868 = vmatprep.subr.bf16.mxu0 %v4267_v9  ;;  %v4288_v23 = vld [vmem:[#allocation3 + $0x450] ss:$8 sps:$4 sm:$0xff]   ;;  %v4289_v24 = vld [vmem:[#allocation3 + $0x64] ss:$8 sps:$4 sm:$0xff]   ;;  %v4293_v26 = vld [vmem:[#allocation3 + $0x60] ss:$8 sps:$4 sm:$0xff]  }
  0x2e   :  { %v4291_v25 = vld [vmem:[#allocation3 + $0x464] ss:$8 sps:$4 sm:$0xff]   ;;  %v4294_v27 = vld [vmem:[#allocation3 + $0x460] ss:$8 sps:$4 sm:$0xff]   ;;  %v4295_v28 = vld [vmem:[#allocation3 + $0x74] ss:$8 sps:$4 sm:$0xff]  }
  0x2f   :  { %2417 = vmatpush1.bf16.msra.mxu1 %v4269_v10  ;;  %v4297_v29 = vld [vmem:[#allocation3 + $0x474] ss:$8 sps:$4 sm:$0xff]   ;;  %v4299_v30 = vld [vmem:[#allocation3 + $0x70] ss:$8 sps:$4 sm:$0xff]   ;;  %v4301_v32 = vld [vmem:[#allocation3 + $0x84] ss:$8 sps:$4 sm:$0xff]  }
  0x30   :  { %2869 = vmatpush1.bf16.msra.mxu0 %v4270_v11  ;;  %2418 = vmatprep.subr.bf16.mxu1 %v4271_v12  ;;  %v4300_v31 = vld [vmem:[#allocation3 + $0x470] ss:$8 sps:$4 sm:$0xff]   ;;  %v4303_v33 = vld [vmem:[#allocation3 + $0x484] ss:$8 sps:$4 sm:$0xff]   ;;  %v4305_v34 = vld [vmem:[#allocation3 + $0x80] ss:$8 sps:$4 sm:$0xff]  }
  0x31   :  { %2870 = vmatprep.subr.bf16.mxu0 %v4273_v13  ;;  %v4306_v35 = vld [vmem:[#allocation3 + $0x480] ss:$8 sps:$4 sm:$0xff]   ;;  %v4307_v36 = vld [vmem:[#allocation3 + $0x94] ss:$8 sps:$4 sm:$0xff]   ;;  %v4311_v38 = vld [vmem:[#allocation3 + $0x90] ss:$8 sps:$4 sm:$0xff]  }
  0x32   :  { %v4309_v37 = vld [vmem:[#allocation3 + $0x494] ss:$8 sps:$4 sm:$0xff]   ;;  %v4312_v39 = vld [vmem:[#allocation3 + $0x490] ss:$8 sps:$4 sm:$0xff]   ;;  %v4313_v40 = vld [vmem:[#allocation3 + $0xa4] ss:$8 sps:$4 sm:$0xff]  }
  0x33   :  { %2419 = vmatpush1.bf16.msra.mxu1 %v4275_v14  ;;  %v4315_v41 = vld [vmem:[#allocation3 + $0x4a4] ss:$8 sps:$4 sm:$0xff]   ;;  %v4317_v42 = vld [vmem:[#allocation3 + $0xa0] ss:$8 sps:$4 sm:$0xff]   ;;  %v4319_v44 = vld [vmem:[#allocation3 + $0xb4] ss:$8 sps:$4 sm:$0xff]  }
  0x34   :  { %2871 = vmatpush1.bf16.msra.mxu0 %v4276_v15  ;;  %2420 = vmatprep.subr.bf16.mxu1 %v4277_v16  ;;  %v4318_v43 = vld [vmem:[#allocation3 + $0x4a0] ss:$8 sps:$4 sm:$0xff]   ;;  %v4321_v45 = vld [vmem:[#allocation3 + $0x4b4] ss:$8 sps:$4 sm:$0xff]   ;;  %v4323_v46 = vld [vmem:[#allocation3 + $0xb0] ss:$8 sps:$4 sm:$0xff]  }
  0x35   :  { %2872 = vmatprep.subr.bf16.mxu0 %v4279_v17  ;;  %v4324_v47 = vld [vmem:[#allocation3 + $0x4b0] ss:$8 sps:$4 sm:$0xff]   ;;  %v108_v48 = vld [vmem:[%s5201_s0] sm:$0xff]  ;;  %v4331_v58 = vld [vmem:[#allocation3 + $0xd4] ss:$8 sps:$4 sm:$0xff]  }
  0x36   :  { %v116_v49 = vld [vmem:[%s5201_s0 + $0x40] sm:$0xff]  ;;  %v4333_v59 = vld [vmem:[#allocation3 + $0x4d4] ss:$8 sps:$4 sm:$0xff]   ;;  %v4335_v60 = vld [vmem:[#allocation3 + $0xd0] ss:$8 sps:$4 sm:$0xff]  }
  0x37   :  { %2421 = vmatpush1.bf16.msra.mxu1 %v4281_v18  ;;  %v112_v50 = vld [vmem:[%s5201_s0 + $0x20] sm:$0xff]  ;;  %v3610_v53 = vcombine.high %v108_v48, %v116_v49  ;;  %v4336_v61 = vld [vmem:[#allocation3 + $0x4d0] ss:$8 sps:$4 sm:$0xff]   ;;  %v4343_v2 = vld [vmem:[#allocation3 + $0xf4] ss:$8 sps:$4 sm:$0xff]   ;;  %v3609_v11 = vcombine.low %v108_v48, %v116_v49 }
  0x38   :  { %2873 = vmatpush1.bf16.msra.mxu0 %v4282_v19  ;;  %2422 = vmatprep.subr.bf16.mxu1 %v4283_v20  ;;  %v120_v51 = vld [vmem:[%s5201_s0 + $0x60] sm:$0xff]  ;;  %v4345_v3 = vld [vmem:[#allocation3 + $0x4f4] ss:$8 sps:$4 sm:$0xff]   ;;  %v4347_v4 = vld [vmem:[#allocation3 + $0xf0] ss:$8 sps:$4 sm:$0xff]  }
  0x39   :  { %2874 = vmatprep.subr.bf16.mxu0 %v4285_v21  ;;  %v4325_v52 = vld [vmem:[#allocation3 + $0xc4] ss:$8 sps:$4 sm:$0xff]   ;;  %v3618_v55 = vcombine.high %v112_v50, %v120_v51  ;;  %2444 = vmatprep.mubr.bf16.mxu1 %v3610_v53  ;;  %v4329_v56 = vld [vmem:[#allocation3 + $0xc0] ss:$8 sps:$4 sm:$0xff]   ;;  %v4348_v5 = vld [vmem:[#allocation3 + $0x4f0] ss:$8 sps:$4 sm:$0xff]   ;;  %v3617_v12 = vcombine.low %v112_v50, %v120_v51 }
  0x3a   :  { %v4327_v54 = vld [vmem:[#allocation3 + $0x4c4] ss:$8 sps:$4 sm:$0xff]   ;;  %v4330_v57 = vld [vmem:[#allocation3 + $0x4c0] ss:$8 sps:$4 sm:$0xff]   ;;  %v4357_v16 = vld [vmem:[#allocation3 + $0x114] ss:$8 sps:$4 sm:$0xff]  }
  0x3b   :  { %2423 = vmatpush1.bf16.msra.mxu1 %v4287_v22  ;;  %2896 = vmatprep.mubr.bf16.mxu0 %v3618_v55  ;;  %v4337_v62 = vld [vmem:[#allocation3 + $0xe4] ss:$8 sps:$4 sm:$0xff]   ;;  %v4341_v0 = vld [vmem:[#allocation3 + $0xe0] ss:$8 sps:$4 sm:$0xff]   ;;  %v4360_v17 = vld [vmem:[#allocation3 + $0x514] ss:$8 sps:$4 sm:$0xff]  }
  0x3c   :  { %2875 = vmatpush1.bf16.msra.mxu0 %v4288_v23  ;;  %2424 = vmatprep.subr.bf16.mxu1 %v4289_v24  ;;  %v4339_v63 = vld [vmem:[#allocation3 + $0x4e4] ss:$8 sps:$4 sm:$0xff]   ;;  %v4342_v1 = vld [vmem:[#allocation3 + $0x4e0] ss:$8 sps:$4 sm:$0xff]   ;;  %v4355_v20 = vld [vmem:[#allocation3 + $0x110] ss:$8 sps:$4 sm:$0xff]  }
  0x3d   :  { %2876 = vmatprep.subr.bf16.mxu0 %v4291_v25  ;;  %v4351_v6 = vld [vmem:[#allocation3 + $0x104] ss:$8 sps:$4 sm:$0xff]   ;;  %v4349_v8 = vld [vmem:[#allocation3 + $0x100] ss:$8 sps:$4 sm:$0xff]   ;;  %v4358_v21 = vld [vmem:[#allocation3 + $0x510] ss:$8 sps:$4 sm:$0xff]  }
  0x3e   :  { %v4354_v7 = vld [vmem:[#allocation3 + $0x504] ss:$8 sps:$4 sm:$0xff]   ;;  %v4352_v9 = vld [vmem:[#allocation3 + $0x500] ss:$8 sps:$4 sm:$0xff]   ;;  %v4381_v48 = vld [vmem:[#allocation3 + $0x154] ss:$8 sps:$4 sm:$0xff]  }
  0x3f   :  { %2425 = vmatpush1.bf16.msra.mxu1 %v4293_v26  ;;  %v124_v10 = vld [vmem:[%s5201_s0 + $0x80] sm:$0xff]  ;;  %v4384_v49 = vld [vmem:[#allocation3 + $0x554] ss:$8 sps:$4 sm:$0xff]   ;;  %v4382_v53 = vld [vmem:[#allocation3 + $0x550] ss:$8 sps:$4 sm:$0xff]  }
  0x40   :  { %2877 = vmatpush1.bf16.msra.mxu0 %v4294_v27  ;;  %2426 = vmatprep.subr.bf16.mxu1 %v4295_v28  ;;  %v132_v13 = vld [vmem:[%s5201_s0 + $0xc0] sm:$0xff] }
  0x41   :  { %2878 = vmatprep.subr.bf16.mxu0 %v4297_v29  ;;  %v128_v14 = vld [vmem:[%s5201_s0 + $0xa0] sm:$0xff]  ;;  %v3626_v18 = vcombine.high %v124_v10, %v132_v13  ;;  %v3625_v28 = vcombine.low %v124_v10, %v132_v13 }
  0x42   :  { %v136_v15 = vld [vmem:[%s5201_s0 + $0xe0] sm:$0xff] }
  0x43   :  { %2427 = vmatpush1.bf16.msra.mxu1 %v4299_v30  ;;  %v3634_v19 = vcombine.high %v128_v14, %v136_v15  ;;  %v4363_v22 = vld [vmem:[#allocation3 + $0x124] ss:$8 sps:$4 sm:$0xff]   ;;  %v4361_v24 = vld [vmem:[#allocation3 + $0x120] ss:$8 sps:$4 sm:$0xff]   ;;  %v3633_v29 = vcombine.low %v128_v14, %v136_v15 }
  0x44   :  { %2879 = vmatpush1.bf16.msra.mxu0 %v4300_v31  ;;  %2428 = vmatprep.subr.bf16.mxu1 %v4301_v32  ;;  %v4366_v23 = vld [vmem:[#allocation3 + $0x524] ss:$8 sps:$4 sm:$0xff]   ;;  %v4364_v25 = vld [vmem:[#allocation3 + $0x520] ss:$8 sps:$4 sm:$0xff]   ;;  %v4369_v32 = vld [vmem:[#allocation3 + $0x134] ss:$8 sps:$4 sm:$0xff]  }
  0x45   :  { %2880 = vmatprep.subr.bf16.mxu0 %v4303_v33  ;;  %v140_v26 = vld [vmem:[%s5201_s0 + $0x100] sm:$0xff]  ;;  %v4372_v33 = vld [vmem:[#allocation3 + $0x534] ss:$8 sps:$4 sm:$0xff]  }
  0x46   :  { %v148_v27 = vld [vmem:[%s5201_s0 + $0x140] sm:$0xff] }
  0x47   :  { %2429 = vmatpush1.bf16.msra.mxu1 %v4305_v34  ;;  %v144_v30 = vld [vmem:[%s5201_s0 + $0x120] sm:$0xff]  ;;  %v3642_v34 = vcombine.high %v140_v26, %v148_v27 }
  0x48   :  { %2881 = vmatpush1.bf16.msra.mxu0 %v4306_v35  ;;  %2430 = vmatprep.subr.bf16.mxu1 %v4307_v36  ;;  %v152_v31 = vld [vmem:[%s5201_s0 + $0x160] sm:$0xff]  ;;  %v4367_v36 = vld [vmem:[#allocation3 + $0x130] ss:$8 sps:$4 sm:$0xff]  }
  0x49   :  { %2882 = vmatprep.subr.bf16.mxu0 %v4309_v37  ;;  %v3650_v35 = vcombine.high %v144_v30, %v152_v31  ;;  %v4370_v37 = vld [vmem:[#allocation3 + $0x530] ss:$8 sps:$4 sm:$0xff]   ;;  %v4390_v55 = vld [vmem:[#allocation3 + $0x564] ss:$8 sps:$4 sm:$0xff]   ;;  %v4397_v14 = vld [vmem:[#allocation3 + $0x180] ss:$8 sps:$4 sm:$0xff]  }
  0x4a   :  { %v200_v13 = vld [vmem:[%s5201_s0 + $0x2e0] sm:$0xff] }
  0x4b   :  { %2431 = vmatpush1.bf16.msra.mxu1 %v4311_v38  ;;  %v4375_v38 = vld [vmem:[#allocation3 + $0x144] ss:$8 sps:$4 sm:$0xff]   ;;  %v4400_v15 = vld [vmem:[#allocation3 + $0x580] ss:$8 sps:$4 sm:$0xff]  }
  0x4c   :  { %2883 = vmatpush1.bf16.msra.mxu0 %v4312_v39  ;;  %2432 = vmatprep.subr.bf16.mxu1 %v4313_v40  ;;  %v4378_v39 = vld [vmem:[#allocation3 + $0x544] ss:$8 sps:$4 sm:$0xff]   ;;  %v4373_v40 = vld [vmem:[#allocation3 + $0x140] ss:$8 sps:$4 sm:$0xff]  }
  0x4d   :  { %2884 = vmatprep.subr.bf16.mxu0 %v4315_v41  ;;  %v4376_v41 = vld [vmem:[#allocation3 + $0x540] ss:$8 sps:$4 sm:$0xff]  }
  0x4f   :  { %2433 = vmatpush1.bf16.msra.mxu1 %v4317_v42  ;;  %v156_v42 = vld [vmem:[%s5201_s0 + $0x180] sm:$0xff] }
  0x50   :  { %2885 = vmatpush1.bf16.msra.mxu0 %v4318_v43  ;;  %2434 = vmatprep.subr.bf16.mxu1 %v4319_v44  ;;  %v164_v43 = vld [vmem:[%s5201_s0 + $0x1c0] sm:$0xff]  ;;  %v3641_v44 = vcombine.low %v140_v26, %v148_v27 }
  0x51   :  { %2886 = vmatprep.subr.bf16.mxu0 %v4321_v45  ;;  %v3649_v45 = vcombine.low %v144_v30, %v152_v31  ;;  %v3658_v50 = vcombine.high %v156_v42, %v164_v43  ;;  %v204_v26 = vld [vmem:[%s5201_s0 + $0x300] sm:$0xff] }
  0x52   :  { %v208_v30 = vld [vmem:[%s5201_s0 + $0x320] sm:$0xff] }
  0x53   :  { %2435 = vmatpush1.bf16.msra.mxu1 %v4323_v46  ;;  %v160_v46 = vld [vmem:[%s5201_s0 + $0x1a0] sm:$0xff] }
  0x54   :  { %2887 = vmatpush1.bf16.msra.mxu0 %v4324_v47  ;;  %2436 = vmatprep.subr.bf16.mxu1 %v4325_v52  ;;  %v168_v47 = vld [vmem:[%s5201_s0 + $0x1e0] sm:$0xff]  ;;  %v4379_v52 = vld [vmem:[#allocation3 + $0x150] ss:$8 sps:$4 sm:$0xff]  }
  0x55   :  { %2888 = vmatprep.subr.bf16.mxu0 %v4327_v54  ;;  %v3666_v51 = vcombine.high %v160_v46, %v168_v47  ;;  %v4387_v54 = vld [vmem:[#allocation3 + $0x164] ss:$8 sps:$4 sm:$0xff]  }
  0x56   :  { %v216_v31 = vld [vmem:[%s5201_s0 + $0x360] sm:$0xff] }
  0x57   :  { %2437 = vmatpush1.bf16.msra.mxu1 %v4329_v56  ;;  %v4385_v56 = vld [vmem:[#allocation3 + $0x160] ss:$8 sps:$4 sm:$0xff]  }
  0x58   :  { %2889 = vmatpush1.bf16.msra.mxu0 %v4330_v57  ;;  %2438 = vmatprep.subr.bf16.mxu1 %v4331_v58  ;;  %v172_v57 = vld [vmem:[%s5201_s0 + $0x200] sm:$0xff] }
  0x59   :  { %2890 = vmatprep.subr.bf16.mxu0 %v4333_v59  ;;  %v180_v58 = vld [vmem:[%s5201_s0 + $0x240] sm:$0xff]  ;;  %v3657_v59 = vcombine.low %v156_v42, %v164_v43 }
  0x5a   :  { %v3673_v10 = vcombine.low %v172_v57, %v180_v58  ;;  %v220_v42 = vld [vmem:[%s5201_s0 + $0x380] sm:$0xff] }
  0x5b   :  { %2439 = vmatpush1.bf16.msra.mxu1 %v4335_v60  ;;  %v3665_v60 = vcombine.low %v160_v46, %v168_v47  ;;  %v228_v43 = vld [vmem:[%s5201_s0 + $0x3c0] sm:$0xff] }
  0x5c   :  { %2891 = vmatpush1.bf16.msra.mxu0 %v4336_v61  ;;  %2440 = vmatprep.subr.bf16.mxu1 %v4337_v62  ;;  %v176_v61 = vld [vmem:[%s5201_s0 + $0x220] sm:$0xff] }
  0x5d   :  { %2892 = vmatprep.subr.bf16.mxu0 %v4339_v63  ;;  %v184_v62 = vld [vmem:[%s5201_s0 + $0x260] sm:$0xff] }
  0x5e   :  { %v4388_v63 = vld [vmem:[#allocation3 + $0x560] ss:$8 sps:$4 sm:$0xff]  }
  0x5f   :  { %2441 = vmatpush1.bf16.msra.mxu1 %v4341_v0  ;;  %v4393_v0 = vld [vmem:[#allocation3 + $0x174] ss:$8 sps:$4 sm:$0xff]   ;;  %v224_v46 = vld [vmem:[%s5201_s0 + $0x3a0] sm:$0xff] }
  0x60   :  { %2893 = vmatpush1.bf16.msra.mxu0 %v4342_v1  ;;  %2442 = vmatprep.subr.bf16.mxu1 %v4343_v2  ;;  %v4396_v1 = vld [vmem:[#allocation3 + $0x574] ss:$8 sps:$4 sm:$0xff]   ;;  %v3674_v2 = vcombine.high %v172_v57, %v180_v58  ;;  %v232_v47 = vld [vmem:[%s5201_s0 + $0x3e0] sm:$0xff]  ;;  %v109_v58 = vld [vmem:[%s5201_s0 + $0x8] sm:$0xff] }
  0x61   :  { %2894 = vmatprep.subr.bf16.mxu0 %v4345_v3  ;;  %v3682_v3 = vcombine.high %v176_v61, %v184_v62  ;;  %v4436_v57 = vld [vmem:[#allocation3 + $0x5e0] ss:$8 sps:$4 sm:$0xff]  }
  0x63   :  { %2443 = vmatpush1.bf16.msra.mxu1 %v4347_v4  ;;  %v4391_v4 = vld [vmem:[#allocation3 + $0x170] ss:$8 sps:$4 sm:$0xff]  }
  0x64   :  { %2895 = vmatpush1.bf16.msra.mxu0 %v4348_v5  ;;  %2525 = vmatprep.subr.bf16.mxu1 %v4351_v6  ;;  %v4394_v5 = vld [vmem:[#allocation3 + $0x570] ss:$8 sps:$4 sm:$0xff]   ;;  %v4399_v6 = vld [vmem:[#allocation3 + $0x184] ss:$8 sps:$4 sm:$0xff]  }
  0x65   :  { %2977 = vmatprep.subr.bf16.mxu0 %v4354_v7  ;;  %v4402_v7 = vld [vmem:[#allocation3 + $0x584] ss:$8 sps:$4 sm:$0xff]  }
  0x66   :  { %2445 = vmatmul.mubr.bf16.vlgmr.msra.gmra.mrb[0].mxu1 %v3609_v11  ;;  %v3681_v11 = vcombine.low %v176_v61, %v184_v62  ;;  %v3729_v61 = vcombine.low %v224_v46, %v232_v47  ;;  %v113_v62 = vld [vmem:[%s5201_s0 + $0x28] sm:$0xff] }
  0x67   :  { %2897 = vmatmul.mubr.bf16.vlgmr.msra.gmra.mrb[0].mxu0 %v3617_v12  ;;  %2526 = vmatpush1.bf16.msra.mxu1 %v4349_v8  ;;  %v188_v8 = vld [vmem:[%s5201_s0 + $0x280] sm:$0xff] }
  0x68   :  { %2978 = vmatpush1.bf16.msra.mxu0 %v4352_v9  ;;  %2527 = vmatprep.subr.bf16.mxu1 %v4357_v16  ;;  %v196_v9 = vld [vmem:[%s5201_s0 + $0x2c0] sm:$0xff]  ;;  %v4405_v16 = vld [vmem:[#allocation3 + $0x194] ss:$8 sps:$4 sm:$0xff]  }
  0x69   :  { %2979 = vmatprep.subr.bf16.mxu0 %v4360_v17  ;;  %2454 = vmatprep.mubr.bf16.mxu1 %v3626_v18  ;;  %v192_v12 = vld [vmem:[%s5201_s0 + $0x2a0] sm:$0xff]  ;;  %v4408_v17 = vld [vmem:[#allocation3 + $0x594] ss:$8 sps:$4 sm:$0xff]   ;;  %v3690_v18 = vcombine.high %v188_v8, %v196_v9  ;;  %v3689_v27 = vcombine.low %v188_v8, %v196_v9  ;;  %v125_v9 = vld [vmem:[%s5201_s0 + $0x88] sm:$0xff] }
  0x6a   :  { %2906 = vmatprep.mubr.bf16.mxu0 %v3634_v19  ;;  %v3698_v19 = vcombine.high %v192_v12, %v200_v13  ;;  %v4445_v8 = vld [vmem:[#allocation3 + $0x200] ss:$8 sps:$4 sm:$0xff]  }
  0x6b   :  { %2528 = vmatpush1.bf16.msra.mxu1 %v4355_v20  ;;  %v4403_v20 = vld [vmem:[#allocation3 + $0x190] ss:$8 sps:$4 sm:$0xff]  }
  0x6c   :  { %2980 = vmatpush1.bf16.msra.mxu0 %v4358_v21  ;;  %2529 = vmatprep.subr.bf16.mxu1 %v4363_v22  ;;  %v4406_v21 = vld [vmem:[#allocation3 + $0x590] ss:$8 sps:$4 sm:$0xff]   ;;  %v4411_v22 = vld [vmem:[#allocation3 + $0x1a4] ss:$8 sps:$4 sm:$0xff]  }
  0x6d   :  { %2981 = vmatprep.subr.bf16.mxu0 %v4366_v23  ;;  %v4414_v23 = vld [vmem:[#allocation3 + $0x5a4] ss:$8 sps:$4 sm:$0xff]  }
  0x6e   :  { %2455 = vmatmul.mubr.bf16.gmra.mrb[4].mxu1 %v3625_v28  ;;  %v3697_v28 = vcombine.low %v192_v12, %v200_v13  ;;  %v129_v13 = vld [vmem:[%s5201_s0 + $0xa8] sm:$0xff] }
  0x6f   :  { %2907 = vmatmul.mubr.bf16.gmra.mrb[4].mxu0 %v3633_v29  ;;  %2530 = vmatpush1.bf16.msra.mxu1 %v4361_v24  ;;  %v4409_v24 = vld [vmem:[#allocation3 + $0x1a0] ss:$8 sps:$4 sm:$0xff]  }
  0x70   :  { %2982 = vmatpush1.bf16.msra.mxu0 %v4364_v25  ;;  %2531 = vmatprep.subr.bf16.mxu1 %v4369_v32  ;;  %v4412_v25 = vld [vmem:[#allocation3 + $0x5a0] ss:$8 sps:$4 sm:$0xff]   ;;  %v4417_v32 = vld [vmem:[#allocation3 + $0x1b4] ss:$8 sps:$4 sm:$0xff]  }
  0x71   :  { %2983 = vmatprep.subr.bf16.mxu0 %v4372_v33  ;;  %2464 = vmatprep.mubr.bf16.mxu1 %v3642_v34  ;;  %v212_v29 = vld [vmem:[%s5201_s0 + $0x340] sm:$0xff]  ;;  %v4420_v33 = vld [vmem:[#allocation3 + $0x5b4] ss:$8 sps:$4 sm:$0xff]  }
  0x72   :  { %2916 = vmatprep.mubr.bf16.mxu0 %v3650_v35  ;;  %v3706_v34 = vcombine.high %v204_v26, %v212_v29  ;;  %v3714_v35 = vcombine.high %v208_v30, %v216_v31 }
  0x73   :  { %2532 = vmatpush1.bf16.msra.mxu1 %v4367_v36  ;;  %v4415_v36 = vld [vmem:[#allocation3 + $0x1b0] ss:$8 sps:$4 sm:$0xff]  }
  0x74   :  { %2984 = vmatpush1.bf16.msra.mxu0 %v4370_v37  ;;  %2533 = vmatprep.subr.bf16.mxu1 %v4375_v38  ;;  %v4418_v37 = vld [vmem:[#allocation3 + $0x5b0] ss:$8 sps:$4 sm:$0xff]   ;;  %v4423_v38 = vld [vmem:[#allocation3 + $0x1c4] ss:$8 sps:$4 sm:$0xff]  }
  0x75   :  { %2985 = vmatprep.subr.bf16.mxu0 %v4378_v39  ;;  %v4426_v39 = vld [vmem:[#allocation3 + $0x5c4] ss:$8 sps:$4 sm:$0xff]  }
  0x76   :  { %2465 = vmatmul.mubr.bf16.gmra.mrb[8].mxu1 %v3641_v44  ;;  %v3705_v44 = vcombine.low %v204_v26, %v212_v29  ;;  %v153_v29 = vld [vmem:[%s5201_s0 + $0x168] sm:$0xff] }
  0x77   :  { %2917 = vmatmul.mubr.bf16.gmra.mrb[8].mxu0 %v3649_v45  ;;  %2534 = vmatpush1.bf16.msra.mxu1 %v4373_v40  ;;  %v4421_v40 = vld [vmem:[#allocation3 + $0x1c0] ss:$8 sps:$4 sm:$0xff]   ;;  %v3713_v45 = vcombine.low %v208_v30, %v216_v31 }
  0x78   :  { %2986 = vmatpush1.bf16.msra.mxu0 %v4376_v41  ;;  %2535 = vmatprep.subr.bf16.mxu1 %v4381_v48  ;;  %v4424_v41 = vld [vmem:[#allocation3 + $0x5c0] ss:$8 sps:$4 sm:$0xff]   ;;  %v4429_v48 = vld [vmem:[#allocation3 + $0x1d4] ss:$8 sps:$4 sm:$0xff]  }
  0x79   :  { %2987 = vmatprep.subr.bf16.mxu0 %v4384_v49  ;;  %2474 = vmatprep.mubr.bf16.mxu1 %v3658_v50  ;;  %v4432_v49 = vld [vmem:[#allocation3 + $0x5d4] ss:$8 sps:$4 sm:$0xff]   ;;  %v3722_v50 = vcombine.high %v220_v42, %v228_v43  ;;  %v4457_v30 = vld [vmem:[#allocation3 + $0x220] ss:$8 sps:$4 sm:$0xff]  }
  0x7a   :  { %2926 = vmatprep.mubr.bf16.mxu0 %v3666_v51  ;;  %v3730_v51 = vcombine.high %v224_v46, %v232_v47  ;;  %v4460_v31 = vld [vmem:[#allocation3 + $0x620] ss:$8 sps:$4 sm:$0xff]  }
  0x7b   :  { %2536 = vmatpush1.bf16.msra.mxu1 %v4379_v52  ;;  %v4427_v52 = vld [vmem:[#allocation3 + $0x1d0] ss:$8 sps:$4 sm:$0xff]   ;;  %v161_v46 = vld [vmem:[%s5201_s0 + $0x1a8] sm:$0xff] }
  0x7c   :  { %2988 = vmatpush1.bf16.msra.mxu0 %v4382_v53  ;;  %2537 = vmatprep.subr.bf16.mxu1 %v4387_v54  ;;  %v4430_v53 = vld [vmem:[#allocation3 + $0x5d0] ss:$8 sps:$4 sm:$0xff]   ;;  %v4435_v54 = vld [vmem:[#allocation3 + $0x1e4] ss:$8 sps:$4 sm:$0xff]  }
  0x7d   :  { %2989 = vmatprep.subr.bf16.mxu0 %v4390_v55  ;;  %v4438_v55 = vld [vmem:[#allocation3 + $0x5e4] ss:$8 sps:$4 sm:$0xff]  }
  0x7e   :  { %2475 = vmatmul.mubr.bf16.gmra.mrb[12].mxu1 %v3657_v59  ;;  %v117_v59 = vld [vmem:[%s5201_s0 + $0x48] sm:$0xff] }
  0x7f   :  { %2927 = vmatmul.mubr.bf16.gmra.mrb[12].mxu0 %v3665_v60  ;;  %2538 = vmatpush1.bf16.msra.mxu1 %v4385_v56  ;;  %v4433_v56 = vld [vmem:[#allocation3 + $0x1e0] ss:$8 sps:$4 sm:$0xff]   ;;  %v3721_v60 = vcombine.low %v220_v42, %v228_v43 }
  0x80   :  { %2990 = vmatpush1.bf16.msra.mxu0 %v4388_v63  ;;  %2539 = vmatprep.subr.bf16.mxu1 %v4393_v0  ;;  %v121_v63 = vld [vmem:[%s5201_s0 + $0x68] sm:$0xff]  ;;  %v4441_v0 = vld [vmem:[#allocation3 + $0x1f4] ss:$8 sps:$4 sm:$0xff]  }
  0x81   :  { %2991 = vmatprep.subr.bf16.mxu0 %v4396_v1  ;;  %2484 = vmatprep.mubr.bf16.mxu1 %v3674_v2  ;;  %v4444_v1 = vld [vmem:[#allocation3 + $0x5f4] ss:$8 sps:$4 sm:$0xff]   ;;  %v3612_v2 = vcombine.high %v109_v58, %v117_v59  ;;  %v3619_v12 = vcombine.low %v113_v62, %v121_v63  ;;  %v157_v42 = vld [vmem:[%s5201_s0 + $0x188] sm:$0xff] }
  0x82   :  { %2936 = vmatprep.mubr.bf16.mxu0 %v3682_v3  ;;  %v3620_v3 = vcombine.high %v113_v62, %v121_v63  ;;  %v169_v47 = vld [vmem:[%s5201_s0 + $0x1e8] sm:$0xff] }
  0x83   :  { %2540 = vmatpush1.bf16.msra.mxu1 %v4391_v4  ;;  %v4439_v4 = vld [vmem:[#allocation3 + $0x1f0] ss:$8 sps:$4 sm:$0xff]   ;;  %v177_v62 = vld [vmem:[%s5201_s0 + $0x228] sm:$0xff] }
  0x84   :  { %2992 = vmatpush1.bf16.msra.mxu0 %v4394_v5  ;;  %2541 = vmatprep.subr.bf16.mxu1 %v4399_v6  ;;  %v4442_v5 = vld [vmem:[#allocation3 + $0x5f0] ss:$8 sps:$4 sm:$0xff]   ;;  %v4447_v6 = vld [vmem:[#allocation3 + $0x204] ss:$8 sps:$4 sm:$0xff]  }
  0x85   :  { %2993 = vmatprep.subr.bf16.mxu0 %v4402_v7  ;;  %v4450_v7 = vld [vmem:[#allocation3 + $0x604] ss:$8 sps:$4 sm:$0xff]  }
  0x86   :  { %2485 = vmatmul.mubr.bf16.gmra.mrb[16].mxu1 %v3673_v10  ;;  %v133_v10 = vld [vmem:[%s5201_s0 + $0xc8] sm:$0xff] }
  0x87   :  { %2937 = vmatmul.mubr.bf16.gmra.mrb[16].mxu0 %v3681_v11  ;;  %2542 = vmatpush1.bf16.msra.mxu1 %v4397_v14  ;;  %v3611_v11 = vcombine.low %v109_v58, %v117_v59  ;;  %v137_v14 = vld [vmem:[%s5201_s0 + $0xe8] sm:$0xff]  ;;  %v3627_v26 = vcombine.low %v125_v9, %v133_v10 }
  0x88   :  { %2994 = vmatpush1.bf16.msra.mxu0 %v4400_v15  ;;  %2543 = vmatprep.subr.bf16.mxu1 %v4405_v16  ;;  %v4448_v15 = vld [vmem:[#allocation3 + $0x600] ss:$8 sps:$4 sm:$0xff]   ;;  %v4453_v16 = vld [vmem:[#allocation3 + $0x214] ss:$8 sps:$4 sm:$0xff]  }
  0x89   :  { %2995 = vmatprep.subr.bf16.mxu0 %v4408_v17  ;;  %2494 = vmatprep.mubr.bf16.mxu1 %v3690_v18  ;;  %v4456_v17 = vld [vmem:[#allocation3 + $0x614] ss:$8 sps:$4 sm:$0xff]   ;;  %v3628_v18 = vcombine.high %v125_v9, %v133_v10  ;;  %v173_v58 = vld [vmem:[%s5201_s0 + $0x208] sm:$0xff] }
  0x8a   :  { %2946 = vmatprep.mubr.bf16.mxu0 %v3698_v19  ;;  %v3636_v19 = vcombine.high %v129_v13, %v137_v14  ;;  %v181_v59 = vld [vmem:[%s5201_s0 + $0x248] sm:$0xff] }
  0x8b   :  { %2544 = vmatpush1.bf16.msra.mxu1 %v4403_v20  ;;  %v4451_v20 = vld [vmem:[#allocation3 + $0x210] ss:$8 sps:$4 sm:$0xff]   ;;  %v185_v63 = vld [vmem:[%s5201_s0 + $0x268] sm:$0xff] }
  0x8c   :  { %2996 = vmatpush1.bf16.msra.mxu0 %v4406_v21  ;;  %2545 = vmatprep.subr.bf16.mxu1 %v4411_v22  ;;  %v4454_v21 = vld [vmem:[#allocation3 + $0x610] ss:$8 sps:$4 sm:$0xff]   ;;  %v4459_v22 = vld [vmem:[#allocation3 + $0x224] ss:$8 sps:$4 sm:$0xff]   ;;  %v4496_v9 = vld [vmem:[#allocation3 + $0x680] ss:$8 sps:$4 sm:$0xff]  }
  0x8d   :  { %2997 = vmatprep.subr.bf16.mxu0 %v4414_v23  ;;  %v4462_v23 = vld [vmem:[#allocation3 + $0x624] ss:$8 sps:$4 sm:$0xff]  }
  0x8e   :  { %2495 = vmatmul.mubr.bf16.gmra.mrb[20].mxu1 %v3689_v27  ;;  %v3635_v27 = vcombine.low %v129_v13, %v137_v14  ;;  %v189_v10 = vld [vmem:[%s5201_s0 + $0x288] sm:$0xff]  ;;  %v3683_v13 = vcombine.low %v177_v62, %v185_v63 }
  0x8f   :  { %2947 = vmatmul.mubr.bf16.gmra.mrb[20].mxu0 %v3697_v28  ;;  %2546 = vmatpush1.bf16.msra.mxu1 %v4409_v24  ;;  %v141_v24 = vld [vmem:[%s5201_s0 + $0x108] sm:$0xff] }
  0x90   :  { %2998 = vmatpush1.bf16.msra.mxu0 %v4412_v25  ;;  %2547 = vmatprep.subr.bf16.mxu1 %v4417_v32  ;;  %v149_v25 = vld [vmem:[%s5201_s0 + $0x148] sm:$0xff]  ;;  %v4465_v32 = vld [vmem:[#allocation3 + $0x234] ss:$8 sps:$4 sm:$0xff]  }
  0x91   :  { %2999 = vmatprep.subr.bf16.mxu0 %v4420_v33  ;;  %2504 = vmatprep.mubr.bf16.mxu1 %v3706_v34  ;;  %v145_v28 = vld [vmem:[%s5201_s0 + $0x128] sm:$0xff]  ;;  %v4468_v33 = vld [vmem:[#allocation3 + $0x634] ss:$8 sps:$4 sm:$0xff]   ;;  %v3644_v34 = vcombine.high %v141_v24, %v149_v25  ;;  %v3643_v43 = vcombine.low %v141_v24, %v149_v25 }
  0x92   :  { %2956 = vmatprep.mubr.bf16.mxu0 %v3714_v35  ;;  %v3652_v35 = vcombine.high %v145_v28, %v153_v29  ;;  %v193_v14 = vld [vmem:[%s5201_s0 + $0x2a8] sm:$0xff] }
  0x93   :  { %2548 = vmatpush1.bf16.msra.mxu1 %v4415_v36  ;;  %v4463_v36 = vld [vmem:[#allocation3 + $0x230] ss:$8 sps:$4 sm:$0xff]   ;;  %v4505_v24 = vld [vmem:[#allocation3 + $0x2a0] ss:$8 sps:$4 sm:$0xff]  }
  0x94   :  { %3000 = vmatpush1.bf16.msra.mxu0 %v4418_v37  ;;  %2549 = vmatprep.subr.bf16.mxu1 %v4423_v38  ;;  %v4466_v37 = vld [vmem:[#allocation3 + $0x630] ss:$8 sps:$4 sm:$0xff]   ;;  %v4471_v38 = vld [vmem:[#allocation3 + $0x244] ss:$8 sps:$4 sm:$0xff]  }
  0x95   :  { %3001 = vmatprep.subr.bf16.mxu0 %v4426_v39  ;;  %v4474_v39 = vld [vmem:[#allocation3 + $0x644] ss:$8 sps:$4 sm:$0xff]  }
  0x96   :  { %2505 = vmatmul.mubr.bf16.gmra.mrb[24].mxu1 %v3705_v44  ;;  %v3651_v44 = vcombine.low %v145_v28, %v153_v29  ;;  %v205_v25 = vld [vmem:[%s5201_s0 + $0x308] sm:$0xff] }
  0x97   :  { %2957 = vmatmul.mubr.bf16.gmra.mrb[24].mxu0 %v3713_v45  ;;  %2550 = vmatpush1.bf16.msra.mxu1 %v4421_v40  ;;  %v4469_v40 = vld [vmem:[#allocation3 + $0x240] ss:$8 sps:$4 sm:$0xff]  }
  0x98   :  { %3002 = vmatpush1.bf16.msra.mxu0 %v4424_v41  ;;  %2551 = vmatprep.subr.bf16.mxu1 %v4429_v48  ;;  %v4472_v41 = vld [vmem:[#allocation3 + $0x640] ss:$8 sps:$4 sm:$0xff]   ;;  %v4477_v48 = vld [vmem:[#allocation3 + $0x254] ss:$8 sps:$4 sm:$0xff]  }
  0x99   :  { %3003 = vmatprep.subr.bf16.mxu0 %v4432_v49  ;;  %2514 = vmatprep.mubr.bf16.mxu1 %v3722_v50  ;;  %v165_v45 = vld [vmem:[%s5201_s0 + $0x1c8] sm:$0xff]  ;;  %v4480_v49 = vld [vmem:[#allocation3 + $0x654] ss:$8 sps:$4 sm:$0xff]  }
  0x9a   :  { %2966 = vmatprep.mubr.bf16.mxu0 %v3730_v51  ;;  %v3660_v50 = vcombine.high %v157_v42, %v165_v45  ;;  %v3668_v51 = vcombine.high %v161_v46, %v169_v47  ;;  %v209_v29 = vld [vmem:[%s5201_s0 + $0x328] sm:$0xff] }
  0x9b   :  { %2552 = vmatpush1.bf16.msra.mxu1 %v4427_v52  ;;  %v4475_v52 = vld [vmem:[#allocation3 + $0x250] ss:$8 sps:$4 sm:$0xff]  }
  0x9c   :  { %3004 = vmatpush1.bf16.msra.mxu0 %v4430_v53  ;;  %2553 = vmatprep.subr.bf16.mxu1 %v4435_v54  ;;  %v4478_v53 = vld [vmem:[#allocation3 + $0x650] ss:$8 sps:$4 sm:$0xff]   ;;  %v4483_v54 = vld [vmem:[#allocation3 + $0x264] ss:$8 sps:$4 sm:$0xff]  }
  0x9d   :  { %3005 = vmatprep.subr.bf16.mxu0 %v4438_v55  ;;  %v4486_v55 = vld [vmem:[#allocation3 + $0x664] ss:$8 sps:$4 sm:$0xff]  }
  0x9e   :  { %2515 = vmatmul.mubr.bf16.gmra.mrb[28].mxu1 %v3721_v60  ;;  %v3659_v60 = vcombine.low %v157_v42, %v165_v45  ;;  %v233_v45 = vld [vmem:[%s5201_s0 + $0x3e8] sm:$0xff] }
  0x9f   :  { %2967 = vmatmul.mubr.bf16.gmra.mrb[28].mxu0 %v3729_v61  ;;  %2554 = vmatpush1.bf16.msra.mxu1 %v4433_v56  ;;  %v4481_v56 = vld [vmem:[#allocation3 + $0x260] ss:$8 sps:$4 sm:$0xff]   ;;  %v3667_v61 = vcombine.low %v161_v46, %v169_v47 }
  0xa0   :  { %3006 = vmatpush1.bf16.msra.mxu0 %v4436_v57  ;;  %2555 = vmatprep.subr.bf16.mxu1 %v4441_v0  ;;  %v4484_v57 = vld [vmem:[#allocation3 + $0x660] ss:$8 sps:$4 sm:$0xff]   ;;  %v4489_v0 = vld [vmem:[#allocation3 + $0x274] ss:$8 sps:$4 sm:$0xff]  }
  0xa1   :  { %3007 = vmatprep.subr.bf16.mxu0 %v4444_v1  ;;  %2557 = vmatprep.mubr.bf16.mxu1 %v3612_v2  ;;  %v4492_v1 = vld [vmem:[#allocation3 + $0x674] ss:$8 sps:$4 sm:$0xff]   ;;  %v3676_v2 = vcombine.high %v173_v58, %v181_v59  ;;  %v4517_v46 = vld [vmem:[#allocation3 + $0x2c0] ss:$8 sps:$4 sm:$0xff]  }
  0xa2   :  { %3009 = vmatprep.mubr.bf16.mxu0 %v3620_v3  ;;  %v3684_v3 = vcombine.high %v177_v62, %v185_v63  ;;  %v4520_v47 = vld [vmem:[#allocation3 + $0x6c0] ss:$8 sps:$4 sm:$0xff]   ;;  %v114_v62 = vld [vmem:[%s5201_s0 + $0x30] sm:$0xff] }
  0xa3   :  { %2556 = vmatpush1.bf16.msra.mxu1 %v4439_v4  ;;  %v4487_v4 = vld [vmem:[#allocation3 + $0x270] ss:$8 sps:$4 sm:$0xff]  }
  0xa4   :  { %3008 = vmatpush1.bf16.msra.mxu0 %v4442_v5  ;;  %2638 = vmatprep.subr.bf16.mxu1 %v4447_v6  ;;  %v4490_v5 = vld [vmem:[#allocation3 + $0x670] ss:$8 sps:$4 sm:$0xff]   ;;  %v4495_v6 = vld [vmem:[#allocation3 + $0x284] ss:$8 sps:$4 sm:$0xff]  }
  0xa5   :  { %3090 = vmatprep.subr.bf16.mxu0 %v4450_v7  ;;  %v4498_v7 = vld [vmem:[#allocation3 + $0x684] ss:$8 sps:$4 sm:$0xff]   ;;  %v122_v63 = vld [vmem:[%s5201_s0 + $0x70] sm:$0xff] }
  0xa6   :  { %2558 = vmatmul.mubr.bf16.vlgmr.msra.gmra.mrb[0].mxu1 %v3611_v11  ;;  %v197_v11 = vld [vmem:[%s5201_s0 + $0x2c8] sm:$0xff] }
  0xa7   :  { %3010 = vmatmul.mubr.bf16.vlgmr.msra.gmra.mrb[0].mxu0 %v3619_v12  ;;  %2639 = vmatpush1.bf16.msra.mxu1 %v4445_v8  ;;  %v4493_v8 = vld [vmem:[#allocation3 + $0x280] ss:$8 sps:$4 sm:$0xff]   ;;  %v3675_v12 = vcombine.low %v173_v58, %v181_v59  ;;  %v110_v58 = vld [vmem:[%s5201_s0 + $0x10] sm:$0xff] }
  0xa8   :  { %3091 = vmatpush1.bf16.msra.mxu0 %v4448_v15  ;;  %2640 = vmatprep.subr.bf16.mxu1 %v4453_v16  ;;  %v201_v15 = vld [vmem:[%s5201_s0 + $0x2e8] sm:$0xff]  ;;  %v4501_v16 = vld [vmem:[#allocation3 + $0x294] ss:$8 sps:$4 sm:$0xff]  }
  0xa9   :  { %3092 = vmatprep.subr.bf16.mxu0 %v4456_v17  ;;  %2567 = vmatprep.mubr.bf16.mxu1 %v3628_v18  ;;  %v4504_v17 = vld [vmem:[#allocation3 + $0x694] ss:$8 sps:$4 sm:$0xff]   ;;  %v3692_v18 = vcombine.high %v189_v10, %v197_v11  ;;  %v3699_v28 = vcombine.low %v193_v14, %v201_v15 }
  0xaa   :  { %3019 = vmatprep.mubr.bf16.mxu0 %v3636_v19  ;;  %v3700_v19 = vcombine.high %v193_v14, %v201_v15  ;;  %v130_v14 = vld [vmem:[%s5201_s0 + $0xb0] sm:$0xff] }
  0xab   :  { %2641 = vmatpush1.bf16.msra.mxu1 %v4451_v20  ;;  %v4499_v20 = vld [vmem:[#allocation3 + $0x290] ss:$8 sps:$4 sm:$0xff]  }
  0xac   :  { %3093 = vmatpush1.bf16.msra.mxu0 %v4454_v21  ;;  %2642 = vmatprep.subr.bf16.mxu1 %v4459_v22  ;;  %v4502_v21 = vld [vmem:[#allocation3 + $0x690] ss:$8 sps:$4 sm:$0xff]   ;;  %v4507_v22 = vld [vmem:[#allocation3 + $0x2a4] ss:$8 sps:$4 sm:$0xff]  }
  0xad   :  { %3094 = vmatprep.subr.bf16.mxu0 %v4462_v23  ;;  %v4510_v23 = vld [vmem:[#allocation3 + $0x6a4] ss:$8 sps:$4 sm:$0xff]   ;;  %v138_v15 = vld [vmem:[%s5201_s0 + $0xf0] sm:$0xff] }
  0xae   :  { %2568 = vmatmul.mubr.bf16.gmra.mrb[4].mxu1 %v3627_v26  ;;  %v213_v26 = vld [vmem:[%s5201_s0 + $0x348] sm:$0xff] }
  0xaf   :  { %3020 = vmatmul.mubr.bf16.gmra.mrb[4].mxu0 %v3635_v27  ;;  %2643 = vmatpush1.bf16.msra.mxu1 %v4457_v30  ;;  %v3691_v27 = vcombine.low %v189_v10, %v197_v11  ;;  %v217_v30 = vld [vmem:[%s5201_s0 + $0x368] sm:$0xff]  ;;  %v3707_v42 = vcombine.low %v205_v25, %v213_v26  ;;  %v126_v10 = vld [vmem:[%s5201_s0 + $0x90] sm:$0xff] }
  0xb0   :  { %3095 = vmatpush1.bf16.msra.mxu0 %v4460_v31  ;;  %2644 = vmatprep.subr.bf16.mxu1 %v4465_v32  ;;  %v4508_v31 = vld [vmem:[#allocation3 + $0x6a0] ss:$8 sps:$4 sm:$0xff]   ;;  %v4513_v32 = vld [vmem:[#allocation3 + $0x2b4] ss:$8 sps:$4 sm:$0xff]  }
  0xb1   :  { %3096 = vmatprep.subr.bf16.mxu0 %v4468_v33  ;;  %2577 = vmatprep.mubr.bf16.mxu1 %v3644_v34  ;;  %v4516_v33 = vld [vmem:[#allocation3 + $0x6b4] ss:$8 sps:$4 sm:$0xff]   ;;  %v3708_v34 = vcombine.high %v205_v25, %v213_v26  ;;  %v4556_v25 = vld [vmem:[#allocation3 + $0x720] ss:$8 sps:$4 sm:$0xff]  }
  0xb2   :  { %3029 = vmatprep.mubr.bf16.mxu0 %v3652_v35  ;;  %v3716_v35 = vcombine.high %v209_v29, %v217_v30  ;;  %v134_v11 = vld [vmem:[%s5201_s0 + $0xd0] sm:$0xff] }
  0xb3   :  { %2645 = vmatpush1.bf16.msra.mxu1 %v4463_v36  ;;  %v4511_v36 = vld [vmem:[#allocation3 + $0x2b0] ss:$8 sps:$4 sm:$0xff]  }
  0xb4   :  { %3097 = vmatpush1.bf16.msra.mxu0 %v4466_v37  ;;  %2646 = vmatprep.subr.bf16.mxu1 %v4471_v38  ;;  %v4514_v37 = vld [vmem:[#allocation3 + $0x6b0] ss:$8 sps:$4 sm:$0xff]   ;;  %v4519_v38 = vld [vmem:[#allocation3 + $0x2c4] ss:$8 sps:$4 sm:$0xff]  }
  0xb5   :  { %3098 = vmatprep.subr.bf16.mxu0 %v4474_v39  ;;  %v4522_v39 = vld [vmem:[#allocation3 + $0x6c4] ss:$8 sps:$4 sm:$0xff]   ;;  %v142_v26 = vld [vmem:[%s5201_s0 + $0x110] sm:$0xff] }
  0xb6   :  { %2578 = vmatmul.mubr.bf16.gmra.mrb[8].mxu1 %v3643_v43  ;;  %v3715_v43 = vcombine.low %v209_v29, %v217_v30  ;;  %v3637_v29 = vcombine.low %v130_v14, %v138_v15  ;;  %v146_v30 = vld [vmem:[%s5201_s0 + $0x130] sm:$0xff] }
  0xb7   :  { %3030 = vmatmul.mubr.bf16.gmra.mrb[8].mxu0 %v3651_v44  ;;  %2647 = vmatpush1.bf16.msra.mxu1 %v4469_v40  ;;  %v221_v40 = vld [vmem:[%s5201_s0 + $0x388] sm:$0xff] }
  0xb8   :  { %3099 = vmatpush1.bf16.msra.mxu0 %v4472_v41  ;;  %2648 = vmatprep.subr.bf16.mxu1 %v4477_v48  ;;  %v229_v41 = vld [vmem:[%s5201_s0 + $0x3c8] sm:$0xff]  ;;  %v4525_v48 = vld [vmem:[#allocation3 + $0x2d4] ss:$8 sps:$4 sm:$0xff]  }
  0xb9   :  { %3100 = vmatprep.subr.bf16.mxu0 %v4480_v49  ;;  %2587 = vmatprep.mubr.bf16.mxu1 %v3660_v50  ;;  %v225_v44 = vld [vmem:[%s5201_s0 + $0x3a8] sm:$0xff]  ;;  %v4528_v49 = vld [vmem:[#allocation3 + $0x6d4] ss:$8 sps:$4 sm:$0xff]   ;;  %v3724_v50 = vcombine.high %v221_v40, %v229_v41  ;;  %v3723_v59 = vcombine.low %v221_v40, %v229_v41 }
  0xba   :  { %3039 = vmatprep.mubr.bf16.mxu0 %v3668_v51  ;;  %v3732_v51 = vcombine.high %v225_v44, %v233_v45  ;;  %v158_v40 = vld [vmem:[%s5201_s0 + $0x190] sm:$0xff] }
  0xbb   :  { %2649 = vmatpush1.bf16.msra.mxu1 %v4475_v52  ;;  %v4523_v52 = vld [vmem:[#allocation3 + $0x2d0] ss:$8 sps:$4 sm:$0xff]  }
  0xbc   :  { %3101 = vmatpush1.bf16.msra.mxu0 %v4478_v53  ;;  %2650 = vmatprep.subr.bf16.mxu1 %v4483_v54  ;;  %v4526_v53 = vld [vmem:[#allocation3 + $0x6d0] ss:$8 sps:$4 sm:$0xff]   ;;  %v4531_v54 = vld [vmem:[#allocation3 + $0x2e4] ss:$8 sps:$4 sm:$0xff]  }
  0xbd   :  { %3102 = vmatprep.subr.bf16.mxu0 %v4486_v55  ;;  %v4534_v55 = vld [vmem:[#allocation3 + $0x6e4] ss:$8 sps:$4 sm:$0xff]  }
  0xbe   :  { %2588 = vmatmul.mubr.bf16.gmra.mrb[12].mxu1 %v3659_v60  ;;  %v3731_v60 = vcombine.low %v225_v44, %v233_v45  ;;  %v162_v44 = vld [vmem:[%s5201_s0 + $0x1b0] sm:$0xff] }
  0xbf   :  { %3040 = vmatmul.mubr.bf16.gmra.mrb[12].mxu0 %v3667_v61  ;;  %2651 = vmatpush1.bf16.msra.mxu1 %v4481_v56  ;;  %v4529_v56 = vld [vmem:[#allocation3 + $0x2e0] ss:$8 sps:$4 sm:$0xff]   ;;  %v118_v61 = vld [vmem:[%s5201_s0 + $0x50] sm:$0xff] }
  0xc0   :  { %3103 = vmatpush1.bf16.msra.mxu0 %v4484_v57  ;;  %2652 = vmatprep.subr.bf16.mxu1 %v4489_v0  ;;  %v4532_v57 = vld [vmem:[#allocation3 + $0x6e0] ss:$8 sps:$4 sm:$0xff]   ;;  %v4537_v0 = vld [vmem:[#allocation3 + $0x2f4] ss:$8 sps:$4 sm:$0xff]  }
  0xc1   :  { %3104 = vmatprep.subr.bf16.mxu0 %v4492_v1  ;;  %2597 = vmatprep.mubr.bf16.mxu1 %v3676_v2  ;;  %v4540_v1 = vld [vmem:[#allocation3 + $0x6f4] ss:$8 sps:$4 sm:$0xff]   ;;  %v3614_v2 = vcombine.high %v110_v58, %v118_v61 }
  0xc2   :  { %3049 = vmatprep.mubr.bf16.mxu0 %v3684_v3  ;;  %v3622_v3 = vcombine.high %v114_v62, %v122_v63  ;;  %v170_v45 = vld [vmem:[%s5201_s0 + $0x1f0] sm:$0xff] }
  0xc3   :  { %2653 = vmatpush1.bf16.msra.mxu1 %v4487_v4  ;;  %v4535_v4 = vld [vmem:[#allocation3 + $0x2f0] ss:$8 sps:$4 sm:$0xff]  }
  0xc4   :  { %3105 = vmatpush1.bf16.msra.mxu0 %v4490_v5  ;;  %2654 = vmatprep.subr.bf16.mxu1 %v4495_v6  ;;  %v4538_v5 = vld [vmem:[#allocation3 + $0x6f0] ss:$8 sps:$4 sm:$0xff]   ;;  %v4543_v6 = vld [vmem:[#allocation3 + $0x304] ss:$8 sps:$4 sm:$0xff]  }
  0xc5   :  { %3106 = vmatprep.subr.bf16.mxu0 %v4498_v7  ;;  %v4546_v7 = vld [vmem:[#allocation3 + $0x704] ss:$8 sps:$4 sm:$0xff]  }
  0xc6   :  { %2598 = vmatmul.mubr.bf16.gmra.mrb[16].mxu1 %v3675_v12  ;;  %v3613_v12 = vcombine.low %v110_v58, %v118_v61  ;;  %v3669_v58 = vcombine.low %v162_v44, %v170_v45  ;;  %v186_v61 = vld [vmem:[%s5201_s0 + $0x270] sm:$0xff] }
  0xc7   :  { %3050 = vmatmul.mubr.bf16.gmra.mrb[16].mxu0 %v3683_v13  ;;  %2655 = vmatpush1.bf16.msra.mxu1 %v4493_v8  ;;  %v4541_v8 = vld [vmem:[#allocation3 + $0x300] ss:$8 sps:$4 sm:$0xff]   ;;  %v3621_v13 = vcombine.low %v114_v62, %v122_v63 }
  0xc8   :  { %3107 = vmatpush1.bf16.msra.mxu0 %v4496_v9  ;;  %2656 = vmatprep.subr.bf16.mxu1 %v4501_v16  ;;  %v4544_v9 = vld [vmem:[#allocation3 + $0x700] ss:$8 sps:$4 sm:$0xff]   ;;  %v4549_v16 = vld [vmem:[#allocation3 + $0x314] ss:$8 sps:$4 sm:$0xff]  }
  0xc9   :  { %3108 = vmatprep.subr.bf16.mxu0 %v4504_v17  ;;  %2607 = vmatprep.mubr.bf16.mxu1 %v3692_v18  ;;  %v4552_v17 = vld [vmem:[#allocation3 + $0x714] ss:$8 sps:$4 sm:$0xff]   ;;  %v3630_v18 = vcombine.high %v126_v10, %v134_v11  ;;  %v4577_v62 = vld [vmem:[#allocation3 + $0x360] ss:$8 sps:$4 sm:$0xff]  }
  0xca   :  { %3059 = vmatprep.mubr.bf16.mxu0 %v3700_v19  ;;  %v3638_v19 = vcombine.high %v130_v14, %v138_v15  ;;  %v4580_v63 = vld [vmem:[#allocation3 + $0x760] ss:$8 sps:$4 sm:$0xff]  }
  0xcb   :  { %2657 = vmatpush1.bf16.msra.mxu1 %v4499_v20  ;;  %v4547_v20 = vld [vmem:[#allocation3 + $0x310] ss:$8 sps:$4 sm:$0xff]   ;;  %v4589_v14 = vld [vmem:[#allocation3 + $0x380] ss:$8 sps:$4 sm:$0xff]  }
  0xcc   :  { %3109 = vmatpush1.bf16.msra.mxu0 %v4502_v21  ;;  %2658 = vmatprep.subr.bf16.mxu1 %v4507_v22  ;;  %v4550_v21 = vld [vmem:[#allocation3 + $0x710] ss:$8 sps:$4 sm:$0xff]   ;;  %v4555_v22 = vld [vmem:[#allocation3 + $0x324] ss:$8 sps:$4 sm:$0xff]   ;;  %v4592_v15 = vld [vmem:[#allocation3 + $0x780] ss:$8 sps:$4 sm:$0xff]  }
  0xcd   :  { %3110 = vmatprep.subr.bf16.mxu0 %v4510_v23  ;;  %v4558_v23 = vld [vmem:[#allocation3 + $0x724] ss:$8 sps:$4 sm:$0xff]  }
  0xce   :  { %2608 = vmatmul.mubr.bf16.gmra.mrb[20].mxu1 %v3691_v27  ;;  %v150_v27 = vld [vmem:[%s5201_s0 + $0x150] sm:$0xff] }
  0xcf   :  { %3060 = vmatmul.mubr.bf16.gmra.mrb[20].mxu0 %v3699_v28  ;;  %2659 = vmatpush1.bf16.msra.mxu1 %v4505_v24  ;;  %v4553_v24 = vld [vmem:[#allocation3 + $0x320] ss:$8 sps:$4 sm:$0xff]   ;;  %v3629_v28 = vcombine.low %v126_v10, %v134_v11  ;;  %v3645_v41 = vcombine.low %v142_v26, %v150_v27  ;;  %v198_v11 = vld [vmem:[%s5201_s0 + $0x2d0] sm:$0xff] }
  0xd0   :  { %3111 = vmatpush1.bf16.msra.mxu0 %v4508_v31  ;;  %2660 = vmatprep.subr.bf16.mxu1 %v4513_v32  ;;  %v154_v31 = vld [vmem:[%s5201_s0 + $0x170] sm:$0xff] }
  0xd1   :  { %3112 = vmatprep.subr.bf16.mxu0 %v4516_v33  ;;  %2617 = vmatprep.mubr.bf16.mxu1 %v3708_v34  ;;  %v4561_v32 = vld [vmem:[#allocation3 + $0x334] ss:$8 sps:$4 sm:$0xff]   ;;  %v3646_v34 = vcombine.high %v142_v26, %v150_v27 }
  0xd2   :  { %3069 = vmatprep.mubr.bf16.mxu0 %v3716_v35  ;;  %v4564_v33 = vld [vmem:[#allocation3 + $0x734] ss:$8 sps:$4 sm:$0xff]   ;;  %v3654_v35 = vcombine.high %v146_v30, %v154_v31 }
  0xd3   :  { %2661 = vmatpush1.bf16.msra.mxu1 %v4511_v36  ;;  %v4559_v36 = vld [vmem:[#allocation3 + $0x330] ss:$8 sps:$4 sm:$0xff]  }
  0xd4   :  { %3113 = vmatpush1.bf16.msra.mxu0 %v4514_v37  ;;  %2662 = vmatprep.subr.bf16.mxu1 %v4519_v38  ;;  %v4562_v37 = vld [vmem:[#allocation3 + $0x730] ss:$8 sps:$4 sm:$0xff]   ;;  %v4567_v38 = vld [vmem:[#allocation3 + $0x344] ss:$8 sps:$4 sm:$0xff]  }
  0xd5   :  { %3114 = vmatprep.subr.bf16.mxu0 %v4522_v39  ;;  %v4570_v39 = vld [vmem:[#allocation3 + $0x744] ss:$8 sps:$4 sm:$0xff]   ;;  %v214_v27 = vld [vmem:[%s5201_s0 + $0x350] sm:$0xff] }
  0xd6   :  { %2618 = vmatmul.mubr.bf16.gmra.mrb[24].mxu1 %v3707_v42  ;;  %v3653_v42 = vcombine.low %v146_v30, %v154_v31  ;;  %v4601_v30 = vld [vmem:[#allocation3 + $0x3a0] ss:$8 sps:$4 sm:$0xff]  }
  0xd7   :  { %3070 = vmatmul.mubr.bf16.gmra.mrb[24].mxu0 %v3715_v43  ;;  %2663 = vmatpush1.bf16.msra.mxu1 %v4517_v46  ;;  %v166_v43 = vld [vmem:[%s5201_s0 + $0x1d0] sm:$0xff]  ;;  %v4565_v46 = vld [vmem:[#allocation3 + $0x340] ss:$8 sps:$4 sm:$0xff]  }
  0xd8   :  { %3115 = vmatpush1.bf16.msra.mxu0 %v4520_v47  ;;  %2664 = vmatprep.subr.bf16.mxu1 %v4525_v48  ;;  %v4568_v47 = vld [vmem:[#allocation3 + $0x740] ss:$8 sps:$4 sm:$0xff]   ;;  %v4573_v48 = vld [vmem:[#allocation3 + $0x354] ss:$8 sps:$4 sm:$0xff]  }
  0xd9   :  { %3116 = vmatprep.subr.bf16.mxu0 %v4528_v49  ;;  %2627 = vmatprep.mubr.bf16.mxu1 %v3724_v50  ;;  %v4576_v49 = vld [vmem:[#allocation3 + $0x754] ss:$8 sps:$4 sm:$0xff]   ;;  %v3662_v50 = vcombine.high %v158_v40, %v166_v43  ;;  %v4604_v31 = vld [vmem:[#allocation3 + $0x7a0] ss:$8 sps:$4 sm:$0xff]  }
  0xda   :  { %3079 = vmatprep.mubr.bf16.mxu0 %v3732_v51  ;;  %v3670_v51 = vcombine.high %v162_v44, %v170_v45  ;;  %v226_v44 = vld [vmem:[%s5201_s0 + $0x3b0] sm:$0xff] }
  0xdb   :  { %2665 = vmatpush1.bf16.msra.mxu1 %v4523_v52  ;;  %v4571_v52 = vld [vmem:[#allocation3 + $0x350] ss:$8 sps:$4 sm:$0xff]  }
  0xdc   :  { %3117 = vmatpush1.bf16.msra.mxu0 %v4526_v53  ;;  %2666 = vmatprep.subr.bf16.mxu1 %v4531_v54  ;;  %v4574_v53 = vld [vmem:[#allocation3 + $0x750] ss:$8 sps:$4 sm:$0xff]   ;;  %v4579_v54 = vld [vmem:[#allocation3 + $0x364] ss:$8 sps:$4 sm:$0xff]  }
  0xdd   :  { %3118 = vmatprep.subr.bf16.mxu0 %v4534_v55  ;;  %v4582_v55 = vld [vmem:[#allocation3 + $0x764] ss:$8 sps:$4 sm:$0xff]   ;;  %v234_v45 = vld [vmem:[%s5201_s0 + $0x3f0] sm:$0xff] }
  0xde   :  { %2628 = vmatmul.mubr.bf16.gmra.mrb[28].mxu1 %v3723_v59  ;;  %v182_v59 = vld [vmem:[%s5201_s0 + $0x250] sm:$0xff] }
  0xdf   :  { %3080 = vmatmul.mubr.bf16.gmra.mrb[28].mxu0 %v3731_v60  ;;  %2667 = vmatpush1.bf16.msra.mxu1 %v4529_v56  ;;  %v174_v56 = vld [vmem:[%s5201_s0 + $0x210] sm:$0xff] }
  0xe0   :  { %3119 = vmatpush1.bf16.msra.mxu0 %v4532_v57  ;;  %2668 = vmatprep.subr.bf16.mxu1 %v4537_v0  ;;  %v3661_v57 = vcombine.low %v158_v40, %v166_v43  ;;  %v178_v60 = vld [vmem:[%s5201_s0 + $0x230] sm:$0xff] }
  0xe1   :  { %3120 = vmatprep.subr.bf16.mxu0 %v4540_v1  ;;  %2670 = vmatprep.mubr.bf16.mxu1 %v3614_v2  ;;  %v4585_v0 = vld [vmem:[#allocation3 + $0x374] ss:$8 sps:$4 sm:$0xff]   ;;  %v3678_v2 = vcombine.high %v174_v56, %v182_v59  ;;  %v3685_v10 = vcombine.low %v178_v60, %v186_v61 }
  0xe2   :  { %3122 = vmatprep.mubr.bf16.mxu0 %v3622_v3  ;;  %v4588_v1 = vld [vmem:[#allocation3 + $0x774] ss:$8 sps:$4 sm:$0xff]   ;;  %v3686_v3 = vcombine.high %v178_v60, %v186_v61 }
  0xe3   :  { %2669 = vmatpush1.bf16.msra.mxu1 %v4535_v4  ;;  %v4583_v4 = vld [vmem:[#allocation3 + $0x370] ss:$8 sps:$4 sm:$0xff]  }
  0xe4   :  { %3121 = vmatpush1.bf16.msra.mxu0 %v4538_v5  ;;  %2751 = vmatprep.subr.bf16.mxu1 %v4543_v6  ;;  %v4586_v5 = vld [vmem:[#allocation3 + $0x770] ss:$8 sps:$4 sm:$0xff]   ;;  %v4591_v6 = vld [vmem:[#allocation3 + $0x384] ss:$8 sps:$4 sm:$0xff]  }
  0xe5   :  { %3203 = vmatprep.subr.bf16.mxu0 %v4546_v7  ;;  %v4594_v7 = vld [vmem:[#allocation3 + $0x784] ss:$8 sps:$4 sm:$0xff]   ;;  %v222_v40 = vld [vmem:[%s5201_s0 + $0x390] sm:$0xff]  ;;  %v115_v60 = vld [vmem:[%s5201_s0 + $0x38] sm:$0xff] }
  0xe6   :  { %2671 = vmatmul.mubr.bf16.vlgmr.msra.gmra.mrb[0].mxu1 %v3613_v12  ;;  %v194_v12 = vld [vmem:[%s5201_s0 + $0x2b0] sm:$0xff]  ;;  %v123_v61 = vld [vmem:[%s5201_s0 + $0x78] sm:$0xff] }
  0xe7   :  { %3123 = vmatmul.mubr.bf16.vlgmr.msra.gmra.mrb[0].mxu0 %v3621_v13  ;;  %2752 = vmatpush1.bf16.msra.mxu1 %v4541_v8  ;;  %v190_v8 = vld [vmem:[%s5201_s0 + $0x290] sm:$0xff] }
  0xe8   :  { %3204 = vmatpush1.bf16.msra.mxu0 %v4544_v9  ;;  %2753 = vmatprep.subr.bf16.mxu1 %v4549_v16  ;;  %v3677_v9 = vcombine.low %v174_v56, %v182_v59  ;;  %v202_v13 = vld [vmem:[%s5201_s0 + $0x2f0] sm:$0xff]  ;;  %v111_v56 = vld [vmem:[%s5201_s0 + $0x18] sm:$0xff] }
  0xe9   :  { %3205 = vmatprep.subr.bf16.mxu0 %v4552_v17  ;;  %2680 = vmatprep.mubr.bf16.mxu1 %v3630_v18  ;;  %v4597_v16 = vld [vmem:[#allocation3 + $0x394] ss:$8 sps:$4 sm:$0xff]   ;;  %v3694_v18 = vcombine.high %v190_v8, %v198_v11  ;;  %v3701_v26 = vcombine.low %v194_v12, %v202_v13 }
  0xea   :  { %3132 = vmatprep.mubr.bf16.mxu0 %v3638_v19  ;;  %v4600_v17 = vld [vmem:[#allocation3 + $0x794] ss:$8 sps:$4 sm:$0xff]   ;;  %v3702_v19 = vcombine.high %v194_v12, %v202_v13 }
  0xeb   :  { %2754 = vmatpush1.bf16.msra.mxu1 %v4547_v20  ;;  %v4595_v20 = vld [vmem:[#allocation3 + $0x390] ss:$8 sps:$4 sm:$0xff]  }
  0xec   :  { %3206 = vmatpush1.bf16.msra.mxu0 %v4550_v21  ;;  %2755 = vmatprep.subr.bf16.mxu1 %v4555_v22  ;;  %v4598_v21 = vld [vmem:[#allocation3 + $0x790] ss:$8 sps:$4 sm:$0xff]   ;;  %v4603_v22 = vld [vmem:[#allocation3 + $0x3a4] ss:$8 sps:$4 sm:$0xff]  }
  0xed   :  { %3207 = vmatprep.subr.bf16.mxu0 %v4558_v23  ;;  %v4606_v23 = vld [vmem:[#allocation3 + $0x7a4] ss:$8 sps:$4 sm:$0xff]   ;;  %v230_v43 = vld [vmem:[%s5201_s0 + $0x3d0] sm:$0xff]  ;;  %v119_v59 = vld [vmem:[%s5201_s0 + $0x58] sm:$0xff] }
  0xee   :  { %2681 = vmatmul.mubr.bf16.gmra.mrb[4].mxu1 %v3629_v28  ;;  %v210_v28 = vld [vmem:[%s5201_s0 + $0x330] sm:$0xff] }
  0xef   :  { %3133 = vmatmul.mubr.bf16.gmra.mrb[4].mxu0 %v3637_v29  ;;  %2756 = vmatpush1.bf16.msra.mxu1 %v4553_v24  ;;  %v206_v24 = vld [vmem:[%s5201_s0 + $0x310] sm:$0xff] }
  0xf0   :  { %3208 = vmatpush1.bf16.msra.mxu0 %v4556_v25  ;;  %2757 = vmatprep.subr.bf16.mxu1 %v4561_v32  ;;  %v3693_v25 = vcombine.low %v190_v8, %v198_v11  ;;  %v218_v29 = vld [vmem:[%s5201_s0 + $0x370] sm:$0xff]  ;;  %v131_v8 = vld [vmem:[%s5201_s0 + $0xb8] sm:$0xff]  ;;  %v3623_v11 = vcombine.low %v115_v60, %v123_v61 }
  0xf1   :  { %3209 = vmatprep.subr.bf16.mxu0 %v4564_v33  ;;  %2690 = vmatprep.mubr.bf16.mxu1 %v3646_v34  ;;  %v4609_v32 = vld [vmem:[#allocation3 + $0x3b4] ss:$8 sps:$4 sm:$0xff]   ;;  %v3710_v34 = vcombine.high %v206_v24, %v214_v27 }
  0xf2   :  { %3142 = vmatprep.mubr.bf16.mxu0 %v3654_v35  ;;  %v4612_v33 = vld [vmem:[#allocation3 + $0x7b4] ss:$8 sps:$4 sm:$0xff]   ;;  %v3718_v35 = vcombine.high %v210_v28, %v218_v29 }
  0xf3   :  { %2758 = vmatpush1.bf16.msra.mxu1 %v4559_v36  ;;  %v4607_v36 = vld [vmem:[#allocation3 + $0x3b0] ss:$8 sps:$4 sm:$0xff]  }
  0xf4   :  { %3210 = vmatpush1.bf16.msra.mxu0 %v4562_v37  ;;  %2759 = vmatprep.subr.bf16.mxu1 %v4567_v38  ;;  %v4610_v37 = vld [vmem:[#allocation3 + $0x7b0] ss:$8 sps:$4 sm:$0xff]   ;;  %v4615_v38 = vld [vmem:[#allocation3 + $0x3c4] ss:$8 sps:$4 sm:$0xff]  }
  0xf5   :  { %3211 = vmatprep.subr.bf16.mxu0 %v4570_v39  ;;  %v4618_v39 = vld [vmem:[#allocation3 + $0x7c4] ss:$8 sps:$4 sm:$0xff]  }
  0xf6   :  { %2691 = vmatmul.mubr.bf16.gmra.mrb[8].mxu1 %v3645_v41  ;;  %v3709_v41 = vcombine.low %v206_v24, %v214_v27  ;;  %v163_v24 = vld [vmem:[%s5201_s0 + $0x1b8] sm:$0xff] }
  0xf7   :  { %3143 = vmatmul.mubr.bf16.gmra.mrb[8].mxu0 %v3653_v42  ;;  %2760 = vmatpush1.bf16.msra.mxu1 %v4565_v46  ;;  %v3717_v42 = vcombine.low %v210_v28, %v218_v29  ;;  %v4613_v46 = vld [vmem:[#allocation3 + $0x3c0] ss:$8 sps:$4 sm:$0xff]  }
  0xf8   :  { %3212 = vmatpush1.bf16.msra.mxu0 %v4568_v47  ;;  %2761 = vmatprep.subr.bf16.mxu1 %v4573_v48  ;;  %v4616_v47 = vld [vmem:[#allocation3 + $0x7c0] ss:$8 sps:$4 sm:$0xff]   ;;  %v4621_v48 = vld [vmem:[#allocation3 + $0x3d4] ss:$8 sps:$4 sm:$0xff]  }
  0xf9   :  { %3213 = vmatprep.subr.bf16.mxu0 %v4576_v49  ;;  %2700 = vmatprep.mubr.bf16.mxu1 %v3662_v50  ;;  %v4624_v49 = vld [vmem:[#allocation3 + $0x7d4] ss:$8 sps:$4 sm:$0xff]   ;;  %v3726_v50 = vcombine.high %v222_v40, %v230_v43 }
  0xfa   :  { %3152 = vmatprep.mubr.bf16.mxu0 %v3670_v51  ;;  %v3734_v51 = vcombine.high %v226_v44, %v234_v45 }
  0xfb   :  { %2762 = vmatpush1.bf16.msra.mxu1 %v4571_v52  ;;  %v4619_v52 = vld [vmem:[#allocation3 + $0x3d0] ss:$8 sps:$4 sm:$0xff]  }
  0xfc   :  { %3214 = vmatpush1.bf16.msra.mxu0 %v4574_v53  ;;  %2763 = vmatprep.subr.bf16.mxu1 %v4579_v54  ;;  %v4622_v53 = vld [vmem:[#allocation3 + $0x7d0] ss:$8 sps:$4 sm:$0xff]   ;;  %v4627_v54 = vld [vmem:[#allocation3 + $0x3e4] ss:$8 sps:$4 sm:$0xff]  }
  0xfd   :  { %3215 = vmatprep.subr.bf16.mxu0 %v4582_v55  ;;  %v4630_v55 = vld [vmem:[#allocation3 + $0x7e4] ss:$8 sps:$4 sm:$0xff]  }
  0xfe   :  { %2701 = vmatmul.mubr.bf16.gmra.mrb[12].mxu1 %v3661_v57  ;;  %v3725_v57 = vcombine.low %v222_v40, %v230_v43  ;;  %v195_v40 = vld [vmem:[%s5201_s0 + $0x2b8] sm:$0xff] }
  0xff   :  { %3153 = vmatmul.mubr.bf16.gmra.mrb[12].mxu0 %v3669_v58  ;;  %2764 = vmatpush1.bf16.msra.mxu1 %v4577_v62  ;;  %v3733_v58 = vcombine.low %v226_v44, %v234_v45  ;;  %v4625_v62 = vld [vmem:[#allocation3 + $0x3e0] ss:$8 sps:$4 sm:$0xff]  }
 0x100   :  { %3216 = vmatpush1.bf16.msra.mxu0 %v4580_v63  ;;  %2765 = vmatprep.subr.bf16.mxu1 %v4585_v0  ;;  %v4628_v63 = vld [vmem:[#allocation3 + $0x7e0] ss:$8 sps:$4 sm:$0xff]   ;;  %v4633_v0 = vld [vmem:[#allocation3 + $0x3f4] ss:$8 sps:$4 sm:$0xff]  }
 0x101   :  { %3217 = vmatprep.subr.bf16.mxu0 %v4588_v1  ;;  %2710 = vmatprep.mubr.bf16.mxu1 %v3678_v2  ;;  %v4636_v1 = vld [vmem:[#allocation3 + $0x7f4] ss:$8 sps:$4 sm:$0xff]   ;;  %v3616_v2 = vcombine.high %v111_v56, %v119_v59 }
 0x102   :  { %3162 = vmatprep.mubr.bf16.mxu0 %v3686_v3  ;;  %v3624_v3 = vcombine.high %v115_v60, %v123_v61 }
 0x103   :  { %2766 = vmatpush1.bf16.msra.mxu1 %v4583_v4  ;;  %v4631_v4 = vld [vmem:[#allocation3 + $0x3f0] ss:$8 sps:$4 sm:$0xff]  }
 0x104   :  { %3218 = vmatpush1.bf16.msra.mxu0 %v4586_v5  ;;  %2767 = vmatprep.subr.bf16.mxu1 %v4591_v6  ;;  %v4634_v5 = vld [vmem:[#allocation3 + $0x7f0] ss:$8 sps:$4 sm:$0xff]  }
 0x105   :  { %3219 = vmatprep.subr.bf16.mxu0 %v4594_v7  ;;  %v127_v6 = vld [vmem:[%s5201_s0 + $0x98] sm:$0xff] }
 0x106   :  { %2711 = vmatmul.mubr.bf16.gmra.mrb[16].mxu1 %v3677_v9  ;;  %v135_v7 = vld [vmem:[%s5201_s0 + $0xd8] sm:$0xff] }
 0x107   :  { %3163 = vmatmul.mubr.bf16.gmra.mrb[16].mxu0 %v3685_v10  ;;  %2768 = vmatpush1.bf16.msra.mxu1 %v4589_v14  ;;  %v139_v9 = vld [vmem:[%s5201_s0 + $0xf8] sm:$0xff]  ;;  %v3615_v10 = vcombine.low %v111_v56, %v119_v59  ;;  %v3632_v12 = vcombine.high %v127_v6, %v135_v7 }
 0x108   :  { %3220 = vmatpush1.bf16.msra.mxu0 %v4592_v15  ;;  %2769 = vmatprep.subr.bf16.mxu1 %v4597_v16  ;;  %v3640_v13 = vcombine.high %v131_v8, %v139_v9  ;;  %v143_v14 = vld [vmem:[%s5201_s0 + $0x118] sm:$0xff] }
 0x109   :  { %3221 = vmatprep.subr.bf16.mxu0 %v4600_v17  ;;  %2720 = vmatprep.mubr.bf16.mxu1 %v3694_v18  ;;  %v151_v15 = vld [vmem:[%s5201_s0 + $0x158] sm:$0xff]  ;;  %v3631_v18 = vcombine.low %v127_v6, %v135_v7 }
 0x10a   :  { %3172 = vmatprep.mubr.bf16.mxu0 %v3702_v19  ;;  %v147_v16 = vld [vmem:[%s5201_s0 + $0x138] sm:$0xff]  ;;  %v3639_v19 = vcombine.low %v131_v8, %v139_v9 }
 0x10b   :  { %2770 = vmatpush1.bf16.msra.mxu1 %v4595_v20  ;;  %v155_v17 = vld [vmem:[%s5201_s0 + $0x178] sm:$0xff]  ;;  %v3648_v20 = vcombine.high %v143_v14, %v151_v15 }
 0x10c   :  { %3222 = vmatpush1.bf16.msra.mxu0 %v4598_v21  ;;  %2771 = vmatprep.subr.bf16.mxu1 %v4603_v22  ;;  %v3656_v21 = vcombine.high %v147_v16, %v155_v17  ;;  %v159_v22 = vld [vmem:[%s5201_s0 + $0x198] sm:$0xff]  ;;  %v3655_v27 = vcombine.low %v147_v16, %v155_v17 }
 0x10d   :  { %3223 = vmatprep.subr.bf16.mxu0 %v4606_v23  ;;  %v167_v23 = vld [vmem:[%s5201_s0 + $0x1d8] sm:$0xff] }
 0x10e   :  { %2721 = vmatmul.mubr.bf16.gmra.mrb[20].mxu1 %v3693_v25  ;;  %v171_v25 = vld [vmem:[%s5201_s0 + $0x1f8] sm:$0xff]  ;;  %v3664_v28 = vcombine.high %v159_v22, %v167_v23 }
 0x10f   :  { %3173 = vmatmul.mubr.bf16.gmra.mrb[20].mxu0 %v3701_v26  ;;  %2772 = vmatpush1.bf16.msra.mxu1 %v4601_v30  ;;  %v3647_v26 = vcombine.low %v143_v14, %v151_v15  ;;  %v3672_v29 = vcombine.high %v163_v24, %v171_v25  ;;  %v175_v30 = vld [vmem:[%s5201_s0 + $0x218] sm:$0xff] }
 0x110   :  { %3224 = vmatpush1.bf16.msra.mxu0 %v4604_v31  ;;  %2773 = vmatprep.subr.bf16.mxu1 %v4609_v32  ;;  %v183_v31 = vld [vmem:[%s5201_s0 + $0x258] sm:$0xff] }
 0x111   :  { %3225 = vmatprep.subr.bf16.mxu0 %v4612_v33  ;;  %2730 = vmatprep.mubr.bf16.mxu1 %v3710_v34  ;;  %v179_v32 = vld [vmem:[%s5201_s0 + $0x238] sm:$0xff]  ;;  %v3663_v34 = vcombine.low %v159_v22, %v167_v23 }
 0x112   :  { %3182 = vmatprep.mubr.bf16.mxu0 %v3718_v35  ;;  %v187_v33 = vld [vmem:[%s5201_s0 + $0x278] sm:$0xff]  ;;  %v3671_v35 = vcombine.low %v163_v24, %v171_v25 }
 0x113   :  { %2774 = vmatpush1.bf16.msra.mxu1 %v4607_v36  ;;  %v3680_v36 = vcombine.high %v175_v30, %v183_v31  ;;  %v3687_v43 = vcombine.low %v179_v32, %v187_v33  ;;  %v227_v56 = vld [vmem:[%s5201_s0 + $0x3b8] sm:$0xff] }
 0x114   :  { %3226 = vmatpush1.bf16.msra.mxu0 %v4610_v37  ;;  %2775 = vmatprep.subr.bf16.mxu1 %v4615_v38  ;;  %v3688_v37 = vcombine.high %v179_v32, %v187_v33  ;;  %v191_v38 = vld [vmem:[%s5201_s0 + $0x298] sm:$0xff] }
 0x115   :  { %3227 = vmatprep.subr.bf16.mxu0 %v4618_v39  ;;  %v199_v39 = vld [vmem:[%s5201_s0 + $0x2d8] sm:$0xff] }
 0x116   :  { %2731 = vmatmul.mubr.bf16.gmra.mrb[24].mxu1 %v3709_v41  ;;  %v203_v41 = vld [vmem:[%s5201_s0 + $0x2f8] sm:$0xff]  ;;  %v3696_v44 = vcombine.high %v191_v38, %v199_v39 }
 0x117   :  { %3183 = vmatmul.mubr.bf16.gmra.mrb[24].mxu0 %v3717_v42  ;;  %2776 = vmatpush1.bf16.msra.mxu1 %v4613_v46  ;;  %v3679_v42 = vcombine.low %v175_v30, %v183_v31  ;;  %v3704_v45 = vcombine.high %v195_v40, %v203_v41  ;;  %v207_v46 = vld [vmem:[%s5201_s0 + $0x318] sm:$0xff] }
 0x118   :  { %3228 = vmatpush1.bf16.msra.mxu0 %v4616_v47  ;;  %2777 = vmatprep.subr.bf16.mxu1 %v4621_v48  ;;  %v215_v47 = vld [vmem:[%s5201_s0 + $0x358] sm:$0xff] }
 0x119   :  { %3229 = vmatprep.subr.bf16.mxu0 %v4624_v49  ;;  %2740 = vmatprep.mubr.bf16.mxu1 %v3726_v50  ;;  %v211_v48 = vld [vmem:[%s5201_s0 + $0x338] sm:$0xff]  ;;  %v3695_v50 = vcombine.low %v191_v38, %v199_v39 }
 0x11a   :  { %3192 = vmatprep.mubr.bf16.mxu0 %v3734_v51  ;;  %v219_v49 = vld [vmem:[%s5201_s0 + $0x378] sm:$0xff]  ;;  %v3703_v51 = vcombine.low %v195_v40, %v203_v41 }
 0x11b   :  { %2778 = vmatpush1.bf16.msra.mxu1 %v4619_v52  ;;  %v3712_v52 = vcombine.high %v207_v46, %v215_v47  ;;  %v3719_v59 = vcombine.low %v211_v48, %v219_v49 }
 0x11c   :  { %3230 = vmatpush1.bf16.msra.mxu0 %v4622_v53  ;;  %2779 = vmatprep.subr.bf16.mxu1 %v4627_v54  ;;  %v3720_v53 = vcombine.high %v211_v48, %v219_v49  ;;  %v223_v54 = vld [vmem:[%s5201_s0 + $0x398] sm:$0xff] }
 0x11d   :  { %3231 = vmatprep.subr.bf16.mxu0 %v4630_v55  ;;  %v231_v55 = vld [vmem:[%s5201_s0 + $0x3d8] sm:$0xff] }
 0x11e   :  { %2741 = vmatmul.mubr.bf16.gmra.mrb[28].mxu1 %v3725_v57  ;;  %v235_v57 = vld [vmem:[%s5201_s0 + $0x3f8] sm:$0xff]  ;;  %v3728_v60 = vcombine.high %v223_v54, %v231_v55 }
 0x11f   :  { %3193 = vmatmul.mubr.bf16.gmra.mrb[28].mxu0 %v3733_v58  ;;  %2780 = vmatpush1.bf16.msra.mxu1 %v4625_v62  ;;  %v3711_v58 = vcombine.low %v207_v46, %v215_v47  ;;  %v3736_v61 = vcombine.high %v227_v56, %v235_v57  ;;  %v3727_v62 = vcombine.low %v223_v54, %v231_v55 }
 0x120   :  { %3232 = vmatpush1.bf16.msra.mxu0 %v4628_v63  ;;  %2781 = vmatprep.subr.bf16.mxu1 %v4633_v0  ;;  %v3735_v63 = vcombine.low %v227_v56, %v235_v57  ;;  %v3417_v0 = vlaneseq }
 0x121   :  { %3233 = vmatprep.subr.bf16.mxu0 %v4636_v1  ;;  %2783 = vmatprep.mubr.bf16.mxu1 %v3616_v2 }
 0x122   :  { %3235 = vmatprep.mubr.bf16.mxu0 %v3624_v3  ;;  %v3418_v1 = vshrl.u32 %v3417_v0, 7  ;;  %v3415_v3 = vld [vmem:[#allocation5] sm:$0x3] }
 0x123   :  { %2782 = vmatpush1.bf16.msra.mxu1 %v4631_v4 }
 0x124   :  { %3234 = vmatpush1.bf16.msra.mxu0 %v4634_v5  ;;  %v3419_v2 = vsub.s32 0, %v3418_v1  ;;  %v3423_v4 = vsub.s32 1, %v3418_v1 }
 0x126   :  { %2784 = vmatmul.mubr.bf16.vlgmr.msra.gmra.mrb[0].mxu1 %v3615_v10  ;;  %v5117_v5 = vrot.slane %v3415_v3, %v3419_v2  ;;  %v5119_v8 = vrot.slane %v3415_v3, %v3423_v4 }
 0x127   :  { %3236 = vmatmul.mubr.bf16.vlgmr.msra.gmra.mrb[0].mxu0 %v3623_v11  ;;  %2793 = vmatprep.mubr.bf16.mxu1 %v3632_v12 }
 0x128   :  { %3245 = vmatprep.mubr.bf16.mxu0 %v3640_v13 }
 0x12e   :  { %2794 = vmatmul.mubr.bf16.gmra.mrb[4].mxu1 %v3631_v18 }
 0x12f   :  { %3246 = vmatmul.mubr.bf16.gmra.mrb[4].mxu0 %v3639_v19  ;;  %2803 = vmatprep.mubr.bf16.mxu1 %v3648_v20 }
 0x130   :  { %3255 = vmatprep.mubr.bf16.mxu0 %v3656_v21 }
 0x136   :  { %2804 = vmatmul.mubr.bf16.gmra.mrb[8].mxu1 %v3647_v26 }
 0x137   :  { %3256 = vmatmul.mubr.bf16.gmra.mrb[8].mxu0 %v3655_v27  ;;  %2813 = vmatprep.mubr.bf16.mxu1 %v3664_v28 }
 0x138   :  { %3265 = vmatprep.mubr.bf16.mxu0 %v3672_v29 }
 0x13e   :  { %2814 = vmatmul.mubr.bf16.gmra.mrb[12].mxu1 %v3663_v34 }
 0x13f   :  { %3266 = vmatmul.mubr.bf16.gmra.mrb[12].mxu0 %v3671_v35  ;;  %2823 = vmatprep.mubr.bf16.mxu1 %v3680_v36 }
 0x140   :  { %3275 = vmatprep.mubr.bf16.mxu0 %v3688_v37 }
 0x146   :  { %2824 = vmatmul.mubr.bf16.gmra.mrb[16].mxu1 %v3679_v42 }
 0x147   :  { %3276 = vmatmul.mubr.bf16.gmra.mrb[16].mxu0 %v3687_v43  ;;  %2833 = vmatprep.mubr.bf16.mxu1 %v3696_v44 }
 0x148   :  { %3285 = vmatprep.mubr.bf16.mxu0 %v3704_v45 }
 0x14e   :  { %2834 = vmatmul.mubr.bf16.gmra.mrb[20].mxu1 %v3695_v50 }
 0x14f   :  { %3286 = vmatmul.mubr.bf16.gmra.mrb[20].mxu0 %v3703_v51  ;;  %2843 = vmatprep.mubr.bf16.mxu1 %v3712_v52 }
 0x150   :  { %3295 = vmatprep.mubr.bf16.mxu0 %v3720_v53 }
 0x156   :  { %2844 = vmatmul.mubr.bf16.gmra.mrb[24].mxu1 %v3711_v58 }
 0x157   :  { %3296 = vmatmul.mubr.bf16.gmra.mrb[24].mxu0 %v3719_v59  ;;  %2853 = vmatprep.mubr.bf16.mxu1 %v3728_v60 }
 0x158   :  { %3305 = vmatprep.mubr.bf16.mxu0 %v3736_v61 }
 0x15e   :  { %2854 = vmatmul.mubr.bf16.gmra.mrb[28].mxu1 %v3727_v62 }
 0x15f   :  { %3306 = vmatmul.mubr.bf16.gmra.mrb[28].mxu0 %v3735_v63 }
 0x1f9   :  { %v2785_v6 = vpop.f32.mrb[0].mxu1 }
 0x1fa   :  { %v3237_v7 = vpop.f32.mrb[0].mxu0  ;;  %v2787_v10 = vpop.f32.mrb[1].mxu1 }
 0x1fb   :  { %v4025_v9 = vadd.f32 %v3237_v7, %v2785_v6  ;;  %v3239_v11 = vpop.f32.mrb[1].mxu0  ;;  %v2789_v13 = vpop.f32.mrb[2].mxu1 }
 0x1fc   :  { %v4026_v12 = vadd.f32 %v3239_v11, %v2787_v10  ;;  %v3241_v14 = vpop.f32.mrb[2].mxu0  ;;  %v2791_v17 = vpop.f32.mrb[3].mxu1 }
 0x1fd   :  { %v3427_v15 = vadd.f32 %v4025_v9, %v5117_v5  ;;  %v4027_v16 = vadd.f32 %v3241_v14, %v2789_v13  ;;  %v3243_v18 = vpop.f32.mrb[3].mxu0 }
 0x1fe   :  { %v3428_v19 = vadd.f32 %v4026_v12, %v5119_v8  ;;  %v4028_v20 = vadd.f32 %v3243_v18, %v2791_v17 }
 0x1ff   :  { %v3459_v21 = vmax.f32 %v3427_v15, 0.0  ;;  %v3429_v22 = vadd.f32 %v4027_v16, %v5117_v5 }
 0x200   :  { %v3460_v23 = vmax.f32 %v3428_v19, 0.0  ;;  %v3430_v24 = vadd.f32 %v4028_v20, %v5119_v8 }
 0x201   :  { %v3461_v25 = vmax.f32 %v3429_v22, 0.0  ;;  %v2795_v28 = vpop.f32.mrb[4].mxu1 }
 0x202   :  { %v4009_v26 = vpack.c.bf16 %v3460_v23, %v3459_v21  ;;  %v3462_v27 = vmax.f32 %v3430_v24, 0.0  ;;  %v3247_v29 = vpop.f32.mrb[4].mxu0  ;;  %v2797_v31 = vpop.f32.mrb[5].mxu1 }
 0x203   :  { %v4029_v30 = vadd.f32 %v3247_v29, %v2795_v28  ;;  %v3249_v32 = vpop.f32.mrb[5].mxu0  ;;  %v2799_v35 = vpop.f32.mrb[6].mxu1 }
 0x204   :  { %3587 = vst [vmem:[%s5204_s3] sm:$0xff] %v4009_v26  ;;  %v4010_v33 = vpack.c.bf16 %v3462_v27, %v3461_v25  ;;  %v4030_v34 = vadd.f32 %v3249_v32, %v2797_v31  ;;  %v3251_v36 = vpop.f32.mrb[6].mxu0  ;;  %v2801_v39 = vpop.f32.mrb[7].mxu1 }
 0x205   :  { %v3431_v37 = vadd.f32 %v4029_v30, %v5117_v5  ;;  %v4031_v38 = vadd.f32 %v3251_v36, %v2799_v35  ;;  %v3253_v40 = vpop.f32.mrb[7].mxu0 }
 0x206   :  { %3588 = vst [vmem:[%s5204_s3 + $0x8] sm:$0xff] %v4010_v33  ;;  %v3432_v41 = vadd.f32 %v4030_v34, %v5119_v8  ;;  %v4032_v42 = vadd.f32 %v3253_v40, %v2801_v39 }
 0x207   :  { %v3463_v43 = vmax.f32 %v3431_v37, 0.0  ;;  %v3433_v44 = vadd.f32 %v4031_v38, %v5117_v5 }
 0x208   :  { %v3464_v45 = vmax.f32 %v3432_v41, 0.0  ;;  %v3434_v46 = vadd.f32 %v4032_v42, %v5119_v8 }
 0x209   :  { %v3465_v47 = vmax.f32 %v3433_v44, 0.0  ;;  %v2805_v50 = vpop.f32.mrb[8].mxu1 }
 0x20a   :  { %v4011_v48 = vpack.c.bf16 %v3464_v45, %v3463_v43  ;;  %v3466_v49 = vmax.f32 %v3434_v46, 0.0  ;;  %v3257_v51 = vpop.f32.mrb[8].mxu0  ;;  %v2807_v53 = vpop.f32.mrb[9].mxu1 }
 0x20b   :  { %v4033_v52 = vadd.f32 %v3257_v51, %v2805_v50  ;;  %v3259_v54 = vpop.f32.mrb[9].mxu0  ;;  %v2809_v57 = vpop.f32.mrb[10].mxu1 }
 0x20c   :  { %3589 = vst [vmem:[%s5204_s3 + $0x10] sm:$0xff] %v4011_v48  ;;  %v4012_v55 = vpack.c.bf16 %v3466_v49, %v3465_v47  ;;  %v4034_v56 = vadd.f32 %v3259_v54, %v2807_v53  ;;  %v3261_v58 = vpop.f32.mrb[10].mxu0  ;;  %v2811_v61 = vpop.f32.mrb[11].mxu1 }
 0x20d   :  { %v3435_v59 = vadd.f32 %v4033_v52, %v5117_v5  ;;  %v4035_v60 = vadd.f32 %v3261_v58, %v2809_v57  ;;  %v3263_v62 = vpop.f32.mrb[11].mxu0 }
 0x20e   :  { %3590 = vst [vmem:[%s5204_s3 + $0x18] sm:$0xff] %v4012_v55  ;;  %v3436_v63 = vadd.f32 %v4034_v56, %v5119_v8  ;;  %v4036_v0 = vadd.f32 %v3263_v62, %v2811_v61 }
 0x20f   :  { %v3467_v1 = vmax.f32 %v3435_v59, 0.0  ;;  %v3437_v2 = vadd.f32 %v4035_v60, %v5117_v5 }
 0x210   :  { %v3468_v3 = vmax.f32 %v3436_v63, 0.0  ;;  %v3438_v4 = vadd.f32 %v4036_v0, %v5119_v8 }
 0x211   :  { %v3469_v6 = vmax.f32 %v3437_v2, 0.0  ;;  %v2815_v10 = vpop.f32.mrb[12].mxu1 }
 0x212   :  { %v4013_v7 = vpack.c.bf16 %v3468_v3, %v3467_v1  ;;  %v3470_v9 = vmax.f32 %v3438_v4, 0.0  ;;  %v3267_v11 = vpop.f32.mrb[12].mxu0  ;;  %v2817_v13 = vpop.f32.mrb[13].mxu1 }
 0x213   :  { %v4037_v12 = vadd.f32 %v3267_v11, %v2815_v10  ;;  %v3269_v14 = vpop.f32.mrb[13].mxu0  ;;  %v2819_v17 = vpop.f32.mrb[14].mxu1 }
 0x214   :  { %3591 = vst [vmem:[%s5204_s3 + $0x20] sm:$0xff] %v4013_v7  ;;  %v4014_v15 = vpack.c.bf16 %v3470_v9, %v3469_v6  ;;  %v4038_v16 = vadd.f32 %v3269_v14, %v2817_v13  ;;  %v3271_v18 = vpop.f32.mrb[14].mxu0  ;;  %v2821_v21 = vpop.f32.mrb[15].mxu1 }
 0x215   :  { %v3439_v19 = vadd.f32 %v4037_v12, %v5117_v5  ;;  %v4039_v20 = vadd.f32 %v3271_v18, %v2819_v17  ;;  %v3273_v22 = vpop.f32.mrb[15].mxu0 }
 0x216   :  { %3592 = vst [vmem:[%s5204_s3 + $0x28] sm:$0xff] %v4014_v15  ;;  %v3440_v23 = vadd.f32 %v4038_v16, %v5119_v8  ;;  %v4040_v24 = vadd.f32 %v3273_v22, %v2821_v21 }
 0x217   :  { %v3471_v25 = vmax.f32 %v3439_v19, 0.0  ;;  %v3441_v26 = vadd.f32 %v4039_v20, %v5117_v5 }
 0x218   :  { %v3472_v27 = vmax.f32 %v3440_v23, 0.0  ;;  %v3442_v28 = vadd.f32 %v4040_v24, %v5119_v8 }
 0x219   :  { %v3473_v29 = vmax.f32 %v3441_v26, 0.0  ;;  %v2825_v32 = vpop.f32.mrb[16].mxu1 }
 0x21a   :  { %v4015_v30 = vpack.c.bf16 %v3472_v27, %v3471_v25  ;;  %v3474_v31 = vmax.f32 %v3442_v28, 0.0  ;;  %v3277_v33 = vpop.f32.mrb[16].mxu0  ;;  %v2827_v35 = vpop.f32.mrb[17].mxu1 }
 0x21b   :  { %v4041_v34 = vadd.f32 %v3277_v33, %v2825_v32  ;;  %v3279_v36 = vpop.f32.mrb[17].mxu0  ;;  %v2829_v39 = vpop.f32.mrb[18].mxu1 }
 0x21c   :  { %3593 = vst [vmem:[%s5204_s3 + $0x30] sm:$0xff] %v4015_v30  ;;  %v4016_v37 = vpack.c.bf16 %v3474_v31, %v3473_v29  ;;  %v4042_v38 = vadd.f32 %v3279_v36, %v2827_v35  ;;  %v3281_v40 = vpop.f32.mrb[18].mxu0  ;;  %v2831_v43 = vpop.f32.mrb[19].mxu1 }
 0x21d   :  { %v3443_v41 = vadd.f32 %v4041_v34, %v5117_v5  ;;  %v4043_v42 = vadd.f32 %v3281_v40, %v2829_v39  ;;  %v3283_v44 = vpop.f32.mrb[19].mxu0 }
 0x21e   :  { %3594 = vst [vmem:[%s5204_s3 + $0x38] sm:$0xff] %v4016_v37  ;;  %v3444_v45 = vadd.f32 %v4042_v38, %v5119_v8  ;;  %v4044_v46 = vadd.f32 %v3283_v44, %v2831_v43 }
 0x21f   :  { %v3475_v47 = vmax.f32 %v3443_v41, 0.0  ;;  %v3445_v48 = vadd.f32 %v4043_v42, %v5117_v5 }
 0x220   :  { %v3476_v49 = vmax.f32 %v3444_v45, 0.0  ;;  %v3446_v50 = vadd.f32 %v4044_v46, %v5119_v8 }
 0x221   :  { %v3477_v51 = vmax.f32 %v3445_v48, 0.0  ;;  %v2835_v54 = vpop.f32.mrb[20].mxu1 }
 0x222   :  { %v4017_v52 = vpack.c.bf16 %v3476_v49, %v3475_v47  ;;  %v3478_v53 = vmax.f32 %v3446_v50, 0.0  ;;  %v3287_v55 = vpop.f32.mrb[20].mxu0  ;;  %v2837_v57 = vpop.f32.mrb[21].mxu1 }
 0x223   :  { %v4045_v56 = vadd.f32 %v3287_v55, %v2835_v54  ;;  %v3289_v58 = vpop.f32.mrb[21].mxu0  ;;  %v2839_v61 = vpop.f32.mrb[22].mxu1 }
 0x224   :  { %3595 = vst [vmem:[%s5204_s3 + $0x40] sm:$0xff] %v4017_v52  ;;  %v4018_v59 = vpack.c.bf16 %v3478_v53, %v3477_v51  ;;  %v4046_v60 = vadd.f32 %v3289_v58, %v2837_v57  ;;  %v3291_v62 = vpop.f32.mrb[22].mxu0  ;;  %v2841_v1 = vpop.f32.mrb[23].mxu1 }
 0x225   :  { %v3447_v63 = vadd.f32 %v4045_v56, %v5117_v5  ;;  %v4047_v0 = vadd.f32 %v3291_v62, %v2839_v61  ;;  %v3293_v2 = vpop.f32.mrb[23].mxu0 }
 0x226   :  { %3596 = vst [vmem:[%s5204_s3 + $0x48] sm:$0xff] %v4018_v59  ;;  %v3448_v3 = vadd.f32 %v4046_v60, %v5119_v8  ;;  %v4048_v4 = vadd.f32 %v3293_v2, %v2841_v1 }
 0x227   :  { %v3479_v6 = vmax.f32 %v3447_v63, 0.0  ;;  %v3449_v7 = vadd.f32 %v4047_v0, %v5117_v5 }
 0x228   :  { %v3480_v9 = vmax.f32 %v3448_v3, 0.0  ;;  %v3450_v10 = vadd.f32 %v4048_v4, %v5119_v8 }
 0x229   :  { %v3481_v11 = vmax.f32 %v3449_v7, 0.0  ;;  %v2845_v14 = vpop.f32.mrb[24].mxu1 }
 0x22a   :  { %v4019_v12 = vpack.c.bf16 %v3480_v9, %v3479_v6  ;;  %v3482_v13 = vmax.f32 %v3450_v10, 0.0  ;;  %v3297_v15 = vpop.f32.mrb[24].mxu0  ;;  %v2847_v17 = vpop.f32.mrb[25].mxu1 }
 0x22b   :  { %v4049_v16 = vadd.f32 %v3297_v15, %v2845_v14  ;;  %v3299_v18 = vpop.f32.mrb[25].mxu0  ;;  %v2849_v21 = vpop.f32.mrb[26].mxu1 }
 0x22c   :  { %3597 = vst [vmem:[%s5204_s3 + $0x50] sm:$0xff] %v4019_v12  ;;  %v4020_v19 = vpack.c.bf16 %v3482_v13, %v3481_v11  ;;  %v4050_v20 = vadd.f32 %v3299_v18, %v2847_v17  ;;  %v3301_v22 = vpop.f32.mrb[26].mxu0  ;;  %v2851_v25 = vpop.f32.mrb[27].mxu1 }
 0x22d   :  { %v3451_v23 = vadd.f32 %v4049_v16, %v5117_v5  ;;  %v4051_v24 = vadd.f32 %v3301_v22, %v2849_v21  ;;  %v3303_v26 = vpop.f32.mrb[27].mxu0 }
 0x22e   :  { %3598 = vst [vmem:[%s5204_s3 + $0x58] sm:$0xff] %v4020_v19  ;;  %v3452_v27 = vadd.f32 %v4050_v20, %v5119_v8  ;;  %v4052_v28 = vadd.f32 %v3303_v26, %v2851_v25 }
 0x22f   :  { %v3483_v29 = vmax.f32 %v3451_v23, 0.0  ;;  %v3453_v30 = vadd.f32 %v4051_v24, %v5117_v5 }
 0x230   :  { %v3484_v31 = vmax.f32 %v3452_v27, 0.0  ;;  %v3454_v32 = vadd.f32 %v4052_v28, %v5119_v8 }
 0x231   :  { %v3485_v33 = vmax.f32 %v3453_v30, 0.0  ;;  %v2855_v36 = vpop.f32.mrb[28].mxu1 }
 0x232   :  { %v4021_v34 = vpack.c.bf16 %v3484_v31, %v3483_v29  ;;  %v3486_v35 = vmax.f32 %v3454_v32, 0.0  ;;  %v3307_v37 = vpop.f32.mrb[28].mxu0  ;;  %v2857_v39 = vpop.f32.mrb[29].mxu1 }
 0x233   :  { %v4053_v38 = vadd.f32 %v3307_v37, %v2855_v36  ;;  %v3309_v40 = vpop.f32.mrb[29].mxu0  ;;  %v2859_v43 = vpop.f32.mrb[30].mxu1 }
 0x234   :  { %3599 = vst [vmem:[%s5204_s3 + $0x60] sm:$0xff] %v4021_v34  ;;  %v4022_v41 = vpack.c.bf16 %v3486_v35, %v3485_v33  ;;  %v4054_v42 = vadd.f32 %v3309_v40, %v2857_v39  ;;  %v3311_v44 = vpop.f32.mrb[30].mxu0  ;;  %v2861_v47 = vpop.f32.mrb[31].mxu1 }
 0x235   :  { %v3455_v45 = vadd.f32 %v4053_v38, %v5117_v5  ;;  %v4055_v46 = vadd.f32 %v3311_v44, %v2859_v43  ;;  %v3313_v48 = vpop.f32.mrb[31].mxu0 }
 0x236   :  { %3600 = vst [vmem:[%s5204_s3 + $0x68] sm:$0xff] %v4022_v41  ;;  %v3456_v49 = vadd.f32 %v4054_v42, %v5119_v8  ;;  %v4056_v50 = vadd.f32 %v3313_v48, %v2861_v47 }
 0x237   :  { %v3487_v51 = vmax.f32 %v3455_v45, 0.0  ;;  %v3457_v52 = vadd.f32 %v4055_v46, %v5117_v5 }
 0x238   :  { %v3488_v53 = vmax.f32 %v3456_v49, 0.0  ;;  %v3458_v54 = vadd.f32 %v4056_v50, %v5119_v8 }
 0x239   :  { %v3489_v55 = vmax.f32 %v3457_v52, 0.0 }
 0x23a   :  { %v4023_v56 = vpack.c.bf16 %v3488_v53, %v3487_v51  ;;  %v3490_v57 = vmax.f32 %v3458_v54, 0.0 }
 0x23c   :  { %3601 = vst [vmem:[%s5204_s3 + $0x70] sm:$0xff] %v4023_v56  ;;  %v4024_v58 = vpack.c.bf16 %v3490_v57, %v3489_v55 }
 0x23e   :  { %3602 = vst [vmem:[%s5204_s3 + $0x78] sm:$0xff] %v4024_v58 }
 0x23f   :  { %3607 = vsyncpa [#allocation4], 1 }
 0x240   :  { %3608 = vsyncpa [#allocation6], 1 }

// kernel: encoder_pallas.8
= control target key start
LH: loop header
LB: loop body
LE: loop exit
PB: predicated region body
PF: predicated region fallthrough
CT: control target
= control target key end

     0   :  { %s5865_s0 = inlined_call_operand.vmem [shape: bf16[32,4096], index: 0, kind: input, shape index: {}]   ;;  %s5866_s1 = inlined_call_operand.vmem [shape: bf16[4096,512], index: 1, kind: input, shape index: {}]   ;;  %s5867_s2 = inlined_call_operand.vmem [shape: f32[1,512], index: 2, kind: input, shape index: {}]   ;;  %s5868_s3 = inlined_call_operand.vmem [shape: bf16[32,512], index: 3, kind: output, shape index: {}]  }
   0x1   :  { %5870 = sst [smem:[#allocation7_spill]] %s5865_s0 }
   0x2   :  { %5871 = sst [smem:[#allocation8_spill]] %s5866_s1 }
   0x3   :  { %s4759_s12 = smov 0   ;;  %s4761_s13 = smov 0  }
   0x4   :  { %s4763_s14 = smov 0   ;;  %s4765_s15 = smov 0  }
   0x5   :  { %s4767_s16 = smov 0   ;;  %s4769_s17 = smov 0  }
   0x6   :  { %s4771_s18 = smov 0   ;;  %s4773_s19 = smov 0  }
   0x7   :  { %s4775_s20 = smov 0   ;;  %s4777_s21 = smov 0  }
   0x8   :  { %s4779_s22 = smov 0  }
   0x9 LB: > { %s3798_s23 = sadd.s32 4294967295, %s4736_s22   ;;  %s25_s24 = sadd.s32 1, %s4728_s20  ;;  %s4736_s22 = sphi %s4779_s22, %s13_s22   ;;  %s4732_s21 = sphi %s4777_s21, %s5888_s21   ;;  %s4728_s20 = sphi %s4775_s20, %s5887_s20   ;;  %s4724_s19 = sphi %s4773_s19, %s5886_s19   ;;  %s4720_s18 = sphi %s4771_s18, %s5885_s18   ;;  %s4716_s17 = sphi %s4769_s17, %s5884_s17   ;;  %s4712_s16 = sphi %s4767_s16, %s5883_s16   ;;  %s4708_s15 = sphi %s4765_s15, %s5882_s15   ;;  %s4704_s14 = sphi %s4763_s14, %s5881_s14   ;;  %s4700_s13 = sphi %s4761_s13, %s5880_s13   ;;  %s4696_s12 = sphi %s4759_s12, %s5879_s12  }
   0xa   : > { %p26_p0 = scmp.ge.s32.totalorder %s25_s24, 2  ;;  %s28_s25 = sadd.s32 1, %s4732_s21 }
   0xb   : > { %s41_s26 = sadd.s32 1, %s4716_s17  ;;  %p48_p1 = scmp.ne.s32.totalorder %s4716_s17, %s4712_s16 }
   0xc   : > { %s5890_s24 = smov (%p26_p0, %s25_s24), 0  ;;  %s5892_s25 = smov (!%p26_p0, %s28_s25), %s4732_s21 }
   0xd   : > { %s37_s27 = ssub.s32 %s4728_s20, %s5890_s24  ;;  %p49_p2 = scmp.eq.s32.totalorder %s4736_s22, 0 }
   0xe   : > { %p30_p3 = scmp.ge.s32.totalorder %s5892_s25, 2  ;;  %p39_p4 = scmp.eq.s32.totalorder %s37_s27, 0 }
   0xf   : > { %p4826_p5 = por %p49_p2, %p48_p1  ;;  %s69_s29 = sadd.s32 1, %s4708_s15 }
  0x10   : > { %s5894_s25 = smov (%p30_p3, %s5892_s25), 0  ;;  %p76_p6 = scmp.ne.s32.totalorder %s4708_s15, %s4704_s14 }
  0x11   : > { %5873 = sst [smem:[#allocation6_spill]] %s5894_s25  ;;  %s65_s4 = ssub.s32 %s4732_s21, %s5894_s25 }
  0x12   : > { %s4834_s30 = scalar_select %p39_p4, %s4716_s17, %s41_s26  }
  0x13   : > { %s66_s5 = sor.u32 %s65_s4, %s37_s27  ;;  %p121_p7 = scmp.eq.s32.totalorder %s65_s4, 0 }
  0x14   : > { %p67_p8 = scmp.eq.s32.totalorder %s66_s5, 0  ;;  %p4840_p9 = por %p76_p6, %p49_p2 }
  0x15   : > { %s123_s7 = sadd.s32 1, %s4700_s13  ;;  %p133_p10 = scmp.ne.s32.totalorder %s4700_s13, %s4696_s12 }
  0x16   : > { %s4848_s8 = scalar_select %p67_p8, %s4708_s15, %s69_s29  }
  0x17   : > { %s4851_s9 = scalar_select %p121_p7, %s4700_s13, %s123_s7  }
  0x18   : > { %p134_p11 = scmp.eq.s32.totalorder %s3798_s23, 3  ;;  %p3801_p13 = scmp.ge.s32.totalorder %s4736_s22, 4 }
  0x1a   : > { %p4853_p12 = por %p134_p11, %p133_p10  ;;  %156 = sbr.rel (%p3801_p13) target bundleno = 197 (0xc5), region = 16 }
  0x21   : > { %159 = sbr.rel (!%p4826_p5) target bundleno = 59 (0x3b), region = 20  ;;  %s161_s11 = sand.u32 (%p4826_p5), 1, %s4716_s17  }
  0x22   : > { %s4114_s26 = sshll.u32 (%p4826_p5), %s4728_s20, 6  ;;  %s3802_s27 = sshll.u32 (%p4826_p5), %s161_s11, 8 }
  0x23   : > { %s5876_s0 = sld [smem:[#allocation7_spill]] (%p4826_p5)  ;;  %s4870_s23 = scalar_lea.vmem (%p4826_p5), [#allocation3], %s3802_s27 }
  0x29   : > { %s4865_s5 = scalar_lea.vmem %s5876_s0, %s4114_s26 }
  0x2a   : > { %v182_v0 = vld [vmem:[%s4865_s5] sm:$0xff]  ;;  %v184_v1 = vld [vmem:[%s4865_s5 + $0x8] sm:$0xff]  ;;  %v186_v2 = vld [vmem:[%s4865_s5 + $0x10] sm:$0xff] }
  0x2b   : > { %183 = vst [vmem:[%s4870_s23] sm:$0xff] %v182_v0  ;;  %185 = vst [vmem:[%s4870_s23 + $0x8] sm:$0xff] %v184_v1  ;;  %v188_v3 = vld [vmem:[%s4865_s5 + $0x18] sm:$0xff]  ;;  %v190_v4 = vld [vmem:[%s4865_s5 + $0x20] sm:$0xff] }
  0x2c   : > { %187 = vst [vmem:[%s4870_s23 + $0x10] sm:$0xff] %v186_v2  ;;  %v192_v5 = vld [vmem:[%s4865_s5 + $0x28] sm:$0xff]  ;;  %189 = vst [vmem:[%s4870_s23 + $0x18] sm:$0xff] %v188_v3  ;;  %v194_v6 = vld [vmem:[%s4865_s5 + $0x30] sm:$0xff] }
  0x2d   : > { %191 = vst [vmem:[%s4870_s23 + $0x20] sm:$0xff] %v190_v4  ;;  %193 = vst [vmem:[%s4870_s23 + $0x28] sm:$0xff] %v192_v5  ;;  %v196_v7 = vld [vmem:[%s4865_s5 + $0x38] sm:$0xff]  ;;  %v198_v8 = vld [vmem:[%s4865_s5 + $0x80] sm:$0xff] }
  0x2e   : > { %195 = vst [vmem:[%s4870_s23 + $0x30] sm:$0xff] %v194_v6  ;;  %197 = vst [vmem:[%s4870_s23 + $0x38] sm:$0xff] %v196_v7  ;;  %v200_v9 = vld [vmem:[%s4865_s5 + $0x88] sm:$0xff]  ;;  %v202_v10 = vld [vmem:[%s4865_s5 + $0x90] sm:$0xff] }
  0x2f   : > { %199 = vst [vmem:[%s4870_s23 + $0x40] sm:$0xff] %v198_v8  ;;  %v204_v11 = vld [vmem:[%s4865_s5 + $0x98] sm:$0xff]  ;;  %201 = vst [vmem:[%s4870_s23 + $0x48] sm:$0xff] %v200_v9  ;;  %v206_v12 = vld [vmem:[%s4865_s5 + $0xa0] sm:$0xff] }
  0x30   : > { %203 = vst [vmem:[%s4870_s23 + $0x50] sm:$0xff] %v202_v10  ;;  %205 = vst [vmem:[%s4870_s23 + $0x58] sm:$0xff] %v204_v11  ;;  %v208_v13 = vld [vmem:[%s4865_s5 + $0xa8] sm:$0xff]  ;;  %v210_v14 = vld [vmem:[%s4865_s5 + $0xb0] sm:$0xff] }
  0x31   : > { %207 = vst [vmem:[%s4870_s23 + $0x60] sm:$0xff] %v206_v12  ;;  %209 = vst [vmem:[%s4870_s23 + $0x68] sm:$0xff] %v208_v13  ;;  %v212_v15 = vld [vmem:[%s4865_s5 + $0xb8] sm:$0xff]  ;;  %v214_v16 = vld [vmem:[%s4865_s5 + $0x100] sm:$0xff] }
  0x32   : > { %211 = vst [vmem:[%s4870_s23 + $0x70] sm:$0xff] %v210_v14  ;;  %v216_v17 = vld [vmem:[%s4865_s5 + $0x108] sm:$0xff]  ;;  %213 = vst [vmem:[%s4870_s23 + $0x78] sm:$0xff] %v212_v15  ;;  %v218_v18 = vld [vmem:[%s4865_s5 + $0x110] sm:$0xff] }
  0x33   : > { %215 = vst [vmem:[%s4870_s23 + $0x80] sm:$0xff] %v214_v16  ;;  %217 = vst [vmem:[%s4870_s23 + $0x88] sm:$0xff] %v216_v17  ;;  %v220_v19 = vld [vmem:[%s4865_s5 + $0x118] sm:$0xff]  ;;  %v222_v20 = vld [vmem:[%s4865_s5 + $0x120] sm:$0xff] }
  0x34   : > { %219 = vst [vmem:[%s4870_s23 + $0x90] sm:$0xff] %v218_v18  ;;  %221 = vst [vmem:[%s4870_s23 + $0x98] sm:$0xff] %v220_v19  ;;  %v224_v21 = vld [vmem:[%s4865_s5 + $0x128] sm:$0xff]  ;;  %v226_v22 = vld [vmem:[%s4865_s5 + $0x130] sm:$0xff] }
  0x35   : > { %223 = vst [vmem:[%s4870_s23 + $0xa0] sm:$0xff] %v222_v20  ;;  %v228_v23 = vld [vmem:[%s4865_s5 + $0x138] sm:$0xff]  ;;  %225 = vst [vmem:[%s4870_s23 + $0xa8] sm:$0xff] %v224_v21  ;;  %v230_v24 = vld [vmem:[%s4865_s5 + $0x180] sm:$0xff] }
  0x36   : > { %227 = vst [vmem:[%s4870_s23 + $0xb0] sm:$0xff] %v226_v22  ;;  %229 = vst [vmem:[%s4870_s23 + $0xb8] sm:$0xff] %v228_v23  ;;  %v232_v25 = vld [vmem:[%s4865_s5 + $0x188] sm:$0xff]  ;;  %v234_v26 = vld [vmem:[%s4865_s5 + $0x190] sm:$0xff] }
  0x37   : > { %231 = vst [vmem:[%s4870_s23 + $0xc0] sm:$0xff] %v230_v24  ;;  %233 = vst [vmem:[%s4870_s23 + $0xc8] sm:$0xff] %v232_v25  ;;  %v236_v27 = vld [vmem:[%s4865_s5 + $0x198] sm:$0xff]  ;;  %v238_v28 = vld [vmem:[%s4865_s5 + $0x1a0] sm:$0xff] }
  0x38   : > { %235 = vst [vmem:[%s4870_s23 + $0xd0] sm:$0xff] %v234_v26  ;;  %v240_v29 = vld [vmem:[%s4865_s5 + $0x1a8] sm:$0xff]  ;;  %237 = vst [vmem:[%s4870_s23 + $0xd8] sm:$0xff] %v236_v27  ;;  %v242_v30 = vld [vmem:[%s4865_s5 + $0x1b0] sm:$0xff] }
  0x39   : > { %239 = vst [vmem:[%s4870_s23 + $0xe0] sm:$0xff] %v238_v28  ;;  %241 = vst [vmem:[%s4870_s23 + $0xe8] sm:$0xff] %v240_v29  ;;  %v244_v31 = vld [vmem:[%s4865_s5 + $0x1b8] sm:$0xff] }
  0x3a   : > { %243 = vst [vmem:[%s4870_s23 + $0xf0] sm:$0xff] %v242_v30  ;;  %245 = vst [vmem:[%s4870_s23 + $0xf8] sm:$0xff] %v244_v31 }
  0x3b PF: > { %251 = sbr.rel (!%p4840_p9) target bundleno = 197 (0xc5), region = 43  ;;  %s253_s28 = sand.u32 (%p4840_p9), 1, %s4708_s15  }
  0x3c   : > { %s3807_s7 = sshll.u32 (%p4840_p9), %s4732_s21, 1  ;;  %s3805_s11 = sshll.u32 (%p4840_p9), %s253_s28, 11 }
  0x3d   : > { %s4115_s26 = sshll.u32 (%p4840_p9), %s4728_s20, 10  ;;  %s5877_s1 = sld [smem:[#allocation8_spill]] (%p4840_p9) }
  0x3e   : > { %s259_s27 = sadd.s32 (%p4840_p9), %s4115_s26, %s3807_s7  ;;  %s4946_s6 = scalar_lea.vmem (%p4840_p9), [#allocation4], %s3805_s11 }
  0x3f   : > { %s3809_s29 = sshll.u32 (%p4840_p9), %s259_s27, 2 }
  0x43   : > { %s4941_s25 = scalar_lea.vmem %s5877_s1, %s3809_s29 }
  0x44   : > { %v799_v32 = vld [vmem:[%s4941_s25] sm:$0xff]  ;;  %v801_v33 = vld [vmem:[%s4941_s25 + $0x10] sm:$0xff] }
  0x45   : > { %v803_v34 = vld [vmem:[%s4941_s25 + $0x20] sm:$0xff]  ;;  %800 = vst [vmem:[%s4946_s6] sm:$0xff] %v799_v32  ;;  %802 = vst [vmem:[%s4946_s6 + $0x8] sm:$0xff] %v801_v33  ;;  %v805_v35 = vld [vmem:[%s4941_s25 + $0x30] sm:$0xff] }
  0x46   : > { %804 = vst [vmem:[%s4946_s6 + $0x10] sm:$0xff] %v803_v34  ;;  %v807_v36 = vld [vmem:[%s4941_s25 + $0x40] sm:$0xff]  ;;  %v809_v37 = vld [vmem:[%s4941_s25 + $0x50] sm:$0xff]  ;;  %806 = vst [vmem:[%s4946_s6 + $0x18] sm:$0xff] %v805_v35 }
  0x47   : > { %808 = vst [vmem:[%s4946_s6 + $0x20] sm:$0xff] %v807_v36  ;;  %810 = vst [vmem:[%s4946_s6 + $0x28] sm:$0xff] %v809_v37  ;;  %v811_v38 = vld [vmem:[%s4941_s25 + $0x60] sm:$0xff]  ;;  %v813_v39 = vld [vmem:[%s4941_s25 + $0x70] sm:$0xff] }
  0x48   : > { %v815_v40 = vld [vmem:[%s4941_s25 + $0x80] sm:$0xff]  ;;  %812 = vst [vmem:[%s4946_s6 + $0x30] sm:$0xff] %v811_v38  ;;  %814 = vst [vmem:[%s4946_s6 + $0x38] sm:$0xff] %v813_v39  ;;  %v817_v41 = vld [vmem:[%s4941_s25 + $0x90] sm:$0xff] }
  0x49   : > { %816 = vst [vmem:[%s4946_s6 + $0x40] sm:$0xff] %v815_v40  ;;  %v819_v42 = vld [vmem:[%s4941_s25 + $0xa0] sm:$0xff]  ;;  %v821_v43 = vld [vmem:[%s4941_s25 + $0xb0] sm:$0xff]  ;;  %818 = vst [vmem:[%s4946_s6 + $0x48] sm:$0xff] %v817_v41 }
  0x4a   : > { %820 = vst [vmem:[%s4946_s6 + $0x50] sm:$0xff] %v819_v42  ;;  %822 = vst [vmem:[%s4946_s6 + $0x58] sm:$0xff] %v821_v43  ;;  %v823_v44 = vld [vmem:[%s4941_s25 + $0xc0] sm:$0xff]  ;;  %v825_v45 = vld [vmem:[%s4941_s25 + $0xd0] sm:$0xff] }
  0x4b   : > { %v827_v46 = vld [vmem:[%s4941_s25 + $0xe0] sm:$0xff]  ;;  %824 = vst [vmem:[%s4946_s6 + $0x60] sm:$0xff] %v823_v44  ;;  %826 = vst [vmem:[%s4946_s6 + $0x68] sm:$0xff] %v825_v45  ;;  %v829_v47 = vld [vmem:[%s4941_s25 + $0xf0] sm:$0xff] }
  0x4c   : > { %828 = vst [vmem:[%s4946_s6 + $0x70] sm:$0xff] %v827_v46  ;;  %v831_v48 = vld [vmem:[%s4941_s25 + $0x100] sm:$0xff]  ;;  %v833_v49 = vld [vmem:[%s4941_s25 + $0x110] sm:$0xff]  ;;  %830 = vst [vmem:[%s4946_s6 + $0x78] sm:$0xff] %v829_v47 }
  0x4d   : > { %832 = vst [vmem:[%s4946_s6 + $0x80] sm:$0xff] %v831_v48  ;;  %834 = vst [vmem:[%s4946_s6 + $0x88] sm:$0xff] %v833_v49  ;;  %v835_v50 = vld [vmem:[%s4941_s25 + $0x120] sm:$0xff]  ;;  %v837_v51 = vld [vmem:[%s4941_s25 + $0x130] sm:$0xff] }
  0x4e   : > { %v839_v52 = vld [vmem:[%s4941_s25 + $0x140] sm:$0xff]  ;;  %836 = vst [vmem:[%s4946_s6 + $0x90] sm:$0xff] %v835_v50  ;;  %838 = vst [vmem:[%s4946_s6 + $0x98] sm:$0xff] %v837_v51  ;;  %v841_v53 = vld [vmem:[%s4941_s25 + $0x150] sm:$0xff] }
  0x4f   : > { %840 = vst [vmem:[%s4946_s6 + $0xa0] sm:$0xff] %v839_v52  ;;  %v843_v54 = vld [vmem:[%s4941_s25 + $0x160] sm:$0xff]  ;;  %v845_v55 = vld [vmem:[%s4941_s25 + $0x170] sm:$0xff]  ;;  %842 = vst [vmem:[%s4946_s6 + $0xa8] sm:$0xff] %v841_v53 }
  0x50   : > { %844 = vst [vmem:[%s4946_s6 + $0xb0] sm:$0xff] %v843_v54  ;;  %846 = vst [vmem:[%s4946_s6 + $0xb8] sm:$0xff] %v845_v55  ;;  %v847_v56 = vld [vmem:[%s4941_s25 + $0x180] sm:$0xff]  ;;  %v849_v57 = vld [vmem:[%s4941_s25 + $0x190] sm:$0xff] }
  0x51   : > { %v851_v58 = vld [vmem:[%s4941_s25 + $0x1a0] sm:$0xff]  ;;  %848 = vst [vmem:[%s4946_s6 + $0xc0] sm:$0xff] %v847_v56  ;;  %850 = vst [vmem:[%s4946_s6 + $0xc8] sm:$0xff] %v849_v57  ;;  %v853_v59 = vld [vmem:[%s4941_s25 + $0x1b0] sm:$0xff] }
  0x52   : > { %852 = vst [vmem:[%s4946_s6 + $0xd0] sm:$0xff] %v851_v58  ;;  %v855_v60 = vld [vmem:[%s4941_s25 + $0x1c0] sm:$0xff]  ;;  %v857_v61 = vld [vmem:[%s4941_s25 + $0x1d0] sm:$0xff]  ;;  %854 = vst [vmem:[%s4946_s6 + $0xd8] sm:$0xff] %v853_v59 }
  0x53   : > { %856 = vst [vmem:[%s4946_s6 + $0xe0] sm:$0xff] %v855_v60  ;;  %858 = vst [vmem:[%s4946_s6 + $0xe8] sm:$0xff] %v857_v61  ;;  %v859_v62 = vld [vmem:[%s4941_s25 + $0x1e0] sm:$0xff]  ;;  %v861_v63 = vld [vmem:[%s4941_s25 + $0x1f0] sm:$0xff] }
  0x54   : > { %v863_v0 = vld [vmem:[%s4941_s25 + $0x200] sm:$0xff]  ;;  %860 = vst [vmem:[%s4946_s6 + $0xf0] sm:$0xff] %v859_v62  ;;  %862 = vst [vmem:[%s4946_s6 + $0xf8] sm:$0xff] %v861_v63  ;;  %v865_v1 = vld [vmem:[%s4941_s25 + $0x210] sm:$0xff] }
  0x55   : > { %864 = vst [vmem:[%s4946_s6 + $0x100] sm:$0xff] %v863_v0  ;;  %v867_v2 = vld [vmem:[%s4941_s25 + $0x220] sm:$0xff]  ;;  %v869_v3 = vld [vmem:[%s4941_s25 + $0x230] sm:$0xff]  ;;  %866 = vst [vmem:[%s4946_s6 + $0x108] sm:$0xff] %v865_v1 }
  0x56   : > { %868 = vst [vmem:[%s4946_s6 + $0x110] sm:$0xff] %v867_v2  ;;  %870 = vst [vmem:[%s4946_s6 + $0x118] sm:$0xff] %v869_v3  ;;  %v871_v4 = vld [vmem:[%s4941_s25 + $0x240] sm:$0xff]  ;;  %v873_v5 = vld [vmem:[%s4941_s25 + $0x250] sm:$0xff] }
  0x57   : > { %v875_v6 = vld [vmem:[%s4941_s25 + $0x260] sm:$0xff]  ;;  %872 = vst [vmem:[%s4946_s6 + $0x120] sm:$0xff] %v871_v4  ;;  %874 = vst [vmem:[%s4946_s6 + $0x128] sm:$0xff] %v873_v5  ;;  %v877_v7 = vld [vmem:[%s4941_s25 + $0x270] sm:$0xff] }
  0x58   : > { %876 = vst [vmem:[%s4946_s6 + $0x130] sm:$0xff] %v875_v6  ;;  %v879_v8 = vld [vmem:[%s4941_s25 + $0x280] sm:$0xff]  ;;  %v881_v9 = vld [vmem:[%s4941_s25 + $0x290] sm:$0xff]  ;;  %878 = vst [vmem:[%s4946_s6 + $0x138] sm:$0xff] %v877_v7 }
  0x59   : > { %880 = vst [vmem:[%s4946_s6 + $0x140] sm:$0xff] %v879_v8  ;;  %882 = vst [vmem:[%s4946_s6 + $0x148] sm:$0xff] %v881_v9  ;;  %v883_v10 = vld [vmem:[%s4941_s25 + $0x2a0] sm:$0xff]  ;;  %v885_v11 = vld [vmem:[%s4941_s25 + $0x2b0] sm:$0xff] }
  0x5a   : > { %v887_v12 = vld [vmem:[%s4941_s25 + $0x2c0] sm:$0xff]  ;;  %884 = vst [vmem:[%s4946_s6 + $0x150] sm:$0xff] %v883_v10  ;;  %886 = vst [vmem:[%s4946_s6 + $0x158] sm:$0xff] %v885_v11  ;;  %v889_v13 = vld [vmem:[%s4941_s25 + $0x2d0] sm:$0xff] }
  0x5b   : > { %888 = vst [vmem:[%s4946_s6 + $0x160] sm:$0xff] %v887_v12  ;;  %v891_v14 = vld [vmem:[%s4941_s25 + $0x2e0] sm:$0xff]  ;;  %v893_v15 = vld [vmem:[%s4941_s25 + $0x2f0] sm:$0xff]  ;;  %890 = vst [vmem:[%s4946_s6 + $0x168] sm:$0xff] %v889_v13 }
  0x5c   : > { %892 = vst [vmem:[%s4946_s6 + $0x170] sm:$0xff] %v891_v14  ;;  %894 = vst [vmem:[%s4946_s6 + $0x178] sm:$0xff] %v893_v15  ;;  %v895_v16 = vld [vmem:[%s4941_s25 + $0x300] sm:$0xff]  ;;  %v897_v17 = vld [vmem:[%s4941_s25 + $0x310] sm:$0xff] }
  0x5d   : > { %v899_v18 = vld [vmem:[%s4941_s25 + $0x320] sm:$0xff]  ;;  %896 = vst [vmem:[%s4946_s6 + $0x180] sm:$0xff] %v895_v16  ;;  %898 = vst [vmem:[%s4946_s6 + $0x188] sm:$0xff] %v897_v17  ;;  %v901_v19 = vld [vmem:[%s4941_s25 + $0x330] sm:$0xff] }
  0x5e   : > { %900 = vst [vmem:[%s4946_s6 + $0x190] sm:$0xff] %v899_v18  ;;  %v903_v20 = vld [vmem:[%s4941_s25 + $0x340] sm:$0xff]  ;;  %v905_v21 = vld [vmem:[%s4941_s25 + $0x350] sm:$0xff]  ;;  %902 = vst [vmem:[%s4946_s6 + $0x198] sm:$0xff] %v901_v19 }
  0x5f   : > { %904 = vst [vmem:[%s4946_s6 + $0x1a0] sm:$0xff] %v903_v20  ;;  %906 = vst [vmem:[%s4946_s6 + $0x1a8] sm:$0xff] %v905_v21  ;;  %v907_v22 = vld [vmem:[%s4941_s25 + $0x360] sm:$0xff]  ;;  %v909_v23 = vld [vmem:[%s4941_s25 + $0x370] sm:$0xff] }
  0x60   : > { %v911_v24 = vld [vmem:[%s4941_s25 + $0x380] sm:$0xff]  ;;  %908 = vst [vmem:[%s4946_s6 + $0x1b0] sm:$0xff] %v907_v22  ;;  %910 = vst [vmem:[%s4946_s6 + $0x1b8] sm:$0xff] %v909_v23  ;;  %v913_v25 = vld [vmem:[%s4941_s25 + $0x390] sm:$0xff] }
  0x61   : > { %912 = vst [vmem:[%s4946_s6 + $0x1c0] sm:$0xff] %v911_v24  ;;  %v915_v26 = vld [vmem:[%s4941_s25 + $0x3a0] sm:$0xff]  ;;  %v917_v27 = vld [vmem:[%s4941_s25 + $0x3b0] sm:$0xff]  ;;  %914 = vst [vmem:[%s4946_s6 + $0x1c8] sm:$0xff] %v913_v25 }
  0x62   : > { %916 = vst [vmem:[%s4946_s6 + $0x1d0] sm:$0xff] %v915_v26  ;;  %918 = vst [vmem:[%s4946_s6 + $0x1d8] sm:$0xff] %v917_v27  ;;  %v919_v28 = vld [vmem:[%s4941_s25 + $0x3c0] sm:$0xff]  ;;  %v921_v29 = vld [vmem:[%s4941_s25 + $0x3d0] sm:$0xff] }
  0x63   : > { %v923_v30 = vld [vmem:[%s4941_s25 + $0x3e0] sm:$0xff]  ;;  %920 = vst [vmem:[%s4946_s6 + $0x1e0] sm:$0xff] %v919_v28  ;;  %922 = vst [vmem:[%s4946_s6 + $0x1e8] sm:$0xff] %v921_v29  ;;  %v925_v31 = vld [vmem:[%s4941_s25 + $0x3f0] sm:$0xff] }
  0x64   : > { %924 = vst [vmem:[%s4946_s6 + $0x1f0] sm:$0xff] %v923_v30  ;;  %v927_v32 = vld [vmem:[%s4941_s25 + $0x400] sm:$0xff]  ;;  %v929_v33 = vld [vmem:[%s4941_s25 + $0x410] sm:$0xff]  ;;  %926 = vst [vmem:[%s4946_s6 + $0x1f8] sm:$0xff] %v925_v31 }
  0x65   : > { %928 = vst [vmem:[%s4946_s6 + $0x200] sm:$0xff] %v927_v32  ;;  %930 = vst [vmem:[%s4946_s6 + $0x208] sm:$0xff] %v929_v33  ;;  %v931_v34 = vld [vmem:[%s4941_s25 + $0x420] sm:$0xff]  ;;  %v933_v35 = vld [vmem:[%s4941_s25 + $0x430] sm:$0xff] }
  0x66   : > { %v935_v36 = vld [vmem:[%s4941_s25 + $0x440] sm:$0xff]  ;;  %932 = vst [vmem:[%s4946_s6 + $0x210] sm:$0xff] %v931_v34  ;;  %934 = vst [vmem:[%s4946_s6 + $0x218] sm:$0xff] %v933_v35  ;;  %v937_v37 = vld [vmem:[%s4941_s25 + $0x450] sm:$0xff] }
  0x67   : > { %936 = vst [vmem:[%s4946_s6 + $0x220] sm:$0xff] %v935_v36  ;;  %v939_v38 = vld [vmem:[%s4941_s25 + $0x460] sm:$0xff]  ;;  %v941_v39 = vld [vmem:[%s4941_s25 + $0x470] sm:$0xff]  ;;  %938 = vst [vmem:[%s4946_s6 + $0x228] sm:$0xff] %v937_v37 }
  0x68   : > { %940 = vst [vmem:[%s4946_s6 + $0x230] sm:$0xff] %v939_v38  ;;  %942 = vst [vmem:[%s4946_s6 + $0x238] sm:$0xff] %v941_v39  ;;  %v943_v40 = vld [vmem:[%s4941_s25 + $0x480] sm:$0xff]  ;;  %v945_v41 = vld [vmem:[%s4941_s25 + $0x490] sm:$0xff] }
  0x69   : > { %v947_v42 = vld [vmem:[%s4941_s25 + $0x4a0] sm:$0xff]  ;;  %944 = vst [vmem:[%s4946_s6 + $0x240] sm:$0xff] %v943_v40  ;;  %946 = vst [vmem:[%s4946_s6 + $0x248] sm:$0xff] %v945_v41  ;;  %v949_v43 = vld [vmem:[%s4941_s25 + $0x4b0] sm:$0xff] }
  0x6a   : > { %948 = vst [vmem:[%s4946_s6 + $0x250] sm:$0xff] %v947_v42  ;;  %v951_v44 = vld [vmem:[%s4941_s25 + $0x4c0] sm:$0xff]  ;;  %v953_v45 = vld [vmem:[%s4941_s25 + $0x4d0] sm:$0xff]  ;;  %950 = vst [vmem:[%s4946_s6 + $0x258] sm:$0xff] %v949_v43 }
  0x6b   : > { %952 = vst [vmem:[%s4946_s6 + $0x260] sm:$0xff] %v951_v44  ;;  %954 = vst [vmem:[%s4946_s6 + $0x268] sm:$0xff] %v953_v45  ;;  %v955_v46 = vld [vmem:[%s4941_s25 + $0x4e0] sm:$0xff]  ;;  %v957_v47 = vld [vmem:[%s4941_s25 + $0x4f0] sm:$0xff] }
  0x6c   : > { %v959_v48 = vld [vmem:[%s4941_s25 + $0x500] sm:$0xff]  ;;  %956 = vst [vmem:[%s4946_s6 + $0x270] sm:$0xff] %v955_v46  ;;  %958 = vst [vmem:[%s4946_s6 + $0x278] sm:$0xff] %v957_v47  ;;  %v961_v49 = vld [vmem:[%s4941_s25 + $0x510] sm:$0xff] }
  0x6d   : > { %960 = vst [vmem:[%s4946_s6 + $0x280] sm:$0xff] %v959_v48  ;;  %v963_v50 = vld [vmem:[%s4941_s25 + $0x520] sm:$0xff]  ;;  %v965_v51 = vld [vmem:[%s4941_s25 + $0x530] sm:$0xff]  ;;  %962 = vst [vmem:[%s4946_s6 + $0x288] sm:$0xff] %v961_v49 }
  0x6e   : > { %964 = vst [vmem:[%s4946_s6 + $0x290] sm:$0xff] %v963_v50  ;;  %966 = vst [vmem:[%s4946_s6 + $0x298] sm:$0xff] %v965_v51  ;;  %v967_v52 = vld [vmem:[%s4941_s25 + $0x540] sm:$0xff]  ;;  %v969_v53 = vld [vmem:[%s4941_s25 + $0x550] sm:$0xff] }
  0x6f   : > { %v971_v54 = vld [vmem:[%s4941_s25 + $0x560] sm:$0xff]  ;;  %968 = vst [vmem:[%s4946_s6 + $0x2a0] sm:$0xff] %v967_v52  ;;  %970 = vst [vmem:[%s4946_s6 + $0x2a8] sm:$0xff] %v969_v53  ;;  %v973_v55 = vld [vmem:[%s4941_s25 + $0x570] sm:$0xff] }
  0x70   : > { %972 = vst [vmem:[%s4946_s6 + $0x2b0] sm:$0xff] %v971_v54  ;;  %v975_v56 = vld [vmem:[%s4941_s25 + $0x580] sm:$0xff]  ;;  %v977_v57 = vld [vmem:[%s4941_s25 + $0x590] sm:$0xff]  ;;  %974 = vst [vmem:[%s4946_s6 + $0x2b8] sm:$0xff] %v973_v55 }
  0x71   : > { %976 = vst [vmem:[%s4946_s6 + $0x2c0] sm:$0xff] %v975_v56  ;;  %978 = vst [vmem:[%s4946_s6 + $0x2c8] sm:$0xff] %v977_v57  ;;  %v979_v58 = vld [vmem:[%s4941_s25 + $0x5a0] sm:$0xff]  ;;  %v981_v59 = vld [vmem:[%s4941_s25 + $0x5b0] sm:$0xff] }
  0x72   : > { %v983_v60 = vld [vmem:[%s4941_s25 + $0x5c0] sm:$0xff]  ;;  %980 = vst [vmem:[%s4946_s6 + $0x2d0] sm:$0xff] %v979_v58  ;;  %982 = vst [vmem:[%s4946_s6 + $0x2d8] sm:$0xff] %v981_v59  ;;  %v985_v61 = vld [vmem:[%s4941_s25 + $0x5d0] sm:$0xff] }
  0x73   : > { %984 = vst [vmem:[%s4946_s6 + $0x2e0] sm:$0xff] %v983_v60  ;;  %v987_v62 = vld [vmem:[%s4941_s25 + $0x5e0] sm:$0xff]  ;;  %v989_v63 = vld [vmem:[%s4941_s25 + $0x5f0] sm:$0xff]  ;;  %986 = vst [vmem:[%s4946_s6 + $0x2e8] sm:$0xff] %v985_v61 }
  0x74   : > { %988 = vst [vmem:[%s4946_s6 + $0x2f0] sm:$0xff] %v987_v62  ;;  %990 = vst [vmem:[%s4946_s6 + $0x2f8] sm:$0xff] %v989_v63  ;;  %v991_v0 = vld [vmem:[%s4941_s25 + $0x600] sm:$0xff]  ;;  %v993_v1 = vld [vmem:[%s4941_s25 + $0x610] sm:$0xff] }
  0x75   : > { %v995_v2 = vld [vmem:[%s4941_s25 + $0x620] sm:$0xff]  ;;  %992 = vst [vmem:[%s4946_s6 + $0x300] sm:$0xff] %v991_v0  ;;  %994 = vst [vmem:[%s4946_s6 + $0x308] sm:$0xff] %v993_v1  ;;  %v997_v3 = vld [vmem:[%s4941_s25 + $0x630] sm:$0xff] }
  0x76   : > { %996 = vst [vmem:[%s4946_s6 + $0x310] sm:$0xff] %v995_v2  ;;  %v999_v4 = vld [vmem:[%s4941_s25 + $0x640] sm:$0xff]  ;;  %v1001_v5 = vld [vmem:[%s4941_s25 + $0x650] sm:$0xff]  ;;  %998 = vst [vmem:[%s4946_s6 + $0x318] sm:$0xff] %v997_v3 }
  0x77   : > { %1000 = vst [vmem:[%s4946_s6 + $0x320] sm:$0xff] %v999_v4  ;;  %1002 = vst [vmem:[%s4946_s6 + $0x328] sm:$0xff] %v1001_v5  ;;  %v1003_v6 = vld [vmem:[%s4941_s25 + $0x660] sm:$0xff]  ;;  %v1005_v7 = vld [vmem:[%s4941_s25 + $0x670] sm:$0xff] }
  0x78   : > { %v1007_v8 = vld [vmem:[%s4941_s25 + $0x680] sm:$0xff]  ;;  %1004 = vst [vmem:[%s4946_s6 + $0x330] sm:$0xff] %v1003_v6  ;;  %1006 = vst [vmem:[%s4946_s6 + $0x338] sm:$0xff] %v1005_v7  ;;  %v1009_v9 = vld [vmem:[%s4941_s25 + $0x690] sm:$0xff] }
  0x79   : > { %1008 = vst [vmem:[%s4946_s6 + $0x340] sm:$0xff] %v1007_v8  ;;  %v1011_v10 = vld [vmem:[%s4941_s25 + $0x6a0] sm:$0xff]  ;;  %v1013_v11 = vld [vmem:[%s4941_s25 + $0x6b0] sm:$0xff]  ;;  %1010 = vst [vmem:[%s4946_s6 + $0x348] sm:$0xff] %v1009_v9 }
  0x7a   : > { %1012 = vst [vmem:[%s4946_s6 + $0x350] sm:$0xff] %v1011_v10  ;;  %1014 = vst [vmem:[%s4946_s6 + $0x358] sm:$0xff] %v1013_v11  ;;  %v1015_v12 = vld [vmem:[%s4941_s25 + $0x6c0] sm:$0xff]  ;;  %v1017_v13 = vld [vmem:[%s4941_s25 + $0x6d0] sm:$0xff] }
  0x7b   : > { %v1019_v14 = vld [vmem:[%s4941_s25 + $0x6e0] sm:$0xff]  ;;  %1016 = vst [vmem:[%s4946_s6 + $0x360] sm:$0xff] %v1015_v12  ;;  %1018 = vst [vmem:[%s4946_s6 + $0x368] sm:$0xff] %v1017_v13  ;;  %v1021_v15 = vld [vmem:[%s4941_s25 + $0x6f0] sm:$0xff] }
  0x7c   : > { %1020 = vst [vmem:[%s4946_s6 + $0x370] sm:$0xff] %v1019_v14  ;;  %v1023_v16 = vld [vmem:[%s4941_s25 + $0x700] sm:$0xff]  ;;  %v1025_v17 = vld [vmem:[%s4941_s25 + $0x710] sm:$0xff]  ;;  %1022 = vst [vmem:[%s4946_s6 + $0x378] sm:$0xff] %v1021_v15 }
  0x7d   : > { %1024 = vst [vmem:[%s4946_s6 + $0x380] sm:$0xff] %v1023_v16  ;;  %1026 = vst [vmem:[%s4946_s6 + $0x388] sm:$0xff] %v1025_v17  ;;  %v1027_v18 = vld [vmem:[%s4941_s25 + $0x720] sm:$0xff]  ;;  %v1029_v19 = vld [vmem:[%s4941_s25 + $0x730] sm:$0xff] }
  0x7e   : > { %v1031_v20 = vld [vmem:[%s4941_s25 + $0x740] sm:$0xff]  ;;  %1028 = vst [vmem:[%s4946_s6 + $0x390] sm:$0xff] %v1027_v18  ;;  %1030 = vst [vmem:[%s4946_s6 + $0x398] sm:$0xff] %v1029_v19  ;;  %v1033_v21 = vld [vmem:[%s4941_s25 + $0x750] sm:$0xff] }
  0x7f   : > { %1032 = vst [vmem:[%s4946_s6 + $0x3a0] sm:$0xff] %v1031_v20  ;;  %v1035_v22 = vld [vmem:[%s4941_s25 + $0x760] sm:$0xff]  ;;  %v1037_v23 = vld [vmem:[%s4941_s25 + $0x770] sm:$0xff]  ;;  %1034 = vst [vmem:[%s4946_s6 + $0x3a8] sm:$0xff] %v1033_v21 }
  0x80   : > { %1036 = vst [vmem:[%s4946_s6 + $0x3b0] sm:$0xff] %v1035_v22  ;;  %1038 = vst [vmem:[%s4946_s6 + $0x3b8] sm:$0xff] %v1037_v23  ;;  %v1039_v24 = vld [vmem:[%s4941_s25 + $0x780] sm:$0xff]  ;;  %v1041_v25 = vld [vmem:[%s4941_s25 + $0x790] sm:$0xff] }
  0x81   : > { %v1043_v26 = vld [vmem:[%s4941_s25 + $0x7a0] sm:$0xff]  ;;  %1040 = vst [vmem:[%s4946_s6 + $0x3c0] sm:$0xff] %v1039_v24  ;;  %1042 = vst [vmem:[%s4946_s6 + $0x3c8] sm:$0xff] %v1041_v25  ;;  %v1045_v27 = vld [vmem:[%s4941_s25 + $0x7b0] sm:$0xff] }
  0x82   : > { %1044 = vst [vmem:[%s4946_s6 + $0x3d0] sm:$0xff] %v1043_v26  ;;  %v1047_v28 = vld [vmem:[%s4941_s25 + $0x7c0] sm:$0xff]  ;;  %v1049_v29 = vld [vmem:[%s4941_s25 + $0x7d0] sm:$0xff]  ;;  %1046 = vst [vmem:[%s4946_s6 + $0x3d8] sm:$0xff] %v1045_v27 }
  0x83   : > { %1048 = vst [vmem:[%s4946_s6 + $0x3e0] sm:$0xff] %v1047_v28  ;;  %1050 = vst [vmem:[%s4946_s6 + $0x3e8] sm:$0xff] %v1049_v29  ;;  %v1051_v30 = vld [vmem:[%s4941_s25 + $0x7e0] sm:$0xff]  ;;  %v1053_v31 = vld [vmem:[%s4941_s25 + $0x7f0] sm:$0xff] }
  0x84   : > { %v1055_v32 = vld [vmem:[%s4941_s25 + $0x800] sm:$0xff]  ;;  %1052 = vst [vmem:[%s4946_s6 + $0x3f0] sm:$0xff] %v1051_v30  ;;  %1054 = vst [vmem:[%s4946_s6 + $0x3f8] sm:$0xff] %v1053_v31  ;;  %v1057_v33 = vld [vmem:[%s4941_s25 + $0x810] sm:$0xff] }
  0x85   : > { %1056 = vst [vmem:[%s4946_s6 + $0x400] sm:$0xff] %v1055_v32  ;;  %v1059_v34 = vld [vmem:[%s4941_s25 + $0x820] sm:$0xff]  ;;  %v1061_v35 = vld [vmem:[%s4941_s25 + $0x830] sm:$0xff]  ;;  %1058 = vst [vmem:[%s4946_s6 + $0x408] sm:$0xff] %v1057_v33 }
  0x86   : > { %1060 = vst [vmem:[%s4946_s6 + $0x410] sm:$0xff] %v1059_v34  ;;  %1062 = vst [vmem:[%s4946_s6 + $0x418] sm:$0xff] %v1061_v35  ;;  %v1063_v36 = vld [vmem:[%s4941_s25 + $0x840] sm:$0xff]  ;;  %v1065_v37 = vld [vmem:[%s4941_s25 + $0x850] sm:$0xff] }
  0x87   : > { %v1067_v38 = vld [vmem:[%s4941_s25 + $0x860] sm:$0xff]  ;;  %1064 = vst [vmem:[%s4946_s6 + $0x420] sm:$0xff] %v1063_v36  ;;  %1066 = vst [vmem:[%s4946_s6 + $0x428] sm:$0xff] %v1065_v37  ;;  %v1069_v39 = vld [vmem:[%s4941_s25 + $0x870] sm:$0xff] }
  0x88   : > { %1068 = vst [vmem:[%s4946_s6 + $0x430] sm:$0xff] %v1067_v38  ;;  %v1071_v40 = vld [vmem:[%s4941_s25 + $0x880] sm:$0xff]  ;;  %v1073_v41 = vld [vmem:[%s4941_s25 + $0x890] sm:$0xff]  ;;  %1070 = vst [vmem:[%s4946_s6 + $0x438] sm:$0xff] %v1069_v39 }
  0x89   : > { %1072 = vst [vmem:[%s4946_s6 + $0x440] sm:$0xff] %v1071_v40  ;;  %1074 = vst [vmem:[%s4946_s6 + $0x448] sm:$0xff] %v1073_v41  ;;  %v1075_v42 = vld [vmem:[%s4941_s25 + $0x8a0] sm:$0xff]  ;;  %v1077_v43 = vld [vmem:[%s4941_s25 + $0x8b0] sm:$0xff] }
  0x8a   : > { %v1079_v44 = vld [vmem:[%s4941_s25 + $0x8c0] sm:$0xff]  ;;  %1076 = vst [vmem:[%s4946_s6 + $0x450] sm:$0xff] %v1075_v42  ;;  %1078 = vst [vmem:[%s4946_s6 + $0x458] sm:$0xff] %v1077_v43  ;;  %v1081_v45 = vld [vmem:[%s4941_s25 + $0x8d0] sm:$0xff] }
  0x8b   : > { %1080 = vst [vmem:[%s4946_s6 + $0x460] sm:$0xff] %v1079_v44  ;;  %v1083_v46 = vld [vmem:[%s4941_s25 + $0x8e0] sm:$0xff]  ;;  %v1085_v47 = vld [vmem:[%s4941_s25 + $0x8f0] sm:$0xff]  ;;  %1082 = vst [vmem:[%s4946_s6 + $0x468] sm:$0xff] %v1081_v45 }
  0x8c   : > { %1084 = vst [vmem:[%s4946_s6 + $0x470] sm:$0xff] %v1083_v46  ;;  %1086 = vst [vmem:[%s4946_s6 + $0x478] sm:$0xff] %v1085_v47  ;;  %v1087_v48 = vld [vmem:[%s4941_s25 + $0x900] sm:$0xff]  ;;  %v1089_v49 = vld [vmem:[%s4941_s25 + $0x910] sm:$0xff] }
  0x8d   : > { %v1091_v50 = vld [vmem:[%s4941_s25 + $0x920] sm:$0xff]  ;;  %1088 = vst [vmem:[%s4946_s6 + $0x480] sm:$0xff] %v1087_v48  ;;  %1090 = vst [vmem:[%s4946_s6 + $0x488] sm:$0xff] %v1089_v49  ;;  %v1093_v51 = vld [vmem:[%s4941_s25 + $0x930] sm:$0xff] }
  0x8e   : > { %1092 = vst [vmem:[%s4946_s6 + $0x490] sm:$0xff] %v1091_v50  ;;  %v1095_v52 = vld [vmem:[%s4941_s25 + $0x940] sm:$0xff]  ;;  %v1097_v53 = vld [vmem:[%s4941_s25 + $0x950] sm:$0xff]  ;;  %1094 = vst [vmem:[%s4946_s6 + $0x498] sm:$0xff] %v1093_v51 }
  0x8f   : > { %1096 = vst [vmem:[%s4946_s6 + $0x4a0] sm:$0xff] %v1095_v52  ;;  %1098 = vst [vmem:[%s4946_s6 + $0x4a8] sm:$0xff] %v1097_v53  ;;  %v1099_v54 = vld [vmem:[%s4941_s25 + $0x960] sm:$0xff]  ;;  %v1101_v55 = vld [vmem:[%s4941_s25 + $0x970] sm:$0xff] }
  0x90   : > { %v1103_v56 = vld [vmem:[%s4941_s25 + $0x980] sm:$0xff]  ;;  %1100 = vst [vmem:[%s4946_s6 + $0x4b0] sm:$0xff] %v1099_v54  ;;  %1102 = vst [vmem:[%s4946_s6 + $0x4b8] sm:$0xff] %v1101_v55  ;;  %v1105_v57 = vld [vmem:[%s4941_s25 + $0x990] sm:$0xff] }
  0x91   : > { %1104 = vst [vmem:[%s4946_s6 + $0x4c0] sm:$0xff] %v1103_v56  ;;  %v1107_v58 = vld [vmem:[%s4941_s25 + $0x9a0] sm:$0xff]  ;;  %v1109_v59 = vld [vmem:[%s4941_s25 + $0x9b0] sm:$0xff]  ;;  %1106 = vst [vmem:[%s4946_s6 + $0x4c8] sm:$0xff] %v1105_v57 }
  0x92   : > { %1108 = vst [vmem:[%s4946_s6 + $0x4d0] sm:$0xff] %v1107_v58  ;;  %1110 = vst [vmem:[%s4946_s6 + $0x4d8] sm:$0xff] %v1109_v59  ;;  %v1111_v60 = vld [vmem:[%s4941_s25 + $0x9c0] sm:$0xff]  ;;  %v1113_v61 = vld [vmem:[%s4941_s25 + $0x9d0] sm:$0xff] }
  0x93   : > { %v1115_v62 = vld [vmem:[%s4941_s25 + $0x9e0] sm:$0xff]  ;;  %1112 = vst [vmem:[%s4946_s6 + $0x4e0] sm:$0xff] %v1111_v60  ;;  %1114 = vst [vmem:[%s4946_s6 + $0x4e8] sm:$0xff] %v1113_v61  ;;  %v1117_v63 = vld [vmem:[%s4941_s25 + $0x9f0] sm:$0xff] }
  0x94   : > { %1116 = vst [vmem:[%s4946_s6 + $0x4f0] sm:$0xff] %v1115_v62  ;;  %v1119_v0 = vld [vmem:[%s4941_s25 + $0xa00] sm:$0xff]  ;;  %v1121_v1 = vld [vmem:[%s4941_s25 + $0xa10] sm:$0xff]  ;;  %1118 = vst [vmem:[%s4946_s6 + $0x4f8] sm:$0xff] %v1117_v63 }
  0x95   : > { %1120 = vst [vmem:[%s4946_s6 + $0x500] sm:$0xff] %v1119_v0  ;;  %1122 = vst [vmem:[%s4946_s6 + $0x508] sm:$0xff] %v1121_v1  ;;  %v1123_v2 = vld [vmem:[%s4941_s25 + $0xa20] sm:$0xff]  ;;  %v1125_v3 = vld [vmem:[%s4941_s25 + $0xa30] sm:$0xff] }
  0x96   : > { %v1127_v4 = vld [vmem:[%s4941_s25 + $0xa40] sm:$0xff]  ;;  %1124 = vst [vmem:[%s4946_s6 + $0x510] sm:$0xff] %v1123_v2  ;;  %1126 = vst [vmem:[%s4946_s6 + $0x518] sm:$0xff] %v1125_v3  ;;  %v1129_v5 = vld [vmem:[%s4941_s25 + $0xa50] sm:$0xff] }
  0x97   : > { %1128 = vst [vmem:[%s4946_s6 + $0x520] sm:$0xff] %v1127_v4  ;;  %v1131_v6 = vld [vmem:[%s4941_s25 + $0xa60] sm:$0xff]  ;;  %v1133_v7 = vld [vmem:[%s4941_s25 + $0xa70] sm:$0xff]  ;;  %1130 = vst [vmem:[%s4946_s6 + $0x528] sm:$0xff] %v1129_v5 }
  0x98   : > { %1132 = vst [vmem:[%s4946_s6 + $0x530] sm:$0xff] %v1131_v6  ;;  %1134 = vst [vmem:[%s4946_s6 + $0x538] sm:$0xff] %v1133_v7  ;;  %v1135_v8 = vld [vmem:[%s4941_s25 + $0xa80] sm:$0xff]  ;;  %v1137_v9 = vld [vmem:[%s4941_s25 + $0xa90] sm:$0xff] }
  0x99   : > { %v1139_v10 = vld [vmem:[%s4941_s25 + $0xaa0] sm:$0xff]  ;;  %1136 = vst [vmem:[%s4946_s6 + $0x540] sm:$0xff] %v1135_v8  ;;  %1138 = vst [vmem:[%s4946_s6 + $0x548] sm:$0xff] %v1137_v9  ;;  %v1141_v11 = vld [vmem:[%s4941_s25 + $0xab0] sm:$0xff] }
  0x9a   : > { %1140 = vst [vmem:[%s4946_s6 + $0x550] sm:$0xff] %v1139_v10  ;;  %v1143_v12 = vld [vmem:[%s4941_s25 + $0xac0] sm:$0xff]  ;;  %v1145_v13 = vld [vmem:[%s4941_s25 + $0xad0] sm:$0xff]  ;;  %1142 = vst [vmem:[%s4946_s6 + $0x558] sm:$0xff] %v1141_v11 }
  0x9b   : > { %1144 = vst [vmem:[%s4946_s6 + $0x560] sm:$0xff] %v1143_v12  ;;  %1146 = vst [vmem:[%s4946_s6 + $0x568] sm:$0xff] %v1145_v13  ;;  %v1147_v14 = vld [vmem:[%s4941_s25 + $0xae0] sm:$0xff]  ;;  %v1149_v15 = vld [vmem:[%s4941_s25 + $0xaf0] sm:$0xff] }
  0x9c   : > { %v1151_v16 = vld [vmem:[%s4941_s25 + $0xb00] sm:$0xff]  ;;  %1148 = vst [vmem:[%s4946_s6 + $0x570] sm:$0xff] %v1147_v14  ;;  %1150 = vst [vmem:[%s4946_s6 + $0x578] sm:$0xff] %v1149_v15  ;;  %v1153_v17 = vld [vmem:[%s4941_s25 + $0xb10] sm:$0xff] }
  0x9d   : > { %1152 = vst [vmem:[%s4946_s6 + $0x580] sm:$0xff] %v1151_v16  ;;  %v1155_v18 = vld [vmem:[%s4941_s25 + $0xb20] sm:$0xff]  ;;  %v1157_v19 = vld [vmem:[%s4941_s25 + $0xb30] sm:$0xff]  ;;  %1154 = vst [vmem:[%s4946_s6 + $0x588] sm:$0xff] %v1153_v17 }
  0x9e   : > { %1156 = vst [vmem:[%s4946_s6 + $0x590] sm:$0xff] %v1155_v18  ;;  %1158 = vst [vmem:[%s4946_s6 + $0x598] sm:$0xff] %v1157_v19  ;;  %v1159_v20 = vld [vmem:[%s4941_s25 + $0xb40] sm:$0xff]  ;;  %v1161_v21 = vld [vmem:[%s4941_s25 + $0xb50] sm:$0xff] }
  0x9f   : > { %v1163_v22 = vld [vmem:[%s4941_s25 + $0xb60] sm:$0xff]  ;;  %1160 = vst [vmem:[%s4946_s6 + $0x5a0] sm:$0xff] %v1159_v20  ;;  %1162 = vst [vmem:[%s4946_s6 + $0x5a8] sm:$0xff] %v1161_v21  ;;  %v1165_v23 = vld [vmem:[%s4941_s25 + $0xb70] sm:$0xff] }
  0xa0   : > { %1164 = vst [vmem:[%s4946_s6 + $0x5b0] sm:$0xff] %v1163_v22  ;;  %v1167_v24 = vld [vmem:[%s4941_s25 + $0xb80] sm:$0xff]  ;;  %v1169_v25 = vld [vmem:[%s4941_s25 + $0xb90] sm:$0xff]  ;;  %1166 = vst [vmem:[%s4946_s6 + $0x5b8] sm:$0xff] %v1165_v23 }
  0xa1   : > { %1168 = vst [vmem:[%s4946_s6 + $0x5c0] sm:$0xff] %v1167_v24  ;;  %1170 = vst [vmem:[%s4946_s6 + $0x5c8] sm:$0xff] %v1169_v25  ;;  %v1171_v26 = vld [vmem:[%s4941_s25 + $0xba0] sm:$0xff]  ;;  %v1173_v27 = vld [vmem:[%s4941_s25 + $0xbb0] sm:$0xff] }
  0xa2   : > { %v1175_v28 = vld [vmem:[%s4941_s25 + $0xbc0] sm:$0xff]  ;;  %1172 = vst [vmem:[%s4946_s6 + $0x5d0] sm:$0xff] %v1171_v26  ;;  %1174 = vst [vmem:[%s4946_s6 + $0x5d8] sm:$0xff] %v1173_v27  ;;  %v1177_v29 = vld [vmem:[%s4941_s25 + $0xbd0] sm:$0xff] }
  0xa3   : > { %1176 = vst [vmem:[%s4946_s6 + $0x5e0] sm:$0xff] %v1175_v28  ;;  %v1179_v30 = vld [vmem:[%s4941_s25 + $0xbe0] sm:$0xff]  ;;  %v1181_v31 = vld [vmem:[%s4941_s25 + $0xbf0] sm:$0xff]  ;;  %1178 = vst [vmem:[%s4946_s6 + $0x5e8] sm:$0xff] %v1177_v29 }
  0xa4   : > { %1180 = vst [vmem:[%s4946_s6 + $0x5f0] sm:$0xff] %v1179_v30  ;;  %1182 = vst [vmem:[%s4946_s6 + $0x5f8] sm:$0xff] %v1181_v31  ;;  %v1183_v32 = vld [vmem:[%s4941_s25 + $0xc00] sm:$0xff]  ;;  %v1185_v33 = vld [vmem:[%s4941_s25 + $0xc10] sm:$0xff] }
  0xa5   : > { %v1187_v34 = vld [vmem:[%s4941_s25 + $0xc20] sm:$0xff]  ;;  %1184 = vst [vmem:[%s4946_s6 + $0x600] sm:$0xff] %v1183_v32  ;;  %1186 = vst [vmem:[%s4946_s6 + $0x608] sm:$0xff] %v1185_v33  ;;  %v1189_v35 = vld [vmem:[%s4941_s25 + $0xc30] sm:$0xff] }
  0xa6   : > { %1188 = vst [vmem:[%s4946_s6 + $0x610] sm:$0xff] %v1187_v34  ;;  %v1191_v36 = vld [vmem:[%s4941_s25 + $0xc40] sm:$0xff]  ;;  %v1193_v37 = vld [vmem:[%s4941_s25 + $0xc50] sm:$0xff]  ;;  %1190 = vst [vmem:[%s4946_s6 + $0x618] sm:$0xff] %v1189_v35 }
  0xa7   : > { %1192 = vst [vmem:[%s4946_s6 + $0x620] sm:$0xff] %v1191_v36  ;;  %1194 = vst [vmem:[%s4946_s6 + $0x628] sm:$0xff] %v1193_v37  ;;  %v1195_v38 = vld [vmem:[%s4941_s25 + $0xc60] sm:$0xff]  ;;  %v1197_v39 = vld [vmem:[%s4941_s25 + $0xc70] sm:$0xff] }
  0xa8   : > { %v1199_v40 = vld [vmem:[%s4941_s25 + $0xc80] sm:$0xff]  ;;  %1196 = vst [vmem:[%s4946_s6 + $0x630] sm:$0xff] %v1195_v38  ;;  %1198 = vst [vmem:[%s4946_s6 + $0x638] sm:$0xff] %v1197_v39  ;;  %v1201_v41 = vld [vmem:[%s4941_s25 + $0xc90] sm:$0xff] }
  0xa9   : > { %1200 = vst [vmem:[%s4946_s6 + $0x640] sm:$0xff] %v1199_v40  ;;  %v1203_v42 = vld [vmem:[%s4941_s25 + $0xca0] sm:$0xff]  ;;  %v1205_v43 = vld [vmem:[%s4941_s25 + $0xcb0] sm:$0xff]  ;;  %1202 = vst [vmem:[%s4946_s6 + $0x648] sm:$0xff] %v1201_v41 }
  0xaa   : > { %1204 = vst [vmem:[%s4946_s6 + $0x650] sm:$0xff] %v1203_v42  ;;  %1206 = vst [vmem:[%s4946_s6 + $0x658] sm:$0xff] %v1205_v43  ;;  %v1207_v44 = vld [vmem:[%s4941_s25 + $0xcc0] sm:$0xff]  ;;  %v1209_v45 = vld [vmem:[%s4941_s25 + $0xcd0] sm:$0xff] }
  0xab   : > { %v1211_v46 = vld [vmem:[%s4941_s25 + $0xce0] sm:$0xff]  ;;  %1208 = vst [vmem:[%s4946_s6 + $0x660] sm:$0xff] %v1207_v44  ;;  %1210 = vst [vmem:[%s4946_s6 + $0x668] sm:$0xff] %v1209_v45  ;;  %v1213_v47 = vld [vmem:[%s4941_s25 + $0xcf0] sm:$0xff] }
  0xac   : > { %1212 = vst [vmem:[%s4946_s6 + $0x670] sm:$0xff] %v1211_v46  ;;  %v1215_v48 = vld [vmem:[%s4941_s25 + $0xd00] sm:$0xff]  ;;  %v1217_v49 = vld [vmem:[%s4941_s25 + $0xd10] sm:$0xff]  ;;  %1214 = vst [vmem:[%s4946_s6 + $0x678] sm:$0xff] %v1213_v47 }
  0xad   : > { %1216 = vst [vmem:[%s4946_s6 + $0x680] sm:$0xff] %v1215_v48  ;;  %1218 = vst [vmem:[%s4946_s6 + $0x688] sm:$0xff] %v1217_v49  ;;  %v1219_v50 = vld [vmem:[%s4941_s25 + $0xd20] sm:$0xff]  ;;  %v1221_v51 = vld [vmem:[%s4941_s25 + $0xd30] sm:$0xff] }
  0xae   : > { %v1223_v52 = vld [vmem:[%s4941_s25 + $0xd40] sm:$0xff]  ;;  %1220 = vst [vmem:[%s4946_s6 + $0x690] sm:$0xff] %v1219_v50  ;;  %1222 = vst [vmem:[%s4946_s6 + $0x698] sm:$0xff] %v1221_v51  ;;  %v1225_v53 = vld [vmem:[%s4941_s25 + $0xd50] sm:$0xff] }
  0xaf   : > { %1224 = vst [vmem:[%s4946_s6 + $0x6a0] sm:$0xff] %v1223_v52  ;;  %v1227_v54 = vld [vmem:[%s4941_s25 + $0xd60] sm:$0xff]  ;;  %v1229_v55 = vld [vmem:[%s4941_s25 + $0xd70] sm:$0xff]  ;;  %1226 = vst [vmem:[%s4946_s6 + $0x6a8] sm:$0xff] %v1225_v53 }
  0xb0   : > { %1228 = vst [vmem:[%s4946_s6 + $0x6b0] sm:$0xff] %v1227_v54  ;;  %1230 = vst [vmem:[%s4946_s6 + $0x6b8] sm:$0xff] %v1229_v55  ;;  %v1231_v56 = vld [vmem:[%s4941_s25 + $0xd80] sm:$0xff]  ;;  %v1233_v57 = vld [vmem:[%s4941_s25 + $0xd90] sm:$0xff] }
  0xb1   : > { %v1235_v58 = vld [vmem:[%s4941_s25 + $0xda0] sm:$0xff]  ;;  %1232 = vst [vmem:[%s4946_s6 + $0x6c0] sm:$0xff] %v1231_v56  ;;  %1234 = vst [vmem:[%s4946_s6 + $0x6c8] sm:$0xff] %v1233_v57  ;;  %v1237_v59 = vld [vmem:[%s4941_s25 + $0xdb0] sm:$0xff] }
  0xb2   : > { %1236 = vst [vmem:[%s4946_s6 + $0x6d0] sm:$0xff] %v1235_v58  ;;  %v1239_v60 = vld [vmem:[%s4941_s25 + $0xdc0] sm:$0xff]  ;;  %v1241_v61 = vld [vmem:[%s4941_s25 + $0xdd0] sm:$0xff]  ;;  %1238 = vst [vmem:[%s4946_s6 + $0x6d8] sm:$0xff] %v1237_v59 }
  0xb3   : > { %1240 = vst [vmem:[%s4946_s6 + $0x6e0] sm:$0xff] %v1239_v60  ;;  %1242 = vst [vmem:[%s4946_s6 + $0x6e8] sm:$0xff] %v1241_v61  ;;  %v1243_v62 = vld [vmem:[%s4941_s25 + $0xde0] sm:$0xff]  ;;  %v1245_v63 = vld [vmem:[%s4941_s25 + $0xdf0] sm:$0xff] }
  0xb4   : > { %v1247_v0 = vld [vmem:[%s4941_s25 + $0xe00] sm:$0xff]  ;;  %1244 = vst [vmem:[%s4946_s6 + $0x6f0] sm:$0xff] %v1243_v62  ;;  %1246 = vst [vmem:[%s4946_s6 + $0x6f8] sm:$0xff] %v1245_v63  ;;  %v1249_v1 = vld [vmem:[%s4941_s25 + $0xe10] sm:$0xff] }
  0xb5   : > { %1248 = vst [vmem:[%s4946_s6 + $0x700] sm:$0xff] %v1247_v0  ;;  %v1251_v2 = vld [vmem:[%s4941_s25 + $0xe20] sm:$0xff]  ;;  %v1253_v3 = vld [vmem:[%s4941_s25 + $0xe30] sm:$0xff]  ;;  %1250 = vst [vmem:[%s4946_s6 + $0x708] sm:$0xff] %v1249_v1 }
  0xb6   : > { %1252 = vst [vmem:[%s4946_s6 + $0x710] sm:$0xff] %v1251_v2  ;;  %1254 = vst [vmem:[%s4946_s6 + $0x718] sm:$0xff] %v1253_v3  ;;  %v1255_v4 = vld [vmem:[%s4941_s25 + $0xe40] sm:$0xff]  ;;  %v1257_v5 = vld [vmem:[%s4941_s25 + $0xe50] sm:$0xff] }
  0xb7   : > { %v1259_v6 = vld [vmem:[%s4941_s25 + $0xe60] sm:$0xff]  ;;  %1256 = vst [vmem:[%s4946_s6 + $0x720] sm:$0xff] %v1255_v4  ;;  %1258 = vst [vmem:[%s4946_s6 + $0x728] sm:$0xff] %v1257_v5  ;;  %v1261_v7 = vld [vmem:[%s4941_s25 + $0xe70] sm:$0xff] }
  0xb8   : > { %1260 = vst [vmem:[%s4946_s6 + $0x730] sm:$0xff] %v1259_v6  ;;  %v1263_v8 = vld [vmem:[%s4941_s25 + $0xe80] sm:$0xff]  ;;  %v1265_v9 = vld [vmem:[%s4941_s25 + $0xe90] sm:$0xff]  ;;  %1262 = vst [vmem:[%s4946_s6 + $0x738] sm:$0xff] %v1261_v7 }
  0xb9   : > { %1264 = vst [vmem:[%s4946_s6 + $0x740] sm:$0xff] %v1263_v8  ;;  %1266 = vst [vmem:[%s4946_s6 + $0x748] sm:$0xff] %v1265_v9  ;;  %v1267_v10 = vld [vmem:[%s4941_s25 + $0xea0] sm:$0xff]  ;;  %v1269_v11 = vld [vmem:[%s4941_s25 + $0xeb0] sm:$0xff] }
  0xba   : > { %v1271_v12 = vld [vmem:[%s4941_s25 + $0xec0] sm:$0xff]  ;;  %1268 = vst [vmem:[%s4946_s6 + $0x750] sm:$0xff] %v1267_v10  ;;  %1270 = vst [vmem:[%s4946_s6 + $0x758] sm:$0xff] %v1269_v11  ;;  %v1273_v13 = vld [vmem:[%s4941_s25 + $0xed0] sm:$0xff] }
  0xbb   : > { %1272 = vst [vmem:[%s4946_s6 + $0x760] sm:$0xff] %v1271_v12  ;;  %v1275_v14 = vld [vmem:[%s4941_s25 + $0xee0] sm:$0xff]  ;;  %v1277_v15 = vld [vmem:[%s4941_s25 + $0xef0] sm:$0xff]  ;;  %1274 = vst [vmem:[%s4946_s6 + $0x768] sm:$0xff] %v1273_v13 }
  0xbc   : > { %1276 = vst [vmem:[%s4946_s6 + $0x770] sm:$0xff] %v1275_v14  ;;  %1278 = vst [vmem:[%s4946_s6 + $0x778] sm:$0xff] %v1277_v15  ;;  %v1279_v16 = vld [vmem:[%s4941_s25 + $0xf00] sm:$0xff]  ;;  %v1281_v17 = vld [vmem:[%s4941_s25 + $0xf10] sm:$0xff] }
  0xbd   : > { %v1283_v18 = vld [vmem:[%s4941_s25 + $0xf20] sm:$0xff]  ;;  %1280 = vst [vmem:[%s4946_s6 + $0x780] sm:$0xff] %v1279_v16  ;;  %1282 = vst [vmem:[%s4946_s6 + $0x788] sm:$0xff] %v1281_v17  ;;  %v1285_v19 = vld [vmem:[%s4941_s25 + $0xf30] sm:$0xff] }
  0xbe   : > { %1284 = vst [vmem:[%s4946_s6 + $0x790] sm:$0xff] %v1283_v18  ;;  %v1287_v20 = vld [vmem:[%s4941_s25 + $0xf40] sm:$0xff]  ;;  %v1289_v21 = vld [vmem:[%s4941_s25 + $0xf50] sm:$0xff]  ;;  %1286 = vst [vmem:[%s4946_s6 + $0x798] sm:$0xff] %v1285_v19 }
  0xbf   : > { %1288 = vst [vmem:[%s4946_s6 + $0x7a0] sm:$0xff] %v1287_v20  ;;  %1290 = vst [vmem:[%s4946_s6 + $0x7a8] sm:$0xff] %v1289_v21  ;;  %v1291_v22 = vld [vmem:[%s4941_s25 + $0xf60] sm:$0xff]  ;;  %v1293_v23 = vld [vmem:[%s4941_s25 + $0xf70] sm:$0xff] }
  0xc0   : > { %v1295_v24 = vld [vmem:[%s4941_s25 + $0xf80] sm:$0xff]  ;;  %1292 = vst [vmem:[%s4946_s6 + $0x7b0] sm:$0xff] %v1291_v22  ;;  %1294 = vst [vmem:[%s4946_s6 + $0x7b8] sm:$0xff] %v1293_v23  ;;  %v1297_v25 = vld [vmem:[%s4941_s25 + $0xf90] sm:$0xff] }
  0xc1   : > { %1296 = vst [vmem:[%s4946_s6 + $0x7c0] sm:$0xff] %v1295_v24  ;;  %v1299_v26 = vld [vmem:[%s4941_s25 + $0xfa0] sm:$0xff]  ;;  %v1301_v27 = vld [vmem:[%s4941_s25 + $0xfb0] sm:$0xff]  ;;  %1298 = vst [vmem:[%s4946_s6 + $0x7c8] sm:$0xff] %v1297_v25 }
  0xc2   : > { %1300 = vst [vmem:[%s4946_s6 + $0x7d0] sm:$0xff] %v1299_v26  ;;  %1302 = vst [vmem:[%s4946_s6 + $0x7d8] sm:$0xff] %v1301_v27  ;;  %v1303_v28 = vld [vmem:[%s4941_s25 + $0xfc0] sm:$0xff]  ;;  %v1305_v29 = vld [vmem:[%s4941_s25 + $0xfd0] sm:$0xff] }
  0xc3   : > { %v1307_v30 = vld [vmem:[%s4941_s25 + $0xfe0] sm:$0xff]  ;;  %1304 = vst [vmem:[%s4946_s6 + $0x7e0] sm:$0xff] %v1303_v28  ;;  %1306 = vst [vmem:[%s4946_s6 + $0x7e8] sm:$0xff] %v1305_v29  ;;  %v1309_v31 = vld [vmem:[%s4941_s25 + $0xff0] sm:$0xff] }
  0xc4   : > { %1308 = vst [vmem:[%s4946_s6 + $0x7f0] sm:$0xff] %v1307_v30  ;;  %1310 = vst [vmem:[%s4946_s6 + $0x7f8] sm:$0xff] %v1309_v31 }
  0xc5 PF: > { %p3810_p0 = scmp.ge.s32.totalorder %s4736_s22, 1  ;;  %p1323_p1 = scmp.lt.s32.totalorder %s4736_s22, 5 }
  0xc7   : > { %p1324_p2 = pnand %p3810_p0, %p1323_p1 }
  0xc8   : > { %s1330_s0 = sand.u32 (!%p1324_p2), 1, %s4712_s16   ;;  %s1337_s5 = sand.u32 (!%p1324_p2), 1, %s4704_s14  }
  0xc9   : > { %1327 = sbr.rel (%p1324_p2) target bundleno = 723 (0x2d3), region = 85  ;;  %s3811_s23 = sshll.u32 (!%p1324_p2), %s1330_s0, 8 }
  0xca   : > { %s3812_s28 = sshll.u32 (!%p1324_p2), %s1337_s5, 11  ;;  %s1364_s7 = sand.u32 (!%p1324_p2), 1, %s4696_s12  }
  0xcb   : > { %s3814_s11 = sshll.u32 (!%p1324_p2), %s4724_s19, 1  ;;  %s3813_s25 = sshll.u32 (!%p1324_p2), %s1364_s7, 5 }
  0xcc   : > { %p1372_p3 = scmp.lt.s32.totalorder (!%p1324_p2), %s3814_s11, 3  ;;  %s5469_s4 = scalar_lea.vmem (!%p1324_p2), [#allocation3], %s3811_s23 }
  0xcd   : > { %s5471_s6 = scalar_lea.vmem (!%p1324_p2), [#allocation4], %s3812_s28  ;;  %s5473_s1 = scalar_lea.vmem (!%p1324_p2), [#allocation5], %s3813_s25 }
  0xce   : > { %p3815_p4 = scmp.ne.s32.totalorder (!%p1324_p2), %s4720_s18, 0 }
  0xd0   : > { %s5896_s11 = smov (!%p1372_p3, %s3814_s11), 3  ;;  %1381 = sbr.rel (%p3815_p4) target bundleno = 215 (0xd7), region = 97 }
  0xd1   : > { %s1374_s29 = scalar_lea.vmem %s5867_s2, %s5896_s11  ;;  %v4738_v32 = vmov (!%p3815_p4), 0.0  }
  0xd2   : > { %1382 = vst [vmem:[#allocation2] sm:$0xff] (!%p3815_p4), %v4738_v32  ;;  %1383 = vst [vmem:[#allocation2 + $0x8] sm:$0xff] (!%p3815_p4), %v4738_v32 }
  0xd3   : > { %1384 = vst [vmem:[#allocation2 + $0x10] sm:$0xff] (!%p3815_p4), %v4738_v32  ;;  %1385 = vst [vmem:[#allocation2 + $0x18] sm:$0xff] (!%p3815_p4), %v4738_v32 }
  0xd4   : > { %1386 = vst [vmem:[#allocation2 + $0x20] sm:$0xff] (!%p3815_p4), %v4738_v32  ;;  %1387 = vst [vmem:[#allocation2 + $0x28] sm:$0xff] (!%p3815_p4), %v4738_v32 }
  0xd5   : > { %1388 = vst [vmem:[#allocation2 + $0x30] sm:$0xff] (!%p3815_p4), %v4738_v32  ;;  %1389 = vst [vmem:[#allocation2 + $0x38] sm:$0xff] (!%p3815_p4), %v4738_v32 }
  0xd7 PF: > { %v4266_v33 = vld [vmem:[%s5471_s6 + $0x4] ss:$8 sps:$4 sm:$0xff]   ;;  %v4270_v35 = vld [vmem:[%s5471_s6] ss:$8 sps:$4 sm:$0xff]   ;;  %v4272_v37 = vld [vmem:[%s5471_s6 + $0x14] ss:$8 sps:$4 sm:$0xff]  }
  0xd8   : > { %v4268_v34 = vld [vmem:[%s5471_s6 + $0x404] ss:$8 sps:$4 sm:$0xff]   ;;  %3126 = vmatprep.subr.bf16.mxu1 %v4266_v33  ;;  %v4271_v36 = vld [vmem:[%s5471_s6 + $0x400] ss:$8 sps:$4 sm:$0xff]   ;;  %v4274_v38 = vld [vmem:[%s5471_s6 + $0x414] ss:$8 sps:$4 sm:$0xff]  }
  0xd9   : > { %3338 = vmatprep.subr.bf16.mxu0 %v4268_v34  ;;  %3127 = vmatpush1.bf16.msra.mxu1 %v4270_v35  ;;  %v4276_v39 = vld [vmem:[%s5471_s6 + $0x10] ss:$8 sps:$4 sm:$0xff]   ;;  %v4278_v41 = vld [vmem:[%s5471_s6 + $0x24] ss:$8 sps:$4 sm:$0xff]   ;;  %v4282_v43 = vld [vmem:[%s5471_s6 + $0x20] ss:$8 sps:$4 sm:$0xff]  }
  0xda   : > { %3339 = vmatpush1.bf16.msra.mxu0 %v4271_v36  ;;  %3128 = vmatprep.subr.bf16.mxu1 %v4272_v37  ;;  %v4277_v40 = vld [vmem:[%s5471_s6 + $0x410] ss:$8 sps:$4 sm:$0xff]   ;;  %v4280_v42 = vld [vmem:[%s5471_s6 + $0x424] ss:$8 sps:$4 sm:$0xff]   ;;  %v4283_v44 = vld [vmem:[%s5471_s6 + $0x420] ss:$8 sps:$4 sm:$0xff]  }
  0xdb   : > { %3340 = vmatprep.subr.bf16.mxu0 %v4274_v38  ;;  %v4284_v45 = vld [vmem:[%s5471_s6 + $0x34] ss:$8 sps:$4 sm:$0xff]   ;;  %v4288_v47 = vld [vmem:[%s5471_s6 + $0x30] ss:$8 sps:$4 sm:$0xff]   ;;  %v4290_v49 = vld [vmem:[%s5471_s6 + $0x44] ss:$8 sps:$4 sm:$0xff]  }
  0xdc   : > { %v4286_v46 = vld [vmem:[%s5471_s6 + $0x434] ss:$8 sps:$4 sm:$0xff]   ;;  %v4289_v48 = vld [vmem:[%s5471_s6 + $0x430] ss:$8 sps:$4 sm:$0xff]   ;;  %v4292_v50 = vld [vmem:[%s5471_s6 + $0x444] ss:$8 sps:$4 sm:$0xff]  }
  0xdd   : > { %3129 = vmatpush1.bf16.msra.mxu1 %v4276_v39  ;;  %v4294_v51 = vld [vmem:[%s5471_s6 + $0x40] ss:$8 sps:$4 sm:$0xff]   ;;  %v4296_v53 = vld [vmem:[%s5471_s6 + $0x54] ss:$8 sps:$4 sm:$0xff]   ;;  %v4300_v55 = vld [vmem:[%s5471_s6 + $0x50] ss:$8 sps:$4 sm:$0xff]  }
  0xde   : > { %3341 = vmatpush1.bf16.msra.mxu0 %v4277_v40  ;;  %3130 = vmatprep.subr.bf16.mxu1 %v4278_v41  ;;  %v4295_v52 = vld [vmem:[%s5471_s6 + $0x440] ss:$8 sps:$4 sm:$0xff]   ;;  %v4298_v54 = vld [vmem:[%s5471_s6 + $0x454] ss:$8 sps:$4 sm:$0xff]   ;;  %v4301_v56 = vld [vmem:[%s5471_s6 + $0x450] ss:$8 sps:$4 sm:$0xff]  }
  0xdf   : > { %3342 = vmatprep.subr.bf16.mxu0 %v4280_v42  ;;  %v4302_v57 = vld [vmem:[%s5471_s6 + $0x64] ss:$8 sps:$4 sm:$0xff]   ;;  %v4306_v59 = vld [vmem:[%s5471_s6 + $0x60] ss:$8 sps:$4 sm:$0xff]   ;;  %v4308_v61 = vld [vmem:[%s5471_s6 + $0x74] ss:$8 sps:$4 sm:$0xff]  }
  0xe0   : > { %v4304_v58 = vld [vmem:[%s5471_s6 + $0x464] ss:$8 sps:$4 sm:$0xff]   ;;  %v4307_v60 = vld [vmem:[%s5471_s6 + $0x460] ss:$8 sps:$4 sm:$0xff]   ;;  %v4310_v62 = vld [vmem:[%s5471_s6 + $0x474] ss:$8 sps:$4 sm:$0xff]  }
  0xe1   : > { %3131 = vmatpush1.bf16.msra.mxu1 %v4282_v43  ;;  %v4312_v63 = vld [vmem:[%s5471_s6 + $0x70] ss:$8 sps:$4 sm:$0xff]   ;;  %v4314_v1 = vld [vmem:[%s5471_s6 + $0x84] ss:$8 sps:$4 sm:$0xff]   ;;  %v4318_v3 = vld [vmem:[%s5471_s6 + $0x80] ss:$8 sps:$4 sm:$0xff]  }
  0xe2   : > { %3343 = vmatpush1.bf16.msra.mxu0 %v4283_v44  ;;  %3132 = vmatprep.subr.bf16.mxu1 %v4284_v45  ;;  %v4313_v0 = vld [vmem:[%s5471_s6 + $0x470] ss:$8 sps:$4 sm:$0xff]   ;;  %v4316_v2 = vld [vmem:[%s5471_s6 + $0x484] ss:$8 sps:$4 sm:$0xff]   ;;  %v4319_v4 = vld [vmem:[%s5471_s6 + $0x480] ss:$8 sps:$4 sm:$0xff]  }
  0xe3   : > { %3344 = vmatprep.subr.bf16.mxu0 %v4286_v46  ;;  %v4320_v5 = vld [vmem:[%s5471_s6 + $0x94] ss:$8 sps:$4 sm:$0xff]   ;;  %v4324_v7 = vld [vmem:[%s5471_s6 + $0x90] ss:$8 sps:$4 sm:$0xff]   ;;  %v4326_v9 = vld [vmem:[%s5471_s6 + $0xa4] ss:$8 sps:$4 sm:$0xff]  }
  0xe4   : > { %v4322_v6 = vld [vmem:[%s5471_s6 + $0x494] ss:$8 sps:$4 sm:$0xff]   ;;  %v4325_v8 = vld [vmem:[%s5471_s6 + $0x490] ss:$8 sps:$4 sm:$0xff]   ;;  %v4328_v10 = vld [vmem:[%s5471_s6 + $0x4a4] ss:$8 sps:$4 sm:$0xff]  }
  0xe5   : > { %3133 = vmatpush1.bf16.msra.mxu1 %v4288_v47  ;;  %v4330_v11 = vld [vmem:[%s5471_s6 + $0xa0] ss:$8 sps:$4 sm:$0xff]   ;;  %v4332_v13 = vld [vmem:[%s5471_s6 + $0xb4] ss:$8 sps:$4 sm:$0xff]   ;;  %v4336_v15 = vld [vmem:[%s5471_s6 + $0xb0] ss:$8 sps:$4 sm:$0xff]  }
  0xe6   : > { %3345 = vmatpush1.bf16.msra.mxu0 %v4289_v48  ;;  %3134 = vmatprep.subr.bf16.mxu1 %v4290_v49  ;;  %v4331_v12 = vld [vmem:[%s5471_s6 + $0x4a0] ss:$8 sps:$4 sm:$0xff]   ;;  %v4334_v14 = vld [vmem:[%s5471_s6 + $0x4b4] ss:$8 sps:$4 sm:$0xff]   ;;  %v4337_v16 = vld [vmem:[%s5471_s6 + $0x4b0] ss:$8 sps:$4 sm:$0xff]  }
  0xe7   : > { %3346 = vmatprep.subr.bf16.mxu0 %v4292_v50  ;;  %v1398_v17 = vld [vmem:[%s5469_s4] sm:$0xff]  ;;  %v4344_v27 = vld [vmem:[%s5471_s6 + $0xd4] ss:$8 sps:$4 sm:$0xff]   ;;  %v4348_v29 = vld [vmem:[%s5471_s6 + $0xd0] ss:$8 sps:$4 sm:$0xff]   ;;  %p4104_p5 = scmp.ne.s32.totalorder %s4720_s18, 1 }
  0xe8   : > { %v1406_v18 = vld [vmem:[%s5469_s4 + $0x40] sm:$0xff]  ;;  %v4346_v28 = vld [vmem:[%s5471_s6 + $0x4d4] ss:$8 sps:$4 sm:$0xff]   ;;  %v4349_v30 = vld [vmem:[%s5471_s6 + $0x4d0] ss:$8 sps:$4 sm:$0xff]  }
  0xe9   : > { %3135 = vmatpush1.bf16.msra.mxu1 %v4294_v51  ;;  %v4338_v19 = vld [vmem:[%s5471_s6 + $0xc4] ss:$8 sps:$4 sm:$0xff]   ;;  %v3817_v21 = vcombine.high %v1398_v17, %v1406_v18  ;;  %v4342_v25 = vld [vmem:[%s5471_s6 + $0xc0] ss:$8 sps:$4 sm:$0xff]   ;;  %v4356_v35 = vld [vmem:[%s5471_s6 + $0xf4] ss:$8 sps:$4 sm:$0xff]   ;;  %v3816_v41 = vcombine.low %v1398_v17, %v1406_v18 }
  0xea   : > { %3347 = vmatpush1.bf16.msra.mxu0 %v4295_v52  ;;  %3136 = vmatprep.subr.bf16.mxu1 %v4296_v53  ;;  %v4340_v20 = vld [vmem:[%s5471_s6 + $0x4c4] ss:$8 sps:$4 sm:$0xff]   ;;  %v4343_v26 = vld [vmem:[%s5471_s6 + $0x4c0] ss:$8 sps:$4 sm:$0xff]   ;;  %v4358_v36 = vld [vmem:[%s5471_s6 + $0x4f4] ss:$8 sps:$4 sm:$0xff]  }
  0xeb   : > { %3348 = vmatprep.subr.bf16.mxu0 %v4298_v54  ;;  %v1402_v22 = vld [vmem:[%s5469_s4 + $0x20] sm:$0xff]  ;;  %3158 = vmatprep.mubr.bf16.mxu1 %v3817_v21  ;;  %v4360_v37 = vld [vmem:[%s5471_s6 + $0xf0] ss:$8 sps:$4 sm:$0xff]   ;;  %v4370_v45 = vld [vmem:[%s5471_s6 + $0x114] ss:$8 sps:$4 sm:$0xff]  }
  0xec   : > { %v1410_v23 = vld [vmem:[%s5469_s4 + $0x60] sm:$0xff]  ;;  %v4361_v38 = vld [vmem:[%s5471_s6 + $0x4f0] ss:$8 sps:$4 sm:$0xff]   ;;  %v4373_v46 = vld [vmem:[%s5471_s6 + $0x514] ss:$8 sps:$4 sm:$0xff]  }
  0xed   : > { %3137 = vmatpush1.bf16.msra.mxu1 %v4300_v55  ;;  %v3825_v24 = vcombine.high %v1402_v22, %v1410_v23  ;;  %v4350_v31 = vld [vmem:[%s5471_s6 + $0xe4] ss:$8 sps:$4 sm:$0xff]   ;;  %v4354_v33 = vld [vmem:[%s5471_s6 + $0xe0] ss:$8 sps:$4 sm:$0xff]   ;;  %v3824_v43 = vcombine.low %v1402_v22, %v1410_v23  ;;  %v4368_v47 = vld [vmem:[%s5471_s6 + $0x110] ss:$8 sps:$4 sm:$0xff]  }
  0xee   : > { %3349 = vmatpush1.bf16.msra.mxu0 %v4301_v56  ;;  %3138 = vmatprep.subr.bf16.mxu1 %v4302_v57  ;;  %v4352_v32 = vld [vmem:[%s5471_s6 + $0x4e4] ss:$8 sps:$4 sm:$0xff]   ;;  %v4355_v34 = vld [vmem:[%s5471_s6 + $0x4e0] ss:$8 sps:$4 sm:$0xff]   ;;  %v4371_v48 = vld [vmem:[%s5471_s6 + $0x510] ss:$8 sps:$4 sm:$0xff]  }
  0xef   : > { %3350 = vmatprep.subr.bf16.mxu0 %v4304_v58  ;;  %3370 = vmatprep.mubr.bf16.mxu0 %v3825_v24  ;;  %v4364_v39 = vld [vmem:[%s5471_s6 + $0x104] ss:$8 sps:$4 sm:$0xff]   ;;  %v4362_v42 = vld [vmem:[%s5471_s6 + $0x100] ss:$8 sps:$4 sm:$0xff]   ;;  %v4382_v53 = vld [vmem:[%s5471_s6 + $0x134] ss:$8 sps:$4 sm:$0xff]  }
  0xf0   : > { %v4367_v40 = vld [vmem:[%s5471_s6 + $0x504] ss:$8 sps:$4 sm:$0xff]   ;;  %v4365_v44 = vld [vmem:[%s5471_s6 + $0x500] ss:$8 sps:$4 sm:$0xff]   ;;  %v4385_v54 = vld [vmem:[%s5471_s6 + $0x534] ss:$8 sps:$4 sm:$0xff]  }
  0xf1   : > { %3139 = vmatpush1.bf16.msra.mxu1 %v4306_v59  ;;  %v4376_v49 = vld [vmem:[%s5471_s6 + $0x124] ss:$8 sps:$4 sm:$0xff]   ;;  %v4374_v51 = vld [vmem:[%s5471_s6 + $0x120] ss:$8 sps:$4 sm:$0xff]   ;;  %v4380_v55 = vld [vmem:[%s5471_s6 + $0x130] ss:$8 sps:$4 sm:$0xff]  }
  0xf2   : > { %3351 = vmatpush1.bf16.msra.mxu0 %v4307_v60  ;;  %3140 = vmatprep.subr.bf16.mxu1 %v4308_v61  ;;  %v4379_v50 = vld [vmem:[%s5471_s6 + $0x524] ss:$8 sps:$4 sm:$0xff]   ;;  %v4377_v52 = vld [vmem:[%s5471_s6 + $0x520] ss:$8 sps:$4 sm:$0xff]   ;;  %v4383_v56 = vld [vmem:[%s5471_s6 + $0x530] ss:$8 sps:$4 sm:$0xff]  }
  0xf3   : > { %3352 = vmatprep.subr.bf16.mxu0 %v4310_v62  ;;  %v4388_v57 = vld [vmem:[%s5471_s6 + $0x144] ss:$8 sps:$4 sm:$0xff]   ;;  %v4386_v59 = vld [vmem:[%s5471_s6 + $0x140] ss:$8 sps:$4 sm:$0xff]   ;;  %v4394_v61 = vld [vmem:[%s5471_s6 + $0x154] ss:$8 sps:$4 sm:$0xff]  }
  0xf4   : > { %v4391_v58 = vld [vmem:[%s5471_s6 + $0x544] ss:$8 sps:$4 sm:$0xff]   ;;  %v4389_v60 = vld [vmem:[%s5471_s6 + $0x540] ss:$8 sps:$4 sm:$0xff]   ;;  %v4397_v62 = vld [vmem:[%s5471_s6 + $0x554] ss:$8 sps:$4 sm:$0xff]  }
  0xf5   : > { %3141 = vmatpush1.bf16.msra.mxu1 %v4312_v63  ;;  %v1414_v63 = vld [vmem:[%s5469_s4 + $0x80] sm:$0xff]  ;;  %v5587_v18 = vld [vmem:[%s5469_s4 + $0x28] sm:$0xff]  ;;  %v4407_v21 = vld [vmem:[%s5471_s6 + $0x570] ss:$8 sps:$4 sm:$0xff]  }
  0xf6   : > { %3353 = vmatpush1.bf16.msra.mxu0 %v4313_v0  ;;  %3142 = vmatprep.subr.bf16.mxu1 %v4314_v1  ;;  %v1422_v0 = vld [vmem:[%s5469_s4 + $0xc0] sm:$0xff]  ;;  %v4392_v1 = vld [vmem:[%s5471_s6 + $0x150] ss:$8 sps:$4 sm:$0xff]  }
  0xf7   : > { %3354 = vmatprep.subr.bf16.mxu0 %v4316_v2  ;;  %v3833_v2 = vcombine.high %v1414_v63, %v1422_v0  ;;  %v4412_v23 = vld [vmem:[%s5471_s6 + $0x184] ss:$8 sps:$4 sm:$0xff]  }
  0xf8   : > { %v4415_v24 = vld [vmem:[%s5471_s6 + $0x584] ss:$8 sps:$4 sm:$0xff]  }
  0xf9   : > { %3143 = vmatpush1.bf16.msra.mxu1 %v4318_v3  ;;  %v4395_v3 = vld [vmem:[%s5471_s6 + $0x550] ss:$8 sps:$4 sm:$0xff]  }
  0xfa   : > { %3355 = vmatpush1.bf16.msra.mxu0 %v4319_v4  ;;  %3144 = vmatprep.subr.bf16.mxu1 %v4320_v5  ;;  %v1418_v4 = vld [vmem:[%s5469_s4 + $0xa0] sm:$0xff] }
  0xfb   : > { %3356 = vmatprep.subr.bf16.mxu0 %v4322_v6  ;;  %v1426_v5 = vld [vmem:[%s5469_s4 + $0xe0] sm:$0xff]  ;;  %v3832_v6 = vcombine.low %v1414_v63, %v1422_v0  ;;  %v4466_v63 = vld [vmem:[%s5471_s6 + $0x214] ss:$8 sps:$4 sm:$0xff]  }
  0xfc   : > { %v4469_v0 = vld [vmem:[%s5471_s6 + $0x614] ss:$8 sps:$4 sm:$0xff]  }
  0xfd   : > { %3145 = vmatpush1.bf16.msra.mxu1 %v4324_v7  ;;  %v4400_v7 = vld [vmem:[%s5471_s6 + $0x164] ss:$8 sps:$4 sm:$0xff]  }
  0xfe   : > { %3357 = vmatpush1.bf16.msra.mxu0 %v4325_v8  ;;  %3146 = vmatprep.subr.bf16.mxu1 %v4326_v9  ;;  %v3841_v8 = vcombine.high %v1418_v4, %v1426_v5  ;;  %v3840_v9 = vcombine.low %v1418_v4, %v1426_v5  ;;  %v4464_v5 = vld [vmem:[%s5471_s6 + $0x210] ss:$8 sps:$4 sm:$0xff]  }
  0xff   : > { %3358 = vmatprep.subr.bf16.mxu0 %v4328_v10  ;;  %v4403_v10 = vld [vmem:[%s5471_s6 + $0x564] ss:$8 sps:$4 sm:$0xff]  }
 0x101   : > { %3147 = vmatpush1.bf16.msra.mxu1 %v4330_v11  ;;  %v4398_v11 = vld [vmem:[%s5471_s6 + $0x160] ss:$8 sps:$4 sm:$0xff]  }
 0x102   : > { %3359 = vmatpush1.bf16.msra.mxu0 %v4331_v12  ;;  %3148 = vmatprep.subr.bf16.mxu1 %v4332_v13  ;;  %v4401_v12 = vld [vmem:[%s5471_s6 + $0x560] ss:$8 sps:$4 sm:$0xff]  }
 0x103   : > { %3360 = vmatprep.subr.bf16.mxu0 %v4334_v14  ;;  %v5577_v13 = vld [vmem:[%s5469_s4 + $0x8] sm:$0xff] }
 0x104   : > { %v5580_v14 = vld [vmem:[%s5469_s4 + $0x48] sm:$0xff] }
 0x105   : > { %3149 = vmatpush1.bf16.msra.mxu1 %v4336_v15  ;;  %v4406_v15 = vld [vmem:[%s5471_s6 + $0x174] ss:$8 sps:$4 sm:$0xff]   ;;  %v3819_v17 = vcombine.high %v5577_v13, %v5580_v14 }
 0x106   : > { %3361 = vmatpush1.bf16.msra.mxu0 %v4337_v16  ;;  %3150 = vmatprep.subr.bf16.mxu1 %v4338_v19  ;;  %v4409_v16 = vld [vmem:[%s5471_s6 + $0x574] ss:$8 sps:$4 sm:$0xff]   ;;  %v5590_v19 = vld [vmem:[%s5469_s4 + $0x68] sm:$0xff] }
 0x107   : > { %3362 = vmatprep.subr.bf16.mxu0 %v4340_v20  ;;  %v4404_v20 = vld [vmem:[%s5471_s6 + $0x170] ss:$8 sps:$4 sm:$0xff]   ;;  %v3827_v22 = vcombine.high %v5587_v18, %v5590_v19 }
 0x109   : > { %3151 = vmatpush1.bf16.msra.mxu1 %v4342_v25  ;;  %v4410_v25 = vld [vmem:[%s5471_s6 + $0x180] ss:$8 sps:$4 sm:$0xff]  }
 0x10a   : > { %3363 = vmatpush1.bf16.msra.mxu0 %v4343_v26  ;;  %3152 = vmatprep.subr.bf16.mxu1 %v4344_v27  ;;  %v4413_v26 = vld [vmem:[%s5471_s6 + $0x580] ss:$8 sps:$4 sm:$0xff]   ;;  %v4418_v27 = vld [vmem:[%s5471_s6 + $0x194] ss:$8 sps:$4 sm:$0xff]  }
 0x10b   : > { %3364 = vmatprep.subr.bf16.mxu0 %v4346_v28  ;;  %v4421_v28 = vld [vmem:[%s5471_s6 + $0x594] ss:$8 sps:$4 sm:$0xff]  }
 0x10d   : > { %3153 = vmatpush1.bf16.msra.mxu1 %v4348_v29  ;;  %v4416_v29 = vld [vmem:[%s5471_s6 + $0x190] ss:$8 sps:$4 sm:$0xff]  }
 0x10e   : > { %3365 = vmatpush1.bf16.msra.mxu0 %v4349_v30  ;;  %3154 = vmatprep.subr.bf16.mxu1 %v4350_v31  ;;  %v4419_v30 = vld [vmem:[%s5471_s6 + $0x590] ss:$8 sps:$4 sm:$0xff]   ;;  %v4424_v31 = vld [vmem:[%s5471_s6 + $0x1a4] ss:$8 sps:$4 sm:$0xff]  }
 0x10f   : > { %3366 = vmatprep.subr.bf16.mxu0 %v4352_v32  ;;  %v4427_v32 = vld [vmem:[%s5471_s6 + $0x5a4] ss:$8 sps:$4 sm:$0xff]  }
 0x111   : > { %3155 = vmatpush1.bf16.msra.mxu1 %v4354_v33  ;;  %v4422_v33 = vld [vmem:[%s5471_s6 + $0x1a0] ss:$8 sps:$4 sm:$0xff]  }
 0x112   : > { %3367 = vmatpush1.bf16.msra.mxu0 %v4355_v34  ;;  %3156 = vmatprep.subr.bf16.mxu1 %v4356_v35  ;;  %v4425_v34 = vld [vmem:[%s5471_s6 + $0x5a0] ss:$8 sps:$4 sm:$0xff]   ;;  %v4430_v35 = vld [vmem:[%s5471_s6 + $0x1b4] ss:$8 sps:$4 sm:$0xff]  }
 0x113   : > { %3368 = vmatprep.subr.bf16.mxu0 %v4358_v36  ;;  %v4433_v36 = vld [vmem:[%s5471_s6 + $0x5b4] ss:$8 sps:$4 sm:$0xff]  }
 0x115   : > { %3157 = vmatpush1.bf16.msra.mxu1 %v4360_v37  ;;  %v4428_v37 = vld [vmem:[%s5471_s6 + $0x1b0] ss:$8 sps:$4 sm:$0xff]  }
 0x116   : > { %3369 = vmatpush1.bf16.msra.mxu0 %v4361_v38  ;;  %3179 = vmatprep.subr.bf16.mxu1 %v4364_v39  ;;  %v4431_v38 = vld [vmem:[%s5471_s6 + $0x5b0] ss:$8 sps:$4 sm:$0xff]   ;;  %v4436_v39 = vld [vmem:[%s5471_s6 + $0x1c4] ss:$8 sps:$4 sm:$0xff]  }
 0x117   : > { %3391 = vmatprep.subr.bf16.mxu0 %v4367_v40  ;;  %v4439_v40 = vld [vmem:[%s5471_s6 + $0x5c4] ss:$8 sps:$4 sm:$0xff]  }
 0x118   : > { %3159 = vmatmul.mubr.bf16.vlgmr.msra.gmra.mrb[0].mxu1 %v3816_v41  ;;  %v4434_v41 = vld [vmem:[%s5471_s6 + $0x1c0] ss:$8 sps:$4 sm:$0xff]  }
 0x119   : > { %3371 = vmatmul.mubr.bf16.vlgmr.msra.gmra.mrb[0].mxu0 %v3824_v43  ;;  %3180 = vmatpush1.bf16.msra.mxu1 %v4362_v42  ;;  %v4437_v42 = vld [vmem:[%s5471_s6 + $0x5c0] ss:$8 sps:$4 sm:$0xff]   ;;  %v4442_v43 = vld [vmem:[%s5471_s6 + $0x1d4] ss:$8 sps:$4 sm:$0xff]  }
 0x11a   : > { %3392 = vmatpush1.bf16.msra.mxu0 %v4365_v44  ;;  %3181 = vmatprep.subr.bf16.mxu1 %v4370_v45  ;;  %v4445_v44 = vld [vmem:[%s5471_s6 + $0x5d4] ss:$8 sps:$4 sm:$0xff]   ;;  %v4440_v45 = vld [vmem:[%s5471_s6 + $0x1d0] ss:$8 sps:$4 sm:$0xff]  }
 0x11b   : > { %3393 = vmatprep.subr.bf16.mxu0 %v4373_v46  ;;  %3168 = vmatprep.mubr.bf16.mxu1 %v3833_v2  ;;  %v4443_v46 = vld [vmem:[%s5471_s6 + $0x5d0] ss:$8 sps:$4 sm:$0xff]   ;;  %v1427_v2 = vld [vmem:[%s5469_s4 + $0xe8] sm:$0xff] }
 0x11c   : > { %3380 = vmatprep.mubr.bf16.mxu0 %v3841_v8  ;;  %v4475_v8 = vld [vmem:[%s5471_s6 + $0x624] ss:$8 sps:$4 sm:$0xff]  }
 0x11d   : > { %3182 = vmatpush1.bf16.msra.mxu1 %v4368_v47  ;;  %v4448_v47 = vld [vmem:[%s5471_s6 + $0x1e4] ss:$8 sps:$4 sm:$0xff]  }
 0x11e   : > { %3394 = vmatpush1.bf16.msra.mxu0 %v4371_v48  ;;  %3183 = vmatprep.subr.bf16.mxu1 %v4376_v49  ;;  %v4451_v48 = vld [vmem:[%s5471_s6 + $0x5e4] ss:$8 sps:$4 sm:$0xff]   ;;  %v4446_v49 = vld [vmem:[%s5471_s6 + $0x1e0] ss:$8 sps:$4 sm:$0xff]  }
 0x11f   : > { %3395 = vmatprep.subr.bf16.mxu0 %v4379_v50  ;;  %v4449_v50 = vld [vmem:[%s5471_s6 + $0x5e0] ss:$8 sps:$4 sm:$0xff]  }
 0x120   : > { %3169 = vmatmul.mubr.bf16.gmra.mrb[4].mxu1 %v3832_v6  ;;  %v4467_v6 = vld [vmem:[%s5471_s6 + $0x610] ss:$8 sps:$4 sm:$0xff]  }
 0x121   : > { %3184 = vmatpush1.bf16.msra.mxu1 %v4374_v51  ;;  %3381 = vmatmul.mubr.bf16.gmra.mrb[4].mxu0 %v3840_v9  ;;  %v4454_v51 = vld [vmem:[%s5471_s6 + $0x1f4] ss:$8 sps:$4 sm:$0xff]   ;;  %v4470_v9 = vld [vmem:[%s5471_s6 + $0x220] ss:$8 sps:$4 sm:$0xff]  }
 0x122   : > { %3396 = vmatpush1.bf16.msra.mxu0 %v4377_v52  ;;  %3185 = vmatprep.subr.bf16.mxu1 %v4382_v53  ;;  %v4457_v52 = vld [vmem:[%s5471_s6 + $0x5f4] ss:$8 sps:$4 sm:$0xff]   ;;  %v4452_v53 = vld [vmem:[%s5471_s6 + $0x1f0] ss:$8 sps:$4 sm:$0xff]  }
 0x123   : > { %3397 = vmatprep.subr.bf16.mxu0 %v4385_v54  ;;  %3211 = vmatprep.mubr.bf16.mxu1 %v3819_v17  ;;  %v4455_v54 = vld [vmem:[%s5471_s6 + $0x5f0] ss:$8 sps:$4 sm:$0xff]   ;;  %v4478_v17 = vld [vmem:[%s5471_s6 + $0x234] ss:$8 sps:$4 sm:$0xff]  }
 0x124   : > { %3423 = vmatprep.mubr.bf16.mxu0 %v3827_v22  ;;  %v4479_v22 = vld [vmem:[%s5471_s6 + $0x630] ss:$8 sps:$4 sm:$0xff]  }
 0x125   : > { %3186 = vmatpush1.bf16.msra.mxu1 %v4380_v55  ;;  %v4460_v55 = vld [vmem:[%s5471_s6 + $0x204] ss:$8 sps:$4 sm:$0xff]  }
 0x126   : > { %3398 = vmatpush1.bf16.msra.mxu0 %v4383_v56  ;;  %3187 = vmatprep.subr.bf16.mxu1 %v4388_v57  ;;  %v4463_v56 = vld [vmem:[%s5471_s6 + $0x604] ss:$8 sps:$4 sm:$0xff]   ;;  %v4458_v57 = vld [vmem:[%s5471_s6 + $0x200] ss:$8 sps:$4 sm:$0xff]  }
 0x127   : > { %3399 = vmatprep.subr.bf16.mxu0 %v4391_v58  ;;  %v4461_v58 = vld [vmem:[%s5471_s6 + $0x600] ss:$8 sps:$4 sm:$0xff]  }
 0x129   : > { %3188 = vmatpush1.bf16.msra.mxu1 %v4386_v59  ;;  %v1415_v59 = vld [vmem:[%s5469_s4 + $0x88] sm:$0xff] }
 0x12a   : > { %3400 = vmatpush1.bf16.msra.mxu0 %v4389_v60  ;;  %3189 = vmatprep.subr.bf16.mxu1 %v4394_v61  ;;  %v3818_v60 = vcombine.low %v5577_v13, %v5580_v14  ;;  %v3826_v61 = vcombine.low %v5587_v18, %v5590_v19  ;;  %v5652_v14 = vld [vmem:[%s5469_s4 + $0x50] sm:$0xff] }
 0x12b   : > { %3401 = vmatprep.subr.bf16.mxu0 %v4397_v62  ;;  %v1423_v62 = vld [vmem:[%s5469_s4 + $0xc8] sm:$0xff]  ;;  %v4481_v18 = vld [vmem:[%s5471_s6 + $0x634] ss:$8 sps:$4 sm:$0xff]  }
 0x12d   : > { %3190 = vmatpush1.bf16.msra.mxu1 %v4392_v1  ;;  %v1419_v1 = vld [vmem:[%s5469_s4 + $0xa8] sm:$0xff] }
 0x12e   : > { %3402 = vmatpush1.bf16.msra.mxu0 %v4395_v3  ;;  %3191 = vmatprep.subr.bf16.mxu1 %v4400_v7  ;;  %v3835_v3 = vcombine.high %v1415_v59, %v1423_v62  ;;  %v3843_v4 = vcombine.high %v1419_v1, %v1427_v2  ;;  %v4472_v7 = vld [vmem:[%s5471_s6 + $0x224] ss:$8 sps:$4 sm:$0xff]   ;;  %v3842_v13 = vcombine.low %v1419_v1, %v1427_v2  ;;  %v4542_v1 = vld [vmem:[%s5471_s6 + $0x2e0] ss:$8 sps:$4 sm:$0xff]  }
 0x12f   : > { %3403 = vmatprep.subr.bf16.mxu0 %v4403_v10  ;;  %v4473_v10 = vld [vmem:[%s5471_s6 + $0x620] ss:$8 sps:$4 sm:$0xff]  }
 0x130   : > { %v4545_v2 = vld [vmem:[%s5471_s6 + $0x6e0] ss:$8 sps:$4 sm:$0xff]  }
 0x131   : > { %3192 = vmatpush1.bf16.msra.mxu1 %v4398_v11  ;;  %v5649_v11 = vld [vmem:[%s5469_s4 + $0x10] sm:$0xff] }
 0x132   : > { %3404 = vmatpush1.bf16.msra.mxu0 %v4401_v12  ;;  %3193 = vmatprep.subr.bf16.mxu1 %v4406_v15  ;;  %v3834_v12 = vcombine.low %v1415_v59, %v1423_v62  ;;  %v5655_v15 = vld [vmem:[%s5469_s4 + $0x30] sm:$0xff]  ;;  %v3821_v19 = vcombine.high %v5649_v11, %v5652_v14 }
 0x133   : > { %3405 = vmatprep.subr.bf16.mxu0 %v4409_v16  ;;  %v5658_v16 = vld [vmem:[%s5469_s4 + $0x70] sm:$0xff] }
 0x134   : > { %v4538_v59 = vld [vmem:[%s5471_s6 + $0x2d4] ss:$8 sps:$4 sm:$0xff]   ;;  %v4539_v62 = vld [vmem:[%s5471_s6 + $0x6d0] ss:$8 sps:$4 sm:$0xff]  }
 0x135   : > { %3194 = vmatpush1.bf16.msra.mxu1 %v4404_v20  ;;  %v3829_v20 = vcombine.high %v5655_v15, %v5658_v16 }
 0x136   : > { %3406 = vmatpush1.bf16.msra.mxu0 %v4407_v21  ;;  %3195 = vmatprep.subr.bf16.mxu1 %v4412_v23  ;;  %v4476_v21 = vld [vmem:[%s5471_s6 + $0x230] ss:$8 sps:$4 sm:$0xff]   ;;  %v4484_v23 = vld [vmem:[%s5471_s6 + $0x244] ss:$8 sps:$4 sm:$0xff]  }
 0x137   : > { %3407 = vmatprep.subr.bf16.mxu0 %v4415_v24  ;;  %v4487_v24 = vld [vmem:[%s5471_s6 + $0x644] ss:$8 sps:$4 sm:$0xff]  }
 0x139   : > { %3196 = vmatpush1.bf16.msra.mxu1 %v4410_v25  ;;  %v4482_v25 = vld [vmem:[%s5471_s6 + $0x240] ss:$8 sps:$4 sm:$0xff]  }
 0x13a   : > { %3408 = vmatpush1.bf16.msra.mxu0 %v4413_v26  ;;  %3197 = vmatprep.subr.bf16.mxu1 %v4418_v27  ;;  %v4485_v26 = vld [vmem:[%s5471_s6 + $0x640] ss:$8 sps:$4 sm:$0xff]   ;;  %v4490_v27 = vld [vmem:[%s5471_s6 + $0x254] ss:$8 sps:$4 sm:$0xff]  }
 0x13b   : > { %3409 = vmatprep.subr.bf16.mxu0 %v4421_v28  ;;  %v4493_v28 = vld [vmem:[%s5471_s6 + $0x654] ss:$8 sps:$4 sm:$0xff]  }
 0x13d   : > { %3198 = vmatpush1.bf16.msra.mxu1 %v4416_v29  ;;  %v4488_v29 = vld [vmem:[%s5471_s6 + $0x250] ss:$8 sps:$4 sm:$0xff]  }
 0x13e   : > { %3410 = vmatpush1.bf16.msra.mxu0 %v4419_v30  ;;  %3199 = vmatprep.subr.bf16.mxu1 %v4424_v31  ;;  %v4491_v30 = vld [vmem:[%s5471_s6 + $0x650] ss:$8 sps:$4 sm:$0xff]   ;;  %v4496_v31 = vld [vmem:[%s5471_s6 + $0x264] ss:$8 sps:$4 sm:$0xff]  }
 0x13f   : > { %3411 = vmatprep.subr.bf16.mxu0 %v4427_v32  ;;  %v4499_v32 = vld [vmem:[%s5471_s6 + $0x664] ss:$8 sps:$4 sm:$0xff]  }
 0x141   : > { %3200 = vmatpush1.bf16.msra.mxu1 %v4422_v33  ;;  %v4494_v33 = vld [vmem:[%s5471_s6 + $0x260] ss:$8 sps:$4 sm:$0xff]  }
 0x142   : > { %3412 = vmatpush1.bf16.msra.mxu0 %v4425_v34  ;;  %3201 = vmatprep.subr.bf16.mxu1 %v4430_v35  ;;  %v4497_v34 = vld [vmem:[%s5471_s6 + $0x660] ss:$8 sps:$4 sm:$0xff]   ;;  %v4502_v35 = vld [vmem:[%s5471_s6 + $0x274] ss:$8 sps:$4 sm:$0xff]  }
 0x143   : > { %3413 = vmatprep.subr.bf16.mxu0 %v4433_v36  ;;  %v4505_v36 = vld [vmem:[%s5471_s6 + $0x674] ss:$8 sps:$4 sm:$0xff]  }
 0x145   : > { %3202 = vmatpush1.bf16.msra.mxu1 %v4428_v37  ;;  %v4500_v37 = vld [vmem:[%s5471_s6 + $0x270] ss:$8 sps:$4 sm:$0xff]  }
 0x146   : > { %3414 = vmatpush1.bf16.msra.mxu0 %v4431_v38  ;;  %3203 = vmatprep.subr.bf16.mxu1 %v4436_v39  ;;  %v4503_v38 = vld [vmem:[%s5471_s6 + $0x670] ss:$8 sps:$4 sm:$0xff]   ;;  %v4508_v39 = vld [vmem:[%s5471_s6 + $0x284] ss:$8 sps:$4 sm:$0xff]  }
 0x147   : > { %3415 = vmatprep.subr.bf16.mxu0 %v4439_v40  ;;  %v4511_v40 = vld [vmem:[%s5471_s6 + $0x684] ss:$8 sps:$4 sm:$0xff]  }
 0x149   : > { %3204 = vmatpush1.bf16.msra.mxu1 %v4434_v41  ;;  %v4506_v41 = vld [vmem:[%s5471_s6 + $0x280] ss:$8 sps:$4 sm:$0xff]  }
 0x14a   : > { %3416 = vmatpush1.bf16.msra.mxu0 %v4437_v42  ;;  %3205 = vmatprep.subr.bf16.mxu1 %v4442_v43  ;;  %v4509_v42 = vld [vmem:[%s5471_s6 + $0x680] ss:$8 sps:$4 sm:$0xff]   ;;  %v4514_v43 = vld [vmem:[%s5471_s6 + $0x294] ss:$8 sps:$4 sm:$0xff]  }
 0x14b   : > { %3417 = vmatprep.subr.bf16.mxu0 %v4445_v44  ;;  %v4517_v44 = vld [vmem:[%s5471_s6 + $0x694] ss:$8 sps:$4 sm:$0xff]  }
 0x14d   : > { %3206 = vmatpush1.bf16.msra.mxu1 %v4440_v45  ;;  %v4512_v45 = vld [vmem:[%s5471_s6 + $0x290] ss:$8 sps:$4 sm:$0xff]  }
 0x14e   : > { %3418 = vmatpush1.bf16.msra.mxu0 %v4443_v46  ;;  %3207 = vmatprep.subr.bf16.mxu1 %v4448_v47  ;;  %v4515_v46 = vld [vmem:[%s5471_s6 + $0x690] ss:$8 sps:$4 sm:$0xff]   ;;  %v4520_v47 = vld [vmem:[%s5471_s6 + $0x2a4] ss:$8 sps:$4 sm:$0xff]  }
 0x14f   : > { %3419 = vmatprep.subr.bf16.mxu0 %v4451_v48  ;;  %v4523_v48 = vld [vmem:[%s5471_s6 + $0x6a4] ss:$8 sps:$4 sm:$0xff]  }
 0x151   : > { %3208 = vmatpush1.bf16.msra.mxu1 %v4446_v49  ;;  %v4518_v49 = vld [vmem:[%s5471_s6 + $0x2a0] ss:$8 sps:$4 sm:$0xff]  }
 0x152   : > { %3420 = vmatpush1.bf16.msra.mxu0 %v4449_v50  ;;  %3209 = vmatprep.subr.bf16.mxu1 %v4454_v51  ;;  %v4521_v50 = vld [vmem:[%s5471_s6 + $0x6a0] ss:$8 sps:$4 sm:$0xff]   ;;  %v4526_v51 = vld [vmem:[%s5471_s6 + $0x2b4] ss:$8 sps:$4 sm:$0xff]  }
 0x153   : > { %3421 = vmatprep.subr.bf16.mxu0 %v4457_v52  ;;  %v4529_v52 = vld [vmem:[%s5471_s6 + $0x6b4] ss:$8 sps:$4 sm:$0xff]  }
 0x155   : > { %3210 = vmatpush1.bf16.msra.mxu1 %v4452_v53  ;;  %v4524_v53 = vld [vmem:[%s5471_s6 + $0x2b0] ss:$8 sps:$4 sm:$0xff]  }
 0x156   : > { %3422 = vmatpush1.bf16.msra.mxu0 %v4455_v54  ;;  %3232 = vmatprep.subr.bf16.mxu1 %v4460_v55  ;;  %v4527_v54 = vld [vmem:[%s5471_s6 + $0x6b0] ss:$8 sps:$4 sm:$0xff]   ;;  %v4532_v55 = vld [vmem:[%s5471_s6 + $0x2c4] ss:$8 sps:$4 sm:$0xff]  }
 0x157   : > { %3444 = vmatprep.subr.bf16.mxu0 %v4463_v56  ;;  %v4535_v56 = vld [vmem:[%s5471_s6 + $0x6c4] ss:$8 sps:$4 sm:$0xff]  }
 0x158   : > { %3212 = vmatmul.mubr.bf16.vlgmr.msra.gmra.mrb[0].mxu1 %v3818_v60  ;;  %v4541_v60 = vld [vmem:[%s5471_s6 + $0x6d4] ss:$8 sps:$4 sm:$0xff]  }
 0x159   : > { %3424 = vmatmul.mubr.bf16.vlgmr.msra.gmra.mrb[0].mxu0 %v3826_v61  ;;  %3233 = vmatpush1.bf16.msra.mxu1 %v4458_v57  ;;  %v4530_v57 = vld [vmem:[%s5471_s6 + $0x2c0] ss:$8 sps:$4 sm:$0xff]   ;;  %v4536_v61 = vld [vmem:[%s5471_s6 + $0x2d0] ss:$8 sps:$4 sm:$0xff]  }
 0x15a   : > { %3445 = vmatpush1.bf16.msra.mxu0 %v4461_v58  ;;  %3234 = vmatprep.subr.bf16.mxu1 %v4466_v63  ;;  %v4533_v58 = vld [vmem:[%s5471_s6 + $0x6c0] ss:$8 sps:$4 sm:$0xff]   ;;  %v4544_v63 = vld [vmem:[%s5471_s6 + $0x2e4] ss:$8 sps:$4 sm:$0xff]  }
 0x15b   : > { %3446 = vmatprep.subr.bf16.mxu0 %v4469_v0  ;;  %3221 = vmatprep.mubr.bf16.mxu1 %v3835_v3  ;;  %v4547_v0 = vld [vmem:[%s5471_s6 + $0x6e4] ss:$8 sps:$4 sm:$0xff]   ;;  %v4550_v3 = vld [vmem:[%s5471_s6 + $0x2f4] ss:$8 sps:$4 sm:$0xff]  }
 0x15c   : > { %3433 = vmatprep.mubr.bf16.mxu0 %v3843_v4  ;;  %v4553_v4 = vld [vmem:[%s5471_s6 + $0x6f4] ss:$8 sps:$4 sm:$0xff]  }
 0x15d   : > { %3235 = vmatpush1.bf16.msra.mxu1 %v4464_v5  ;;  %v4548_v5 = vld [vmem:[%s5471_s6 + $0x2f0] ss:$8 sps:$4 sm:$0xff]  }
 0x15e   : > { %3447 = vmatpush1.bf16.msra.mxu0 %v4467_v6  ;;  %3236 = vmatprep.subr.bf16.mxu1 %v4472_v7  ;;  %v4551_v6 = vld [vmem:[%s5471_s6 + $0x6f0] ss:$8 sps:$4 sm:$0xff]   ;;  %v4556_v7 = vld [vmem:[%s5471_s6 + $0x304] ss:$8 sps:$4 sm:$0xff]  }
 0x15f   : > { %3448 = vmatprep.subr.bf16.mxu0 %v4475_v8  ;;  %v4559_v8 = vld [vmem:[%s5471_s6 + $0x704] ss:$8 sps:$4 sm:$0xff]  }
 0x160   : > { %3222 = vmatmul.mubr.bf16.gmra.mrb[4].mxu1 %v3834_v12  ;;  %v3828_v12 = vcombine.low %v5655_v15, %v5658_v16  ;;  %v4560_v15 = vld [vmem:[%s5471_s6 + $0x310] ss:$8 sps:$4 sm:$0xff]  }
 0x161   : > { %3434 = vmatmul.mubr.bf16.gmra.mrb[4].mxu0 %v3842_v13  ;;  %3237 = vmatpush1.bf16.msra.mxu1 %v4470_v9  ;;  %v1416_v9 = vld [vmem:[%s5469_s4 + $0x90] sm:$0xff] }
 0x162   : > { %3449 = vmatpush1.bf16.msra.mxu0 %v4473_v10  ;;  %3238 = vmatprep.subr.bf16.mxu1 %v4478_v17  ;;  %v3820_v10 = vcombine.low %v5649_v11, %v5652_v14  ;;  %v1424_v13 = vld [vmem:[%s5469_s4 + $0xd0] sm:$0xff] }
 0x163   : > { %3450 = vmatprep.subr.bf16.mxu0 %v4481_v18  ;;  %3264 = vmatprep.mubr.bf16.mxu1 %v3821_v19  ;;  %v1420_v17 = vld [vmem:[%s5469_s4 + $0xb0] sm:$0xff]  ;;  %v4554_v19 = vld [vmem:[%s5471_s6 + $0x300] ss:$8 sps:$4 sm:$0xff]   ;;  %v3837_v11 = vcombine.high %v1416_v9, %v1424_v13 }
 0x164   : > { %3476 = vmatprep.mubr.bf16.mxu0 %v3829_v20  ;;  %v1428_v18 = vld [vmem:[%s5469_s4 + $0xf0] sm:$0xff]  ;;  %v4557_v20 = vld [vmem:[%s5471_s6 + $0x700] ss:$8 sps:$4 sm:$0xff]  }
 0x165   : > { %3239 = vmatpush1.bf16.msra.mxu1 %v4476_v21  ;;  %v4562_v21 = vld [vmem:[%s5471_s6 + $0x314] ss:$8 sps:$4 sm:$0xff]   ;;  %v3845_v14 = vcombine.high %v1420_v17, %v1428_v18  ;;  %v4563_v16 = vld [vmem:[%s5471_s6 + $0x710] ss:$8 sps:$4 sm:$0xff]  }
 0x166   : > { %3451 = vmatpush1.bf16.msra.mxu0 %v4479_v22  ;;  %3240 = vmatprep.subr.bf16.mxu1 %v4484_v23  ;;  %v4565_v22 = vld [vmem:[%s5471_s6 + $0x714] ss:$8 sps:$4 sm:$0xff]   ;;  %v4568_v23 = vld [vmem:[%s5471_s6 + $0x324] ss:$8 sps:$4 sm:$0xff]  }
 0x167   : > { %3452 = vmatprep.subr.bf16.mxu0 %v4487_v24  ;;  %v4571_v24 = vld [vmem:[%s5471_s6 + $0x724] ss:$8 sps:$4 sm:$0xff]  }
 0x169   : > { %3241 = vmatpush1.bf16.msra.mxu1 %v4482_v25  ;;  %v5735_v25 = vld [vmem:[%s5469_s4 + $0x18] sm:$0xff] }
 0x16a   : > { %3453 = vmatpush1.bf16.msra.mxu0 %v4485_v26  ;;  %3242 = vmatprep.subr.bf16.mxu1 %v4490_v27  ;;  %v3836_v26 = vcombine.low %v1416_v9, %v1424_v13  ;;  %v3844_v27 = vcombine.low %v1420_v17, %v1428_v18  ;;  %v4626_v9 = vld [vmem:[%s5471_s6 + $0x3c0] ss:$8 sps:$4 sm:$0xff]   ;;  %v4637_v13 = vld [vmem:[%s5471_s6 + $0x7d4] ss:$8 sps:$4 sm:$0xff]   ;;  %v4632_v17 = vld [vmem:[%s5471_s6 + $0x3d0] ss:$8 sps:$4 sm:$0xff]  }
 0x16b   : > { %3454 = vmatprep.subr.bf16.mxu0 %v4493_v28  ;;  %v5738_v28 = vld [vmem:[%s5469_s4 + $0x58] sm:$0xff] }
 0x16c   : > { %v4635_v18 = vld [vmem:[%s5471_s6 + $0x7d0] ss:$8 sps:$4 sm:$0xff]  }
 0x16d   : > { %3243 = vmatpush1.bf16.msra.mxu1 %v4488_v29  ;;  %v5741_v29 = vld [vmem:[%s5469_s4 + $0x38] sm:$0xff] }
 0x16e   : > { %3455 = vmatpush1.bf16.msra.mxu0 %v4491_v30  ;;  %3244 = vmatprep.subr.bf16.mxu1 %v4496_v31  ;;  %v5744_v30 = vld [vmem:[%s5469_s4 + $0x78] sm:$0xff]  ;;  %v4566_v31 = vld [vmem:[%s5471_s6 + $0x320] ss:$8 sps:$4 sm:$0xff]  }
 0x16f   : > { %3456 = vmatprep.subr.bf16.mxu0 %v4499_v32  ;;  %v4569_v32 = vld [vmem:[%s5471_s6 + $0x720] ss:$8 sps:$4 sm:$0xff]  }
 0x171   : > { %3245 = vmatpush1.bf16.msra.mxu1 %v4494_v33  ;;  %v4574_v33 = vld [vmem:[%s5471_s6 + $0x334] ss:$8 sps:$4 sm:$0xff]  }
 0x172   : > { %3457 = vmatpush1.bf16.msra.mxu0 %v4497_v34  ;;  %3246 = vmatprep.subr.bf16.mxu1 %v4502_v35  ;;  %v4577_v34 = vld [vmem:[%s5471_s6 + $0x734] ss:$8 sps:$4 sm:$0xff]   ;;  %v3823_v35 = vcombine.high %v5735_v25, %v5738_v28 }
 0x173   : > { %3458 = vmatprep.subr.bf16.mxu0 %v4505_v36  ;;  %v3831_v36 = vcombine.high %v5741_v29, %v5744_v30 }
 0x175   : > { %3247 = vmatpush1.bf16.msra.mxu1 %v4500_v37  ;;  %v4572_v37 = vld [vmem:[%s5471_s6 + $0x330] ss:$8 sps:$4 sm:$0xff]  }
 0x176   : > { %3459 = vmatpush1.bf16.msra.mxu0 %v4503_v38  ;;  %3248 = vmatprep.subr.bf16.mxu1 %v4508_v39  ;;  %v4575_v38 = vld [vmem:[%s5471_s6 + $0x730] ss:$8 sps:$4 sm:$0xff]   ;;  %v4580_v39 = vld [vmem:[%s5471_s6 + $0x344] ss:$8 sps:$4 sm:$0xff]  }
 0x177   : > { %3460 = vmatprep.subr.bf16.mxu0 %v4511_v40  ;;  %v4583_v40 = vld [vmem:[%s5471_s6 + $0x744] ss:$8 sps:$4 sm:$0xff]  }
 0x179   : > { %3249 = vmatpush1.bf16.msra.mxu1 %v4506_v41  ;;  %v4578_v41 = vld [vmem:[%s5471_s6 + $0x340] ss:$8 sps:$4 sm:$0xff]  }
 0x17a   : > { %3461 = vmatpush1.bf16.msra.mxu0 %v4509_v42  ;;  %3250 = vmatprep.subr.bf16.mxu1 %v4514_v43  ;;  %v4581_v42 = vld [vmem:[%s5471_s6 + $0x740] ss:$8 sps:$4 sm:$0xff]   ;;  %v4586_v43 = vld [vmem:[%s5471_s6 + $0x354] ss:$8 sps:$4 sm:$0xff]  }
 0x17b   : > { %3462 = vmatprep.subr.bf16.mxu0 %v4517_v44  ;;  %v4589_v44 = vld [vmem:[%s5471_s6 + $0x754] ss:$8 sps:$4 sm:$0xff]  }
 0x17d   : > { %3251 = vmatpush1.bf16.msra.mxu1 %v4512_v45  ;;  %v4584_v45 = vld [vmem:[%s5471_s6 + $0x350] ss:$8 sps:$4 sm:$0xff]  }
 0x17e   : > { %3463 = vmatpush1.bf16.msra.mxu0 %v4515_v46  ;;  %3252 = vmatprep.subr.bf16.mxu1 %v4520_v47  ;;  %v4587_v46 = vld [vmem:[%s5471_s6 + $0x750] ss:$8 sps:$4 sm:$0xff]   ;;  %v4592_v47 = vld [vmem:[%s5471_s6 + $0x364] ss:$8 sps:$4 sm:$0xff]  }
 0x17f   : > { %3464 = vmatprep.subr.bf16.mxu0 %v4523_v48  ;;  %v4595_v48 = vld [vmem:[%s5471_s6 + $0x764] ss:$8 sps:$4 sm:$0xff]  }
 0x181   : > { %3253 = vmatpush1.bf16.msra.mxu1 %v4518_v49  ;;  %v4590_v49 = vld [vmem:[%s5471_s6 + $0x360] ss:$8 sps:$4 sm:$0xff]  }
 0x182   : > { %3465 = vmatpush1.bf16.msra.mxu0 %v4521_v50  ;;  %3254 = vmatprep.subr.bf16.mxu1 %v4526_v51  ;;  %v4593_v50 = vld [vmem:[%s5471_s6 + $0x760] ss:$8 sps:$4 sm:$0xff]   ;;  %v4598_v51 = vld [vmem:[%s5471_s6 + $0x374] ss:$8 sps:$4 sm:$0xff]  }
 0x183   : > { %3466 = vmatprep.subr.bf16.mxu0 %v4529_v52  ;;  %v4601_v52 = vld [vmem:[%s5471_s6 + $0x774] ss:$8 sps:$4 sm:$0xff]  }
 0x185   : > { %3255 = vmatpush1.bf16.msra.mxu1 %v4524_v53  ;;  %v4596_v53 = vld [vmem:[%s5471_s6 + $0x370] ss:$8 sps:$4 sm:$0xff]  }
 0x186   : > { %3467 = vmatpush1.bf16.msra.mxu0 %v4527_v54  ;;  %3256 = vmatprep.subr.bf16.mxu1 %v4532_v55  ;;  %v4599_v54 = vld [vmem:[%s5471_s6 + $0x770] ss:$8 sps:$4 sm:$0xff]   ;;  %v4604_v55 = vld [vmem:[%s5471_s6 + $0x384] ss:$8 sps:$4 sm:$0xff]  }
 0x187   : > { %3468 = vmatprep.subr.bf16.mxu0 %v4535_v56  ;;  %v4607_v56 = vld [vmem:[%s5471_s6 + $0x784] ss:$8 sps:$4 sm:$0xff]  }
 0x189   : > { %3257 = vmatpush1.bf16.msra.mxu1 %v4530_v57  ;;  %v4602_v57 = vld [vmem:[%s5471_s6 + $0x380] ss:$8 sps:$4 sm:$0xff]  }
 0x18a   : > { %3469 = vmatpush1.bf16.msra.mxu0 %v4533_v58  ;;  %3258 = vmatprep.subr.bf16.mxu1 %v4538_v59  ;;  %v4605_v58 = vld [vmem:[%s5471_s6 + $0x780] ss:$8 sps:$4 sm:$0xff]   ;;  %v4610_v59 = vld [vmem:[%s5471_s6 + $0x394] ss:$8 sps:$4 sm:$0xff]  }
 0x18b   : > { %3470 = vmatprep.subr.bf16.mxu0 %v4541_v60  ;;  %v4613_v60 = vld [vmem:[%s5471_s6 + $0x794] ss:$8 sps:$4 sm:$0xff]  }
 0x18d   : > { %3259 = vmatpush1.bf16.msra.mxu1 %v4536_v61  ;;  %v4608_v61 = vld [vmem:[%s5471_s6 + $0x390] ss:$8 sps:$4 sm:$0xff]  }
 0x18e   : > { %3471 = vmatpush1.bf16.msra.mxu0 %v4539_v62  ;;  %3260 = vmatprep.subr.bf16.mxu1 %v4544_v63  ;;  %v4611_v62 = vld [vmem:[%s5471_s6 + $0x790] ss:$8 sps:$4 sm:$0xff]   ;;  %v4616_v63 = vld [vmem:[%s5471_s6 + $0x3a4] ss:$8 sps:$4 sm:$0xff]  }
 0x18f   : > { %3472 = vmatprep.subr.bf16.mxu0 %v4547_v0  ;;  %v4619_v0 = vld [vmem:[%s5471_s6 + $0x7a4] ss:$8 sps:$4 sm:$0xff]  }
 0x191   : > { %3261 = vmatpush1.bf16.msra.mxu1 %v4542_v1  ;;  %v4614_v1 = vld [vmem:[%s5471_s6 + $0x3a0] ss:$8 sps:$4 sm:$0xff]  }
 0x192   : > { %3473 = vmatpush1.bf16.msra.mxu0 %v4545_v2  ;;  %3262 = vmatprep.subr.bf16.mxu1 %v4550_v3  ;;  %v4617_v2 = vld [vmem:[%s5471_s6 + $0x7a0] ss:$8 sps:$4 sm:$0xff]   ;;  %v4622_v3 = vld [vmem:[%s5471_s6 + $0x3b4] ss:$8 sps:$4 sm:$0xff]  }
 0x193   : > { %3474 = vmatprep.subr.bf16.mxu0 %v4553_v4  ;;  %v4625_v4 = vld [vmem:[%s5471_s6 + $0x7b4] ss:$8 sps:$4 sm:$0xff]  }
 0x195   : > { %3263 = vmatpush1.bf16.msra.mxu1 %v4548_v5  ;;  %v4620_v5 = vld [vmem:[%s5471_s6 + $0x3b0] ss:$8 sps:$4 sm:$0xff]  }
 0x196   : > { %3475 = vmatpush1.bf16.msra.mxu0 %v4551_v6  ;;  %3285 = vmatprep.subr.bf16.mxu1 %v4556_v7  ;;  %v4623_v6 = vld [vmem:[%s5471_s6 + $0x7b0] ss:$8 sps:$4 sm:$0xff]   ;;  %v4628_v7 = vld [vmem:[%s5471_s6 + $0x3c4] ss:$8 sps:$4 sm:$0xff]  }
 0x197   : > { %3497 = vmatprep.subr.bf16.mxu0 %v4559_v8  ;;  %v4631_v8 = vld [vmem:[%s5471_s6 + $0x7c4] ss:$8 sps:$4 sm:$0xff]  }
 0x198   : > { %3265 = vmatmul.mubr.bf16.vlgmr.msra.gmra.mrb[0].mxu1 %v3820_v10  ;;  %v4629_v10 = vld [vmem:[%s5471_s6 + $0x7c0] ss:$8 sps:$4 sm:$0xff]  }
 0x199   : > { %3477 = vmatmul.mubr.bf16.vlgmr.msra.gmra.mrb[0].mxu0 %v3828_v12  ;;  %3286 = vmatpush1.bf16.msra.mxu1 %v4554_v19  ;;  %v4634_v12 = vld [vmem:[%s5471_s6 + $0x3d4] ss:$8 sps:$4 sm:$0xff]   ;;  %v4640_v19 = vld [vmem:[%s5471_s6 + $0x3e4] ss:$8 sps:$4 sm:$0xff]  }
 0x19a   : > { %3498 = vmatpush1.bf16.msra.mxu0 %v4557_v20  ;;  %3287 = vmatprep.subr.bf16.mxu1 %v4562_v21  ;;  %v4643_v20 = vld [vmem:[%s5471_s6 + $0x7e4] ss:$8 sps:$4 sm:$0xff]   ;;  %v4638_v21 = vld [vmem:[%s5471_s6 + $0x3e0] ss:$8 sps:$4 sm:$0xff]  }
 0x19b   : > { %3499 = vmatprep.subr.bf16.mxu0 %v4565_v22  ;;  %3274 = vmatprep.mubr.bf16.mxu1 %v3837_v11  ;;  %v4641_v22 = vld [vmem:[%s5471_s6 + $0x7e0] ss:$8 sps:$4 sm:$0xff]   ;;  %v4646_v11 = vld [vmem:[%s5471_s6 + $0x3f4] ss:$8 sps:$4 sm:$0xff]  }
 0x19c   : > { %3486 = vmatprep.mubr.bf16.mxu0 %v3845_v14  ;;  %v4649_v14 = vld [vmem:[%s5471_s6 + $0x7f4] ss:$8 sps:$4 sm:$0xff]  }
 0x19d   : > { %3288 = vmatpush1.bf16.msra.mxu1 %v4560_v15  ;;  %v4644_v15 = vld [vmem:[%s5471_s6 + $0x3f0] ss:$8 sps:$4 sm:$0xff]  }
 0x19e   : > { %3500 = vmatpush1.bf16.msra.mxu0 %v4563_v16  ;;  %3289 = vmatprep.subr.bf16.mxu1 %v4568_v23  ;;  %v4647_v16 = vld [vmem:[%s5471_s6 + $0x7f0] ss:$8 sps:$4 sm:$0xff]  }
 0x19f   : > { %3501 = vmatprep.subr.bf16.mxu0 %v4571_v24  ;;  %v1417_v23 = vld [vmem:[%s5469_s4 + $0x98] sm:$0xff] }
 0x1a0   : > { %3275 = vmatmul.mubr.bf16.gmra.mrb[4].mxu1 %v3836_v26  ;;  %v1425_v24 = vld [vmem:[%s5469_s4 + $0xd8] sm:$0xff] }
 0x1a1   : > { %3487 = vmatmul.mubr.bf16.gmra.mrb[4].mxu0 %v3844_v27  ;;  %3290 = vmatpush1.bf16.msra.mxu1 %v4566_v31  ;;  %v1421_v26 = vld [vmem:[%s5469_s4 + $0xb8] sm:$0xff]  ;;  %v3822_v31 = vcombine.low %v5735_v25, %v5738_v28  ;;  %v1391_v28 = vld [vmem:[#allocation2 + $0x8] sm:$0xff] }
 0x1a2   : > { %3502 = vmatpush1.bf16.msra.mxu0 %v4569_v32  ;;  %3291 = vmatprep.subr.bf16.mxu1 %v4574_v33  ;;  %v1429_v27 = vld [vmem:[%s5469_s4 + $0xf8] sm:$0xff]  ;;  %v3830_v32 = vcombine.low %v5741_v29, %v5744_v30  ;;  %v3839_v33 = vcombine.high %v1417_v23, %v1425_v24 }
 0x1a3   : > { %3503 = vmatprep.subr.bf16.mxu0 %v4577_v34  ;;  %3317 = vmatprep.mubr.bf16.mxu1 %v3823_v35  ;;  %v3847_v34 = vcombine.high %v1421_v26, %v1429_v27  ;;  %v3838_v35 = vcombine.low %v1417_v23, %v1425_v24 }
 0x1a4   : > { %3529 = vmatprep.mubr.bf16.mxu0 %v3831_v36  ;;  %v3846_v36 = vcombine.low %v1421_v26, %v1429_v27 }
 0x1a5   : > { %3292 = vmatpush1.bf16.msra.mxu1 %v4572_v37 }
 0x1a6   : > { %3504 = vmatpush1.bf16.msra.mxu0 %v4575_v38  ;;  %3293 = vmatprep.subr.bf16.mxu1 %v4580_v39  ;;  %v1390_v38 = vld [vmem:[#allocation2] sm:$0xff] }
 0x1a7   : > { %3505 = vmatprep.subr.bf16.mxu0 %v4583_v40 }
 0x1a9   : > { %3294 = vmatpush1.bf16.msra.mxu1 %v4578_v41 }
 0x1aa   : > { %3506 = vmatpush1.bf16.msra.mxu0 %v4581_v42  ;;  %3295 = vmatprep.subr.bf16.mxu1 %v4586_v43  ;;  %v1392_v42 = vld [vmem:[#allocation2 + $0x10] sm:$0xff] }
 0x1ab   : > { %3507 = vmatprep.subr.bf16.mxu0 %v4589_v44 }
 0x1ad   : > { %3296 = vmatpush1.bf16.msra.mxu1 %v4584_v45 }
 0x1ae   : > { %3508 = vmatpush1.bf16.msra.mxu0 %v4587_v46  ;;  %3297 = vmatprep.subr.bf16.mxu1 %v4592_v47  ;;  %v1393_v47 = vld [vmem:[#allocation2 + $0x18] sm:$0xff] }
 0x1af   : > { %3509 = vmatprep.subr.bf16.mxu0 %v4595_v48 }
 0x1b1   : > { %3298 = vmatpush1.bf16.msra.mxu1 %v4590_v49 }
 0x1b2   : > { %3510 = vmatpush1.bf16.msra.mxu0 %v4593_v50  ;;  %3299 = vmatprep.subr.bf16.mxu1 %v4598_v51 }
 0x1b3   : > { %3511 = vmatprep.subr.bf16.mxu0 %v4601_v52 }
 0x1b5   : > { %3300 = vmatpush1.bf16.msra.mxu1 %v4596_v53 }
 0x1b6   : > { %3512 = vmatpush1.bf16.msra.mxu0 %v4599_v54  ;;  %3301 = vmatprep.subr.bf16.mxu1 %v4604_v55  ;;  %v1394_v54 = vld [vmem:[#allocation2 + $0x20] sm:$0xff] }
 0x1b7   : > { %3513 = vmatprep.subr.bf16.mxu0 %v4607_v56 }
 0x1b9   : > { %3302 = vmatpush1.bf16.msra.mxu1 %v4602_v57 }
 0x1ba   : > { %3514 = vmatpush1.bf16.msra.mxu0 %v4605_v58  ;;  %3303 = vmatprep.subr.bf16.mxu1 %v4610_v59  ;;  %v1395_v58 = vld [vmem:[#allocation2 + $0x28] sm:$0xff] }
 0x1bb   : > { %3515 = vmatprep.subr.bf16.mxu0 %v4613_v60 }
 0x1bd   : > { %3304 = vmatpush1.bf16.msra.mxu1 %v4608_v61 }
 0x1be   : > { %3516 = vmatpush1.bf16.msra.mxu0 %v4611_v62  ;;  %3305 = vmatprep.subr.bf16.mxu1 %v4616_v63  ;;  %v1396_v62 = vld [vmem:[#allocation2 + $0x30] sm:$0xff] }
 0x1bf   : > { %3517 = vmatprep.subr.bf16.mxu0 %v4619_v0 }
 0x1c1   : > { %3306 = vmatpush1.bf16.msra.mxu1 %v4614_v1 }
 0x1c2   : > { %3518 = vmatpush1.bf16.msra.mxu0 %v4617_v2  ;;  %3307 = vmatprep.subr.bf16.mxu1 %v4622_v3  ;;  %v1397_v3 = vld [vmem:[#allocation2 + $0x38] sm:$0xff] }
 0x1c3   : > { %3519 = vmatprep.subr.bf16.mxu0 %v4625_v4 }
 0x1c5   : > { %3308 = vmatpush1.bf16.msra.mxu1 %v4620_v5 }
 0x1c6   : > { %3520 = vmatpush1.bf16.msra.mxu0 %v4623_v6  ;;  %3309 = vmatprep.subr.bf16.mxu1 %v4628_v7 }
 0x1c7   : > { %3521 = vmatprep.subr.bf16.mxu0 %v4631_v8 }
 0x1c9   : > { %3310 = vmatpush1.bf16.msra.mxu1 %v4626_v9  ;;  %v3580_v9 = vlaneseq (!%p4104_p5) }
 0x1ca   : > { %3522 = vmatpush1.bf16.msra.mxu0 %v4629_v10  ;;  %3311 = vmatprep.subr.bf16.mxu1 %v4634_v12  ;;  %v3578_v12 = vld [vmem:[%s1374_s29] sm:$0x3] (!%p4104_p5) }
 0x1cb   : > { %3523 = vmatprep.subr.bf16.mxu0 %v4637_v13  ;;  %v3581_v10 = vshrl.u32 (!%p4104_p5), %v3580_v9, 7 }
 0x1cd   : > { %3312 = vmatpush1.bf16.msra.mxu1 %v4632_v17 }
 0x1ce   : > { %3524 = vmatpush1.bf16.msra.mxu0 %v4635_v18  ;;  %3313 = vmatprep.subr.bf16.mxu1 %v4640_v19  ;;  %v3582_v18 = vsub.s32 (!%p4104_p5), 0, %v3581_v10  ;;  %v3586_v19 = vsub.s32 (!%p4104_p5), 1, %v3581_v10 }
 0x1cf   : > { %3525 = vmatprep.subr.bf16.mxu0 %v4643_v20 }
 0x1d1   : > { %3314 = vmatpush1.bf16.msra.mxu1 %v4638_v21 }
 0x1d2   : > { %3526 = vmatpush1.bf16.msra.mxu0 %v4641_v22  ;;  %3315 = vmatprep.subr.bf16.mxu1 %v4646_v11  ;;  %v3583_v11 = vrot.slane (!%p4104_p5), %v3578_v12, %v3582_v18 }
 0x1d3   : > { %3527 = vmatprep.subr.bf16.mxu0 %v4649_v14  ;;  %v3587_v14 = vrot.slane (!%p4104_p5), %v3578_v12, %v3586_v19 }
 0x1d5   : > { %3316 = vmatpush1.bf16.msra.mxu1 %v4644_v15 }
 0x1d6   : > { %3528 = vmatpush1.bf16.msra.mxu0 %v4647_v16 }
 0x1d8   : > { %3318 = vmatmul.mubr.bf16.vlgmr.msra.gmra.mrb[0].mxu1 %v3822_v31 }
 0x1d9   : > { %3530 = vmatmul.mubr.bf16.vlgmr.msra.gmra.mrb[0].mxu0 %v3830_v32  ;;  %3327 = vmatprep.mubr.bf16.mxu1 %v3839_v33 }
 0x1da   : > { %3539 = vmatprep.mubr.bf16.mxu0 %v3847_v34 }
 0x1e0   : > { %3328 = vmatmul.mubr.bf16.gmra.mrb[4].mxu1 %v3838_v35 }
 0x1e1   : > { %3540 = vmatmul.mubr.bf16.gmra.mrb[4].mxu0 %v3846_v36 }
 0x2ab   : > { %v3319_v37 = vpop.f32.mrb[0].mxu1 }
 0x2ac   : > { %v3531_v39 = vpop.f32.mrb[0].mxu0  ;;  %v3321_v25 = vpop.f32.mrb[1].mxu1 }
 0x2ad   : > { %v4121_v40 = vadd.f32 %v3531_v39, %v3319_v37  ;;  %v3533_v41 = vpop.f32.mrb[1].mxu0  ;;  %v3323_v30 = vpop.f32.mrb[2].mxu1 }
 0x2ae   : > { %v4122_v29 = vadd.f32 %v3533_v41, %v3321_v25  ;;  %v3535_v43 = vpop.f32.mrb[2].mxu0  ;;  %v3325_v46 = vpop.f32.mrb[3].mxu1 }
 0x2af   : > { %v3550_v44 = vadd.f32 %v4121_v40, %v1390_v38  ;;  %v4123_v45 = vadd.f32 %v3535_v43, %v3323_v30  ;;  %v3537_v48 = vpop.f32.mrb[3].mxu0 }
 0x2b0   : > { %v3551_v49 = vadd.f32 %v4122_v29, %v1391_v28  ;;  %v4124_v50 = vadd.f32 %v3537_v48, %v3325_v46 }
 0x2b1   : > { %3558 = vst [vmem:[#allocation2] sm:$0xff] %v3550_v44  ;;  %v3552_v51 = vadd.f32 %v4123_v45, %v1392_v42 }
 0x2b2   : > { %3559 = vst [vmem:[#allocation2 + $0x8] sm:$0xff] %v3551_v49  ;;  %v3553_v52 = vadd.f32 %v4124_v50, %v1393_v47 }
 0x2b3   : > { %3560 = vst [vmem:[#allocation2 + $0x10] sm:$0xff] %v3552_v51  ;;  %v3329_v53 = vpop.f32.mrb[4].mxu1 }
 0x2b4   : > { %3561 = vst [vmem:[#allocation2 + $0x18] sm:$0xff] %v3553_v52  ;;  %v3541_v55 = vpop.f32.mrb[4].mxu0  ;;  %v3331_v57 = vpop.f32.mrb[5].mxu1 }
 0x2b5   : > { %v4125_v56 = vadd.f32 %v3541_v55, %v3329_v53  ;;  %v3543_v59 = vpop.f32.mrb[5].mxu0  ;;  %v3333_v61 = vpop.f32.mrb[6].mxu1 }
 0x2b6   : > { %v4126_v60 = vadd.f32 %v3543_v59, %v3331_v57  ;;  %v3545_v63 = vpop.f32.mrb[6].mxu0  ;;  %v3335_v2 = vpop.f32.mrb[7].mxu1  ;;  %3569 = sbr.rel (%p4104_p5) target bundleno = 715 (0x2cb), region = 101 }
 0x2b7   : > { %v3554_v0 = vadd.f32 %v4125_v56, %v1394_v54  ;;  %v4127_v1 = vadd.f32 %v3545_v63, %v3333_v61  ;;  %v3547_v4 = vpop.f32.mrb[7].mxu0 }
 0x2b8   : > { %v3555_v5 = vadd.f32 %v4126_v60, %v1395_v58  ;;  %v4128_v6 = vadd.f32 %v3547_v4, %v3335_v2  ;;  %v3570_v13 = vld [vmem:[#allocation2] sm:$0xff] (!%p4104_p5) }
 0x2b9   : > { %3562 = vst [vmem:[#allocation2 + $0x20] sm:$0xff] %v3554_v0  ;;  %v3556_v7 = vadd.f32 %v4127_v1, %v1396_v62  ;;  %v3571_v17 = vld [vmem:[#allocation2 + $0x8] sm:$0xff] (!%p4104_p5)  ;;  %v3590_v24 = vadd.f32 (!%p4104_p5), %v3583_v11, %v3570_v13 }
 0x2ba   : > { %3563 = vst [vmem:[#allocation2 + $0x28] sm:$0xff] %v3555_v5  ;;  %v3557_v8 = vadd.f32 %v4128_v6, %v1397_v3  ;;  %v3572_v20 = vld [vmem:[#allocation2 + $0x10] sm:$0xff] (!%p4104_p5)  ;;  %v3591_v26 = vadd.f32 (!%p4104_p5), %v3587_v14, %v3571_v17 }
 0x2bb   : > { %3564 = vst [vmem:[#allocation2 + $0x30] sm:$0xff] %v3556_v7  ;;  %v3573_v21 = vld [vmem:[#allocation2 + $0x18] sm:$0xff] (!%p4104_p5)  ;;  %v3592_v27 = vadd.f32 (!%p4104_p5), %v3583_v11, %v3572_v20  ;;  %v3598_v36 = vmax.f32 (!%p4104_p5), %v3590_v24, 0.0 }
 0x2bc   : > { %3565 = vst [vmem:[#allocation2 + $0x38] sm:$0xff] %v3557_v8  ;;  %v3593_v31 = vadd.f32 (!%p4104_p5), %v3587_v14, %v3573_v21  ;;  %v3599_v37 = vmax.f32 (!%p4104_p5), %v3591_v26, 0.0 }
 0x2bd   : > { %v3600_v38 = vmax.f32 %v3592_v27, 0.0 }
 0x2be   : > { %v3601_v39 = vmax.f32 %v3593_v31, 0.0  ;;  %v4116_v29 = vpack.c.bf16 %v3599_v37, %v3598_v36 }
 0x2c0   : > { %v3574_v22 = vld [vmem:[#allocation2 + $0x20] sm:$0xff]  ;;  %v4117_v30 = vpack.c.bf16 %v3601_v39, %v3600_v38  ;;  %3630 = vst [vmem:[%s5473_s1] sm:$0xff] %v4116_v29 }
 0x2c1   : > { %v3575_v15 = vld [vmem:[#allocation2 + $0x28] sm:$0xff]  ;;  %v3594_v32 = vadd.f32 %v3583_v11, %v3574_v22 }
 0x2c2   : > { %v3576_v16 = vld [vmem:[#allocation2 + $0x30] sm:$0xff]  ;;  %v3595_v33 = vadd.f32 %v3587_v14, %v3575_v15  ;;  %3631 = vst [vmem:[%s5473_s1 + $0x8] sm:$0xff] %v4117_v30 }
 0x2c3   : > { %v3577_v23 = vld [vmem:[#allocation2 + $0x38] sm:$0xff]  ;;  %v3596_v34 = vadd.f32 %v3583_v11, %v3576_v16  ;;  %v3602_v40 = vmax.f32 %v3594_v32, 0.0 }
 0x2c4   : > { %v3597_v35 = vadd.f32 %v3587_v14, %v3577_v23  ;;  %v3603_v25 = vmax.f32 %v3595_v33, 0.0 }
 0x2c5   : > { %v3604_v28 = vmax.f32 %v3596_v34, 0.0 }
 0x2c6   : > { %v3605_v41 = vmax.f32 %v3597_v35, 0.0  ;;  %v4118_v42 = vpack.c.bf16 %v3603_v25, %v3602_v40 }
 0x2c8   : > { %v4119_v43 = vpack.c.bf16 %v3605_v41, %v3604_v28  ;;  %3632 = vst [vmem:[%s5473_s1 + $0x10] sm:$0xff] %v4118_v42 }
 0x2ca   : > { %3633 = vst [vmem:[%s5473_s1 + $0x18] sm:$0xff] %v4119_v43 }
 0x2cb PF: > { %3640 = sbr.rel (!%p4853_p12) target bundleno = 723 (0x2d3), region = 105  ;;  %s4120_s16 = sshll.u32 (%p4853_p12), %s4724_s19, 3  ;;  %v3680_v44 = vld [vmem:[%s5473_s1] sm:$0xff] (%p4853_p12)  ;;  %v3682_v45 = vld [vmem:[%s5473_s1 + $0x8] sm:$0xff] (%p4853_p12) }
 0x2cc   : > { %s3646_s5 = scalar_lea.vmem (%p4853_p12), %s5868_s3, %s4120_s16 }
 0x2cd   : > { %3681 = vst [vmem:[%s3646_s5] sm:$0xff] (%p4853_p12), %v3680_v44  ;;  %3683 = vst [vmem:[%s3646_s5 + $0x10] sm:$0xff] (%p4853_p12), %v3682_v45 }
 0x2cf   : > { %v3684_v46 = vld [vmem:[%s5473_s1 + $0x10] sm:$0xff] (%p4853_p12) }
 0x2d0   : > { %3685 = vst [vmem:[%s3646_s5 + $0x20] sm:$0xff] (%p4853_p12), %v3684_v46 }
 0x2d1   : > { %v3686_v47 = vld [vmem:[%s5473_s1 + $0x18] sm:$0xff] (%p4853_p12) }
 0x2d2   : > { %3687 = vst [vmem:[%s3646_s5 + $0x30] sm:$0xff] %v3686_v47 }
 0x2d3 PF: > { %s13_s22 = sadd.s32 1, %s4736_s22   ;;  %s5878_s10 = sld [smem:[#allocation6_spill]] }
 0x2d4   : > { %p10_p6 = scmp.ge.s32.totalorder %s13_s22, 6   ;;  %s5879_s12 = smov %s4700_s13 }
 0x2d5   : > { %s5880_s13 = smov %s4851_s9  ;;  %s5881_s14 = smov %s4708_s15 }
 0x2d6   : > { %s5882_s15 = smov %s4848_s8  ;;  %s5883_s16 = smov %s4716_s17 }
 0x2d7   : > { %s5884_s17 = smov %s4834_s30  ;;  %s5885_s18 = smov %s4728_s20 }
 0x2d8   : > { %s5886_s19 = smov %s4732_s21  ;;  %s5887_s20 = smov %s5890_s24 }
 0x2d9   : > { %s5888_s21 = smov %s5878_s10  ;;  %12 = sbr.rel (!%p10_p6) target bundleno = 9 (0x9), region = 185 }

// kernel: encoder_pallas.9
= control target key start
LH: loop header
LB: loop body
LE: loop exit
PB: predicated region body
PF: predicated region fallthrough
CT: control target
= control target key end

     0   :  { %s5466_s0 = inlined_call_operand.vmem [shape: bf16[16,8192], index: 0, kind: input, shape index: {}]   ;;  %s5467_s1 = inlined_call_operand.vmem [shape: bf16[8192,1024], index: 1, kind: input, shape index: {}]   ;;  %s5468_s2 = inlined_call_operand.vmem [shape: f32[1,1024], index: 2, kind: input, shape index: {}]   ;;  %s5469_s3 = inlined_call_operand.vmem [shape: f32[16,1024], index: 3, kind: output, shape index: {}]  }
   0x1   :  { %5471 = sst [smem:[#allocation7_spill]] %s5466_s0 }
   0x2   :  { %5472 = sst [smem:[#allocation8_spill]] %s5467_s1 }
   0x3   :  { %s4426_s12 = smov 0   ;;  %s4428_s13 = smov 0  }
   0x4   :  { %s4430_s14 = smov 0   ;;  %s4432_s15 = smov 0  }
   0x5   :  { %s4434_s16 = smov 0   ;;  %s4436_s17 = smov 0  }
   0x6   :  { %s4438_s18 = smov 0   ;;  %s4440_s19 = smov 0  }
   0x7   :  { %s4442_s20 = smov 0   ;;  %s4444_s21 = smov 0  }
   0x8   :  { %s4446_s22 = smov 0  }
   0x9 LB: > { %s3517_s23 = sadd.s32 4294967295, %s4403_s22   ;;  %s25_s24 = sadd.s32 1, %s4395_s20  ;;  %s4403_s22 = sphi %s4446_s22, %s13_s22   ;;  %s4399_s21 = sphi %s4444_s21, %s5489_s21   ;;  %s4395_s20 = sphi %s4442_s20, %s5488_s20   ;;  %s4391_s19 = sphi %s4440_s19, %s5487_s19   ;;  %s4387_s18 = sphi %s4438_s18, %s5486_s18   ;;  %s4383_s17 = sphi %s4436_s17, %s5485_s17   ;;  %s4379_s16 = sphi %s4434_s16, %s5484_s16   ;;  %s4375_s15 = sphi %s4432_s15, %s5483_s15   ;;  %s4371_s14 = sphi %s4430_s14, %s5482_s14   ;;  %s4367_s13 = sphi %s4428_s13, %s5481_s13   ;;  %s4363_s12 = sphi %s4426_s12, %s5480_s12  }
   0xa   : > { %p26_p0 = scmp.ge.s32.totalorder %s25_s24, 4  ;;  %s28_s25 = sadd.s32 1, %s4399_s21 }
   0xb   : > { %s41_s26 = sadd.s32 1, %s4383_s17  ;;  %p48_p1 = scmp.ne.s32.totalorder %s4383_s17, %s4379_s16 }
   0xc   : > { %s5491_s24 = smov (%p26_p0, %s25_s24), 0  ;;  %s5493_s25 = smov (!%p26_p0, %s28_s25), %s4399_s21 }
   0xd   : > { %s37_s27 = ssub.s32 %s4395_s20, %s5491_s24  ;;  %p49_p2 = scmp.eq.s32.totalorder %s4403_s22, 0 }
   0xe   : > { %p30_p3 = scmp.ge.s32.totalorder %s5493_s25, 4  ;;  %p39_p4 = scmp.eq.s32.totalorder %s37_s27, 0 }
   0xf   : > { %p4493_p5 = por %p49_p2, %p48_p1  ;;  %s69_s29 = sadd.s32 1, %s4375_s15 }
  0x10   : > { %s5495_s25 = smov (%p30_p3, %s5493_s25), 0  ;;  %p76_p6 = scmp.ne.s32.totalorder %s4375_s15, %s4371_s14 }
  0x11   : > { %5474 = sst [smem:[#allocation6_spill]] %s5495_s25  ;;  %s65_s4 = ssub.s32 %s4399_s21, %s5495_s25 }
  0x12   : > { %s4501_s30 = scalar_select %p39_p4, %s4383_s17, %s41_s26  }
  0x13   : > { %s66_s5 = sor.u32 %s65_s4, %s37_s27  ;;  %p121_p7 = scmp.eq.s32.totalorder %s65_s4, 0 }
  0x14   : > { %p67_p8 = scmp.eq.s32.totalorder %s66_s5, 0  ;;  %p4507_p9 = por %p76_p6, %p49_p2 }
  0x15   : > { %s123_s7 = sadd.s32 1, %s4367_s13  ;;  %p133_p10 = scmp.ne.s32.totalorder %s4367_s13, %s4363_s12 }
  0x16   : > { %s4515_s8 = scalar_select %p67_p8, %s4375_s15, %s69_s29  }
  0x17   : > { %s4518_s9 = scalar_select %p121_p7, %s4367_s13, %s123_s7  }
  0x18   : > { %p134_p11 = scmp.eq.s32.totalorder %s3517_s23, 15  ;;  %p3520_p13 = scmp.ge.s32.totalorder %s4403_s22, 16 }
  0x1a   : > { %p4520_p12 = por %p134_p11, %p133_p10  ;;  %156 = sbr.rel (%p3520_p13) target bundleno = 317 (0x13d), region = 16 }
  0x21   : > { %159 = sbr.rel (!%p4493_p5) target bundleno = 51 (0x33), region = 20  ;;  %s161_s11 = sand.u32 (%p4493_p5), 1, %s4383_s17  }
  0x22   : > { %s3813_s26 = sshll.u32 (%p4493_p5), %s4395_s20, 6  ;;  %s3521_s27 = sshll.u32 (%p4493_p5), %s161_s11, 7 }
  0x23   : > { %s5477_s0 = sld [smem:[#allocation7_spill]] (%p4493_p5)  ;;  %s163_s23 = scalar_lea.vmem (%p4493_p5), [#allocation3], %s3521_s27 }
  0x29   : > { %s4532_s5 = scalar_lea.vmem %s5477_s0, %s3813_s26 }
  0x2a   : > { %v182_v0 = vld [vmem:[%s4532_s5] sm:$0xff]  ;;  %v184_v1 = vld [vmem:[%s4532_s5 + $0x8] sm:$0xff]  ;;  %v186_v2 = vld [vmem:[%s4532_s5 + $0x10] sm:$0xff] }
  0x2b   : > { %183 = vst [vmem:[%s163_s23] sm:$0xff] %v182_v0  ;;  %185 = vst [vmem:[%s163_s23 + $0x8] sm:$0xff] %v184_v1  ;;  %v188_v3 = vld [vmem:[%s4532_s5 + $0x18] sm:$0xff]  ;;  %v190_v4 = vld [vmem:[%s4532_s5 + $0x20] sm:$0xff] }
  0x2c   : > { %187 = vst [vmem:[%s163_s23 + $0x10] sm:$0xff] %v186_v2  ;;  %v192_v5 = vld [vmem:[%s4532_s5 + $0x28] sm:$0xff]  ;;  %189 = vst [vmem:[%s163_s23 + $0x18] sm:$0xff] %v188_v3  ;;  %v194_v6 = vld [vmem:[%s4532_s5 + $0x30] sm:$0xff] }
  0x2d   : > { %191 = vst [vmem:[%s163_s23 + $0x20] sm:$0xff] %v190_v4  ;;  %193 = vst [vmem:[%s163_s23 + $0x28] sm:$0xff] %v192_v5  ;;  %v196_v7 = vld [vmem:[%s4532_s5 + $0x38] sm:$0xff]  ;;  %v198_v8 = vld [vmem:[%s4532_s5 + $0x100] sm:$0xff] }
  0x2e   : > { %195 = vst [vmem:[%s163_s23 + $0x30] sm:$0xff] %v194_v6  ;;  %197 = vst [vmem:[%s163_s23 + $0x38] sm:$0xff] %v196_v7  ;;  %v200_v9 = vld [vmem:[%s4532_s5 + $0x108] sm:$0xff]  ;;  %v202_v10 = vld [vmem:[%s4532_s5 + $0x110] sm:$0xff] }
  0x2f   : > { %199 = vst [vmem:[%s163_s23 + $0x40] sm:$0xff] %v198_v8  ;;  %v204_v11 = vld [vmem:[%s4532_s5 + $0x118] sm:$0xff]  ;;  %201 = vst [vmem:[%s163_s23 + $0x48] sm:$0xff] %v200_v9  ;;  %v206_v12 = vld [vmem:[%s4532_s5 + $0x120] sm:$0xff] }
  0x30   : > { %203 = vst [vmem:[%s163_s23 + $0x50] sm:$0xff] %v202_v10  ;;  %205 = vst [vmem:[%s163_s23 + $0x58] sm:$0xff] %v204_v11  ;;  %v208_v13 = vld [vmem:[%s4532_s5 + $0x128] sm:$0xff]  ;;  %v210_v14 = vld [vmem:[%s4532_s5 + $0x130] sm:$0xff] }
  0x31   : > { %207 = vst [vmem:[%s163_s23 + $0x60] sm:$0xff] %v206_v12  ;;  %209 = vst [vmem:[%s163_s23 + $0x68] sm:$0xff] %v208_v13  ;;  %v212_v15 = vld [vmem:[%s4532_s5 + $0x138] sm:$0xff] }
  0x32   : > { %211 = vst [vmem:[%s163_s23 + $0x70] sm:$0xff] %v210_v14  ;;  %213 = vst [vmem:[%s163_s23 + $0x78] sm:$0xff] %v212_v15 }
  0x33 PF: > { %219 = sbr.rel (!%p4507_p9) target bundleno = 317 (0x13d), region = 43  ;;  %s221_s28 = sand.u32 (%p4507_p9), 1, %s4375_s15  }
  0x34   : > { %s3526_s7 = sshll.u32 (%p4507_p9), %s4399_s21, 1  ;;  %s3524_s11 = sshll.u32 (%p4507_p9), %s221_s28, 11 }
  0x35   : > { %s3814_s26 = sshll.u32 (%p4507_p9), %s4395_s20, 11  ;;  %s5478_s1 = sld [smem:[#allocation8_spill]] (%p4507_p9) }
  0x36   : > { %s227_s27 = sadd.s32 (%p4507_p9), %s3814_s26, %s3526_s7  ;;  %s4563_s6 = scalar_lea.vmem (%p4507_p9), [#allocation4], %s3524_s11 }
  0x37   : > { %s3528_s29 = sshll.u32 (%p4507_p9), %s227_s27, 2 }
  0x3b   : > { %s4558_s25 = scalar_lea.vmem %s5478_s1, %s3528_s29 }
  0x3c   : > { %v767_v16 = vld [vmem:[%s4558_s25] sm:$0xff] }
  0x3d   : > { %v769_v17 = vld [vmem:[%s4558_s25 + $0x20] sm:$0xff]  ;;  %768 = vst [vmem:[%s4563_s6] sm:$0xff] %v767_v16 }
  0x3e   : > { %v771_v18 = vld [vmem:[%s4558_s25 + $0x40] sm:$0xff]  ;;  %770 = vst [vmem:[%s4563_s6 + $0x8] sm:$0xff] %v769_v17 }
  0x3f   : > { %772 = vst [vmem:[%s4563_s6 + $0x10] sm:$0xff] %v771_v18  ;;  %v773_v19 = vld [vmem:[%s4558_s25 + $0x60] sm:$0xff] }
  0x40   : > { %v775_v20 = vld [vmem:[%s4558_s25 + $0x80] sm:$0xff]  ;;  %774 = vst [vmem:[%s4563_s6 + $0x18] sm:$0xff] %v773_v19 }
  0x41   : > { %v777_v21 = vld [vmem:[%s4558_s25 + $0xa0] sm:$0xff]  ;;  %776 = vst [vmem:[%s4563_s6 + $0x20] sm:$0xff] %v775_v20 }
  0x42   : > { %778 = vst [vmem:[%s4563_s6 + $0x28] sm:$0xff] %v777_v21  ;;  %v779_v22 = vld [vmem:[%s4558_s25 + $0xc0] sm:$0xff] }
  0x43   : > { %v781_v23 = vld [vmem:[%s4558_s25 + $0xe0] sm:$0xff]  ;;  %780 = vst [vmem:[%s4563_s6 + $0x30] sm:$0xff] %v779_v22 }
  0x44   : > { %v783_v24 = vld [vmem:[%s4558_s25 + $0x100] sm:$0xff]  ;;  %782 = vst [vmem:[%s4563_s6 + $0x38] sm:$0xff] %v781_v23 }
  0x45   : > { %784 = vst [vmem:[%s4563_s6 + $0x40] sm:$0xff] %v783_v24  ;;  %v785_v25 = vld [vmem:[%s4558_s25 + $0x120] sm:$0xff] }
  0x46   : > { %v787_v26 = vld [vmem:[%s4558_s25 + $0x140] sm:$0xff]  ;;  %786 = vst [vmem:[%s4563_s6 + $0x48] sm:$0xff] %v785_v25 }
  0x47   : > { %v789_v27 = vld [vmem:[%s4558_s25 + $0x160] sm:$0xff]  ;;  %788 = vst [vmem:[%s4563_s6 + $0x50] sm:$0xff] %v787_v26 }
  0x48   : > { %790 = vst [vmem:[%s4563_s6 + $0x58] sm:$0xff] %v789_v27  ;;  %v791_v28 = vld [vmem:[%s4558_s25 + $0x180] sm:$0xff] }
  0x49   : > { %v793_v29 = vld [vmem:[%s4558_s25 + $0x1a0] sm:$0xff]  ;;  %792 = vst [vmem:[%s4563_s6 + $0x60] sm:$0xff] %v791_v28 }
  0x4a   : > { %v795_v30 = vld [vmem:[%s4558_s25 + $0x1c0] sm:$0xff]  ;;  %794 = vst [vmem:[%s4563_s6 + $0x68] sm:$0xff] %v793_v29 }
  0x4b   : > { %796 = vst [vmem:[%s4563_s6 + $0x70] sm:$0xff] %v795_v30  ;;  %v797_v31 = vld [vmem:[%s4558_s25 + $0x1e0] sm:$0xff] }
  0x4c   : > { %v799_v32 = vld [vmem:[%s4558_s25 + $0x200] sm:$0xff]  ;;  %798 = vst [vmem:[%s4563_s6 + $0x78] sm:$0xff] %v797_v31 }
  0x4d   : > { %v801_v33 = vld [vmem:[%s4558_s25 + $0x220] sm:$0xff]  ;;  %800 = vst [vmem:[%s4563_s6 + $0x80] sm:$0xff] %v799_v32 }
  0x4e   : > { %802 = vst [vmem:[%s4563_s6 + $0x88] sm:$0xff] %v801_v33  ;;  %v803_v34 = vld [vmem:[%s4558_s25 + $0x240] sm:$0xff] }
  0x4f   : > { %v805_v35 = vld [vmem:[%s4558_s25 + $0x260] sm:$0xff]  ;;  %804 = vst [vmem:[%s4563_s6 + $0x90] sm:$0xff] %v803_v34 }
  0x50   : > { %v807_v36 = vld [vmem:[%s4558_s25 + $0x280] sm:$0xff]  ;;  %806 = vst [vmem:[%s4563_s6 + $0x98] sm:$0xff] %v805_v35 }
  0x51   : > { %808 = vst [vmem:[%s4563_s6 + $0xa0] sm:$0xff] %v807_v36  ;;  %v809_v37 = vld [vmem:[%s4558_s25 + $0x2a0] sm:$0xff] }
  0x52   : > { %v811_v38 = vld [vmem:[%s4558_s25 + $0x2c0] sm:$0xff]  ;;  %810 = vst [vmem:[%s4563_s6 + $0xa8] sm:$0xff] %v809_v37 }
  0x53   : > { %v813_v39 = vld [vmem:[%s4558_s25 + $0x2e0] sm:$0xff]  ;;  %812 = vst [vmem:[%s4563_s6 + $0xb0] sm:$0xff] %v811_v38 }
  0x54   : > { %814 = vst [vmem:[%s4563_s6 + $0xb8] sm:$0xff] %v813_v39  ;;  %v815_v40 = vld [vmem:[%s4558_s25 + $0x300] sm:$0xff] }
  0x55   : > { %v817_v41 = vld [vmem:[%s4558_s25 + $0x320] sm:$0xff]  ;;  %816 = vst [vmem:[%s4563_s6 + $0xc0] sm:$0xff] %v815_v40 }
  0x56   : > { %v819_v42 = vld [vmem:[%s4558_s25 + $0x340] sm:$0xff]  ;;  %818 = vst [vmem:[%s4563_s6 + $0xc8] sm:$0xff] %v817_v41 }
  0x57   : > { %820 = vst [vmem:[%s4563_s6 + $0xd0] sm:$0xff] %v819_v42  ;;  %v821_v43 = vld [vmem:[%s4558_s25 + $0x360] sm:$0xff] }
  0x58   : > { %v823_v44 = vld [vmem:[%s4558_s25 + $0x380] sm:$0xff]  ;;  %822 = vst [vmem:[%s4563_s6 + $0xd8] sm:$0xff] %v821_v43 }
  0x59   : > { %v825_v45 = vld [vmem:[%s4558_s25 + $0x3a0] sm:$0xff]  ;;  %824 = vst [vmem:[%s4563_s6 + $0xe0] sm:$0xff] %v823_v44 }
  0x5a   : > { %826 = vst [vmem:[%s4563_s6 + $0xe8] sm:$0xff] %v825_v45  ;;  %v827_v46 = vld [vmem:[%s4558_s25 + $0x3c0] sm:$0xff] }
  0x5b   : > { %v829_v47 = vld [vmem:[%s4558_s25 + $0x3e0] sm:$0xff]  ;;  %828 = vst [vmem:[%s4563_s6 + $0xf0] sm:$0xff] %v827_v46 }
  0x5c   : > { %v831_v48 = vld [vmem:[%s4558_s25 + $0x400] sm:$0xff]  ;;  %830 = vst [vmem:[%s4563_s6 + $0xf8] sm:$0xff] %v829_v47 }
  0x5d   : > { %832 = vst [vmem:[%s4563_s6 + $0x100] sm:$0xff] %v831_v48  ;;  %v833_v49 = vld [vmem:[%s4558_s25 + $0x420] sm:$0xff] }
  0x5e   : > { %v835_v50 = vld [vmem:[%s4558_s25 + $0x440] sm:$0xff]  ;;  %834 = vst [vmem:[%s4563_s6 + $0x108] sm:$0xff] %v833_v49 }
  0x5f   : > { %v837_v51 = vld [vmem:[%s4558_s25 + $0x460] sm:$0xff]  ;;  %836 = vst [vmem:[%s4563_s6 + $0x110] sm:$0xff] %v835_v50 }
  0x60   : > { %838 = vst [vmem:[%s4563_s6 + $0x118] sm:$0xff] %v837_v51  ;;  %v839_v52 = vld [vmem:[%s4558_s25 + $0x480] sm:$0xff] }
  0x61   : > { %v841_v53 = vld [vmem:[%s4558_s25 + $0x4a0] sm:$0xff]  ;;  %840 = vst [vmem:[%s4563_s6 + $0x120] sm:$0xff] %v839_v52 }
  0x62   : > { %v843_v54 = vld [vmem:[%s4558_s25 + $0x4c0] sm:$0xff]  ;;  %842 = vst [vmem:[%s4563_s6 + $0x128] sm:$0xff] %v841_v53 }
  0x63   : > { %844 = vst [vmem:[%s4563_s6 + $0x130] sm:$0xff] %v843_v54  ;;  %v845_v55 = vld [vmem:[%s4558_s25 + $0x4e0] sm:$0xff] }
  0x64   : > { %v847_v56 = vld [vmem:[%s4558_s25 + $0x500] sm:$0xff]  ;;  %846 = vst [vmem:[%s4563_s6 + $0x138] sm:$0xff] %v845_v55 }
  0x65   : > { %v849_v57 = vld [vmem:[%s4558_s25 + $0x520] sm:$0xff]  ;;  %848 = vst [vmem:[%s4563_s6 + $0x140] sm:$0xff] %v847_v56 }
  0x66   : > { %850 = vst [vmem:[%s4563_s6 + $0x148] sm:$0xff] %v849_v57  ;;  %v851_v58 = vld [vmem:[%s4558_s25 + $0x540] sm:$0xff] }
  0x67   : > { %v853_v59 = vld [vmem:[%s4558_s25 + $0x560] sm:$0xff]  ;;  %852 = vst [vmem:[%s4563_s6 + $0x150] sm:$0xff] %v851_v58 }
  0x68   : > { %v855_v60 = vld [vmem:[%s4558_s25 + $0x580] sm:$0xff]  ;;  %854 = vst [vmem:[%s4563_s6 + $0x158] sm:$0xff] %v853_v59 }
  0x69   : > { %856 = vst [vmem:[%s4563_s6 + $0x160] sm:$0xff] %v855_v60  ;;  %v857_v61 = vld [vmem:[%s4558_s25 + $0x5a0] sm:$0xff] }
  0x6a   : > { %v859_v62 = vld [vmem:[%s4558_s25 + $0x5c0] sm:$0xff]  ;;  %858 = vst [vmem:[%s4563_s6 + $0x168] sm:$0xff] %v857_v61 }
  0x6b   : > { %v861_v63 = vld [vmem:[%s4558_s25 + $0x5e0] sm:$0xff]  ;;  %860 = vst [vmem:[%s4563_s6 + $0x170] sm:$0xff] %v859_v62 }
  0x6c   : > { %862 = vst [vmem:[%s4563_s6 + $0x178] sm:$0xff] %v861_v63  ;;  %v863_v0 = vld [vmem:[%s4558_s25 + $0x600] sm:$0xff] }
  0x6d   : > { %v865_v1 = vld [vmem:[%s4558_s25 + $0x620] sm:$0xff]  ;;  %864 = vst [vmem:[%s4563_s6 + $0x180] sm:$0xff] %v863_v0 }
  0x6e   : > { %v867_v2 = vld [vmem:[%s4558_s25 + $0x640] sm:$0xff]  ;;  %866 = vst [vmem:[%s4563_s6 + $0x188] sm:$0xff] %v865_v1 }
  0x6f   : > { %868 = vst [vmem:[%s4563_s6 + $0x190] sm:$0xff] %v867_v2  ;;  %v869_v3 = vld [vmem:[%s4558_s25 + $0x660] sm:$0xff] }
  0x70   : > { %v871_v4 = vld [vmem:[%s4558_s25 + $0x680] sm:$0xff]  ;;  %870 = vst [vmem:[%s4563_s6 + $0x198] sm:$0xff] %v869_v3 }
  0x71   : > { %v873_v5 = vld [vmem:[%s4558_s25 + $0x6a0] sm:$0xff]  ;;  %872 = vst [vmem:[%s4563_s6 + $0x1a0] sm:$0xff] %v871_v4 }
  0x72   : > { %874 = vst [vmem:[%s4563_s6 + $0x1a8] sm:$0xff] %v873_v5  ;;  %v875_v6 = vld [vmem:[%s4558_s25 + $0x6c0] sm:$0xff] }
  0x73   : > { %v877_v7 = vld [vmem:[%s4558_s25 + $0x6e0] sm:$0xff]  ;;  %876 = vst [vmem:[%s4563_s6 + $0x1b0] sm:$0xff] %v875_v6 }
  0x74   : > { %v879_v8 = vld [vmem:[%s4558_s25 + $0x700] sm:$0xff]  ;;  %878 = vst [vmem:[%s4563_s6 + $0x1b8] sm:$0xff] %v877_v7 }
  0x75   : > { %880 = vst [vmem:[%s4563_s6 + $0x1c0] sm:$0xff] %v879_v8  ;;  %v881_v9 = vld [vmem:[%s4558_s25 + $0x720] sm:$0xff] }
  0x76   : > { %v883_v10 = vld [vmem:[%s4558_s25 + $0x740] sm:$0xff]  ;;  %882 = vst [vmem:[%s4563_s6 + $0x1c8] sm:$0xff] %v881_v9 }
  0x77   : > { %v885_v11 = vld [vmem:[%s4558_s25 + $0x760] sm:$0xff]  ;;  %884 = vst [vmem:[%s4563_s6 + $0x1d0] sm:$0xff] %v883_v10 }
  0x78   : > { %886 = vst [vmem:[%s4563_s6 + $0x1d8] sm:$0xff] %v885_v11  ;;  %v887_v12 = vld [vmem:[%s4558_s25 + $0x780] sm:$0xff] }
  0x79   : > { %v889_v13 = vld [vmem:[%s4558_s25 + $0x7a0] sm:$0xff]  ;;  %888 = vst [vmem:[%s4563_s6 + $0x1e0] sm:$0xff] %v887_v12 }
  0x7a   : > { %v891_v14 = vld [vmem:[%s4558_s25 + $0x7c0] sm:$0xff]  ;;  %890 = vst [vmem:[%s4563_s6 + $0x1e8] sm:$0xff] %v889_v13 }
  0x7b   : > { %892 = vst [vmem:[%s4563_s6 + $0x1f0] sm:$0xff] %v891_v14  ;;  %v893_v15 = vld [vmem:[%s4558_s25 + $0x7e0] sm:$0xff] }
  0x7c   : > { %v895_v16 = vld [vmem:[%s4558_s25 + $0x800] sm:$0xff]  ;;  %894 = vst [vmem:[%s4563_s6 + $0x1f8] sm:$0xff] %v893_v15 }
  0x7d   : > { %v897_v17 = vld [vmem:[%s4558_s25 + $0x820] sm:$0xff]  ;;  %896 = vst [vmem:[%s4563_s6 + $0x200] sm:$0xff] %v895_v16 }
  0x7e   : > { %898 = vst [vmem:[%s4563_s6 + $0x208] sm:$0xff] %v897_v17  ;;  %v899_v18 = vld [vmem:[%s4558_s25 + $0x840] sm:$0xff] }
  0x7f   : > { %v901_v19 = vld [vmem:[%s4558_s25 + $0x860] sm:$0xff]  ;;  %900 = vst [vmem:[%s4563_s6 + $0x210] sm:$0xff] %v899_v18 }
  0x80   : > { %v903_v20 = vld [vmem:[%s4558_s25 + $0x880] sm:$0xff]  ;;  %902 = vst [vmem:[%s4563_s6 + $0x218] sm:$0xff] %v901_v19 }
  0x81   : > { %904 = vst [vmem:[%s4563_s6 + $0x220] sm:$0xff] %v903_v20  ;;  %v905_v21 = vld [vmem:[%s4558_s25 + $0x8a0] sm:$0xff] }
  0x82   : > { %v907_v22 = vld [vmem:[%s4558_s25 + $0x8c0] sm:$0xff]  ;;  %906 = vst [vmem:[%s4563_s6 + $0x228] sm:$0xff] %v905_v21 }
  0x83   : > { %v909_v23 = vld [vmem:[%s4558_s25 + $0x8e0] sm:$0xff]  ;;  %908 = vst [vmem:[%s4563_s6 + $0x230] sm:$0xff] %v907_v22 }
  0x84   : > { %910 = vst [vmem:[%s4563_s6 + $0x238] sm:$0xff] %v909_v23  ;;  %v911_v24 = vld [vmem:[%s4558_s25 + $0x900] sm:$0xff] }
  0x85   : > { %v913_v25 = vld [vmem:[%s4558_s25 + $0x920] sm:$0xff]  ;;  %912 = vst [vmem:[%s4563_s6 + $0x240] sm:$0xff] %v911_v24 }
  0x86   : > { %v915_v26 = vld [vmem:[%s4558_s25 + $0x940] sm:$0xff]  ;;  %914 = vst [vmem:[%s4563_s6 + $0x248] sm:$0xff] %v913_v25 }
  0x87   : > { %916 = vst [vmem:[%s4563_s6 + $0x250] sm:$0xff] %v915_v26  ;;  %v917_v27 = vld [vmem:[%s4558_s25 + $0x960] sm:$0xff] }
  0x88   : > { %v919_v28 = vld [vmem:[%s4558_s25 + $0x980] sm:$0xff]  ;;  %918 = vst [vmem:[%s4563_s6 + $0x258] sm:$0xff] %v917_v27 }
  0x89   : > { %v921_v29 = vld [vmem:[%s4558_s25 + $0x9a0] sm:$0xff]  ;;  %920 = vst [vmem:[%s4563_s6 + $0x260] sm:$0xff] %v919_v28 }
  0x8a   : > { %922 = vst [vmem:[%s4563_s6 + $0x268] sm:$0xff] %v921_v29  ;;  %v923_v30 = vld [vmem:[%s4558_s25 + $0x9c0] sm:$0xff] }
  0x8b   : > { %v925_v31 = vld [vmem:[%s4558_s25 + $0x9e0] sm:$0xff]  ;;  %924 = vst [vmem:[%s4563_s6 + $0x270] sm:$0xff] %v923_v30 }
  0x8c   : > { %v927_v32 = vld [vmem:[%s4558_s25 + $0xa00] sm:$0xff]  ;;  %926 = vst [vmem:[%s4563_s6 + $0x278] sm:$0xff] %v925_v31 }
  0x8d   : > { %928 = vst [vmem:[%s4563_s6 + $0x280] sm:$0xff] %v927_v32  ;;  %v929_v33 = vld [vmem:[%s4558_s25 + $0xa20] sm:$0xff] }
  0x8e   : > { %v931_v34 = vld [vmem:[%s4558_s25 + $0xa40] sm:$0xff]  ;;  %930 = vst [vmem:[%s4563_s6 + $0x288] sm:$0xff] %v929_v33 }
  0x8f   : > { %v933_v35 = vld [vmem:[%s4558_s25 + $0xa60] sm:$0xff]  ;;  %932 = vst [vmem:[%s4563_s6 + $0x290] sm:$0xff] %v931_v34 }
  0x90   : > { %934 = vst [vmem:[%s4563_s6 + $0x298] sm:$0xff] %v933_v35  ;;  %v935_v36 = vld [vmem:[%s4558_s25 + $0xa80] sm:$0xff] }
  0x91   : > { %v937_v37 = vld [vmem:[%s4558_s25 + $0xaa0] sm:$0xff]  ;;  %936 = vst [vmem:[%s4563_s6 + $0x2a0] sm:$0xff] %v935_v36 }
  0x92   : > { %v939_v38 = vld [vmem:[%s4558_s25 + $0xac0] sm:$0xff]  ;;  %938 = vst [vmem:[%s4563_s6 + $0x2a8] sm:$0xff] %v937_v37 }
  0x93   : > { %940 = vst [vmem:[%s4563_s6 + $0x2b0] sm:$0xff] %v939_v38  ;;  %v941_v39 = vld [vmem:[%s4558_s25 + $0xae0] sm:$0xff] }
  0x94   : > { %v943_v40 = vld [vmem:[%s4558_s25 + $0xb00] sm:$0xff]  ;;  %942 = vst [vmem:[%s4563_s6 + $0x2b8] sm:$0xff] %v941_v39 }
  0x95   : > { %v945_v41 = vld [vmem:[%s4558_s25 + $0xb20] sm:$0xff]  ;;  %944 = vst [vmem:[%s4563_s6 + $0x2c0] sm:$0xff] %v943_v40 }
  0x96   : > { %946 = vst [vmem:[%s4563_s6 + $0x2c8] sm:$0xff] %v945_v41  ;;  %v947_v42 = vld [vmem:[%s4558_s25 + $0xb40] sm:$0xff] }
  0x97   : > { %v949_v43 = vld [vmem:[%s4558_s25 + $0xb60] sm:$0xff]  ;;  %948 = vst [vmem:[%s4563_s6 + $0x2d0] sm:$0xff] %v947_v42 }
  0x98   : > { %v951_v44 = vld [vmem:[%s4558_s25 + $0xb80] sm:$0xff]  ;;  %950 = vst [vmem:[%s4563_s6 + $0x2d8] sm:$0xff] %v949_v43 }
  0x99   : > { %952 = vst [vmem:[%s4563_s6 + $0x2e0] sm:$0xff] %v951_v44  ;;  %v953_v45 = vld [vmem:[%s4558_s25 + $0xba0] sm:$0xff] }
  0x9a   : > { %v955_v46 = vld [vmem:[%s4558_s25 + $0xbc0] sm:$0xff]  ;;  %954 = vst [vmem:[%s4563_s6 + $0x2e8] sm:$0xff] %v953_v45 }
  0x9b   : > { %v957_v47 = vld [vmem:[%s4558_s25 + $0xbe0] sm:$0xff]  ;;  %956 = vst [vmem:[%s4563_s6 + $0x2f0] sm:$0xff] %v955_v46 }
  0x9c   : > { %958 = vst [vmem:[%s4563_s6 + $0x2f8] sm:$0xff] %v957_v47  ;;  %v959_v48 = vld [vmem:[%s4558_s25 + $0xc00] sm:$0xff] }
  0x9d   : > { %v961_v49 = vld [vmem:[%s4558_s25 + $0xc20] sm:$0xff]  ;;  %960 = vst [vmem:[%s4563_s6 + $0x300] sm:$0xff] %v959_v48 }
  0x9e   : > { %v963_v50 = vld [vmem:[%s4558_s25 + $0xc40] sm:$0xff]  ;;  %962 = vst [vmem:[%s4563_s6 + $0x308] sm:$0xff] %v961_v49 }
  0x9f   : > { %964 = vst [vmem:[%s4563_s6 + $0x310] sm:$0xff] %v963_v50  ;;  %v965_v51 = vld [vmem:[%s4558_s25 + $0xc60] sm:$0xff] }
  0xa0   : > { %v967_v52 = vld [vmem:[%s4558_s25 + $0xc80] sm:$0xff]  ;;  %966 = vst [vmem:[%s4563_s6 + $0x318] sm:$0xff] %v965_v51 }
  0xa1   : > { %v969_v53 = vld [vmem:[%s4558_s25 + $0xca0] sm:$0xff]  ;;  %968 = vst [vmem:[%s4563_s6 + $0x320] sm:$0xff] %v967_v52 }
  0xa2   : > { %970 = vst [vmem:[%s4563_s6 + $0x328] sm:$0xff] %v969_v53  ;;  %v971_v54 = vld [vmem:[%s4558_s25 + $0xcc0] sm:$0xff] }
  0xa3   : > { %v973_v55 = vld [vmem:[%s4558_s25 + $0xce0] sm:$0xff]  ;;  %972 = vst [vmem:[%s4563_s6 + $0x330] sm:$0xff] %v971_v54 }
  0xa4   : > { %v975_v56 = vld [vmem:[%s4558_s25 + $0xd00] sm:$0xff]  ;;  %974 = vst [vmem:[%s4563_s6 + $0x338] sm:$0xff] %v973_v55 }
  0xa5   : > { %976 = vst [vmem:[%s4563_s6 + $0x340] sm:$0xff] %v975_v56  ;;  %v977_v57 = vld [vmem:[%s4558_s25 + $0xd20] sm:$0xff] }
  0xa6   : > { %v979_v58 = vld [vmem:[%s4558_s25 + $0xd40] sm:$0xff]  ;;  %978 = vst [vmem:[%s4563_s6 + $0x348] sm:$0xff] %v977_v57 }
  0xa7   : > { %v981_v59 = vld [vmem:[%s4558_s25 + $0xd60] sm:$0xff]  ;;  %980 = vst [vmem:[%s4563_s6 + $0x350] sm:$0xff] %v979_v58 }
  0xa8   : > { %982 = vst [vmem:[%s4563_s6 + $0x358] sm:$0xff] %v981_v59  ;;  %v983_v60 = vld [vmem:[%s4558_s25 + $0xd80] sm:$0xff] }
  0xa9   : > { %v985_v61 = vld [vmem:[%s4558_s25 + $0xda0] sm:$0xff]  ;;  %984 = vst [vmem:[%s4563_s6 + $0x360] sm:$0xff] %v983_v60 }
  0xaa   : > { %v987_v62 = vld [vmem:[%s4558_s25 + $0xdc0] sm:$0xff]  ;;  %986 = vst [vmem:[%s4563_s6 + $0x368] sm:$0xff] %v985_v61 }
  0xab   : > { %988 = vst [vmem:[%s4563_s6 + $0x370] sm:$0xff] %v987_v62  ;;  %v989_v63 = vld [vmem:[%s4558_s25 + $0xde0] sm:$0xff] }
  0xac   : > { %v991_v0 = vld [vmem:[%s4558_s25 + $0xe00] sm:$0xff]  ;;  %990 = vst [vmem:[%s4563_s6 + $0x378] sm:$0xff] %v989_v63 }
  0xad   : > { %v993_v1 = vld [vmem:[%s4558_s25 + $0xe20] sm:$0xff]  ;;  %992 = vst [vmem:[%s4563_s6 + $0x380] sm:$0xff] %v991_v0 }
  0xae   : > { %994 = vst [vmem:[%s4563_s6 + $0x388] sm:$0xff] %v993_v1  ;;  %v995_v2 = vld [vmem:[%s4558_s25 + $0xe40] sm:$0xff] }
  0xaf   : > { %v997_v3 = vld [vmem:[%s4558_s25 + $0xe60] sm:$0xff]  ;;  %996 = vst [vmem:[%s4563_s6 + $0x390] sm:$0xff] %v995_v2 }
  0xb0   : > { %v999_v4 = vld [vmem:[%s4558_s25 + $0xe80] sm:$0xff]  ;;  %998 = vst [vmem:[%s4563_s6 + $0x398] sm:$0xff] %v997_v3 }
  0xb1   : > { %1000 = vst [vmem:[%s4563_s6 + $0x3a0] sm:$0xff] %v999_v4  ;;  %v1001_v5 = vld [vmem:[%s4558_s25 + $0xea0] sm:$0xff] }
  0xb2   : > { %v1003_v6 = vld [vmem:[%s4558_s25 + $0xec0] sm:$0xff]  ;;  %1002 = vst [vmem:[%s4563_s6 + $0x3a8] sm:$0xff] %v1001_v5 }
  0xb3   : > { %v1005_v7 = vld [vmem:[%s4558_s25 + $0xee0] sm:$0xff]  ;;  %1004 = vst [vmem:[%s4563_s6 + $0x3b0] sm:$0xff] %v1003_v6 }
  0xb4   : > { %1006 = vst [vmem:[%s4563_s6 + $0x3b8] sm:$0xff] %v1005_v7  ;;  %v1007_v8 = vld [vmem:[%s4558_s25 + $0xf00] sm:$0xff] }
  0xb5   : > { %v1009_v9 = vld [vmem:[%s4558_s25 + $0xf20] sm:$0xff]  ;;  %1008 = vst [vmem:[%s4563_s6 + $0x3c0] sm:$0xff] %v1007_v8 }
  0xb6   : > { %v1011_v10 = vld [vmem:[%s4558_s25 + $0xf40] sm:$0xff]  ;;  %1010 = vst [vmem:[%s4563_s6 + $0x3c8] sm:$0xff] %v1009_v9 }
  0xb7   : > { %1012 = vst [vmem:[%s4563_s6 + $0x3d0] sm:$0xff] %v1011_v10  ;;  %v1013_v11 = vld [vmem:[%s4558_s25 + $0xf60] sm:$0xff] }
  0xb8   : > { %v1015_v12 = vld [vmem:[%s4558_s25 + $0xf80] sm:$0xff]  ;;  %1014 = vst [vmem:[%s4563_s6 + $0x3d8] sm:$0xff] %v1013_v11 }
  0xb9   : > { %v1017_v13 = vld [vmem:[%s4558_s25 + $0xfa0] sm:$0xff]  ;;  %1016 = vst [vmem:[%s4563_s6 + $0x3e0] sm:$0xff] %v1015_v12 }
  0xba   : > { %1018 = vst [vmem:[%s4563_s6 + $0x3e8] sm:$0xff] %v1017_v13  ;;  %v1019_v14 = vld [vmem:[%s4558_s25 + $0xfc0] sm:$0xff] }
  0xbb   : > { %v1021_v15 = vld [vmem:[%s4558_s25 + $0xfe0] sm:$0xff]  ;;  %1020 = vst [vmem:[%s4563_s6 + $0x3f0] sm:$0xff] %v1019_v14 }
  0xbc   : > { %v1023_v16 = vld [vmem:[%s4558_s25 + $0x1000] sm:$0xff]  ;;  %1022 = vst [vmem:[%s4563_s6 + $0x3f8] sm:$0xff] %v1021_v15 }
  0xbd   : > { %1024 = vst [vmem:[%s4563_s6 + $0x400] sm:$0xff] %v1023_v16  ;;  %v1025_v17 = vld [vmem:[%s4558_s25 + $0x1020] sm:$0xff] }
  0xbe   : > { %v1027_v18 = vld [vmem:[%s4558_s25 + $0x1040] sm:$0xff]  ;;  %1026 = vst [vmem:[%s4563_s6 + $0x408] sm:$0xff] %v1025_v17 }
  0xbf   : > { %v1029_v19 = vld [vmem:[%s4558_s25 + $0x1060] sm:$0xff]  ;;  %1028 = vst [vmem:[%s4563_s6 + $0x410] sm:$0xff] %v1027_v18 }
  0xc0   : > { %1030 = vst [vmem:[%s4563_s6 + $0x418] sm:$0xff] %v1029_v19  ;;  %v1031_v20 = vld [vmem:[%s4558_s25 + $0x1080] sm:$0xff] }
  0xc1   : > { %v1033_v21 = vld [vmem:[%s4558_s25 + $0x10a0] sm:$0xff]  ;;  %1032 = vst [vmem:[%s4563_s6 + $0x420] sm:$0xff] %v1031_v20 }
  0xc2   : > { %v1035_v22 = vld [vmem:[%s4558_s25 + $0x10c0] sm:$0xff]  ;;  %1034 = vst [vmem:[%s4563_s6 + $0x428] sm:$0xff] %v1033_v21 }
  0xc3   : > { %1036 = vst [vmem:[%s4563_s6 + $0x430] sm:$0xff] %v1035_v22  ;;  %v1037_v23 = vld [vmem:[%s4558_s25 + $0x10e0] sm:$0xff] }
  0xc4   : > { %v1039_v24 = vld [vmem:[%s4558_s25 + $0x1100] sm:$0xff]  ;;  %1038 = vst [vmem:[%s4563_s6 + $0x438] sm:$0xff] %v1037_v23 }
  0xc5   : > { %v1041_v25 = vld [vmem:[%s4558_s25 + $0x1120] sm:$0xff]  ;;  %1040 = vst [vmem:[%s4563_s6 + $0x440] sm:$0xff] %v1039_v24 }
  0xc6   : > { %1042 = vst [vmem:[%s4563_s6 + $0x448] sm:$0xff] %v1041_v25  ;;  %v1043_v26 = vld [vmem:[%s4558_s25 + $0x1140] sm:$0xff] }
  0xc7   : > { %v1045_v27 = vld [vmem:[%s4558_s25 + $0x1160] sm:$0xff]  ;;  %1044 = vst [vmem:[%s4563_s6 + $0x450] sm:$0xff] %v1043_v26 }
  0xc8   : > { %v1047_v28 = vld [vmem:[%s4558_s25 + $0x1180] sm:$0xff]  ;;  %1046 = vst [vmem:[%s4563_s6 + $0x458] sm:$0xff] %v1045_v27 }
  0xc9   : > { %1048 = vst [vmem:[%s4563_s6 + $0x460] sm:$0xff] %v1047_v28  ;;  %v1049_v29 = vld [vmem:[%s4558_s25 + $0x11a0] sm:$0xff] }
  0xca   : > { %v1051_v30 = vld [vmem:[%s4558_s25 + $0x11c0] sm:$0xff]  ;;  %1050 = vst [vmem:[%s4563_s6 + $0x468] sm:$0xff] %v1049_v29 }
  0xcb   : > { %v1053_v31 = vld [vmem:[%s4558_s25 + $0x11e0] sm:$0xff]  ;;  %1052 = vst [vmem:[%s4563_s6 + $0x470] sm:$0xff] %v1051_v30 }
  0xcc   : > { %1054 = vst [vmem:[%s4563_s6 + $0x478] sm:$0xff] %v1053_v31  ;;  %v1055_v32 = vld [vmem:[%s4558_s25 + $0x1200] sm:$0xff] }
  0xcd   : > { %v1057_v33 = vld [vmem:[%s4558_s25 + $0x1220] sm:$0xff]  ;;  %1056 = vst [vmem:[%s4563_s6 + $0x480] sm:$0xff] %v1055_v32 }
  0xce   : > { %v1059_v34 = vld [vmem:[%s4558_s25 + $0x1240] sm:$0xff]  ;;  %1058 = vst [vmem:[%s4563_s6 + $0x488] sm:$0xff] %v1057_v33 }
  0xcf   : > { %1060 = vst [vmem:[%s4563_s6 + $0x490] sm:$0xff] %v1059_v34  ;;  %v1061_v35 = vld [vmem:[%s4558_s25 + $0x1260] sm:$0xff] }
  0xd0   : > { %v1063_v36 = vld [vmem:[%s4558_s25 + $0x1280] sm:$0xff]  ;;  %1062 = vst [vmem:[%s4563_s6 + $0x498] sm:$0xff] %v1061_v35 }
  0xd1   : > { %v1065_v37 = vld [vmem:[%s4558_s25 + $0x12a0] sm:$0xff]  ;;  %1064 = vst [vmem:[%s4563_s6 + $0x4a0] sm:$0xff] %v1063_v36 }
  0xd2   : > { %1066 = vst [vmem:[%s4563_s6 + $0x4a8] sm:$0xff] %v1065_v37  ;;  %v1067_v38 = vld [vmem:[%s4558_s25 + $0x12c0] sm:$0xff] }
  0xd3   : > { %v1069_v39 = vld [vmem:[%s4558_s25 + $0x12e0] sm:$0xff]  ;;  %1068 = vst [vmem:[%s4563_s6 + $0x4b0] sm:$0xff] %v1067_v38 }
  0xd4   : > { %v1071_v40 = vld [vmem:[%s4558_s25 + $0x1300] sm:$0xff]  ;;  %1070 = vst [vmem:[%s4563_s6 + $0x4b8] sm:$0xff] %v1069_v39 }
  0xd5   : > { %1072 = vst [vmem:[%s4563_s6 + $0x4c0] sm:$0xff] %v1071_v40  ;;  %v1073_v41 = vld [vmem:[%s4558_s25 + $0x1320] sm:$0xff] }
  0xd6   : > { %v1075_v42 = vld [vmem:[%s4558_s25 + $0x1340] sm:$0xff]  ;;  %1074 = vst [vmem:[%s4563_s6 + $0x4c8] sm:$0xff] %v1073_v41 }
  0xd7   : > { %v1077_v43 = vld [vmem:[%s4558_s25 + $0x1360] sm:$0xff]  ;;  %1076 = vst [vmem:[%s4563_s6 + $0x4d0] sm:$0xff] %v1075_v42 }
  0xd8   : > { %1078 = vst [vmem:[%s4563_s6 + $0x4d8] sm:$0xff] %v1077_v43  ;;  %v1079_v44 = vld [vmem:[%s4558_s25 + $0x1380] sm:$0xff] }
  0xd9   : > { %v1081_v45 = vld [vmem:[%s4558_s25 + $0x13a0] sm:$0xff]  ;;  %1080 = vst [vmem:[%s4563_s6 + $0x4e0] sm:$0xff] %v1079_v44 }
  0xda   : > { %v1083_v46 = vld [vmem:[%s4558_s25 + $0x13c0] sm:$0xff]  ;;  %1082 = vst [vmem:[%s4563_s6 + $0x4e8] sm:$0xff] %v1081_v45 }
  0xdb   : > { %1084 = vst [vmem:[%s4563_s6 + $0x4f0] sm:$0xff] %v1083_v46  ;;  %v1085_v47 = vld [vmem:[%s4558_s25 + $0x13e0] sm:$0xff] }
  0xdc   : > { %v1087_v48 = vld [vmem:[%s4558_s25 + $0x1400] sm:$0xff]  ;;  %1086 = vst [vmem:[%s4563_s6 + $0x4f8] sm:$0xff] %v1085_v47 }
  0xdd   : > { %v1089_v49 = vld [vmem:[%s4558_s25 + $0x1420] sm:$0xff]  ;;  %1088 = vst [vmem:[%s4563_s6 + $0x500] sm:$0xff] %v1087_v48 }
  0xde   : > { %1090 = vst [vmem:[%s4563_s6 + $0x508] sm:$0xff] %v1089_v49  ;;  %v1091_v50 = vld [vmem:[%s4558_s25 + $0x1440] sm:$0xff] }
  0xdf   : > { %v1093_v51 = vld [vmem:[%s4558_s25 + $0x1460] sm:$0xff]  ;;  %1092 = vst [vmem:[%s4563_s6 + $0x510] sm:$0xff] %v1091_v50 }
  0xe0   : > { %v1095_v52 = vld [vmem:[%s4558_s25 + $0x1480] sm:$0xff]  ;;  %1094 = vst [vmem:[%s4563_s6 + $0x518] sm:$0xff] %v1093_v51 }
  0xe1   : > { %1096 = vst [vmem:[%s4563_s6 + $0x520] sm:$0xff] %v1095_v52  ;;  %v1097_v53 = vld [vmem:[%s4558_s25 + $0x14a0] sm:$0xff] }
  0xe2   : > { %v1099_v54 = vld [vmem:[%s4558_s25 + $0x14c0] sm:$0xff]  ;;  %1098 = vst [vmem:[%s4563_s6 + $0x528] sm:$0xff] %v1097_v53 }
  0xe3   : > { %v1101_v55 = vld [vmem:[%s4558_s25 + $0x14e0] sm:$0xff]  ;;  %1100 = vst [vmem:[%s4563_s6 + $0x530] sm:$0xff] %v1099_v54 }
  0xe4   : > { %1102 = vst [vmem:[%s4563_s6 + $0x538] sm:$0xff] %v1101_v55  ;;  %v1103_v56 = vld [vmem:[%s4558_s25 + $0x1500] sm:$0xff] }
  0xe5   : > { %v1105_v57 = vld [vmem:[%s4558_s25 + $0x1520] sm:$0xff]  ;;  %1104 = vst [vmem:[%s4563_s6 + $0x540] sm:$0xff] %v1103_v56 }
  0xe6   : > { %v1107_v58 = vld [vmem:[%s4558_s25 + $0x1540] sm:$0xff]  ;;  %1106 = vst [vmem:[%s4563_s6 + $0x548] sm:$0xff] %v1105_v57 }
  0xe7   : > { %1108 = vst [vmem:[%s4563_s6 + $0x550] sm:$0xff] %v1107_v58  ;;  %v1109_v59 = vld [vmem:[%s4558_s25 + $0x1560] sm:$0xff] }
  0xe8   : > { %v1111_v60 = vld [vmem:[%s4558_s25 + $0x1580] sm:$0xff]  ;;  %1110 = vst [vmem:[%s4563_s6 + $0x558] sm:$0xff] %v1109_v59 }
  0xe9   : > { %v1113_v61 = vld [vmem:[%s4558_s25 + $0x15a0] sm:$0xff]  ;;  %1112 = vst [vmem:[%s4563_s6 + $0x560] sm:$0xff] %v1111_v60 }
  0xea   : > { %1114 = vst [vmem:[%s4563_s6 + $0x568] sm:$0xff] %v1113_v61  ;;  %v1115_v62 = vld [vmem:[%s4558_s25 + $0x15c0] sm:$0xff] }
  0xeb   : > { %v1117_v63 = vld [vmem:[%s4558_s25 + $0x15e0] sm:$0xff]  ;;  %1116 = vst [vmem:[%s4563_s6 + $0x570] sm:$0xff] %v1115_v62 }
  0xec   : > { %v1119_v0 = vld [vmem:[%s4558_s25 + $0x1600] sm:$0xff]  ;;  %1118 = vst [vmem:[%s4563_s6 + $0x578] sm:$0xff] %v1117_v63 }
  0xed   : > { %1120 = vst [vmem:[%s4563_s6 + $0x580] sm:$0xff] %v1119_v0  ;;  %v1121_v1 = vld [vmem:[%s4558_s25 + $0x1620] sm:$0xff] }
  0xee   : > { %v1123_v2 = vld [vmem:[%s4558_s25 + $0x1640] sm:$0xff]  ;;  %1122 = vst [vmem:[%s4563_s6 + $0x588] sm:$0xff] %v1121_v1 }
  0xef   : > { %v1125_v3 = vld [vmem:[%s4558_s25 + $0x1660] sm:$0xff]  ;;  %1124 = vst [vmem:[%s4563_s6 + $0x590] sm:$0xff] %v1123_v2 }
  0xf0   : > { %1126 = vst [vmem:[%s4563_s6 + $0x598] sm:$0xff] %v1125_v3  ;;  %v1127_v4 = vld [vmem:[%s4558_s25 + $0x1680] sm:$0xff] }
  0xf1   : > { %v1129_v5 = vld [vmem:[%s4558_s25 + $0x16a0] sm:$0xff]  ;;  %1128 = vst [vmem:[%s4563_s6 + $0x5a0] sm:$0xff] %v1127_v4 }
  0xf2   : > { %v1131_v6 = vld [vmem:[%s4558_s25 + $0x16c0] sm:$0xff]  ;;  %1130 = vst [vmem:[%s4563_s6 + $0x5a8] sm:$0xff] %v1129_v5 }
  0xf3   : > { %1132 = vst [vmem:[%s4563_s6 + $0x5b0] sm:$0xff] %v1131_v6  ;;  %v1133_v7 = vld [vmem:[%s4558_s25 + $0x16e0] sm:$0xff] }
  0xf4   : > { %v1135_v8 = vld [vmem:[%s4558_s25 + $0x1700] sm:$0xff]  ;;  %1134 = vst [vmem:[%s4563_s6 + $0x5b8] sm:$0xff] %v1133_v7 }
  0xf5   : > { %v1137_v9 = vld [vmem:[%s4558_s25 + $0x1720] sm:$0xff]  ;;  %1136 = vst [vmem:[%s4563_s6 + $0x5c0] sm:$0xff] %v1135_v8 }
  0xf6   : > { %1138 = vst [vmem:[%s4563_s6 + $0x5c8] sm:$0xff] %v1137_v9  ;;  %v1139_v10 = vld [vmem:[%s4558_s25 + $0x1740] sm:$0xff] }
  0xf7   : > { %v1141_v11 = vld [vmem:[%s4558_s25 + $0x1760] sm:$0xff]  ;;  %1140 = vst [vmem:[%s4563_s6 + $0x5d0] sm:$0xff] %v1139_v10 }
  0xf8   : > { %v1143_v12 = vld [vmem:[%s4558_s25 + $0x1780] sm:$0xff]  ;;  %1142 = vst [vmem:[%s4563_s6 + $0x5d8] sm:$0xff] %v1141_v11 }
  0xf9   : > { %1144 = vst [vmem:[%s4563_s6 + $0x5e0] sm:$0xff] %v1143_v12  ;;  %v1145_v13 = vld [vmem:[%s4558_s25 + $0x17a0] sm:$0xff] }
  0xfa   : > { %v1147_v14 = vld [vmem:[%s4558_s25 + $0x17c0] sm:$0xff]  ;;  %1146 = vst [vmem:[%s4563_s6 + $0x5e8] sm:$0xff] %v1145_v13 }
  0xfb   : > { %v1149_v15 = vld [vmem:[%s4558_s25 + $0x17e0] sm:$0xff]  ;;  %1148 = vst [vmem:[%s4563_s6 + $0x5f0] sm:$0xff] %v1147_v14 }
  0xfc   : > { %1150 = vst [vmem:[%s4563_s6 + $0x5f8] sm:$0xff] %v1149_v15  ;;  %v1151_v16 = vld [vmem:[%s4558_s25 + $0x1800] sm:$0xff] }
  0xfd   : > { %v1153_v17 = vld [vmem:[%s4558_s25 + $0x1820] sm:$0xff]  ;;  %1152 = vst [vmem:[%s4563_s6 + $0x600] sm:$0xff] %v1151_v16 }
  0xfe   : > { %v1155_v18 = vld [vmem:[%s4558_s25 + $0x1840] sm:$0xff]  ;;  %1154 = vst [vmem:[%s4563_s6 + $0x608] sm:$0xff] %v1153_v17 }
  0xff   : > { %1156 = vst [vmem:[%s4563_s6 + $0x610] sm:$0xff] %v1155_v18  ;;  %v1157_v19 = vld [vmem:[%s4558_s25 + $0x1860] sm:$0xff] }
 0x100   : > { %v1159_v20 = vld [vmem:[%s4558_s25 + $0x1880] sm:$0xff]  ;;  %1158 = vst [vmem:[%s4563_s6 + $0x618] sm:$0xff] %v1157_v19 }
 0x101   : > { %v1161_v21 = vld [vmem:[%s4558_s25 + $0x18a0] sm:$0xff]  ;;  %1160 = vst [vmem:[%s4563_s6 + $0x620] sm:$0xff] %v1159_v20 }
 0x102   : > { %1162 = vst [vmem:[%s4563_s6 + $0x628] sm:$0xff] %v1161_v21  ;;  %v1163_v22 = vld [vmem:[%s4558_s25 + $0x18c0] sm:$0xff] }
 0x103   : > { %v1165_v23 = vld [vmem:[%s4558_s25 + $0x18e0] sm:$0xff]  ;;  %1164 = vst [vmem:[%s4563_s6 + $0x630] sm:$0xff] %v1163_v22 }
 0x104   : > { %v1167_v24 = vld [vmem:[%s4558_s25 + $0x1900] sm:$0xff]  ;;  %1166 = vst [vmem:[%s4563_s6 + $0x638] sm:$0xff] %v1165_v23 }
 0x105   : > { %1168 = vst [vmem:[%s4563_s6 + $0x640] sm:$0xff] %v1167_v24  ;;  %v1169_v25 = vld [vmem:[%s4558_s25 + $0x1920] sm:$0xff] }
 0x106   : > { %v1171_v26 = vld [vmem:[%s4558_s25 + $0x1940] sm:$0xff]  ;;  %1170 = vst [vmem:[%s4563_s6 + $0x648] sm:$0xff] %v1169_v25 }
 0x107   : > { %v1173_v27 = vld [vmem:[%s4558_s25 + $0x1960] sm:$0xff]  ;;  %1172 = vst [vmem:[%s4563_s6 + $0x650] sm:$0xff] %v1171_v26 }
 0x108   : > { %1174 = vst [vmem:[%s4563_s6 + $0x658] sm:$0xff] %v1173_v27  ;;  %v1175_v28 = vld [vmem:[%s4558_s25 + $0x1980] sm:$0xff] }
 0x109   : > { %v1177_v29 = vld [vmem:[%s4558_s25 + $0x19a0] sm:$0xff]  ;;  %1176 = vst [vmem:[%s4563_s6 + $0x660] sm:$0xff] %v1175_v28 }
 0x10a   : > { %v1179_v30 = vld [vmem:[%s4558_s25 + $0x19c0] sm:$0xff]  ;;  %1178 = vst [vmem:[%s4563_s6 + $0x668] sm:$0xff] %v1177_v29 }
 0x10b   : > { %1180 = vst [vmem:[%s4563_s6 + $0x670] sm:$0xff] %v1179_v30  ;;  %v1181_v31 = vld [vmem:[%s4558_s25 + $0x19e0] sm:$0xff] }
 0x10c   : > { %v1183_v32 = vld [vmem:[%s4558_s25 + $0x1a00] sm:$0xff]  ;;  %1182 = vst [vmem:[%s4563_s6 + $0x678] sm:$0xff] %v1181_v31 }
 0x10d   : > { %v1185_v33 = vld [vmem:[%s4558_s25 + $0x1a20] sm:$0xff]  ;;  %1184 = vst [vmem:[%s4563_s6 + $0x680] sm:$0xff] %v1183_v32 }
 0x10e   : > { %1186 = vst [vmem:[%s4563_s6 + $0x688] sm:$0xff] %v1185_v33  ;;  %v1187_v34 = vld [vmem:[%s4558_s25 + $0x1a40] sm:$0xff] }
 0x10f   : > { %v1189_v35 = vld [vmem:[%s4558_s25 + $0x1a60] sm:$0xff]  ;;  %1188 = vst [vmem:[%s4563_s6 + $0x690] sm:$0xff] %v1187_v34 }
 0x110   : > { %v1191_v36 = vld [vmem:[%s4558_s25 + $0x1a80] sm:$0xff]  ;;  %1190 = vst [vmem:[%s4563_s6 + $0x698] sm:$0xff] %v1189_v35 }
 0x111   : > { %1192 = vst [vmem:[%s4563_s6 + $0x6a0] sm:$0xff] %v1191_v36  ;;  %v1193_v37 = vld [vmem:[%s4558_s25 + $0x1aa0] sm:$0xff] }
 0x112   : > { %v1195_v38 = vld [vmem:[%s4558_s25 + $0x1ac0] sm:$0xff]  ;;  %1194 = vst [vmem:[%s4563_s6 + $0x6a8] sm:$0xff] %v1193_v37 }
 0x113   : > { %v1197_v39 = vld [vmem:[%s4558_s25 + $0x1ae0] sm:$0xff]  ;;  %1196 = vst [vmem:[%s4563_s6 + $0x6b0] sm:$0xff] %v1195_v38 }
 0x114   : > { %1198 = vst [vmem:[%s4563_s6 + $0x6b8] sm:$0xff] %v1197_v39  ;;  %v1199_v40 = vld [vmem:[%s4558_s25 + $0x1b00] sm:$0xff] }
 0x115   : > { %v1201_v41 = vld [vmem:[%s4558_s25 + $0x1b20] sm:$0xff]  ;;  %1200 = vst [vmem:[%s4563_s6 + $0x6c0] sm:$0xff] %v1199_v40 }
 0x116   : > { %v1203_v42 = vld [vmem:[%s4558_s25 + $0x1b40] sm:$0xff]  ;;  %1202 = vst [vmem:[%s4563_s6 + $0x6c8] sm:$0xff] %v1201_v41 }
 0x117   : > { %1204 = vst [vmem:[%s4563_s6 + $0x6d0] sm:$0xff] %v1203_v42  ;;  %v1205_v43 = vld [vmem:[%s4558_s25 + $0x1b60] sm:$0xff] }
 0x118   : > { %v1207_v44 = vld [vmem:[%s4558_s25 + $0x1b80] sm:$0xff]  ;;  %1206 = vst [vmem:[%s4563_s6 + $0x6d8] sm:$0xff] %v1205_v43 }
 0x119   : > { %v1209_v45 = vld [vmem:[%s4558_s25 + $0x1ba0] sm:$0xff]  ;;  %1208 = vst [vmem:[%s4563_s6 + $0x6e0] sm:$0xff] %v1207_v44 }
 0x11a   : > { %1210 = vst [vmem:[%s4563_s6 + $0x6e8] sm:$0xff] %v1209_v45  ;;  %v1211_v46 = vld [vmem:[%s4558_s25 + $0x1bc0] sm:$0xff] }
 0x11b   : > { %v1213_v47 = vld [vmem:[%s4558_s25 + $0x1be0] sm:$0xff]  ;;  %1212 = vst [vmem:[%s4563_s6 + $0x6f0] sm:$0xff] %v1211_v46 }
 0x11c   : > { %v1215_v48 = vld [vmem:[%s4558_s25 + $0x1c00] sm:$0xff]  ;;  %1214 = vst [vmem:[%s4563_s6 + $0x6f8] sm:$0xff] %v1213_v47 }
 0x11d   : > { %1216 = vst [vmem:[%s4563_s6 + $0x700] sm:$0xff] %v1215_v48  ;;  %v1217_v49 = vld [vmem:[%s4558_s25 + $0x1c20] sm:$0xff] }
 0x11e   : > { %v1219_v50 = vld [vmem:[%s4558_s25 + $0x1c40] sm:$0xff]  ;;  %1218 = vst [vmem:[%s4563_s6 + $0x708] sm:$0xff] %v1217_v49 }
 0x11f   : > { %v1221_v51 = vld [vmem:[%s4558_s25 + $0x1c60] sm:$0xff]  ;;  %1220 = vst [vmem:[%s4563_s6 + $0x710] sm:$0xff] %v1219_v50 }
 0x120   : > { %1222 = vst [vmem:[%s4563_s6 + $0x718] sm:$0xff] %v1221_v51  ;;  %v1223_v52 = vld [vmem:[%s4558_s25 + $0x1c80] sm:$0xff] }
 0x121   : > { %v1225_v53 = vld [vmem:[%s4558_s25 + $0x1ca0] sm:$0xff]  ;;  %1224 = vst [vmem:[%s4563_s6 + $0x720] sm:$0xff] %v1223_v52 }
 0x122   : > { %v1227_v54 = vld [vmem:[%s4558_s25 + $0x1cc0] sm:$0xff]  ;;  %1226 = vst [vmem:[%s4563_s6 + $0x728] sm:$0xff] %v1225_v53 }
 0x123   : > { %1228 = vst [vmem:[%s4563_s6 + $0x730] sm:$0xff] %v1227_v54  ;;  %v1229_v55 = vld [vmem:[%s4558_s25 + $0x1ce0] sm:$0xff] }
 0x124   : > { %v1231_v56 = vld [vmem:[%s4558_s25 + $0x1d00] sm:$0xff]  ;;  %1230 = vst [vmem:[%s4563_s6 + $0x738] sm:$0xff] %v1229_v55 }
 0x125   : > { %v1233_v57 = vld [vmem:[%s4558_s25 + $0x1d20] sm:$0xff]  ;;  %1232 = vst [vmem:[%s4563_s6 + $0x740] sm:$0xff] %v1231_v56 }
 0x126   : > { %1234 = vst [vmem:[%s4563_s6 + $0x748] sm:$0xff] %v1233_v57  ;;  %v1235_v58 = vld [vmem:[%s4558_s25 + $0x1d40] sm:$0xff] }
 0x127   : > { %v1237_v59 = vld [vmem:[%s4558_s25 + $0x1d60] sm:$0xff]  ;;  %1236 = vst [vmem:[%s4563_s6 + $0x750] sm:$0xff] %v1235_v58 }
 0x128   : > { %v1239_v60 = vld [vmem:[%s4558_s25 + $0x1d80] sm:$0xff]  ;;  %1238 = vst [vmem:[%s4563_s6 + $0x758] sm:$0xff] %v1237_v59 }
 0x129   : > { %1240 = vst [vmem:[%s4563_s6 + $0x760] sm:$0xff] %v1239_v60  ;;  %v1241_v61 = vld [vmem:[%s4558_s25 + $0x1da0] sm:$0xff] }
 0x12a   : > { %v1243_v62 = vld [vmem:[%s4558_s25 + $0x1dc0] sm:$0xff]  ;;  %1242 = vst [vmem:[%s4563_s6 + $0x768] sm:$0xff] %v1241_v61 }
 0x12b   : > { %v1245_v63 = vld [vmem:[%s4558_s25 + $0x1de0] sm:$0xff]  ;;  %1244 = vst [vmem:[%s4563_s6 + $0x770] sm:$0xff] %v1243_v62 }
 0x12c   : > { %1246 = vst [vmem:[%s4563_s6 + $0x778] sm:$0xff] %v1245_v63  ;;  %v1247_v0 = vld [vmem:[%s4558_s25 + $0x1e00] sm:$0xff] }
 0x12d   : > { %v1249_v1 = vld [vmem:[%s4558_s25 + $0x1e20] sm:$0xff]  ;;  %1248 = vst [vmem:[%s4563_s6 + $0x780] sm:$0xff] %v1247_v0 }
 0x12e   : > { %v1251_v2 = vld [vmem:[%s4558_s25 + $0x1e40] sm:$0xff]  ;;  %1250 = vst [vmem:[%s4563_s6 + $0x788] sm:$0xff] %v1249_v1 }
 0x12f   : > { %1252 = vst [vmem:[%s4563_s6 + $0x790] sm:$0xff] %v1251_v2  ;;  %v1253_v3 = vld [vmem:[%s4558_s25 + $0x1e60] sm:$0xff] }
 0x130   : > { %v1255_v4 = vld [vmem:[%s4558_s25 + $0x1e80] sm:$0xff]  ;;  %1254 = vst [vmem:[%s4563_s6 + $0x798] sm:$0xff] %v1253_v3 }
 0x131   : > { %v1257_v5 = vld [vmem:[%s4558_s25 + $0x1ea0] sm:$0xff]  ;;  %1256 = vst [vmem:[%s4563_s6 + $0x7a0] sm:$0xff] %v1255_v4 }
 0x132   : > { %1258 = vst [vmem:[%s4563_s6 + $0x7a8] sm:$0xff] %v1257_v5  ;;  %v1259_v6 = vld [vmem:[%s4558_s25 + $0x1ec0] sm:$0xff] }
 0x133   : > { %v1261_v7 = vld [vmem:[%s4558_s25 + $0x1ee0] sm:$0xff]  ;;  %1260 = vst [vmem:[%s4563_s6 + $0x7b0] sm:$0xff] %v1259_v6 }
 0x134   : > { %v1263_v8 = vld [vmem:[%s4558_s25 + $0x1f00] sm:$0xff]  ;;  %1262 = vst [vmem:[%s4563_s6 + $0x7b8] sm:$0xff] %v1261_v7 }
 0x135   : > { %1264 = vst [vmem:[%s4563_s6 + $0x7c0] sm:$0xff] %v1263_v8  ;;  %v1265_v9 = vld [vmem:[%s4558_s25 + $0x1f20] sm:$0xff] }
 0x136   : > { %v1267_v10 = vld [vmem:[%s4558_s25 + $0x1f40] sm:$0xff]  ;;  %1266 = vst [vmem:[%s4563_s6 + $0x7c8] sm:$0xff] %v1265_v9 }
 0x137   : > { %v1269_v11 = vld [vmem:[%s4558_s25 + $0x1f60] sm:$0xff]  ;;  %1268 = vst [vmem:[%s4563_s6 + $0x7d0] sm:$0xff] %v1267_v10 }
 0x138   : > { %1270 = vst [vmem:[%s4563_s6 + $0x7d8] sm:$0xff] %v1269_v11  ;;  %v1271_v12 = vld [vmem:[%s4558_s25 + $0x1f80] sm:$0xff] }
 0x139   : > { %v1273_v13 = vld [vmem:[%s4558_s25 + $0x1fa0] sm:$0xff]  ;;  %1272 = vst [vmem:[%s4563_s6 + $0x7e0] sm:$0xff] %v1271_v12 }
 0x13a   : > { %v1275_v14 = vld [vmem:[%s4558_s25 + $0x1fc0] sm:$0xff]  ;;  %1274 = vst [vmem:[%s4563_s6 + $0x7e8] sm:$0xff] %v1273_v13 }
 0x13b   : > { %1276 = vst [vmem:[%s4563_s6 + $0x7f0] sm:$0xff] %v1275_v14  ;;  %v1277_v15 = vld [vmem:[%s4558_s25 + $0x1fe0] sm:$0xff] }
 0x13c   : > { %1278 = vst [vmem:[%s4563_s6 + $0x7f8] sm:$0xff] %v1277_v15 }
 0x13d PF: > { %p3529_p0 = scmp.ge.s32.totalorder %s4403_s22, 1  ;;  %p1291_p1 = scmp.lt.s32.totalorder %s4403_s22, 17 }
 0x13f   : > { %p1292_p2 = pnand %p3529_p0, %p1291_p1 }
 0x140   : > { %s1298_s0 = sand.u32 (!%p1292_p2), 1, %s4379_s16   ;;  %s1305_s5 = sand.u32 (!%p1292_p2), 1, %s4371_s14  }
 0x141   : > { %1295 = sbr.rel (%p1292_p2) target bundleno = 833 (0x341), region = 85  ;;  %s3530_s23 = sshll.u32 (!%p1292_p2), %s1298_s0, 7 }
 0x142   : > { %s3531_s28 = sshll.u32 (!%p1292_p2), %s1305_s5, 11  ;;  %s1332_s7 = sand.u32 (!%p1292_p2), 1, %s4363_s12  }
 0x143   : > { %s3533_s11 = sshll.u32 (!%p1292_p2), %s4391_s19, 1  ;;  %s3532_s25 = sshll.u32 (!%p1292_p2), %s1332_s7, 5 }
 0x144   : > { %p1340_p3 = scmp.lt.s32.totalorder (!%p1292_p2), %s3533_s11, 7  ;;  %s5086_s4 = scalar_lea.vmem (!%p1292_p2), [#allocation3], %s3530_s23 }
 0x145   : > { %s5088_s6 = scalar_lea.vmem (!%p1292_p2), [#allocation4], %s3531_s28  ;;  %s5090_s1 = scalar_lea.vmem (!%p1292_p2), [#allocation5], %s3532_s25 }
 0x146   : > { %p3534_p4 = scmp.ne.s32.totalorder (!%p1292_p2), %s4387_s18, 0 }
 0x148   : > { %s5497_s11 = smov (!%p1340_p3, %s3533_s11), 7  ;;  %1349 = sbr.rel (%p3534_p4) target bundleno = 335 (0x14f), region = 97 }
 0x149   : > { %s1342_s29 = scalar_lea.vmem %s5468_s2, %s5497_s11  ;;  %v4405_v16 = vmov (!%p3534_p4), 0.0  }
 0x14a   : > { %1350 = vst [vmem:[#allocation2] sm:$0xff] (!%p3534_p4), %v4405_v16  ;;  %1351 = vst [vmem:[#allocation2 + $0x8] sm:$0xff] (!%p3534_p4), %v4405_v16 }
 0x14b   : > { %1352 = vst [vmem:[#allocation2 + $0x10] sm:$0xff] (!%p3534_p4), %v4405_v16  ;;  %1353 = vst [vmem:[#allocation2 + $0x18] sm:$0xff] (!%p3534_p4), %v4405_v16 }
 0x14f PF: > { %v3933_v17 = vld [vmem:[%s5088_s6 + $0x4] ss:$8 sps:$4 sm:$0xff]   ;;  %v3937_v19 = vld [vmem:[%s5088_s6] ss:$8 sps:$4 sm:$0xff]   ;;  %v3939_v21 = vld [vmem:[%s5088_s6 + $0x14] ss:$8 sps:$4 sm:$0xff]  }
 0x150   : > { %v3935_v18 = vld [vmem:[%s5088_s6 + $0x404] ss:$8 sps:$4 sm:$0xff]   ;;  %2990 = vmatprep.subr.bf16.mxu1 %v3933_v17  ;;  %v3938_v20 = vld [vmem:[%s5088_s6 + $0x400] ss:$8 sps:$4 sm:$0xff]   ;;  %v3941_v22 = vld [vmem:[%s5088_s6 + $0x414] ss:$8 sps:$4 sm:$0xff]  }
 0x151   : > { %3162 = vmatprep.subr.bf16.mxu0 %v3935_v18  ;;  %2991 = vmatpush1.bf16.msra.mxu1 %v3937_v19  ;;  %v3943_v23 = vld [vmem:[%s5088_s6 + $0x10] ss:$8 sps:$4 sm:$0xff]   ;;  %v3945_v25 = vld [vmem:[%s5088_s6 + $0x24] ss:$8 sps:$4 sm:$0xff]   ;;  %v3949_v27 = vld [vmem:[%s5088_s6 + $0x20] ss:$8 sps:$4 sm:$0xff]  }
 0x152   : > { %3163 = vmatpush1.bf16.msra.mxu0 %v3938_v20  ;;  %2992 = vmatprep.subr.bf16.mxu1 %v3939_v21  ;;  %v3944_v24 = vld [vmem:[%s5088_s6 + $0x410] ss:$8 sps:$4 sm:$0xff]   ;;  %v3947_v26 = vld [vmem:[%s5088_s6 + $0x424] ss:$8 sps:$4 sm:$0xff]   ;;  %v3950_v28 = vld [vmem:[%s5088_s6 + $0x420] ss:$8 sps:$4 sm:$0xff]  }
 0x153   : > { %3164 = vmatprep.subr.bf16.mxu0 %v3941_v22  ;;  %v3951_v29 = vld [vmem:[%s5088_s6 + $0x34] ss:$8 sps:$4 sm:$0xff]   ;;  %v3955_v31 = vld [vmem:[%s5088_s6 + $0x30] ss:$8 sps:$4 sm:$0xff]   ;;  %v3957_v33 = vld [vmem:[%s5088_s6 + $0x44] ss:$8 sps:$4 sm:$0xff]  }
 0x154   : > { %v3953_v30 = vld [vmem:[%s5088_s6 + $0x434] ss:$8 sps:$4 sm:$0xff]   ;;  %v3956_v32 = vld [vmem:[%s5088_s6 + $0x430] ss:$8 sps:$4 sm:$0xff]   ;;  %v3959_v34 = vld [vmem:[%s5088_s6 + $0x444] ss:$8 sps:$4 sm:$0xff]  }
 0x155   : > { %2993 = vmatpush1.bf16.msra.mxu1 %v3943_v23  ;;  %v3961_v35 = vld [vmem:[%s5088_s6 + $0x40] ss:$8 sps:$4 sm:$0xff]   ;;  %v3963_v37 = vld [vmem:[%s5088_s6 + $0x54] ss:$8 sps:$4 sm:$0xff]   ;;  %v3967_v39 = vld [vmem:[%s5088_s6 + $0x50] ss:$8 sps:$4 sm:$0xff]  }
 0x156   : > { %3165 = vmatpush1.bf16.msra.mxu0 %v3944_v24  ;;  %2994 = vmatprep.subr.bf16.mxu1 %v3945_v25  ;;  %v3962_v36 = vld [vmem:[%s5088_s6 + $0x440] ss:$8 sps:$4 sm:$0xff]   ;;  %v3965_v38 = vld [vmem:[%s5088_s6 + $0x454] ss:$8 sps:$4 sm:$0xff]   ;;  %v3968_v40 = vld [vmem:[%s5088_s6 + $0x450] ss:$8 sps:$4 sm:$0xff]  }
 0x157   : > { %3166 = vmatprep.subr.bf16.mxu0 %v3947_v26  ;;  %v3969_v41 = vld [vmem:[%s5088_s6 + $0x64] ss:$8 sps:$4 sm:$0xff]   ;;  %v3973_v43 = vld [vmem:[%s5088_s6 + $0x60] ss:$8 sps:$4 sm:$0xff]   ;;  %v3975_v45 = vld [vmem:[%s5088_s6 + $0x74] ss:$8 sps:$4 sm:$0xff]  }
 0x158   : > { %v3971_v42 = vld [vmem:[%s5088_s6 + $0x464] ss:$8 sps:$4 sm:$0xff]   ;;  %v3974_v44 = vld [vmem:[%s5088_s6 + $0x460] ss:$8 sps:$4 sm:$0xff]   ;;  %v3977_v46 = vld [vmem:[%s5088_s6 + $0x474] ss:$8 sps:$4 sm:$0xff]  }
 0x159   : > { %2995 = vmatpush1.bf16.msra.mxu1 %v3949_v27  ;;  %v3979_v47 = vld [vmem:[%s5088_s6 + $0x70] ss:$8 sps:$4 sm:$0xff]   ;;  %v3981_v49 = vld [vmem:[%s5088_s6 + $0x84] ss:$8 sps:$4 sm:$0xff]   ;;  %v3985_v51 = vld [vmem:[%s5088_s6 + $0x80] ss:$8 sps:$4 sm:$0xff]  }
 0x15a   : > { %3167 = vmatpush1.bf16.msra.mxu0 %v3950_v28  ;;  %2996 = vmatprep.subr.bf16.mxu1 %v3951_v29  ;;  %v3980_v48 = vld [vmem:[%s5088_s6 + $0x470] ss:$8 sps:$4 sm:$0xff]   ;;  %v3983_v50 = vld [vmem:[%s5088_s6 + $0x484] ss:$8 sps:$4 sm:$0xff]   ;;  %v3986_v52 = vld [vmem:[%s5088_s6 + $0x480] ss:$8 sps:$4 sm:$0xff]  }
 0x15b   : > { %3168 = vmatprep.subr.bf16.mxu0 %v3953_v30  ;;  %v3987_v53 = vld [vmem:[%s5088_s6 + $0x94] ss:$8 sps:$4 sm:$0xff]   ;;  %v3991_v55 = vld [vmem:[%s5088_s6 + $0x90] ss:$8 sps:$4 sm:$0xff]   ;;  %v3993_v57 = vld [vmem:[%s5088_s6 + $0xa4] ss:$8 sps:$4 sm:$0xff]  }
 0x15c   : > { %v3989_v54 = vld [vmem:[%s5088_s6 + $0x494] ss:$8 sps:$4 sm:$0xff]   ;;  %v3992_v56 = vld [vmem:[%s5088_s6 + $0x490] ss:$8 sps:$4 sm:$0xff]   ;;  %v3995_v58 = vld [vmem:[%s5088_s6 + $0x4a4] ss:$8 sps:$4 sm:$0xff]  }
 0x15d   : > { %2997 = vmatpush1.bf16.msra.mxu1 %v3955_v31  ;;  %v3997_v59 = vld [vmem:[%s5088_s6 + $0xa0] ss:$8 sps:$4 sm:$0xff]   ;;  %v3999_v61 = vld [vmem:[%s5088_s6 + $0xb4] ss:$8 sps:$4 sm:$0xff]   ;;  %v4003_v63 = vld [vmem:[%s5088_s6 + $0xb0] ss:$8 sps:$4 sm:$0xff]  }
 0x15e   : > { %3169 = vmatpush1.bf16.msra.mxu0 %v3956_v32  ;;  %2998 = vmatprep.subr.bf16.mxu1 %v3957_v33  ;;  %v3998_v60 = vld [vmem:[%s5088_s6 + $0x4a0] ss:$8 sps:$4 sm:$0xff]   ;;  %v4001_v62 = vld [vmem:[%s5088_s6 + $0x4b4] ss:$8 sps:$4 sm:$0xff]   ;;  %v4004_v0 = vld [vmem:[%s5088_s6 + $0x4b0] ss:$8 sps:$4 sm:$0xff]  }
 0x15f   : > { %3170 = vmatprep.subr.bf16.mxu0 %v3959_v34  ;;  %v1358_v1 = vld [vmem:[%s5086_s4] sm:$0xff]  ;;  %v4011_v11 = vld [vmem:[%s5088_s6 + $0xd4] ss:$8 sps:$4 sm:$0xff]   ;;  %v4015_v13 = vld [vmem:[%s5088_s6 + $0xd0] ss:$8 sps:$4 sm:$0xff]   ;;  %p3807_p5 = scmp.ne.s32.totalorder %s4387_s18, 3 }
 0x160   : > { %v1366_v2 = vld [vmem:[%s5086_s4 + $0x40] sm:$0xff]  ;;  %v4013_v12 = vld [vmem:[%s5088_s6 + $0x4d4] ss:$8 sps:$4 sm:$0xff]   ;;  %v4016_v14 = vld [vmem:[%s5088_s6 + $0x4d0] ss:$8 sps:$4 sm:$0xff]  }
 0x161   : > { %2999 = vmatpush1.bf16.msra.mxu1 %v3961_v35  ;;  %v4005_v3 = vld [vmem:[%s5088_s6 + $0xc4] ss:$8 sps:$4 sm:$0xff]   ;;  %v3536_v5 = vcombine.high %v1358_v1, %v1366_v2  ;;  %v4009_v9 = vld [vmem:[%s5088_s6 + $0xc0] ss:$8 sps:$4 sm:$0xff]   ;;  %v4023_v19 = vld [vmem:[%s5088_s6 + $0xf4] ss:$8 sps:$4 sm:$0xff]   ;;  %v3535_v25 = vcombine.low %v1358_v1, %v1366_v2 }
 0x162   : > { %3171 = vmatpush1.bf16.msra.mxu0 %v3962_v36  ;;  %3000 = vmatprep.subr.bf16.mxu1 %v3963_v37  ;;  %v4007_v4 = vld [vmem:[%s5088_s6 + $0x4c4] ss:$8 sps:$4 sm:$0xff]   ;;  %v4010_v10 = vld [vmem:[%s5088_s6 + $0x4c0] ss:$8 sps:$4 sm:$0xff]   ;;  %v4025_v20 = vld [vmem:[%s5088_s6 + $0x4f4] ss:$8 sps:$4 sm:$0xff]  }
 0x163   : > { %3172 = vmatprep.subr.bf16.mxu0 %v3965_v38  ;;  %v1362_v6 = vld [vmem:[%s5086_s4 + $0x20] sm:$0xff]  ;;  %3022 = vmatprep.mubr.bf16.mxu1 %v3536_v5  ;;  %v4027_v21 = vld [vmem:[%s5088_s6 + $0xf0] ss:$8 sps:$4 sm:$0xff]   ;;  %v4037_v29 = vld [vmem:[%s5088_s6 + $0x114] ss:$8 sps:$4 sm:$0xff]  }
 0x164   : > { %v1370_v7 = vld [vmem:[%s5086_s4 + $0x60] sm:$0xff]  ;;  %v4028_v22 = vld [vmem:[%s5088_s6 + $0x4f0] ss:$8 sps:$4 sm:$0xff]   ;;  %v4040_v30 = vld [vmem:[%s5088_s6 + $0x514] ss:$8 sps:$4 sm:$0xff]  }
 0x165   : > { %3001 = vmatpush1.bf16.msra.mxu1 %v3967_v39  ;;  %v3544_v8 = vcombine.high %v1362_v6, %v1370_v7  ;;  %v4017_v15 = vld [vmem:[%s5088_s6 + $0xe4] ss:$8 sps:$4 sm:$0xff]   ;;  %v4021_v17 = vld [vmem:[%s5088_s6 + $0xe0] ss:$8 sps:$4 sm:$0xff]   ;;  %v3543_v27 = vcombine.low %v1362_v6, %v1370_v7  ;;  %v4035_v31 = vld [vmem:[%s5088_s6 + $0x110] ss:$8 sps:$4 sm:$0xff]  }
 0x166   : > { %3173 = vmatpush1.bf16.msra.mxu0 %v3968_v40  ;;  %3002 = vmatprep.subr.bf16.mxu1 %v3969_v41  ;;  %v4019_v16 = vld [vmem:[%s5088_s6 + $0x4e4] ss:$8 sps:$4 sm:$0xff]   ;;  %v4022_v18 = vld [vmem:[%s5088_s6 + $0x4e0] ss:$8 sps:$4 sm:$0xff]   ;;  %v4038_v32 = vld [vmem:[%s5088_s6 + $0x510] ss:$8 sps:$4 sm:$0xff]  }
 0x167   : > { %3174 = vmatprep.subr.bf16.mxu0 %v3971_v42  ;;  %3194 = vmatprep.mubr.bf16.mxu0 %v3544_v8  ;;  %v4031_v23 = vld [vmem:[%s5088_s6 + $0x104] ss:$8 sps:$4 sm:$0xff]   ;;  %v4029_v26 = vld [vmem:[%s5088_s6 + $0x100] ss:$8 sps:$4 sm:$0xff]   ;;  %v4049_v37 = vld [vmem:[%s5088_s6 + $0x134] ss:$8 sps:$4 sm:$0xff]  }
 0x168   : > { %v4034_v24 = vld [vmem:[%s5088_s6 + $0x504] ss:$8 sps:$4 sm:$0xff]   ;;  %v4032_v28 = vld [vmem:[%s5088_s6 + $0x500] ss:$8 sps:$4 sm:$0xff]   ;;  %v4052_v38 = vld [vmem:[%s5088_s6 + $0x534] ss:$8 sps:$4 sm:$0xff]  }
 0x169   : > { %3003 = vmatpush1.bf16.msra.mxu1 %v3973_v43  ;;  %v4043_v33 = vld [vmem:[%s5088_s6 + $0x124] ss:$8 sps:$4 sm:$0xff]   ;;  %v4041_v35 = vld [vmem:[%s5088_s6 + $0x120] ss:$8 sps:$4 sm:$0xff]   ;;  %v4047_v39 = vld [vmem:[%s5088_s6 + $0x130] ss:$8 sps:$4 sm:$0xff]  }
 0x16a   : > { %3175 = vmatpush1.bf16.msra.mxu0 %v3974_v44  ;;  %3004 = vmatprep.subr.bf16.mxu1 %v3975_v45  ;;  %v4046_v34 = vld [vmem:[%s5088_s6 + $0x524] ss:$8 sps:$4 sm:$0xff]   ;;  %v4044_v36 = vld [vmem:[%s5088_s6 + $0x520] ss:$8 sps:$4 sm:$0xff]   ;;  %v4050_v40 = vld [vmem:[%s5088_s6 + $0x530] ss:$8 sps:$4 sm:$0xff]  }
 0x16b   : > { %3176 = vmatprep.subr.bf16.mxu0 %v3977_v46  ;;  %v4055_v41 = vld [vmem:[%s5088_s6 + $0x144] ss:$8 sps:$4 sm:$0xff]   ;;  %v4053_v43 = vld [vmem:[%s5088_s6 + $0x140] ss:$8 sps:$4 sm:$0xff]   ;;  %v4061_v45 = vld [vmem:[%s5088_s6 + $0x154] ss:$8 sps:$4 sm:$0xff]  }
 0x16c   : > { %v4058_v42 = vld [vmem:[%s5088_s6 + $0x544] ss:$8 sps:$4 sm:$0xff]   ;;  %v4056_v44 = vld [vmem:[%s5088_s6 + $0x540] ss:$8 sps:$4 sm:$0xff]   ;;  %v4064_v46 = vld [vmem:[%s5088_s6 + $0x554] ss:$8 sps:$4 sm:$0xff]  }
 0x16d   : > { %3005 = vmatpush1.bf16.msra.mxu1 %v3979_v47  ;;  %v4059_v47 = vld [vmem:[%s5088_s6 + $0x150] ss:$8 sps:$4 sm:$0xff]   ;;  %v4077_v1 = vld [vmem:[%s5088_s6 + $0x180] ss:$8 sps:$4 sm:$0xff]   ;;  %v4091_v7 = vld [vmem:[%s5088_s6 + $0x1a4] ss:$8 sps:$4 sm:$0xff]  }
 0x16e   : > { %3177 = vmatpush1.bf16.msra.mxu0 %v3980_v48  ;;  %3006 = vmatprep.subr.bf16.mxu1 %v3981_v49  ;;  %v4062_v48 = vld [vmem:[%s5088_s6 + $0x550] ss:$8 sps:$4 sm:$0xff]   ;;  %v4067_v49 = vld [vmem:[%s5088_s6 + $0x164] ss:$8 sps:$4 sm:$0xff]   ;;  %v4080_v2 = vld [vmem:[%s5088_s6 + $0x580] ss:$8 sps:$4 sm:$0xff]  }
 0x16f   : > { %3178 = vmatprep.subr.bf16.mxu0 %v3983_v50  ;;  %v4070_v50 = vld [vmem:[%s5088_s6 + $0x564] ss:$8 sps:$4 sm:$0xff]   ;;  %v4083_v5 = vld [vmem:[%s5088_s6 + $0x190] ss:$8 sps:$4 sm:$0xff]  }
 0x170   : > { %v4086_v6 = vld [vmem:[%s5088_s6 + $0x590] ss:$8 sps:$4 sm:$0xff]   ;;  %v4094_v8 = vld [vmem:[%s5088_s6 + $0x5a4] ss:$8 sps:$4 sm:$0xff]  }
 0x171   : > { %3007 = vmatpush1.bf16.msra.mxu1 %v3985_v51  ;;  %v4065_v51 = vld [vmem:[%s5088_s6 + $0x160] ss:$8 sps:$4 sm:$0xff]  }
 0x172   : > { %3179 = vmatpush1.bf16.msra.mxu0 %v3986_v52  ;;  %3008 = vmatprep.subr.bf16.mxu1 %v3987_v53  ;;  %v4068_v52 = vld [vmem:[%s5088_s6 + $0x560] ss:$8 sps:$4 sm:$0xff]  }
 0x173   : > { %3180 = vmatprep.subr.bf16.mxu0 %v3989_v54  ;;  %v5190_v53 = vld [vmem:[%s5086_s4 + $0x8] sm:$0xff] }
 0x174   : > { %v5193_v54 = vld [vmem:[%s5086_s4 + $0x48] sm:$0xff] }
 0x175   : > { %3009 = vmatpush1.bf16.msra.mxu1 %v3991_v55  ;;  %v4073_v55 = vld [vmem:[%s5088_s6 + $0x174] ss:$8 sps:$4 sm:$0xff]  }
 0x176   : > { %3181 = vmatpush1.bf16.msra.mxu0 %v3992_v56  ;;  %3010 = vmatprep.subr.bf16.mxu1 %v3993_v57  ;;  %v4076_v56 = vld [vmem:[%s5088_s6 + $0x574] ss:$8 sps:$4 sm:$0xff]   ;;  %v3538_v57 = vcombine.high %v5190_v53, %v5193_v54 }
 0x177   : > { %3182 = vmatprep.subr.bf16.mxu0 %v3995_v58  ;;  %v5200_v58 = vld [vmem:[%s5086_s4 + $0x28] sm:$0xff] }
 0x179   : > { %3011 = vmatpush1.bf16.msra.mxu1 %v3997_v59  ;;  %v5203_v59 = vld [vmem:[%s5086_s4 + $0x68] sm:$0xff] }
 0x17a   : > { %3183 = vmatpush1.bf16.msra.mxu0 %v3998_v60  ;;  %3012 = vmatprep.subr.bf16.mxu1 %v3999_v61  ;;  %v3546_v60 = vcombine.high %v5200_v58, %v5203_v59  ;;  %v4071_v61 = vld [vmem:[%s5088_s6 + $0x170] ss:$8 sps:$4 sm:$0xff]  }
 0x17b   : > { %3184 = vmatprep.subr.bf16.mxu0 %v4001_v62  ;;  %v4074_v62 = vld [vmem:[%s5088_s6 + $0x570] ss:$8 sps:$4 sm:$0xff]  }
 0x17d   : > { %3013 = vmatpush1.bf16.msra.mxu1 %v4003_v63  ;;  %v4079_v63 = vld [vmem:[%s5088_s6 + $0x184] ss:$8 sps:$4 sm:$0xff]  }
 0x17e   : > { %3185 = vmatpush1.bf16.msra.mxu0 %v4004_v0  ;;  %3014 = vmatprep.subr.bf16.mxu1 %v4005_v3  ;;  %v4082_v0 = vld [vmem:[%s5088_s6 + $0x584] ss:$8 sps:$4 sm:$0xff]   ;;  %v4085_v3 = vld [vmem:[%s5088_s6 + $0x194] ss:$8 sps:$4 sm:$0xff]  }
 0x17f   : > { %3186 = vmatprep.subr.bf16.mxu0 %v4007_v4  ;;  %v4088_v4 = vld [vmem:[%s5088_s6 + $0x594] ss:$8 sps:$4 sm:$0xff]  }
 0x181   : > { %3015 = vmatpush1.bf16.msra.mxu1 %v4009_v9  ;;  %v4089_v9 = vld [vmem:[%s5088_s6 + $0x1a0] ss:$8 sps:$4 sm:$0xff]  }
 0x182   : > { %3187 = vmatpush1.bf16.msra.mxu0 %v4010_v10  ;;  %3016 = vmatprep.subr.bf16.mxu1 %v4011_v11  ;;  %v4092_v10 = vld [vmem:[%s5088_s6 + $0x5a0] ss:$8 sps:$4 sm:$0xff]   ;;  %v4097_v11 = vld [vmem:[%s5088_s6 + $0x1b4] ss:$8 sps:$4 sm:$0xff]  }
 0x183   : > { %3188 = vmatprep.subr.bf16.mxu0 %v4013_v12  ;;  %v4100_v12 = vld [vmem:[%s5088_s6 + $0x5b4] ss:$8 sps:$4 sm:$0xff]  }
 0x185   : > { %3017 = vmatpush1.bf16.msra.mxu1 %v4015_v13  ;;  %v4095_v13 = vld [vmem:[%s5088_s6 + $0x1b0] ss:$8 sps:$4 sm:$0xff]  }
 0x186   : > { %3189 = vmatpush1.bf16.msra.mxu0 %v4016_v14  ;;  %3018 = vmatprep.subr.bf16.mxu1 %v4017_v15  ;;  %v4098_v14 = vld [vmem:[%s5088_s6 + $0x5b0] ss:$8 sps:$4 sm:$0xff]   ;;  %v4103_v15 = vld [vmem:[%s5088_s6 + $0x1c4] ss:$8 sps:$4 sm:$0xff]  }
 0x187   : > { %3190 = vmatprep.subr.bf16.mxu0 %v4019_v16  ;;  %v4106_v16 = vld [vmem:[%s5088_s6 + $0x5c4] ss:$8 sps:$4 sm:$0xff]  }
 0x189   : > { %3019 = vmatpush1.bf16.msra.mxu1 %v4021_v17  ;;  %v4101_v17 = vld [vmem:[%s5088_s6 + $0x1c0] ss:$8 sps:$4 sm:$0xff]  }
 0x18a   : > { %3191 = vmatpush1.bf16.msra.mxu0 %v4022_v18  ;;  %3020 = vmatprep.subr.bf16.mxu1 %v4023_v19  ;;  %v4104_v18 = vld [vmem:[%s5088_s6 + $0x5c0] ss:$8 sps:$4 sm:$0xff]   ;;  %v4109_v19 = vld [vmem:[%s5088_s6 + $0x1d4] ss:$8 sps:$4 sm:$0xff]  }
 0x18b   : > { %3192 = vmatprep.subr.bf16.mxu0 %v4025_v20  ;;  %v4112_v20 = vld [vmem:[%s5088_s6 + $0x5d4] ss:$8 sps:$4 sm:$0xff]  }
 0x18d   : > { %3021 = vmatpush1.bf16.msra.mxu1 %v4027_v21  ;;  %v4107_v21 = vld [vmem:[%s5088_s6 + $0x1d0] ss:$8 sps:$4 sm:$0xff]  }
 0x18e   : > { %3193 = vmatpush1.bf16.msra.mxu0 %v4028_v22  ;;  %3033 = vmatprep.subr.bf16.mxu1 %v4031_v23  ;;  %v4110_v22 = vld [vmem:[%s5088_s6 + $0x5d0] ss:$8 sps:$4 sm:$0xff]   ;;  %v4115_v23 = vld [vmem:[%s5088_s6 + $0x1e4] ss:$8 sps:$4 sm:$0xff]  }
 0x18f   : > { %3205 = vmatprep.subr.bf16.mxu0 %v4034_v24  ;;  %v4118_v24 = vld [vmem:[%s5088_s6 + $0x5e4] ss:$8 sps:$4 sm:$0xff]  }
 0x190   : > { %3023 = vmatmul.mubr.bf16.vlgmr.msra.gmra.mrb[0].mxu1 %v3535_v25  ;;  %v4113_v25 = vld [vmem:[%s5088_s6 + $0x1e0] ss:$8 sps:$4 sm:$0xff]  }
 0x191   : > { %3195 = vmatmul.mubr.bf16.vlgmr.msra.gmra.mrb[0].mxu0 %v3543_v27  ;;  %3034 = vmatpush1.bf16.msra.mxu1 %v4029_v26  ;;  %v4116_v26 = vld [vmem:[%s5088_s6 + $0x5e0] ss:$8 sps:$4 sm:$0xff]   ;;  %v4121_v27 = vld [vmem:[%s5088_s6 + $0x1f4] ss:$8 sps:$4 sm:$0xff]  }
 0x192   : > { %3206 = vmatpush1.bf16.msra.mxu0 %v4032_v28  ;;  %3035 = vmatprep.subr.bf16.mxu1 %v4037_v29  ;;  %v4124_v28 = vld [vmem:[%s5088_s6 + $0x5f4] ss:$8 sps:$4 sm:$0xff]   ;;  %v4119_v29 = vld [vmem:[%s5088_s6 + $0x1f0] ss:$8 sps:$4 sm:$0xff]  }
 0x193   : > { %3207 = vmatprep.subr.bf16.mxu0 %v4040_v30  ;;  %3065 = vmatprep.mubr.bf16.mxu1 %v3538_v57  ;;  %v4122_v30 = vld [vmem:[%s5088_s6 + $0x5f0] ss:$8 sps:$4 sm:$0xff]   ;;  %v4149_v57 = vld [vmem:[%s5088_s6 + $0x240] ss:$8 sps:$4 sm:$0xff]  }
 0x194   : > { %3237 = vmatprep.mubr.bf16.mxu0 %v3546_v60  ;;  %v4160_v60 = vld [vmem:[%s5088_s6 + $0x654] ss:$8 sps:$4 sm:$0xff]  }
 0x195   : > { %3036 = vmatpush1.bf16.msra.mxu1 %v4035_v31  ;;  %v4127_v31 = vld [vmem:[%s5088_s6 + $0x204] ss:$8 sps:$4 sm:$0xff]  }
 0x196   : > { %3208 = vmatpush1.bf16.msra.mxu0 %v4038_v32  ;;  %3037 = vmatprep.subr.bf16.mxu1 %v4043_v33  ;;  %v4130_v32 = vld [vmem:[%s5088_s6 + $0x604] ss:$8 sps:$4 sm:$0xff]   ;;  %v3537_v33 = vcombine.low %v5190_v53, %v5193_v54  ;;  %v4143_v53 = vld [vmem:[%s5088_s6 + $0x230] ss:$8 sps:$4 sm:$0xff]  }
 0x197   : > { %3209 = vmatprep.subr.bf16.mxu0 %v4046_v34  ;;  %v4125_v34 = vld [vmem:[%s5088_s6 + $0x200] ss:$8 sps:$4 sm:$0xff]   ;;  %v4146_v54 = vld [vmem:[%s5088_s6 + $0x630] ss:$8 sps:$4 sm:$0xff]  }
 0x199   : > { %3038 = vmatpush1.bf16.msra.mxu1 %v4041_v35  ;;  %v3545_v35 = vcombine.low %v5200_v58, %v5203_v59  ;;  %v4152_v58 = vld [vmem:[%s5088_s6 + $0x640] ss:$8 sps:$4 sm:$0xff]   ;;  %v4157_v59 = vld [vmem:[%s5088_s6 + $0x254] ss:$8 sps:$4 sm:$0xff]  }
 0x19a   : > { %3210 = vmatpush1.bf16.msra.mxu0 %v4044_v36  ;;  %3039 = vmatprep.subr.bf16.mxu1 %v4049_v37  ;;  %v4128_v36 = vld [vmem:[%s5088_s6 + $0x600] ss:$8 sps:$4 sm:$0xff]   ;;  %v4133_v37 = vld [vmem:[%s5088_s6 + $0x214] ss:$8 sps:$4 sm:$0xff]  }
 0x19b   : > { %3211 = vmatprep.subr.bf16.mxu0 %v4052_v38  ;;  %v4136_v38 = vld [vmem:[%s5088_s6 + $0x614] ss:$8 sps:$4 sm:$0xff]  }
 0x19d   : > { %3040 = vmatpush1.bf16.msra.mxu1 %v4047_v39  ;;  %v4131_v39 = vld [vmem:[%s5088_s6 + $0x210] ss:$8 sps:$4 sm:$0xff]  }
 0x19e   : > { %3212 = vmatpush1.bf16.msra.mxu0 %v4050_v40  ;;  %3041 = vmatprep.subr.bf16.mxu1 %v4055_v41  ;;  %v4134_v40 = vld [vmem:[%s5088_s6 + $0x610] ss:$8 sps:$4 sm:$0xff]  }
 0x19f   : > { %3213 = vmatprep.subr.bf16.mxu0 %v4058_v42  ;;  %v5254_v41 = vld [vmem:[%s5086_s4 + $0x10] sm:$0xff] }
 0x1a0   : > { %v5257_v42 = vld [vmem:[%s5086_s4 + $0x50] sm:$0xff] }
 0x1a1   : > { %3042 = vmatpush1.bf16.msra.mxu1 %v4053_v43  ;;  %v4139_v43 = vld [vmem:[%s5088_s6 + $0x224] ss:$8 sps:$4 sm:$0xff]  }
 0x1a2   : > { %3214 = vmatpush1.bf16.msra.mxu0 %v4056_v44  ;;  %3043 = vmatprep.subr.bf16.mxu1 %v4061_v45  ;;  %v4142_v44 = vld [vmem:[%s5088_s6 + $0x624] ss:$8 sps:$4 sm:$0xff]   ;;  %v3540_v45 = vcombine.high %v5254_v41, %v5257_v42 }
 0x1a3   : > { %3215 = vmatprep.subr.bf16.mxu0 %v4064_v46  ;;  %v5264_v46 = vld [vmem:[%s5086_s4 + $0x30] sm:$0xff] }
 0x1a5   : > { %3044 = vmatpush1.bf16.msra.mxu1 %v4059_v47  ;;  %v5267_v47 = vld [vmem:[%s5086_s4 + $0x70] sm:$0xff] }
 0x1a6   : > { %3216 = vmatpush1.bf16.msra.mxu0 %v4062_v48  ;;  %3045 = vmatprep.subr.bf16.mxu1 %v4067_v49  ;;  %v3548_v48 = vcombine.high %v5264_v46, %v5267_v47  ;;  %v4137_v49 = vld [vmem:[%s5088_s6 + $0x220] ss:$8 sps:$4 sm:$0xff]  }
 0x1a7   : > { %3217 = vmatprep.subr.bf16.mxu0 %v4070_v50  ;;  %v4140_v50 = vld [vmem:[%s5088_s6 + $0x620] ss:$8 sps:$4 sm:$0xff]  }
 0x1a9   : > { %3046 = vmatpush1.bf16.msra.mxu1 %v4065_v51  ;;  %v4145_v51 = vld [vmem:[%s5088_s6 + $0x234] ss:$8 sps:$4 sm:$0xff]  }
 0x1aa   : > { %3218 = vmatpush1.bf16.msra.mxu0 %v4068_v52  ;;  %3047 = vmatprep.subr.bf16.mxu1 %v4073_v55  ;;  %v4148_v52 = vld [vmem:[%s5088_s6 + $0x634] ss:$8 sps:$4 sm:$0xff]   ;;  %v4151_v55 = vld [vmem:[%s5088_s6 + $0x244] ss:$8 sps:$4 sm:$0xff]  }
 0x1ab   : > { %3219 = vmatprep.subr.bf16.mxu0 %v4076_v56  ;;  %v4154_v56 = vld [vmem:[%s5088_s6 + $0x644] ss:$8 sps:$4 sm:$0xff]  }
 0x1ad   : > { %3048 = vmatpush1.bf16.msra.mxu1 %v4071_v61  ;;  %v4155_v61 = vld [vmem:[%s5088_s6 + $0x250] ss:$8 sps:$4 sm:$0xff]  }
 0x1ae   : > { %3220 = vmatpush1.bf16.msra.mxu0 %v4074_v62  ;;  %3049 = vmatprep.subr.bf16.mxu1 %v4079_v63  ;;  %v4158_v62 = vld [vmem:[%s5088_s6 + $0x650] ss:$8 sps:$4 sm:$0xff]   ;;  %v4163_v63 = vld [vmem:[%s5088_s6 + $0x264] ss:$8 sps:$4 sm:$0xff]  }
 0x1af   : > { %3221 = vmatprep.subr.bf16.mxu0 %v4082_v0  ;;  %v4166_v0 = vld [vmem:[%s5088_s6 + $0x664] ss:$8 sps:$4 sm:$0xff]  }
 0x1b1   : > { %3050 = vmatpush1.bf16.msra.mxu1 %v4077_v1  ;;  %v4161_v1 = vld [vmem:[%s5088_s6 + $0x260] ss:$8 sps:$4 sm:$0xff]  }
 0x1b2   : > { %3222 = vmatpush1.bf16.msra.mxu0 %v4080_v2  ;;  %3051 = vmatprep.subr.bf16.mxu1 %v4085_v3  ;;  %v4164_v2 = vld [vmem:[%s5088_s6 + $0x660] ss:$8 sps:$4 sm:$0xff]   ;;  %v4169_v3 = vld [vmem:[%s5088_s6 + $0x274] ss:$8 sps:$4 sm:$0xff]  }
 0x1b3   : > { %3223 = vmatprep.subr.bf16.mxu0 %v4088_v4  ;;  %v4172_v4 = vld [vmem:[%s5088_s6 + $0x674] ss:$8 sps:$4 sm:$0xff]  }
 0x1b5   : > { %3052 = vmatpush1.bf16.msra.mxu1 %v4083_v5  ;;  %v4167_v5 = vld [vmem:[%s5088_s6 + $0x270] ss:$8 sps:$4 sm:$0xff]  }
 0x1b6   : > { %3224 = vmatpush1.bf16.msra.mxu0 %v4086_v6  ;;  %3053 = vmatprep.subr.bf16.mxu1 %v4091_v7  ;;  %v4170_v6 = vld [vmem:[%s5088_s6 + $0x670] ss:$8 sps:$4 sm:$0xff]   ;;  %v4175_v7 = vld [vmem:[%s5088_s6 + $0x284] ss:$8 sps:$4 sm:$0xff]  }
 0x1b7   : > { %3225 = vmatprep.subr.bf16.mxu0 %v4094_v8  ;;  %v4178_v8 = vld [vmem:[%s5088_s6 + $0x684] ss:$8 sps:$4 sm:$0xff]  }
 0x1b9   : > { %3054 = vmatpush1.bf16.msra.mxu1 %v4089_v9  ;;  %v4173_v9 = vld [vmem:[%s5088_s6 + $0x280] ss:$8 sps:$4 sm:$0xff]  }
 0x1ba   : > { %3226 = vmatpush1.bf16.msra.mxu0 %v4092_v10  ;;  %3055 = vmatprep.subr.bf16.mxu1 %v4097_v11  ;;  %v4176_v10 = vld [vmem:[%s5088_s6 + $0x680] ss:$8 sps:$4 sm:$0xff]   ;;  %v4181_v11 = vld [vmem:[%s5088_s6 + $0x294] ss:$8 sps:$4 sm:$0xff]  }
 0x1bb   : > { %3227 = vmatprep.subr.bf16.mxu0 %v4100_v12  ;;  %v4184_v12 = vld [vmem:[%s5088_s6 + $0x694] ss:$8 sps:$4 sm:$0xff]  }
 0x1bd   : > { %3056 = vmatpush1.bf16.msra.mxu1 %v4095_v13  ;;  %v4179_v13 = vld [vmem:[%s5088_s6 + $0x290] ss:$8 sps:$4 sm:$0xff]  }
 0x1be   : > { %3228 = vmatpush1.bf16.msra.mxu0 %v4098_v14  ;;  %3057 = vmatprep.subr.bf16.mxu1 %v4103_v15  ;;  %v4182_v14 = vld [vmem:[%s5088_s6 + $0x690] ss:$8 sps:$4 sm:$0xff]   ;;  %v4187_v15 = vld [vmem:[%s5088_s6 + $0x2a4] ss:$8 sps:$4 sm:$0xff]  }
 0x1bf   : > { %3229 = vmatprep.subr.bf16.mxu0 %v4106_v16  ;;  %v4190_v16 = vld [vmem:[%s5088_s6 + $0x6a4] ss:$8 sps:$4 sm:$0xff]  }
 0x1c1   : > { %3058 = vmatpush1.bf16.msra.mxu1 %v4101_v17  ;;  %v4185_v17 = vld [vmem:[%s5088_s6 + $0x2a0] ss:$8 sps:$4 sm:$0xff]  }
 0x1c2   : > { %3230 = vmatpush1.bf16.msra.mxu0 %v4104_v18  ;;  %3059 = vmatprep.subr.bf16.mxu1 %v4109_v19  ;;  %v4188_v18 = vld [vmem:[%s5088_s6 + $0x6a0] ss:$8 sps:$4 sm:$0xff]   ;;  %v4193_v19 = vld [vmem:[%s5088_s6 + $0x2b4] ss:$8 sps:$4 sm:$0xff]  }
 0x1c3   : > { %3231 = vmatprep.subr.bf16.mxu0 %v4112_v20  ;;  %v4196_v20 = vld [vmem:[%s5088_s6 + $0x6b4] ss:$8 sps:$4 sm:$0xff]  }
 0x1c5   : > { %3060 = vmatpush1.bf16.msra.mxu1 %v4107_v21  ;;  %v4191_v21 = vld [vmem:[%s5088_s6 + $0x2b0] ss:$8 sps:$4 sm:$0xff]  }
 0x1c6   : > { %3232 = vmatpush1.bf16.msra.mxu0 %v4110_v22  ;;  %3061 = vmatprep.subr.bf16.mxu1 %v4115_v23  ;;  %v4194_v22 = vld [vmem:[%s5088_s6 + $0x6b0] ss:$8 sps:$4 sm:$0xff]   ;;  %v4199_v23 = vld [vmem:[%s5088_s6 + $0x2c4] ss:$8 sps:$4 sm:$0xff]  }
 0x1c7   : > { %3233 = vmatprep.subr.bf16.mxu0 %v4118_v24  ;;  %v4202_v24 = vld [vmem:[%s5088_s6 + $0x6c4] ss:$8 sps:$4 sm:$0xff]  }
 0x1c9   : > { %3062 = vmatpush1.bf16.msra.mxu1 %v4113_v25  ;;  %v4197_v25 = vld [vmem:[%s5088_s6 + $0x2c0] ss:$8 sps:$4 sm:$0xff]  }
 0x1ca   : > { %3234 = vmatpush1.bf16.msra.mxu0 %v4116_v26  ;;  %3063 = vmatprep.subr.bf16.mxu1 %v4121_v27  ;;  %v4200_v26 = vld [vmem:[%s5088_s6 + $0x6c0] ss:$8 sps:$4 sm:$0xff]   ;;  %v4205_v27 = vld [vmem:[%s5088_s6 + $0x2d4] ss:$8 sps:$4 sm:$0xff]  }
 0x1cb   : > { %3235 = vmatprep.subr.bf16.mxu0 %v4124_v28  ;;  %v4208_v28 = vld [vmem:[%s5088_s6 + $0x6d4] ss:$8 sps:$4 sm:$0xff]  }
 0x1cd   : > { %3064 = vmatpush1.bf16.msra.mxu1 %v4119_v29  ;;  %v4203_v29 = vld [vmem:[%s5088_s6 + $0x2d0] ss:$8 sps:$4 sm:$0xff]  }
 0x1ce   : > { %3236 = vmatpush1.bf16.msra.mxu0 %v4122_v30  ;;  %3076 = vmatprep.subr.bf16.mxu1 %v4127_v31  ;;  %v4206_v30 = vld [vmem:[%s5088_s6 + $0x6d0] ss:$8 sps:$4 sm:$0xff]   ;;  %v4211_v31 = vld [vmem:[%s5088_s6 + $0x2e4] ss:$8 sps:$4 sm:$0xff]  }
 0x1cf   : > { %3248 = vmatprep.subr.bf16.mxu0 %v4130_v32  ;;  %v4214_v32 = vld [vmem:[%s5088_s6 + $0x6e4] ss:$8 sps:$4 sm:$0xff]  }
 0x1d0   : > { %3066 = vmatmul.mubr.bf16.vlgmr.msra.gmra.mrb[0].mxu1 %v3537_v33  ;;  %v4209_v33 = vld [vmem:[%s5088_s6 + $0x2e0] ss:$8 sps:$4 sm:$0xff]  }
 0x1d1   : > { %3238 = vmatmul.mubr.bf16.vlgmr.msra.gmra.mrb[0].mxu0 %v3545_v35  ;;  %3077 = vmatpush1.bf16.msra.mxu1 %v4125_v34  ;;  %v4212_v34 = vld [vmem:[%s5088_s6 + $0x6e0] ss:$8 sps:$4 sm:$0xff]   ;;  %v4217_v35 = vld [vmem:[%s5088_s6 + $0x2f4] ss:$8 sps:$4 sm:$0xff]  }
 0x1d2   : > { %3249 = vmatpush1.bf16.msra.mxu0 %v4128_v36  ;;  %3078 = vmatprep.subr.bf16.mxu1 %v4133_v37  ;;  %v4220_v36 = vld [vmem:[%s5088_s6 + $0x6f4] ss:$8 sps:$4 sm:$0xff]   ;;  %v4215_v37 = vld [vmem:[%s5088_s6 + $0x2f0] ss:$8 sps:$4 sm:$0xff]  }
 0x1d3   : > { %3250 = vmatprep.subr.bf16.mxu0 %v4136_v38  ;;  %3108 = vmatprep.mubr.bf16.mxu1 %v3540_v45  ;;  %v4218_v38 = vld [vmem:[%s5088_s6 + $0x6f0] ss:$8 sps:$4 sm:$0xff]   ;;  %v3547_v45 = vcombine.low %v5264_v46, %v5267_v47 }
 0x1d4   : > { %3280 = vmatprep.mubr.bf16.mxu0 %v3548_v48  ;;  %v5335_v48 = vld [vmem:[%s5086_s4 + $0x58] sm:$0xff] }
 0x1d5   : > { %3079 = vmatpush1.bf16.msra.mxu1 %v4131_v39  ;;  %v4223_v39 = vld [vmem:[%s5088_s6 + $0x304] ss:$8 sps:$4 sm:$0xff]  }
 0x1d6   : > { %3251 = vmatpush1.bf16.msra.mxu0 %v4134_v40  ;;  %3080 = vmatprep.subr.bf16.mxu1 %v4139_v43  ;;  %v4226_v40 = vld [vmem:[%s5088_s6 + $0x704] ss:$8 sps:$4 sm:$0xff]   ;;  %v5328_v43 = vld [vmem:[%s5086_s4 + $0x18] sm:$0xff] }
 0x1d7   : > { %3252 = vmatprep.subr.bf16.mxu0 %v4142_v44  ;;  %v3539_v44 = vcombine.low %v5254_v41, %v5257_v42  ;;  %v4229_v41 = vld [vmem:[%s5088_s6 + $0x314] ss:$8 sps:$4 sm:$0xff]   ;;  %v3542_v46 = vcombine.high %v5328_v43, %v5335_v48 }
 0x1d8   : > { %v4232_v42 = vld [vmem:[%s5088_s6 + $0x714] ss:$8 sps:$4 sm:$0xff]  }
 0x1d9   : > { %3081 = vmatpush1.bf16.msra.mxu1 %v4137_v49  ;;  %v5338_v49 = vld [vmem:[%s5086_s4 + $0x38] sm:$0xff] }
 0x1da   : > { %3253 = vmatpush1.bf16.msra.mxu0 %v4140_v50  ;;  %3082 = vmatprep.subr.bf16.mxu1 %v4145_v51  ;;  %v5341_v50 = vld [vmem:[%s5086_s4 + $0x78] sm:$0xff]  ;;  %v4221_v51 = vld [vmem:[%s5088_s6 + $0x300] ss:$8 sps:$4 sm:$0xff]  }
 0x1db   : > { %3254 = vmatprep.subr.bf16.mxu0 %v4148_v52  ;;  %v4224_v52 = vld [vmem:[%s5088_s6 + $0x700] ss:$8 sps:$4 sm:$0xff]   ;;  %v3550_v47 = vcombine.high %v5338_v49, %v5341_v50 }
 0x1dd   : > { %3083 = vmatpush1.bf16.msra.mxu1 %v4143_v53  ;;  %v4227_v53 = vld [vmem:[%s5088_s6 + $0x310] ss:$8 sps:$4 sm:$0xff]  }
 0x1de   : > { %3255 = vmatpush1.bf16.msra.mxu0 %v4146_v54  ;;  %3084 = vmatprep.subr.bf16.mxu1 %v4151_v55  ;;  %v4230_v54 = vld [vmem:[%s5088_s6 + $0x710] ss:$8 sps:$4 sm:$0xff]   ;;  %v4235_v55 = vld [vmem:[%s5088_s6 + $0x324] ss:$8 sps:$4 sm:$0xff]  }
 0x1df   : > { %3256 = vmatprep.subr.bf16.mxu0 %v4154_v56  ;;  %v4238_v56 = vld [vmem:[%s5088_s6 + $0x724] ss:$8 sps:$4 sm:$0xff]  }
 0x1e1   : > { %3085 = vmatpush1.bf16.msra.mxu1 %v4149_v57  ;;  %v4233_v57 = vld [vmem:[%s5088_s6 + $0x320] ss:$8 sps:$4 sm:$0xff]  }
 0x1e2   : > { %3257 = vmatpush1.bf16.msra.mxu0 %v4152_v58  ;;  %3086 = vmatprep.subr.bf16.mxu1 %v4157_v59  ;;  %v4236_v58 = vld [vmem:[%s5088_s6 + $0x720] ss:$8 sps:$4 sm:$0xff]   ;;  %v4241_v59 = vld [vmem:[%s5088_s6 + $0x334] ss:$8 sps:$4 sm:$0xff]  }
 0x1e3   : > { %3258 = vmatprep.subr.bf16.mxu0 %v4160_v60  ;;  %v4244_v60 = vld [vmem:[%s5088_s6 + $0x734] ss:$8 sps:$4 sm:$0xff]  }
 0x1e5   : > { %3087 = vmatpush1.bf16.msra.mxu1 %v4155_v61  ;;  %v4239_v61 = vld [vmem:[%s5088_s6 + $0x330] ss:$8 sps:$4 sm:$0xff]  }
 0x1e6   : > { %3259 = vmatpush1.bf16.msra.mxu0 %v4158_v62  ;;  %3088 = vmatprep.subr.bf16.mxu1 %v4163_v63  ;;  %v4242_v62 = vld [vmem:[%s5088_s6 + $0x730] ss:$8 sps:$4 sm:$0xff]   ;;  %v4247_v63 = vld [vmem:[%s5088_s6 + $0x344] ss:$8 sps:$4 sm:$0xff]  }
 0x1e7   : > { %3260 = vmatprep.subr.bf16.mxu0 %v4166_v0  ;;  %v4250_v0 = vld [vmem:[%s5088_s6 + $0x744] ss:$8 sps:$4 sm:$0xff]  }
 0x1e9   : > { %3089 = vmatpush1.bf16.msra.mxu1 %v4161_v1  ;;  %v4245_v1 = vld [vmem:[%s5088_s6 + $0x340] ss:$8 sps:$4 sm:$0xff]  }
 0x1ea   : > { %3261 = vmatpush1.bf16.msra.mxu0 %v4164_v2  ;;  %3090 = vmatprep.subr.bf16.mxu1 %v4169_v3  ;;  %v4248_v2 = vld [vmem:[%s5088_s6 + $0x740] ss:$8 sps:$4 sm:$0xff]   ;;  %v4253_v3 = vld [vmem:[%s5088_s6 + $0x354] ss:$8 sps:$4 sm:$0xff]  }
 0x1eb   : > { %3262 = vmatprep.subr.bf16.mxu0 %v4172_v4  ;;  %v4256_v4 = vld [vmem:[%s5088_s6 + $0x754] ss:$8 sps:$4 sm:$0xff]  }
 0x1ed   : > { %3091 = vmatpush1.bf16.msra.mxu1 %v4167_v5  ;;  %v4251_v5 = vld [vmem:[%s5088_s6 + $0x350] ss:$8 sps:$4 sm:$0xff]  }
 0x1ee   : > { %3263 = vmatpush1.bf16.msra.mxu0 %v4170_v6  ;;  %3092 = vmatprep.subr.bf16.mxu1 %v4175_v7  ;;  %v4254_v6 = vld [vmem:[%s5088_s6 + $0x750] ss:$8 sps:$4 sm:$0xff]   ;;  %v4259_v7 = vld [vmem:[%s5088_s6 + $0x364] ss:$8 sps:$4 sm:$0xff]  }
 0x1ef   : > { %3264 = vmatprep.subr.bf16.mxu0 %v4178_v8  ;;  %v4262_v8 = vld [vmem:[%s5088_s6 + $0x764] ss:$8 sps:$4 sm:$0xff]  }
 0x1f1   : > { %3093 = vmatpush1.bf16.msra.mxu1 %v4173_v9  ;;  %v4257_v9 = vld [vmem:[%s5088_s6 + $0x360] ss:$8 sps:$4 sm:$0xff]  }
 0x1f2   : > { %3265 = vmatpush1.bf16.msra.mxu0 %v4176_v10  ;;  %3094 = vmatprep.subr.bf16.mxu1 %v4181_v11  ;;  %v4260_v10 = vld [vmem:[%s5088_s6 + $0x760] ss:$8 sps:$4 sm:$0xff]   ;;  %v4265_v11 = vld [vmem:[%s5088_s6 + $0x374] ss:$8 sps:$4 sm:$0xff]  }
 0x1f3   : > { %3266 = vmatprep.subr.bf16.mxu0 %v4184_v12  ;;  %v4268_v12 = vld [vmem:[%s5088_s6 + $0x774] ss:$8 sps:$4 sm:$0xff]  }
 0x1f5   : > { %3095 = vmatpush1.bf16.msra.mxu1 %v4179_v13  ;;  %v4263_v13 = vld [vmem:[%s5088_s6 + $0x370] ss:$8 sps:$4 sm:$0xff]  }
 0x1f6   : > { %3267 = vmatpush1.bf16.msra.mxu0 %v4182_v14  ;;  %3096 = vmatprep.subr.bf16.mxu1 %v4187_v15  ;;  %v4266_v14 = vld [vmem:[%s5088_s6 + $0x770] ss:$8 sps:$4 sm:$0xff]   ;;  %v4271_v15 = vld [vmem:[%s5088_s6 + $0x384] ss:$8 sps:$4 sm:$0xff]  }
 0x1f7   : > { %3268 = vmatprep.subr.bf16.mxu0 %v4190_v16  ;;  %v4274_v16 = vld [vmem:[%s5088_s6 + $0x784] ss:$8 sps:$4 sm:$0xff]  }
 0x1f9   : > { %3097 = vmatpush1.bf16.msra.mxu1 %v4185_v17  ;;  %v4269_v17 = vld [vmem:[%s5088_s6 + $0x380] ss:$8 sps:$4 sm:$0xff]  }
 0x1fa   : > { %3269 = vmatpush1.bf16.msra.mxu0 %v4188_v18  ;;  %3098 = vmatprep.subr.bf16.mxu1 %v4193_v19  ;;  %v4272_v18 = vld [vmem:[%s5088_s6 + $0x780] ss:$8 sps:$4 sm:$0xff]   ;;  %v4277_v19 = vld [vmem:[%s5088_s6 + $0x394] ss:$8 sps:$4 sm:$0xff]  }
 0x1fb   : > { %3270 = vmatprep.subr.bf16.mxu0 %v4196_v20  ;;  %v4280_v20 = vld [vmem:[%s5088_s6 + $0x794] ss:$8 sps:$4 sm:$0xff]  }
 0x1fd   : > { %3099 = vmatpush1.bf16.msra.mxu1 %v4191_v21  ;;  %v4275_v21 = vld [vmem:[%s5088_s6 + $0x390] ss:$8 sps:$4 sm:$0xff]  }
 0x1fe   : > { %3271 = vmatpush1.bf16.msra.mxu0 %v4194_v22  ;;  %3100 = vmatprep.subr.bf16.mxu1 %v4199_v23  ;;  %v4278_v22 = vld [vmem:[%s5088_s6 + $0x790] ss:$8 sps:$4 sm:$0xff]   ;;  %v4283_v23 = vld [vmem:[%s5088_s6 + $0x3a4] ss:$8 sps:$4 sm:$0xff]  }
 0x1ff   : > { %3272 = vmatprep.subr.bf16.mxu0 %v4202_v24  ;;  %v4286_v24 = vld [vmem:[%s5088_s6 + $0x7a4] ss:$8 sps:$4 sm:$0xff]  }
 0x201   : > { %3101 = vmatpush1.bf16.msra.mxu1 %v4197_v25  ;;  %v4281_v25 = vld [vmem:[%s5088_s6 + $0x3a0] ss:$8 sps:$4 sm:$0xff]  }
 0x202   : > { %3273 = vmatpush1.bf16.msra.mxu0 %v4200_v26  ;;  %3102 = vmatprep.subr.bf16.mxu1 %v4205_v27  ;;  %v4284_v26 = vld [vmem:[%s5088_s6 + $0x7a0] ss:$8 sps:$4 sm:$0xff]   ;;  %v4289_v27 = vld [vmem:[%s5088_s6 + $0x3b4] ss:$8 sps:$4 sm:$0xff]  }
 0x203   : > { %3274 = vmatprep.subr.bf16.mxu0 %v4208_v28  ;;  %v4292_v28 = vld [vmem:[%s5088_s6 + $0x7b4] ss:$8 sps:$4 sm:$0xff]  }
 0x205   : > { %3103 = vmatpush1.bf16.msra.mxu1 %v4203_v29  ;;  %v4287_v29 = vld [vmem:[%s5088_s6 + $0x3b0] ss:$8 sps:$4 sm:$0xff]  }
 0x206   : > { %3275 = vmatpush1.bf16.msra.mxu0 %v4206_v30  ;;  %3104 = vmatprep.subr.bf16.mxu1 %v4211_v31  ;;  %v4290_v30 = vld [vmem:[%s5088_s6 + $0x7b0] ss:$8 sps:$4 sm:$0xff]   ;;  %v4295_v31 = vld [vmem:[%s5088_s6 + $0x3c4] ss:$8 sps:$4 sm:$0xff]  }
 0x207   : > { %3276 = vmatprep.subr.bf16.mxu0 %v4214_v32  ;;  %v4298_v32 = vld [vmem:[%s5088_s6 + $0x7c4] ss:$8 sps:$4 sm:$0xff]  }
 0x209   : > { %3105 = vmatpush1.bf16.msra.mxu1 %v4209_v33  ;;  %v4293_v33 = vld [vmem:[%s5088_s6 + $0x3c0] ss:$8 sps:$4 sm:$0xff]  }
 0x20a   : > { %3277 = vmatpush1.bf16.msra.mxu0 %v4212_v34  ;;  %3106 = vmatprep.subr.bf16.mxu1 %v4217_v35  ;;  %v4296_v34 = vld [vmem:[%s5088_s6 + $0x7c0] ss:$8 sps:$4 sm:$0xff]   ;;  %v4301_v35 = vld [vmem:[%s5088_s6 + $0x3d4] ss:$8 sps:$4 sm:$0xff]  }
 0x20b   : > { %3278 = vmatprep.subr.bf16.mxu0 %v4220_v36  ;;  %v4304_v36 = vld [vmem:[%s5088_s6 + $0x7d4] ss:$8 sps:$4 sm:$0xff]  }
 0x20d   : > { %3107 = vmatpush1.bf16.msra.mxu1 %v4215_v37  ;;  %v4299_v37 = vld [vmem:[%s5088_s6 + $0x3d0] ss:$8 sps:$4 sm:$0xff]  }
 0x20e   : > { %3279 = vmatpush1.bf16.msra.mxu0 %v4218_v38  ;;  %3119 = vmatprep.subr.bf16.mxu1 %v4223_v39  ;;  %v4302_v38 = vld [vmem:[%s5088_s6 + $0x7d0] ss:$8 sps:$4 sm:$0xff]   ;;  %v4307_v39 = vld [vmem:[%s5088_s6 + $0x3e4] ss:$8 sps:$4 sm:$0xff]  }
 0x20f   : > { %3291 = vmatprep.subr.bf16.mxu0 %v4226_v40  ;;  %v4310_v40 = vld [vmem:[%s5088_s6 + $0x7e4] ss:$8 sps:$4 sm:$0xff]  }
 0x210   : > { %3109 = vmatmul.mubr.bf16.vlgmr.msra.gmra.mrb[0].mxu1 %v3539_v44  ;;  %v4305_v44 = vld [vmem:[%s5088_s6 + $0x3e0] ss:$8 sps:$4 sm:$0xff]  }
 0x211   : > { %3281 = vmatmul.mubr.bf16.vlgmr.msra.gmra.mrb[0].mxu0 %v3547_v45  ;;  %3120 = vmatpush1.bf16.msra.mxu1 %v4221_v51  ;;  %v4308_v45 = vld [vmem:[%s5088_s6 + $0x7e0] ss:$8 sps:$4 sm:$0xff]   ;;  %v4313_v51 = vld [vmem:[%s5088_s6 + $0x3f4] ss:$8 sps:$4 sm:$0xff]  }
 0x212   : > { %3292 = vmatpush1.bf16.msra.mxu0 %v4224_v52  ;;  %3121 = vmatprep.subr.bf16.mxu1 %v4229_v41  ;;  %v4316_v52 = vld [vmem:[%s5088_s6 + $0x7f4] ss:$8 sps:$4 sm:$0xff]   ;;  %v4311_v41 = vld [vmem:[%s5088_s6 + $0x3f0] ss:$8 sps:$4 sm:$0xff]  }
 0x213   : > { %3293 = vmatprep.subr.bf16.mxu0 %v4232_v42  ;;  %3151 = vmatprep.mubr.bf16.mxu1 %v3542_v46  ;;  %v4314_v42 = vld [vmem:[%s5088_s6 + $0x7f0] ss:$8 sps:$4 sm:$0xff]   ;;  %v3541_v46 = vcombine.low %v5328_v43, %v5335_v48 }
 0x214   : > { %3323 = vmatprep.mubr.bf16.mxu0 %v3550_v47  ;;  %v3549_v47 = vcombine.low %v5338_v49, %v5341_v50 }
 0x215   : > { %3122 = vmatpush1.bf16.msra.mxu1 %v4227_v53 }
 0x216   : > { %3294 = vmatpush1.bf16.msra.mxu0 %v4230_v54  ;;  %3123 = vmatprep.subr.bf16.mxu1 %v4235_v55  ;;  %v1354_v54 = vld [vmem:[#allocation2] sm:$0xff] }
 0x217   : > { %3295 = vmatprep.subr.bf16.mxu0 %v4238_v56 }
 0x219   : > { %3124 = vmatpush1.bf16.msra.mxu1 %v4233_v57 }
 0x21a   : > { %3296 = vmatpush1.bf16.msra.mxu0 %v4236_v58  ;;  %3125 = vmatprep.subr.bf16.mxu1 %v4241_v59  ;;  %v1355_v58 = vld [vmem:[#allocation2 + $0x8] sm:$0xff] }
 0x21b   : > { %3297 = vmatprep.subr.bf16.mxu0 %v4244_v60 }
 0x21d   : > { %3126 = vmatpush1.bf16.msra.mxu1 %v4239_v61 }
 0x21e   : > { %3298 = vmatpush1.bf16.msra.mxu0 %v4242_v62  ;;  %3127 = vmatprep.subr.bf16.mxu1 %v4247_v63  ;;  %v1356_v62 = vld [vmem:[#allocation2 + $0x10] sm:$0xff] }
 0x21f   : > { %3299 = vmatprep.subr.bf16.mxu0 %v4250_v0 }
 0x221   : > { %3128 = vmatpush1.bf16.msra.mxu1 %v4245_v1  ;;  %v1357_v1 = vld [vmem:[#allocation2 + $0x18] sm:$0xff] }
 0x222   : > { %3300 = vmatpush1.bf16.msra.mxu0 %v4248_v2  ;;  %3129 = vmatprep.subr.bf16.mxu1 %v4253_v3 }
 0x223   : > { %3301 = vmatprep.subr.bf16.mxu0 %v4256_v4 }
 0x225   : > { %3130 = vmatpush1.bf16.msra.mxu1 %v4251_v5  ;;  %v3352_v5 = vlaneseq (!%p3807_p5) }
 0x226   : > { %3302 = vmatpush1.bf16.msra.mxu0 %v4254_v6  ;;  %3131 = vmatprep.subr.bf16.mxu1 %v4259_v7  ;;  %v3350_v7 = vld [vmem:[%s1342_s29] sm:$0x3] (!%p3807_p5) }
 0x227   : > { %3303 = vmatprep.subr.bf16.mxu0 %v4262_v8  ;;  %v3353_v6 = vshrl.u32 (!%p3807_p5), %v3352_v5, 7 }
 0x229   : > { %3132 = vmatpush1.bf16.msra.mxu1 %v4257_v9  ;;  %v3354_v9 = vsub.s32 (!%p3807_p5), 0, %v3353_v6 }
 0x22a   : > { %3304 = vmatpush1.bf16.msra.mxu0 %v4260_v10  ;;  %3133 = vmatprep.subr.bf16.mxu1 %v4265_v11  ;;  %v3358_v10 = vsub.s32 (!%p3807_p5), 1, %v3353_v6 }
 0x22b   : > { %3305 = vmatprep.subr.bf16.mxu0 %v4268_v12 }
 0x22d   : > { %3134 = vmatpush1.bf16.msra.mxu1 %v4263_v13 }
 0x22e   : > { %3306 = vmatpush1.bf16.msra.mxu0 %v4266_v14  ;;  %3135 = vmatprep.subr.bf16.mxu1 %v4271_v15  ;;  %v3355_v14 = vrot.slane (!%p3807_p5), %v3350_v7, %v3354_v9  ;;  %v3359_v15 = vrot.slane (!%p3807_p5), %v3350_v7, %v3358_v10 }
 0x22f   : > { %3307 = vmatprep.subr.bf16.mxu0 %v4274_v16 }
 0x231   : > { %3136 = vmatpush1.bf16.msra.mxu1 %v4269_v17 }
 0x232   : > { %3308 = vmatpush1.bf16.msra.mxu0 %v4272_v18  ;;  %3137 = vmatprep.subr.bf16.mxu1 %v4277_v19 }
 0x233   : > { %3309 = vmatprep.subr.bf16.mxu0 %v4280_v20 }
 0x235   : > { %3138 = vmatpush1.bf16.msra.mxu1 %v4275_v21 }
 0x236   : > { %3310 = vmatpush1.bf16.msra.mxu0 %v4278_v22  ;;  %3139 = vmatprep.subr.bf16.mxu1 %v4283_v23 }
 0x237   : > { %3311 = vmatprep.subr.bf16.mxu0 %v4286_v24 }
 0x239   : > { %3140 = vmatpush1.bf16.msra.mxu1 %v4281_v25 }
 0x23a   : > { %3312 = vmatpush1.bf16.msra.mxu0 %v4284_v26  ;;  %3141 = vmatprep.subr.bf16.mxu1 %v4289_v27 }
 0x23b   : > { %3313 = vmatprep.subr.bf16.mxu0 %v4292_v28 }
 0x23d   : > { %3142 = vmatpush1.bf16.msra.mxu1 %v4287_v29 }
 0x23e   : > { %3314 = vmatpush1.bf16.msra.mxu0 %v4290_v30  ;;  %3143 = vmatprep.subr.bf16.mxu1 %v4295_v31 }
 0x23f   : > { %3315 = vmatprep.subr.bf16.mxu0 %v4298_v32 }
 0x241   : > { %3144 = vmatpush1.bf16.msra.mxu1 %v4293_v33 }
 0x242   : > { %3316 = vmatpush1.bf16.msra.mxu0 %v4296_v34  ;;  %3145 = vmatprep.subr.bf16.mxu1 %v4301_v35 }
 0x243   : > { %3317 = vmatprep.subr.bf16.mxu0 %v4304_v36 }
 0x245   : > { %3146 = vmatpush1.bf16.msra.mxu1 %v4299_v37 }
 0x246   : > { %3318 = vmatpush1.bf16.msra.mxu0 %v4302_v38  ;;  %3147 = vmatprep.subr.bf16.mxu1 %v4307_v39 }
 0x247   : > { %3319 = vmatprep.subr.bf16.mxu0 %v4310_v40 }
 0x249   : > { %3148 = vmatpush1.bf16.msra.mxu1 %v4305_v44 }
 0x24a   : > { %3320 = vmatpush1.bf16.msra.mxu0 %v4308_v45  ;;  %3149 = vmatprep.subr.bf16.mxu1 %v4313_v51 }
 0x24b   : > { %3321 = vmatprep.subr.bf16.mxu0 %v4316_v52 }
 0x24d   : > { %3150 = vmatpush1.bf16.msra.mxu1 %v4311_v41 }
 0x24e   : > { %3322 = vmatpush1.bf16.msra.mxu0 %v4314_v42 }
 0x250   : > { %3152 = vmatmul.mubr.bf16.vlgmr.msra.gmra.mrb[0].mxu1 %v3541_v46 }
 0x251   : > { %3324 = vmatmul.mubr.bf16.vlgmr.msra.gmra.mrb[0].mxu0 %v3549_v47 }
 0x323   : > { %v3153_v53 = vpop.f32.mrb[0].mxu1 }
 0x324   : > { %v3325_v55 = vpop.f32.mrb[0].mxu0  ;;  %v3155_v57 = vpop.f32.mrb[1].mxu1 }
 0x325   : > { %v3816_v56 = vadd.f32 %v3325_v55, %v3153_v53  ;;  %v3327_v59 = vpop.f32.mrb[1].mxu0  ;;  %v3157_v61 = vpop.f32.mrb[2].mxu1 }
 0x326   : > { %v3817_v60 = vadd.f32 %v3327_v59, %v3155_v57  ;;  %v3329_v63 = vpop.f32.mrb[2].mxu0  ;;  %v3159_v48 = vpop.f32.mrb[3].mxu1  ;;  %3345 = sbr.rel (%p3807_p5) target bundleno = 825 (0x339), region = 101 }
 0x327   : > { %v3334_v0 = vadd.f32 %v3816_v56, %v1354_v54  ;;  %v3818_v43 = vadd.f32 %v3329_v63, %v3157_v61  ;;  %v3331_v49 = vpop.f32.mrb[3].mxu0 }
 0x328   : > { %v3335_v50 = vadd.f32 %v3817_v60, %v1355_v58  ;;  %v3819_v2 = vadd.f32 %v3331_v49, %v3159_v48 }
 0x329   : > { %3338 = vst [vmem:[#allocation2] sm:$0xff] %v3334_v0  ;;  %v3336_v3 = vadd.f32 %v3818_v43, %v1356_v62 }
 0x32a   : > { %3339 = vst [vmem:[#allocation2 + $0x8] sm:$0xff] %v3335_v50  ;;  %v3337_v4 = vadd.f32 %v3819_v2, %v1357_v1 }
 0x32b   : > { %3340 = vst [vmem:[#allocation2 + $0x10] sm:$0xff] %v3336_v3 }
 0x32c   : > { %3341 = vst [vmem:[#allocation2 + $0x18] sm:$0xff] %v3337_v4 }
 0x330   : > { %v3346_v8 = vld [vmem:[#allocation2] sm:$0xff] }
 0x331   : > { %v3347_v11 = vld [vmem:[#allocation2 + $0x8] sm:$0xff]  ;;  %v3362_v16 = vadd.f32 %v3355_v14, %v3346_v8 }
 0x332   : > { %v3348_v12 = vld [vmem:[#allocation2 + $0x10] sm:$0xff]  ;;  %v3363_v17 = vadd.f32 %v3359_v15, %v3347_v11 }
 0x333   : > { %v3349_v13 = vld [vmem:[#allocation2 + $0x18] sm:$0xff]  ;;  %v3364_v18 = vadd.f32 %v3355_v14, %v3348_v12  ;;  %v3366_v20 = vmax.f32 %v3362_v16, 0.0 }
 0x334   : > { %v3365_v19 = vadd.f32 %v3359_v15, %v3349_v13  ;;  %v3367_v21 = vmax.f32 %v3363_v17, 0.0 }
 0x335   : > { %v3368_v22 = vmax.f32 %v3364_v18, 0.0  ;;  %3370 = vst [vmem:[%s5090_s1] sm:$0xff] %v3366_v20 }
 0x336   : > { %v3369_v23 = vmax.f32 %v3365_v19, 0.0  ;;  %3371 = vst [vmem:[%s5090_s1 + $0x8] sm:$0xff] %v3367_v21 }
 0x337   : > { %3372 = vst [vmem:[%s5090_s1 + $0x10] sm:$0xff] %v3368_v22 }
 0x338   : > { %3373 = vst [vmem:[%s5090_s1 + $0x18] sm:$0xff] %v3369_v23 }
 0x339 PF: > { %3380 = sbr.rel (!%p4520_p12) target bundleno = 833 (0x341), region = 105  ;;  %s3815_s16 = sshll.u32 (%p4520_p12), %s4391_s19, 4 }
 0x33a   : > { %s3386_s5 = scalar_lea.vmem (%p4520_p12), %s5469_s3, %s3815_s16 }
 0x33c   : > { %v3399_v24 = vld [vmem:[%s5090_s1] sm:$0xff] (%p4520_p12) }
 0x33d   : > { %v3401_v25 = vld [vmem:[%s5090_s1 + $0x8] sm:$0xff] (%p4520_p12)  ;;  %3400 = vst [vmem:[%s3386_s5] sm:$0xff] (%p4520_p12), %v3399_v24 }
 0x33e   : > { %v3403_v26 = vld [vmem:[%s5090_s1 + $0x10] sm:$0xff] (%p4520_p12)  ;;  %3402 = vst [vmem:[%s3386_s5 + $0x8] sm:$0xff] (%p4520_p12), %v3401_v25 }
 0x33f   : > { %v3405_v27 = vld [vmem:[%s5090_s1 + $0x18] sm:$0xff] (%p4520_p12)  ;;  %3404 = vst [vmem:[%s3386_s5 + $0x40] sm:$0xff] (%p4520_p12), %v3403_v26 }
 0x340   : > { %3406 = vst [vmem:[%s3386_s5 + $0x48] sm:$0xff] %v3405_v27 }
 0x341 PF: > { %s13_s22 = sadd.s32 1, %s4403_s22   ;;  %s5479_s10 = sld [smem:[#allocation6_spill]] }
 0x342   : > { %p10_p6 = scmp.ge.s32.totalorder %s13_s22, 18   ;;  %s5480_s12 = smov %s4367_s13 }
 0x343   : > { %s5481_s13 = smov %s4518_s9  ;;  %s5482_s14 = smov %s4375_s15 }
 0x344   : > { %s5483_s15 = smov %s4515_s8  ;;  %s5484_s16 = smov %s4383_s17 }
 0x345   : > { %s5485_s17 = smov %s4501_s30  ;;  %s5486_s18 = smov %s4395_s20 }
 0x346   : > { %s5487_s19 = smov %s4399_s21  ;;  %s5488_s20 = smov %s5491_s24 }
 0x347   : > { %s5489_s21 = smov %s5479_s10  ;;  %12 = sbr.rel (!%p10_p6) target bundleno = 9 (0x9), region = 170 }

</bundles_post_ra>
